<compile_context>
chip_gen: v6e
topology: v6e:2x2x1
jax: 0.10.0
libtpu: 0.0.40
codegen_flags: <defaults>
</compile_context>

<pallas_src>
import functools

import jax
import jax.numpy as jnp
from jax.experimental import pallas as pl
from jax.experimental.pallas import tpu as pltpu

INPUT_DIM = 32
HIDDEN_DIM = 64
D_MODEL = HIDDEN_DIM // 2          # 32
NUM_HEADS = 8
HEAD_DIM = D_MODEL // NUM_HEADS    # 4
FF_DIM = HIDDEN_DIM                # 64 (dim_feedforward)
NUM_LAYERS = 6
LN_EPS = 1e-5                      # PyTorch LayerNorm default

# slab row layout (per layer) for the stacked weight slab: (160, 96)
_W_ROWS = D_MODEL + D_MODEL + D_MODEL + FF_DIM      # wqkv | wo | wf1 | wf2
# slab row layout for the per-layer vector slab: 8 rows x 96 lanes
_V_ROWS = 8
# encoder slab: ew1 rows | ew2 rows | eb1 row | eb2 row
_ENC_ROWS = INPUT_DIM + HIDDEN_DIM + 2


def _vmem():
    # Whole (tiny) arrays live in VMEM; no grid tiling at these shapes.
    return pl.BlockSpec(memory_space=pltpu.MemorySpace.VMEM)


def _layernorm(x, w, b):
    # two-moment form: both reductions are independent (shorter XLU chain)
    mean = jnp.mean(x, axis=-1, keepdims=True)
    meansq = jnp.mean(x * x, axis=-1, keepdims=True)
    var = meansq - mean * mean
    return (x - mean) * jax.lax.rsqrt(var + LN_EPS) * w + b


# ----------------------------- fused kernel ---------------------------------

def fused_kernel(x_ref, enc_ref, w_ref, v_ref, o_ref, *, batch, seq):
    B, S = batch, seq
    T = B * S

    # ---- (S, B, IN) -> (T, IN), batch-major token order (in-kernel permute; the
    #      wrapper launches no separate XLA transpose kernels) ----
    x = x_ref[...]                                                   # (S, B, IN)
    xt = jnp.concatenate([x[:, b, :] for b in range(B)], axis=0)     # (T, IN), t = b*S + s

    # ---- encoder: Linear -> ReLU -> Linear (weights pre-transposed to (in,out)) ----
    ew1 = enc_ref[0:INPUT_DIM, :]                                             # (32, 64)
    ew2 = enc_ref[INPUT_DIM:INPUT_DIM + HIDDEN_DIM, 0:D_MODEL]                # (64, 32)
    eb1 = enc_ref[INPUT_DIM + HIDDEN_DIM:INPUT_DIM + HIDDEN_DIM + 1, :]       # (1, 64)
    eb2 = enc_ref[INPUT_DIM + HIDDEN_DIM + 1:INPUT_DIM + HIDDEN_DIM + 2, 0:D_MODEL]

    h = jnp.dot(xt, ew1, preferred_element_type=jnp.float32) + eb1
    h = jnp.maximum(h, 0.0)
    y = jnp.dot(h, ew2, preferred_element_type=jnp.float32) + eb2             # (T, D)

    # ---- 6 post-LN transformer encoder layers (dropout = identity in eval) ----
    for l in range(NUM_LAYERS):
        W = w_ref[l]                                   # (160, 96) weight slab, layer l
        V = v_ref[l]                                   # (8, 96)   bias/LN slab, layer l

        wqkv = W[0:D_MODEL, :]                                         # (32, 96) Q pre-scaled
        wo = W[D_MODEL:2 * D_MODEL, 0:D_MODEL]                         # (32, 32)
        wf1 = W[2 * D_MODEL:3 * D_MODEL, 0:FF_DIM]                     # (32, 64)
        wf2 = W[3 * D_MODEL:3 * D_MODEL + FF_DIM, 0:D_MODEL]           # (64, 32)

        bqkv = V[0:1, :]                                               # (1, 96) Q pre-scaled
        bo = V[1:2, 0:D_MODEL]
        ln1w = V[2:3, 0:D_MODEL]
        ln1b = V[3:4, 0:D_MODEL]
        bf1 = V[4:5, 0:FF_DIM]
        bf2 = V[5:6, 0:D_MODEL]
        ln2w = V[6:7, 0:D_MODEL]
        ln2b = V[7:8, 0:D_MODEL]

        # fused QKV projection (scale 1/sqrt(head_dim) already folded into Q cols/bias)
        qkv = jnp.dot(y, wqkv, preferred_element_type=jnp.float32) + bqkv     # (T, 96)

        # fold heads into the einsum batch dim: (H*B, S, d), flat index = h*B + b.
        # Built from static lane slices + a leading-axis concat (no rank>2 transpose).
        def split_heads(off):
            parts = [
                qkv[:, off + hh * HEAD_DIM: off + (hh + 1) * HEAD_DIM]
                .reshape(B, S, HEAD_DIM)
                for hh in range(NUM_HEADS)
            ]
            return jnp.concatenate(parts, axis=0)                      # (H*B, S, d)

        qh = split_heads(0)
        kh = split_heads(D_MODEL)
        vh = split_heads(2 * D_MODEL)

        # ONE batched score einsum + ONE softmax + ONE batched context einsum
        s = jnp.einsum('bqd,bkd->bqk', qh, kh,
                       preferred_element_type=jnp.float32)             # (H*B, S, S)
        s = s - jnp.max(s, axis=-1, keepdims=True)
        p = jnp.exp(s)
        p = p * pl.reciprocal(jnp.sum(p, axis=-1, keepdims=True), approx=True)
        ctx = jnp.einsum('bqk,bkd->bqd', p, vh,
                         preferred_element_type=jnp.float32)           # (H*B, S, d)

        # back to (T, D): major-dim slices per head + one lane concat
        ctx4 = ctx.reshape(NUM_HEADS, B, S, HEAD_DIM)
        ctx2d = jnp.concatenate(
            [ctx4[hh].reshape(T, HEAD_DIM) for hh in range(NUM_HEADS)], axis=-1)

        attn = jnp.dot(ctx2d, wo, preferred_element_type=jnp.float32) + bo
        y = _layernorm(y + attn, ln1w, ln1b)

        ff = jnp.dot(y, wf1, preferred_element_type=jnp.float32) + bf1
        ff = jnp.maximum(ff, 0.0)
        ff = jnp.dot(ff, wf2, preferred_element_type=jnp.float32) + bf2
        y = _layernorm(y + ff, ln2w, ln2b)

    # ---- (T, D) batch-major -> (S, B, D) output, single full store ----
    o_ref[...] = jnp.concatenate(
        [y[b * S:(b + 1) * S, :].reshape(S, 1, D_MODEL) for b in range(B)], axis=1)


# ----------------------------- wrapper ---------------------------------------

@jax.jit
def kaleidoscope_forward(x, fp):
    # x: (S, B, INPUT_DIM) (PyTorch batch_first=False) -> (S, B, D_MODEL)
    S, B, _ = x.shape
    return pl.pallas_call(
        functools.partial(fused_kernel, batch=B, seq=S),
        out_shape=jax.ShapeDtypeStruct((S, B, D_MODEL), jnp.float32),
        in_specs=[_vmem()] * 4,
        out_specs=_vmem(),
    )(x, fp['enc'], fp['w'], fp['v'])


# ----------------------------- parameters ------------------------------------

def init_params(key):
    """Random params in PyTorch layout: Linear weights are (out, in)."""
    keys = iter(jax.random.split(key, 64))

    def w(shape, scale=0.05):
        return scale * jax.random.normal(next(keys), shape, dtype=jnp.float32)

    encoder = {'w1': w((HIDDEN_DIM, INPUT_DIM)), 'b1': w((HIDDEN_DIM,)),
               'w2': w((D_MODEL, HIDDEN_DIM)),   'b2': w((D_MODEL,))}
    layers = []
    for _ in range(NUM_LAYERS):
        layers.append({
            'in_proj_weight':  w((3 * D_MODEL, D_MODEL)),
            'in_proj_bias':    w((3 * D_MODEL,)),
            'out_proj_weight': w((D_MODEL, D_MODEL)),
            'out_proj_bias':   w((D_MODEL,)),
            'ln1_weight': jnp.ones((D_MODEL,), jnp.float32),
            'ln1_bias':   jnp.zeros((D_MODEL,), jnp.float32),
            'linear1_weight': w((FF_DIM, D_MODEL)),
            'linear1_bias':   w((FF_DIM,)),
            'linear2_weight': w((D_MODEL, FF_DIM)),
            'linear2_bias':   w((D_MODEL,)),
            'ln2_weight': jnp.ones((D_MODEL,), jnp.float32),
            'ln2_bias':   jnp.zeros((D_MODEL,), jnp.float32),
        })
    return {'encoder': encoder, 'layers': layers}


def prepare_params(p):
    """Pre-transpose to (in, out), fold 1/sqrt(HEAD_DIM) into Q, pack into 3 slabs."""
    scale = 1.0 / (HEAD_DIM ** 0.5)
    enc = p['encoder']

    # encoder slab: (98, 64) = ew1 | ew2(padded) | eb1 | eb2(padded)
    enc_slab = jnp.zeros((_ENC_ROWS, HIDDEN_DIM), jnp.float32)
    enc_slab = enc_slab.at[0:INPUT_DIM, :].set(enc['w1'].T)
    enc_slab = enc_slab.at[INPUT_DIM:INPUT_DIM + HIDDEN_DIM, 0:D_MODEL].set(enc['w2'].T)
    enc_slab = enc_slab.at[INPUT_DIM + HIDDEN_DIM, :].set(enc['b1'])
    enc_slab = enc_slab.at[INPUT_DIM + HIDDEN_DIM + 1, 0:D_MODEL].set(enc['b2'])

    w_slab = jnp.zeros((NUM_LAYERS, _W_ROWS, 3 * D_MODEL), jnp.float32)
    v_slab = jnp.zeros((NUM_LAYERS, _V_ROWS, 3 * D_MODEL), jnp.float32)
    for l, lp in enumerate(p['layers']):
        wqkv = lp['in_proj_weight'].T                            # (D, 3D)
        wqkv = wqkv.at[:, :D_MODEL].multiply(scale)              # pre-scale Q columns
        bqkv = lp['in_proj_bias'].at[:D_MODEL].multiply(scale)

        w_slab = w_slab.at[l, 0:D_MODEL, :].set(wqkv)
        w_slab = w_slab.at[l, D_MODEL:2 * D_MODEL, 0:D_MODEL].set(lp['out_proj_weight'].T)
        w_slab = w_slab.at[l, 2 * D_MODEL:3 * D_MODEL, 0:FF_DIM].set(lp['linear1_weight'].T)
        w_slab = w_slab.at[l, 3 * D_MODEL:3 * D_MODEL + FF_DIM, 0:D_MODEL].set(
            lp['linear2_weight'].T)

        v_slab = v_slab.at[l, 0, :].set(bqkv)
        v_slab = v_slab.at[l, 1, 0:D_MODEL].set(lp['out_proj_bias'])
        v_slab = v_slab.at[l, 2, 0:D_MODEL].set(lp['ln1_weight'])
        v_slab = v_slab.at[l, 3, 0:D_MODEL].set(lp['ln1_bias'])
        v_slab = v_slab.at[l, 4, 0:FF_DIM].set(lp['linear1_bias'])
        v_slab = v_slab.at[l, 5, 0:D_MODEL].set(lp['linear2_bias'])
        v_slab = v_slab.at[l, 6, 0:D_MODEL].set(lp['ln2_weight'])
        v_slab = v_slab.at[l, 7, 0:D_MODEL].set(lp['ln2_bias'])

    return {'enc': enc_slab, 'w': w_slab, 'v': v_slab}


# ----------------------------- pure-JAX reference ----------------------------

def reference_forward(x, p):
    """Pure-JAX replica of the PyTorch forward (eval mode), PyTorch param layout."""
    S, B, _ = x.shape
    enc = p['encoder']
    h = jnp.maximum(x @ enc['w1'].T + enc['b1'], 0.0)
    y = h @ enc['w2'].T + enc['b2']                              # (S, B, D)
    scale = 1.0 / (HEAD_DIM ** 0.5)

    def ln(z, w, b):
        m = z.mean(-1, keepdims=True)
        v = ((z - m) ** 2).mean(-1, keepdims=True)
        return (z - m) / jnp.sqrt(v + LN_EPS) * w + b

    for lp in p['layers']:
        qkv = y @ lp['in_proj_weight'].T + lp['in_proj_bias']    # (S, B, 3D)
        q, k, v = jnp.split(qkv, 3, axis=-1)
        q = q.reshape(S, B, NUM_HEADS, HEAD_DIM)
        k = k.reshape(S, B, NUM_HEADS, HEAD_DIM)
        v = v.reshape(S, B, NUM_HEADS, HEAD_DIM)
        s = jnp.einsum('qbhd,kbhd->bhqk', q, k) * scale
        pattn = jax.nn.softmax(s, axis=-1)
        ctx = jnp.einsum('bhqk,kbhd->qbhd', pattn, v).reshape(S, B, D_MODEL)
        attn = ctx @ lp['out_proj_weight'].T + lp['out_proj_bias']
        y = ln(y + attn, lp['ln1_weight'], lp['ln1_bias'])
        ff = jnp.maximum(y @ lp['linear1_weight'].T + lp['linear1_bias'], 0.0)
        ff = ff @ lp['linear2_weight'].T + lp['linear2_bias']
        y = ln(y + ff, lp['ln2_weight'], lp['ln2_bias'])
    return y


# ----------------------------- main -------------------------------------------

if __name__ == "__main__":
    key = jax.random.PRNGKey(0)
    pkey, xkey = jax.random.split(key)

    raw_params = init_params(pkey)
    params = prepare_params(raw_params)

    SEQ, BATCH = 8, 2
    x = jax.random.normal(xkey, (SEQ, BATCH, INPUT_DIM), dtype=jnp.float32)

    out = kaleidoscope_forward(x, params)
    jax.block_until_ready(out)

    assert out.shape == (SEQ, BATCH, D_MODEL), out.shape
    assert out.dtype == jnp.float32

    # Tolerance check vs pure-JAX reference (approx reciprocal + MXU ordering => small diff).
    with jax.default_matmul_precision('highest'):
        ref = reference_forward(x, raw_params)
    max_err = float(jnp.max(jnp.abs(out - ref)))
    assert max_err < 5e-2, f"max abs error vs reference too large: {max_err}"

    print("KERNEL_OK")
</pallas_src>

<mosaic_0001>
module attributes {stable_mosaic.version = 11 : i64} {
  func.func @fused_kernel(%arg0: memref<8x2x32xf32, #tpu.memory_space<vmem>>, %arg1: memref<98x64xf32, #tpu.memory_space<vmem>>, %arg2: memref<6x160x96xf32, #tpu.memory_space<vmem>>, %arg3: memref<6x8x96xf32, #tpu.memory_space<vmem>>, %arg4: memref<8x2x32xf32, #tpu.memory_space<vmem>>) attributes {dimension_semantics = [], scalar_prefetch = 0 : i64, scratch_operands = 0 : i64, tpu.core_type = #tpu.core_type<tc>} {
    %c0 = arith.constant 0 : index
    %c0_0 = arith.constant 0 : index
    %c0_1 = arith.constant 0 : index
    %0 = vector.load %arg0[%c0, %c0_0, %c0_1] : memref<8x2x32xf32, #tpu.memory_space<vmem>>, vector<8x2x32xf32>
    %1 = vector.extract_strided_slice %0 {offsets = [0, 0, 0], sizes = [8, 1, 32], strides = [1, 1, 1]} : vector<8x2x32xf32> to vector<8x1x32xf32>
    %2 = vector.shape_cast %1 : vector<8x1x32xf32> to vector<8x32xf32>
    %3 = vector.extract_strided_slice %0 {offsets = [0, 1, 0], sizes = [8, 1, 32], strides = [1, 1, 1]} : vector<8x2x32xf32> to vector<8x1x32xf32>
    %4 = vector.shape_cast %3 : vector<8x1x32xf32> to vector<8x32xf32>
    %5 = tpu.concatenate %2, %4 in 0 : vector<8x32xf32>, vector<8x32xf32> -> vector<16x32xf32>
    %c0_2 = arith.constant 0 : index
    %c0_3 = arith.constant 0 : index
    %6 = vector.load %arg1[%c0_2, %c0_3] : memref<98x64xf32, #tpu.memory_space<vmem>>, vector<32x64xf32>
    %c32 = arith.constant 32 : index
    %c0_4 = arith.constant 0 : index
    %7 = vector.load %arg1[%c32, %c0_4] : memref<98x64xf32, #tpu.memory_space<vmem>>, vector<64x32xf32>
    %c96 = arith.constant 96 : index
    %c0_5 = arith.constant 0 : index
    %8 = vector.load %arg1[%c96, %c0_5] : memref<98x64xf32, #tpu.memory_space<vmem>>, vector<1x64xf32>
    %c97 = arith.constant 97 : index
    %c0_6 = arith.constant 0 : index
    %9 = vector.load %arg1[%c97, %c0_6] : memref<98x64xf32, #tpu.memory_space<vmem>>, vector<1x32xf32>
    %cst = arith.constant dense<0.000000e+00> : vector<16x64xf32>
    %10 = tpu.matmul %5, %6, %cst {dimension_numbers = #tpu.dot_dimension_numbers<[1], [0], [0], [1], [0, 0, 1, 1], [], []>} : vector<16x32xf32>, vector<32x64xf32>, vector<16x64xf32> -> vector<16x64xf32>
    %11 = vector.broadcast %8 : vector<1x64xf32> to vector<16x64xf32>
    %12 = arith.addf %10, %11 : vector<16x64xf32>
    %cst_7 = arith.constant 0.000000e+00 : f32
    %13 = vector.broadcast %cst_7 : f32 to vector<16x64xf32>
    %14 = arith.maximumf %12, %13 : vector<16x64xf32>
    %cst_8 = arith.constant dense<0.000000e+00> : vector<16x32xf32>
    %15 = tpu.matmul %14, %7, %cst_8 {dimension_numbers = #tpu.dot_dimension_numbers<[1], [0], [0], [1], [0, 0, 1, 1], [], []>} : vector<16x64xf32>, vector<64x32xf32>, vector<16x32xf32> -> vector<16x32xf32>
    %16 = vector.broadcast %9 : vector<1x32xf32> to vector<16x32xf32>
    %17 = arith.addf %15, %16 : vector<16x32xf32>
    %c0_9 = arith.constant 0 : index
    %c0_10 = arith.constant 0 : index
    %c0_11 = arith.constant 0 : index
    %18 = vector.load %arg2[%c0_9, %c0_10, %c0_11] : memref<6x160x96xf32, #tpu.memory_space<vmem>>, vector<1x160x96xf32>
    %19 = vector.shape_cast %18 : vector<1x160x96xf32> to vector<160x96xf32>
    %c0_12 = arith.constant 0 : index
    %c0_13 = arith.constant 0 : index
    %c0_14 = arith.constant 0 : index
    %20 = vector.load %arg3[%c0_12, %c0_13, %c0_14] : memref<6x8x96xf32, #tpu.memory_space<vmem>>, vector<1x8x96xf32>
    %21 = vector.shape_cast %20 : vector<1x8x96xf32> to vector<8x96xf32>
    %22 = vector.extract_strided_slice %19 {offsets = [0, 0], sizes = [32, 96], strides = [1, 1]} : vector<160x96xf32> to vector<32x96xf32>
    %23 = vector.extract_strided_slice %19 {offsets = [32, 0], sizes = [32, 32], strides = [1, 1]} : vector<160x96xf32> to vector<32x32xf32>
    %24 = vector.extract_strided_slice %19 {offsets = [64, 0], sizes = [32, 64], strides = [1, 1]} : vector<160x96xf32> to vector<32x64xf32>
    %25 = vector.extract_strided_slice %19 {offsets = [96, 0], sizes = [64, 32], strides = [1, 1]} : vector<160x96xf32> to vector<64x32xf32>
    %26 = vector.extract_strided_slice %21 {offsets = [0, 0], sizes = [1, 96], strides = [1, 1]} : vector<8x96xf32> to vector<1x96xf32>
    %27 = vector.extract_strided_slice %21 {offsets = [1, 0], sizes = [1, 32], strides = [1, 1]} : vector<8x96xf32> to vector<1x32xf32>
    %28 = vector.extract_strided_slice %21 {offsets = [2, 0], sizes = [1, 32], strides = [1, 1]} : vector<8x96xf32> to vector<1x32xf32>
    %29 = vector.extract_strided_slice %21 {offsets = [3, 0], sizes = [1, 32], strides = [1, 1]} : vector<8x96xf32> to vector<1x32xf32>
    %30 = vector.extract_strided_slice %21 {offsets = [4, 0], sizes = [1, 64], strides = [1, 1]} : vector<8x96xf32> to vector<1x64xf32>
    %31 = vector.extract_strided_slice %21 {offsets = [5, 0], sizes = [1, 32], strides = [1, 1]} : vector<8x96xf32> to vector<1x32xf32>
    %32 = vector.extract_strided_slice %21 {offsets = [6, 0], sizes = [1, 32], strides = [1, 1]} : vector<8x96xf32> to vector<1x32xf32>
    %33 = vector.extract_strided_slice %21 {offsets = [7, 0], sizes = [1, 32], strides = [1, 1]} : vector<8x96xf32> to vector<1x32xf32>
    %cst_15 = arith.constant dense<0.000000e+00> : vector<16x96xf32>
    %34 = tpu.matmul %17, %22, %cst_15 {dimension_numbers = #tpu.dot_dimension_numbers<[1], [0], [0], [1], [0, 0, 1, 1], [], []>} : vector<16x32xf32>, vector<32x96xf32>, vector<16x96xf32> -> vector<16x96xf32>
    %35 = vector.broadcast %26 : vector<1x96xf32> to vector<16x96xf32>
    %36 = arith.addf %34, %35 : vector<16x96xf32>
    %37 = vector.extract_strided_slice %36 {offsets = [0, 0], sizes = [16, 4], strides = [1, 1]} : vector<16x96xf32> to vector<16x4xf32>
    %38 = vector.shape_cast %37 : vector<16x4xf32> to vector<2x8x4xf32>
    %39 = vector.extract_strided_slice %36 {offsets = [0, 4], sizes = [16, 4], strides = [1, 1]} : vector<16x96xf32> to vector<16x4xf32>
    %40 = vector.shape_cast %39 : vector<16x4xf32> to vector<2x8x4xf32>
    %41 = vector.extract_strided_slice %36 {offsets = [0, 8], sizes = [16, 4], strides = [1, 1]} : vector<16x96xf32> to vector<16x4xf32>
    %42 = vector.shape_cast %41 : vector<16x4xf32> to vector<2x8x4xf32>
    %43 = vector.extract_strided_slice %36 {offsets = [0, 12], sizes = [16, 4], strides = [1, 1]} : vector<16x96xf32> to vector<16x4xf32>
    %44 = vector.shape_cast %43 : vector<16x4xf32> to vector<2x8x4xf32>
    %45 = vector.extract_strided_slice %36 {offsets = [0, 16], sizes = [16, 4], strides = [1, 1]} : vector<16x96xf32> to vector<16x4xf32>
    %46 = vector.shape_cast %45 : vector<16x4xf32> to vector<2x8x4xf32>
    %47 = vector.extract_strided_slice %36 {offsets = [0, 20], sizes = [16, 4], strides = [1, 1]} : vector<16x96xf32> to vector<16x4xf32>
    %48 = vector.shape_cast %47 : vector<16x4xf32> to vector<2x8x4xf32>
    %49 = vector.extract_strided_slice %36 {offsets = [0, 24], sizes = [16, 4], strides = [1, 1]} : vector<16x96xf32> to vector<16x4xf32>
    %50 = vector.shape_cast %49 : vector<16x4xf32> to vector<2x8x4xf32>
    %51 = vector.extract_strided_slice %36 {offsets = [0, 28], sizes = [16, 4], strides = [1, 1]} : vector<16x96xf32> to vector<16x4xf32>
    %52 = vector.shape_cast %51 : vector<16x4xf32> to vector<2x8x4xf32>
    %53 = tpu.concatenate %38, %40, %42, %44, %46, %48, %50, %52 in 0 : vector<2x8x4xf32>, vector<2x8x4xf32>, vector<2x8x4xf32>, vector<2x8x4xf32>, vector<2x8x4xf32>, vector<2x8x4xf32>, vector<2x8x4xf32>, vector<2x8x4xf32> -> vector<16x8x4xf32>
    %54 = vector.extract_strided_slice %36 {offsets = [0, 32], sizes = [16, 4], strides = [1, 1]} : vector<16x96xf32> to vector<16x4xf32>
    %55 = vector.shape_cast %54 : vector<16x4xf32> to vector<2x8x4xf32>
    %56 = vector.extract_strided_slice %36 {offsets = [0, 36], sizes = [16, 4], strides = [1, 1]} : vector<16x96xf32> to vector<16x4xf32>
    %57 = vector.shape_cast %56 : vector<16x4xf32> to vector<2x8x4xf32>
    %58 = vector.extract_strided_slice %36 {offsets = [0, 40], sizes = [16, 4], strides = [1, 1]} : vector<16x96xf32> to vector<16x4xf32>
    %59 = vector.shape_cast %58 : vector<16x4xf32> to vector<2x8x4xf32>
    %60 = vector.extract_strided_slice %36 {offsets = [0, 44], sizes = [16, 4], strides = [1, 1]} : vector<16x96xf32> to vector<16x4xf32>
    %61 = vector.shape_cast %60 : vector<16x4xf32> to vector<2x8x4xf32>
    %62 = vector.extract_strided_slice %36 {offsets = [0, 48], sizes = [16, 4], strides = [1, 1]} : vector<16x96xf32> to vector<16x4xf32>
    %63 = vector.shape_cast %62 : vector<16x4xf32> to vector<2x8x4xf32>
    %64 = vector.extract_strided_slice %36 {offsets = [0, 52], sizes = [16, 4], strides = [1, 1]} : vector<16x96xf32> to vector<16x4xf32>
    %65 = vector.shape_cast %64 : vector<16x4xf32> to vector<2x8x4xf32>
    %66 = vector.extract_strided_slice %36 {offsets = [0, 56], sizes = [16, 4], strides = [1, 1]} : vector<16x96xf32> to vector<16x4xf32>
    %67 = vector.shape_cast %66 : vector<16x4xf32> to vector<2x8x4xf32>
    %68 = vector.extract_strided_slice %36 {offsets = [0, 60], sizes = [16, 4], strides = [1, 1]} : vector<16x96xf32> to vector<16x4xf32>
    %69 = vector.shape_cast %68 : vector<16x4xf32> to vector<2x8x4xf32>
    %70 = tpu.concatenate %55, %57, %59, %61, %63, %65, %67, %69 in 0 : vector<2x8x4xf32>, vector<2x8x4xf32>, vector<2x8x4xf32>, vector<2x8x4xf32>, vector<2x8x4xf32>, vector<2x8x4xf32>, vector<2x8x4xf32>, vector<2x8x4xf32> -> vector<16x8x4xf32>
    %71 = vector.extract_strided_slice %36 {offsets = [0, 64], sizes = [16, 4], strides = [1, 1]} : vector<16x96xf32> to vector<16x4xf32>
    %72 = vector.shape_cast %71 : vector<16x4xf32> to vector<2x8x4xf32>
    %73 = vector.extract_strided_slice %36 {offsets = [0, 68], sizes = [16, 4], strides = [1, 1]} : vector<16x96xf32> to vector<16x4xf32>
    %74 = vector.shape_cast %73 : vector<16x4xf32> to vector<2x8x4xf32>
    %75 = vector.extract_strided_slice %36 {offsets = [0, 72], sizes = [16, 4], strides = [1, 1]} : vector<16x96xf32> to vector<16x4xf32>
    %76 = vector.shape_cast %75 : vector<16x4xf32> to vector<2x8x4xf32>
    %77 = vector.extract_strided_slice %36 {offsets = [0, 76], sizes = [16, 4], strides = [1, 1]} : vector<16x96xf32> to vector<16x4xf32>
    %78 = vector.shape_cast %77 : vector<16x4xf32> to vector<2x8x4xf32>
    %79 = vector.extract_strided_slice %36 {offsets = [0, 80], sizes = [16, 4], strides = [1, 1]} : vector<16x96xf32> to vector<16x4xf32>
    %80 = vector.shape_cast %79 : vector<16x4xf32> to vector<2x8x4xf32>
    %81 = vector.extract_strided_slice %36 {offsets = [0, 84], sizes = [16, 4], strides = [1, 1]} : vector<16x96xf32> to vector<16x4xf32>
    %82 = vector.shape_cast %81 : vector<16x4xf32> to vector<2x8x4xf32>
    %83 = vector.extract_strided_slice %36 {offsets = [0, 88], sizes = [16, 4], strides = [1, 1]} : vector<16x96xf32> to vector<16x4xf32>
    %84 = vector.shape_cast %83 : vector<16x4xf32> to vector<2x8x4xf32>
    %85 = vector.extract_strided_slice %36 {offsets = [0, 92], sizes = [16, 4], strides = [1, 1]} : vector<16x96xf32> to vector<16x4xf32>
    %86 = vector.shape_cast %85 : vector<16x4xf32> to vector<2x8x4xf32>
    %87 = tpu.concatenate %72, %74, %76, %78, %80, %82, %84, %86 in 0 : vector<2x8x4xf32>, vector<2x8x4xf32>, vector<2x8x4xf32>, vector<2x8x4xf32>, vector<2x8x4xf32>, vector<2x8x4xf32>, vector<2x8x4xf32>, vector<2x8x4xf32> -> vector<16x8x4xf32>
    "tpu.trace_start"() <{level = 10 : i32, message = "bqd,bkd->bqk"}> : () -> ()
    %cst_16 = arith.constant dense<0.000000e+00> : vector<16x8x8xf32>
    %88 = tpu.matmul %53, %70, %cst_16 {dimension_numbers = #tpu.dot_dimension_numbers<[2], [2], [1], [1], [0, 0, 0, 1, 1, 1], [0], [0]>} : vector<16x8x4xf32>, vector<16x8x4xf32>, vector<16x8x8xf32> -> vector<16x8x8xf32>
    "tpu.trace_stop"() : () -> ()
    %cst_17 = arith.constant dense<0xFF800000> : vector<16x8xf32>
    %89 = vector.multi_reduction <maximumf>, %88, %cst_17 [2] : vector<16x8x8xf32> to vector<16x8xf32>
    %90 = vector.shape_cast %89 : vector<16x8xf32> to vector<16x8x1xf32>
    %91 = vector.broadcast %90 : vector<16x8x1xf32> to vector<16x8x8xf32>
    %92 = arith.subf %88, %91 : vector<16x8x8xf32>
    %93 = math.exp %92 : vector<16x8x8xf32>
    %cst_18 = arith.constant dense<0.000000e+00> : vector<16x8xf32>
    %94 = vector.multi_reduction <add>, %93, %cst_18 [2] : vector<16x8x8xf32> to vector<16x8xf32>
    %95 = vector.shape_cast %94 : vector<16x8xf32> to vector<16x8x1xf32>
    %96 = tpu.reciprocal %95 {approx = true} : vector<16x8x1xf32> -> vector<16x8x1xf32>
    %97 = vector.broadcast %96 : vector<16x8x1xf32> to vector<16x8x8xf32>
    %98 = arith.mulf %93, %97 : vector<16x8x8xf32>
    "tpu.trace_start"() <{level = 10 : i32, message = "bqk,bkd->bqd"}> : () -> ()
    %cst_19 = arith.constant dense<0.000000e+00> : vector<16x8x4xf32>
    %99 = tpu.matmul %98, %87, %cst_19 {dimension_numbers = #tpu.dot_dimension_numbers<[2], [1], [1], [2], [0, 0, 0, 1, 1, 2], [0], [0]>} : vector<16x8x8xf32>, vector<16x8x4xf32>, vector<16x8x4xf32> -> vector<16x8x4xf32>
    "tpu.trace_stop"() : () -> ()
    %100 = vector.shape_cast %99 : vector<16x8x4xf32> to vector<8x2x8x4xf32>
    %101 = vector.extract_strided_slice %100 {offsets = [0, 0, 0, 0], sizes = [1, 2, 8, 4], strides = [1, 1, 1, 1]} : vector<8x2x8x4xf32> to vector<1x2x8x4xf32>
    %102 = vector.shape_cast %101 : vector<1x2x8x4xf32> to vector<2x8x4xf32>
    %103 = vector.shape_cast %102 : vector<2x8x4xf32> to vector<16x4xf32>
    %104 = vector.extract_strided_slice %100 {offsets = [1, 0, 0, 0], sizes = [1, 2, 8, 4], strides = [1, 1, 1, 1]} : vector<8x2x8x4xf32> to vector<1x2x8x4xf32>
    %105 = vector.shape_cast %104 : vector<1x2x8x4xf32> to vector<2x8x4xf32>
    %106 = vector.shape_cast %105 : vector<2x8x4xf32> to vector<16x4xf32>
    %107 = vector.extract_strided_slice %100 {offsets = [2, 0, 0, 0], sizes = [1, 2, 8, 4], strides = [1, 1, 1, 1]} : vector<8x2x8x4xf32> to vector<1x2x8x4xf32>
    %108 = vector.shape_cast %107 : vector<1x2x8x4xf32> to vector<2x8x4xf32>
    %109 = vector.shape_cast %108 : vector<2x8x4xf32> to vector<16x4xf32>
    %110 = vector.extract_strided_slice %100 {offsets = [3, 0, 0, 0], sizes = [1, 2, 8, 4], strides = [1, 1, 1, 1]} : vector<8x2x8x4xf32> to vector<1x2x8x4xf32>
    %111 = vector.shape_cast %110 : vector<1x2x8x4xf32> to vector<2x8x4xf32>
    %112 = vector.shape_cast %111 : vector<2x8x4xf32> to vector<16x4xf32>
    %113 = vector.extract_strided_slice %100 {offsets = [4, 0, 0, 0], sizes = [1, 2, 8, 4], strides = [1, 1, 1, 1]} : vector<8x2x8x4xf32> to vector<1x2x8x4xf32>
    %114 = vector.shape_cast %113 : vector<1x2x8x4xf32> to vector<2x8x4xf32>
    %115 = vector.shape_cast %114 : vector<2x8x4xf32> to vector<16x4xf32>
    %116 = vector.extract_strided_slice %100 {offsets = [5, 0, 0, 0], sizes = [1, 2, 8, 4], strides = [1, 1, 1, 1]} : vector<8x2x8x4xf32> to vector<1x2x8x4xf32>
    %117 = vector.shape_cast %116 : vector<1x2x8x4xf32> to vector<2x8x4xf32>
    %118 = vector.shape_cast %117 : vector<2x8x4xf32> to vector<16x4xf32>
    %119 = vector.extract_strided_slice %100 {offsets = [6, 0, 0, 0], sizes = [1, 2, 8, 4], strides = [1, 1, 1, 1]} : vector<8x2x8x4xf32> to vector<1x2x8x4xf32>
    %120 = vector.shape_cast %119 : vector<1x2x8x4xf32> to vector<2x8x4xf32>
    %121 = vector.shape_cast %120 : vector<2x8x4xf32> to vector<16x4xf32>
    %122 = vector.extract_strided_slice %100 {offsets = [7, 0, 0, 0], sizes = [1, 2, 8, 4], strides = [1, 1, 1, 1]} : vector<8x2x8x4xf32> to vector<1x2x8x4xf32>
    %123 = vector.shape_cast %122 : vector<1x2x8x4xf32> to vector<2x8x4xf32>
    %124 = vector.shape_cast %123 : vector<2x8x4xf32> to vector<16x4xf32>
    %125 = tpu.concatenate %103, %106, %109, %112, %115, %118, %121, %124 in 1 : vector<16x4xf32>, vector<16x4xf32>, vector<16x4xf32>, vector<16x4xf32>, vector<16x4xf32>, vector<16x4xf32>, vector<16x4xf32>, vector<16x4xf32> -> vector<16x32xf32>
    %cst_20 = arith.constant dense<0.000000e+00> : vector<16x32xf32>
    %126 = tpu.matmul %125, %23, %cst_20 {dimension_numbers = #tpu.dot_dimension_numbers<[1], [0], [0], [1], [0, 0, 1, 1], [], []>} : vector<16x32xf32>, vector<32x32xf32>, vector<16x32xf32> -> vector<16x32xf32>
    %127 = vector.broadcast %27 : vector<1x32xf32> to vector<16x32xf32>
    %128 = arith.addf %126, %127 : vector<16x32xf32>
    %129 = arith.addf %17, %128 : vector<16x32xf32>
    %cst_21 = arith.constant dense<0.000000e+00> : vector<16xf32>
    %130 = vector.multi_reduction <add>, %129, %cst_21 [1] : vector<16x32xf32> to vector<16xf32>
    %131 = vector.shape_cast %130 : vector<16xf32> to vector<16x1xf32>
    %cst_22 = arith.constant 3.200000e+01 : f32
    %132 = vector.broadcast %cst_22 : f32 to vector<16x1xf32>
    %133 = arith.divf %131, %132 : vector<16x1xf32>
    %134 = arith.mulf %129, %129 : vector<16x32xf32>
    %cst_23 = arith.constant dense<0.000000e+00> : vector<16xf32>
    %135 = vector.multi_reduction <add>, %134, %cst_23 [1] : vector<16x32xf32> to vector<16xf32>
    %136 = vector.shape_cast %135 : vector<16xf32> to vector<16x1xf32>
    %cst_24 = arith.constant 3.200000e+01 : f32
    %137 = vector.broadcast %cst_24 : f32 to vector<16x1xf32>
    %138 = arith.divf %136, %137 : vector<16x1xf32>
    %139 = arith.mulf %133, %133 : vector<16x1xf32>
    %140 = arith.subf %138, %139 : vector<16x1xf32>
    %141 = vector.broadcast %133 : vector<16x1xf32> to vector<16x32xf32>
    %142 = arith.subf %129, %141 : vector<16x32xf32>
    %cst_25 = arith.constant 9.99999974E-6 : f32
    %143 = vector.broadcast %cst_25 : f32 to vector<16x1xf32>
    %144 = arith.addf %140, %143 : vector<16x1xf32>
    %145 = math.rsqrt %144 : vector<16x1xf32>
    %146 = vector.broadcast %145 : vector<16x1xf32> to vector<16x32xf32>
    %147 = arith.mulf %142, %146 : vector<16x32xf32>
    %148 = vector.broadcast %28 : vector<1x32xf32> to vector<16x32xf32>
    %149 = arith.mulf %147, %148 : vector<16x32xf32>
    %150 = vector.broadcast %29 : vector<1x32xf32> to vector<16x32xf32>
    %151 = arith.addf %149, %150 : vector<16x32xf32>
    %cst_26 = arith.constant dense<0.000000e+00> : vector<16x64xf32>
    %152 = tpu.matmul %151, %24, %cst_26 {dimension_numbers = #tpu.dot_dimension_numbers<[1], [0], [0], [1], [0, 0, 1, 1], [], []>} : vector<16x32xf32>, vector<32x64xf32>, vector<16x64xf32> -> vector<16x64xf32>
    %153 = vector.broadcast %30 : vector<1x64xf32> to vector<16x64xf32>
    %154 = arith.addf %152, %153 : vector<16x64xf32>
    %cst_27 = arith.constant 0.000000e+00 : f32
    %155 = vector.broadcast %cst_27 : f32 to vector<16x64xf32>
    %156 = arith.maximumf %154, %155 : vector<16x64xf32>
    %cst_28 = arith.constant dense<0.000000e+00> : vector<16x32xf32>
    %157 = tpu.matmul %156, %25, %cst_28 {dimension_numbers = #tpu.dot_dimension_numbers<[1], [0], [0], [1], [0, 0, 1, 1], [], []>} : vector<16x64xf32>, vector<64x32xf32>, vector<16x32xf32> -> vector<16x32xf32>
    %158 = vector.broadcast %31 : vector<1x32xf32> to vector<16x32xf32>
    %159 = arith.addf %157, %158 : vector<16x32xf32>
    %160 = arith.addf %151, %159 : vector<16x32xf32>
    %cst_29 = arith.constant dense<0.000000e+00> : vector<16xf32>
    %161 = vector.multi_reduction <add>, %160, %cst_29 [1] : vector<16x32xf32> to vector<16xf32>
    %162 = vector.shape_cast %161 : vector<16xf32> to vector<16x1xf32>
    %cst_30 = arith.constant 3.200000e+01 : f32
    %163 = vector.broadcast %cst_30 : f32 to vector<16x1xf32>
    %164 = arith.divf %162, %163 : vector<16x1xf32>
    %165 = arith.mulf %160, %160 : vector<16x32xf32>
    %cst_31 = arith.constant dense<0.000000e+00> : vector<16xf32>
    %166 = vector.multi_reduction <add>, %165, %cst_31 [1] : vector<16x32xf32> to vector<16xf32>
    %167 = vector.shape_cast %166 : vector<16xf32> to vector<16x1xf32>
    %cst_32 = arith.constant 3.200000e+01 : f32
    %168 = vector.broadcast %cst_32 : f32 to vector<16x1xf32>
    %169 = arith.divf %167, %168 : vector<16x1xf32>
    %170 = arith.mulf %164, %164 : vector<16x1xf32>
    %171 = arith.subf %169, %170 : vector<16x1xf32>
    %172 = vector.broadcast %164 : vector<16x1xf32> to vector<16x32xf32>
    %173 = arith.subf %160, %172 : vector<16x32xf32>
    %cst_33 = arith.constant 9.99999974E-6 : f32
    %174 = vector.broadcast %cst_33 : f32 to vector<16x1xf32>
    %175 = arith.addf %171, %174 : vector<16x1xf32>
    %176 = math.rsqrt %175 : vector<16x1xf32>
    %177 = vector.broadcast %176 : vector<16x1xf32> to vector<16x32xf32>
    %178 = arith.mulf %173, %177 : vector<16x32xf32>
    %179 = vector.broadcast %32 : vector<1x32xf32> to vector<16x32xf32>
    %180 = arith.mulf %178, %179 : vector<16x32xf32>
    %181 = vector.broadcast %33 : vector<1x32xf32> to vector<16x32xf32>
    %182 = arith.addf %180, %181 : vector<16x32xf32>
    %c1 = arith.constant 1 : index
    %c0_34 = arith.constant 0 : index
    %c0_35 = arith.constant 0 : index
    %183 = vector.load %arg2[%c1, %c0_34, %c0_35] : memref<6x160x96xf32, #tpu.memory_space<vmem>>, vector<1x160x96xf32>
    %184 = vector.shape_cast %183 : vector<1x160x96xf32> to vector<160x96xf32>
    %c1_36 = arith.constant 1 : index
    %c0_37 = arith.constant 0 : index
    %c0_38 = arith.constant 0 : index
    %185 = vector.load %arg3[%c1_36, %c0_37, %c0_38] : memref<6x8x96xf32, #tpu.memory_space<vmem>>, vector<1x8x96xf32>
    %186 = vector.shape_cast %185 : vector<1x8x96xf32> to vector<8x96xf32>
    %187 = vector.extract_strided_slice %184 {offsets = [0, 0], sizes = [32, 96], strides = [1, 1]} : vector<160x96xf32> to vector<32x96xf32>
    %188 = vector.extract_strided_slice %184 {offsets = [32, 0], sizes = [32, 32], strides = [1, 1]} : vector<160x96xf32> to vector<32x32xf32>
    %189 = vector.extract_strided_slice %184 {offsets = [64, 0], sizes = [32, 64], strides = [1, 1]} : vector<160x96xf32> to vector<32x64xf32>
    %190 = vector.extract_strided_slice %184 {offsets = [96, 0], sizes = [64, 32], strides = [1, 1]} : vector<160x96xf32> to vector<64x32xf32>
    %191 = vector.extract_strided_slice %186 {offsets = [0, 0], sizes = [1, 96], strides = [1, 1]} : vector<8x96xf32> to vector<1x96xf32>
    %192 = vector.extract_strided_slice %186 {offsets = [1, 0], sizes = [1, 32], strides = [1, 1]} : vector<8x96xf32> to vector<1x32xf32>
    %193 = vector.extract_strided_slice %186 {offsets = [2, 0], sizes = [1, 32], strides = [1, 1]} : vector<8x96xf32> to vector<1x32xf32>
    %194 = vector.extract_strided_slice %186 {offsets = [3, 0], sizes = [1, 32], strides = [1, 1]} : vector<8x96xf32> to vector<1x32xf32>
    %195 = vector.extract_strided_slice %186 {offsets = [4, 0], sizes = [1, 64], strides = [1, 1]} : vector<8x96xf32> to vector<1x64xf32>
    %196 = vector.extract_strided_slice %186 {offsets = [5, 0], sizes = [1, 32], strides = [1, 1]} : vector<8x96xf32> to vector<1x32xf32>
    %197 = vector.extract_strided_slice %186 {offsets = [6, 0], sizes = [1, 32], strides = [1, 1]} : vector<8x96xf32> to vector<1x32xf32>
    %198 = vector.extract_strided_slice %186 {offsets = [7, 0], sizes = [1, 32], strides = [1, 1]} : vector<8x96xf32> to vector<1x32xf32>
    %cst_39 = arith.constant dense<0.000000e+00> : vector<16x96xf32>
    %199 = tpu.matmul %182, %187, %cst_39 {dimension_numbers = #tpu.dot_dimension_numbers<[1], [0], [0], [1], [0, 0, 1, 1], [], []>} : vector<16x32xf32>, vector<32x96xf32>, vector<16x96xf32> -> vector<16x96xf32>
    %200 = vector.broadcast %191 : vector<1x96xf32> to vector<16x96xf32>
    %201 = arith.addf %199, %200 : vector<16x96xf32>
    %202 = vector.extract_strided_slice %201 {offsets = [0, 0], sizes = [16, 4], strides = [1, 1]} : vector<16x96xf32> to vector<16x4xf32>
    %203 = vector.shape_cast %202 : vector<16x4xf32> to vector<2x8x4xf32>
    %204 = vector.extract_strided_slice %201 {offsets = [0, 4], sizes = [16, 4], strides = [1, 1]} : vector<16x96xf32> to vector<16x4xf32>
    %205 = vector.shape_cast %204 : vector<16x4xf32> to vector<2x8x4xf32>
    %206 = vector.extract_strided_slice %201 {offsets = [0, 8], sizes = [16, 4], strides = [1, 1]} : vector<16x96xf32> to vector<16x4xf32>
    %207 = vector.shape_cast %206 : vector<16x4xf32> to vector<2x8x4xf32>
    %208 = vector.extract_strided_slice %201 {offsets = [0, 12], sizes = [16, 4], strides = [1, 1]} : vector<16x96xf32> to vector<16x4xf32>
    %209 = vector.shape_cast %208 : vector<16x4xf32> to vector<2x8x4xf32>
    %210 = vector.extract_strided_slice %201 {offsets = [0, 16], sizes = [16, 4], strides = [1, 1]} : vector<16x96xf32> to vector<16x4xf32>
    %211 = vector.shape_cast %210 : vector<16x4xf32> to vector<2x8x4xf32>
    %212 = vector.extract_strided_slice %201 {offsets = [0, 20], sizes = [16, 4], strides = [1, 1]} : vector<16x96xf32> to vector<16x4xf32>
    %213 = vector.shape_cast %212 : vector<16x4xf32> to vector<2x8x4xf32>
    %214 = vector.extract_strided_slice %201 {offsets = [0, 24], sizes = [16, 4], strides = [1, 1]} : vector<16x96xf32> to vector<16x4xf32>
    %215 = vector.shape_cast %214 : vector<16x4xf32> to vector<2x8x4xf32>
    %216 = vector.extract_strided_slice %201 {offsets = [0, 28], sizes = [16, 4], strides = [1, 1]} : vector<16x96xf32> to vector<16x4xf32>
    %217 = vector.shape_cast %216 : vector<16x4xf32> to vector<2x8x4xf32>
    %218 = tpu.concatenate %203, %205, %207, %209, %211, %213, %215, %217 in 0 : vector<2x8x4xf32>, vector<2x8x4xf32>, vector<2x8x4xf32>, vector<2x8x4xf32>, vector<2x8x4xf32>, vector<2x8x4xf32>, vector<2x8x4xf32>, vector<2x8x4xf32> -> vector<16x8x4xf32>
    %219 = vector.extract_strided_slice %201 {offsets = [0, 32], sizes = [16, 4], strides = [1, 1]} : vector<16x96xf32> to vector<16x4xf32>
    %220 = vector.shape_cast %219 : vector<16x4xf32> to vector<2x8x4xf32>
    %221 = vector.extract_strided_slice %201 {offsets = [0, 36], sizes = [16, 4], strides = [1, 1]} : vector<16x96xf32> to vector<16x4xf32>
    %222 = vector.shape_cast %221 : vector<16x4xf32> to vector<2x8x4xf32>
    %223 = vector.extract_strided_slice %201 {offsets = [0, 40], sizes = [16, 4], strides = [1, 1]} : vector<16x96xf32> to vector<16x4xf32>
    %224 = vector.shape_cast %223 : vector<16x4xf32> to vector<2x8x4xf32>
    %225 = vector.extract_strided_slice %201 {offsets = [0, 44], sizes = [16, 4], strides = [1, 1]} : vector<16x96xf32> to vector<16x4xf32>
    %226 = vector.shape_cast %225 : vector<16x4xf32> to vector<2x8x4xf32>
    %227 = vector.extract_strided_slice %201 {offsets = [0, 48], sizes = [16, 4], strides = [1, 1]} : vector<16x96xf32> to vector<16x4xf32>
    %228 = vector.shape_cast %227 : vector<16x4xf32> to vector<2x8x4xf32>
    %229 = vector.extract_strided_slice %201 {offsets = [0, 52], sizes = [16, 4], strides = [1, 1]} : vector<16x96xf32> to vector<16x4xf32>
    %230 = vector.shape_cast %229 : vector<16x4xf32> to vector<2x8x4xf32>
    %231 = vector.extract_strided_slice %201 {offsets = [0, 56], sizes = [16, 4], strides = [1, 1]} : vector<16x96xf32> to vector<16x4xf32>
    %232 = vector.shape_cast %231 : vector<16x4xf32> to vector<2x8x4xf32>
    %233 = vector.extract_strided_slice %201 {offsets = [0, 60], sizes = [16, 4], strides = [1, 1]} : vector<16x96xf32> to vector<16x4xf32>
    %234 = vector.shape_cast %233 : vector<16x4xf32> to vector<2x8x4xf32>
    %235 = tpu.concatenate %220, %222, %224, %226, %228, %230, %232, %234 in 0 : vector<2x8x4xf32>, vector<2x8x4xf32>, vector<2x8x4xf32>, vector<2x8x4xf32>, vector<2x8x4xf32>, vector<2x8x4xf32>, vector<2x8x4xf32>, vector<2x8x4xf32> -> vector<16x8x4xf32>
    %236 = vector.extract_strided_slice %201 {offsets = [0, 64], sizes = [16, 4], strides = [1, 1]} : vector<16x96xf32> to vector<16x4xf32>
    %237 = vector.shape_cast %236 : vector<16x4xf32> to vector<2x8x4xf32>
    %238 = vector.extract_strided_slice %201 {offsets = [0, 68], sizes = [16, 4], strides = [1, 1]} : vector<16x96xf32> to vector<16x4xf32>
    %239 = vector.shape_cast %238 : vector<16x4xf32> to vector<2x8x4xf32>
    %240 = vector.extract_strided_slice %201 {offsets = [0, 72], sizes = [16, 4], strides = [1, 1]} : vector<16x96xf32> to vector<16x4xf32>
    %241 = vector.shape_cast %240 : vector<16x4xf32> to vector<2x8x4xf32>
    %242 = vector.extract_strided_slice %201 {offsets = [0, 76], sizes = [16, 4], strides = [1, 1]} : vector<16x96xf32> to vector<16x4xf32>
    %243 = vector.shape_cast %242 : vector<16x4xf32> to vector<2x8x4xf32>
    %244 = vector.extract_strided_slice %201 {offsets = [0, 80], sizes = [16, 4], strides = [1, 1]} : vector<16x96xf32> to vector<16x4xf32>
    %245 = vector.shape_cast %244 : vector<16x4xf32> to vector<2x8x4xf32>
    %246 = vector.extract_strided_slice %201 {offsets = [0, 84], sizes = [16, 4], strides = [1, 1]} : vector<16x96xf32> to vector<16x4xf32>
    %247 = vector.shape_cast %246 : vector<16x4xf32> to vector<2x8x4xf32>
    %248 = vector.extract_strided_slice %201 {offsets = [0, 88], sizes = [16, 4], strides = [1, 1]} : vector<16x96xf32> to vector<16x4xf32>
    %249 = vector.shape_cast %248 : vector<16x4xf32> to vector<2x8x4xf32>
    %250 = vector.extract_strided_slice %201 {offsets = [0, 92], sizes = [16, 4], strides = [1, 1]} : vector<16x96xf32> to vector<16x4xf32>
    %251 = vector.shape_cast %250 : vector<16x4xf32> to vector<2x8x4xf32>
    %252 = tpu.concatenate %237, %239, %241, %243, %245, %247, %249, %251 in 0 : vector<2x8x4xf32>, vector<2x8x4xf32>, vector<2x8x4xf32>, vector<2x8x4xf32>, vector<2x8x4xf32>, vector<2x8x4xf32>, vector<2x8x4xf32>, vector<2x8x4xf32> -> vector<16x8x4xf32>
    "tpu.trace_start"() <{level = 10 : i32, message = "bqd,bkd->bqk"}> : () -> ()
    %cst_40 = arith.constant dense<0.000000e+00> : vector<16x8x8xf32>
    %253 = tpu.matmul %218, %235, %cst_40 {dimension_numbers = #tpu.dot_dimension_numbers<[2], [2], [1], [1], [0, 0, 0, 1, 1, 1], [0], [0]>} : vector<16x8x4xf32>, vector<16x8x4xf32>, vector<16x8x8xf32> -> vector<16x8x8xf32>
    "tpu.trace_stop"() : () -> ()
    %cst_41 = arith.constant dense<0xFF800000> : vector<16x8xf32>
    %254 = vector.multi_reduction <maximumf>, %253, %cst_41 [2] : vector<16x8x8xf32> to vector<16x8xf32>
    %255 = vector.shape_cast %254 : vector<16x8xf32> to vector<16x8x1xf32>
    %256 = vector.broadcast %255 : vector<16x8x1xf32> to vector<16x8x8xf32>
    %257 = arith.subf %253, %256 : vector<16x8x8xf32>
    %258 = math.exp %257 : vector<16x8x8xf32>
    %cst_42 = arith.constant dense<0.000000e+00> : vector<16x8xf32>
    %259 = vector.multi_reduction <add>, %258, %cst_42 [2] : vector<16x8x8xf32> to vector<16x8xf32>
    %260 = vector.shape_cast %259 : vector<16x8xf32> to vector<16x8x1xf32>
    %261 = tpu.reciprocal %260 {approx = true} : vector<16x8x1xf32> -> vector<16x8x1xf32>
    %262 = vector.broadcast %261 : vector<16x8x1xf32> to vector<16x8x8xf32>
    %263 = arith.mulf %258, %262 : vector<16x8x8xf32>
    "tpu.trace_start"() <{level = 10 : i32, message = "bqk,bkd->bqd"}> : () -> ()
    %cst_43 = arith.constant dense<0.000000e+00> : vector<16x8x4xf32>
    %264 = tpu.matmul %263, %252, %cst_43 {dimension_numbers = #tpu.dot_dimension_numbers<[2], [1], [1], [2], [0, 0, 0, 1, 1, 2], [0], [0]>} : vector<16x8x8xf32>, vector<16x8x4xf32>, vector<16x8x4xf32> -> vector<16x8x4xf32>
    "tpu.trace_stop"() : () -> ()
    %265 = vector.shape_cast %264 : vector<16x8x4xf32> to vector<8x2x8x4xf32>
    %266 = vector.extract_strided_slice %265 {offsets = [0, 0, 0, 0], sizes = [1, 2, 8, 4], strides = [1, 1, 1, 1]} : vector<8x2x8x4xf32> to vector<1x2x8x4xf32>
    %267 = vector.shape_cast %266 : vector<1x2x8x4xf32> to vector<2x8x4xf32>
    %268 = vector.shape_cast %267 : vector<2x8x4xf32> to vector<16x4xf32>
    %269 = vector.extract_strided_slice %265 {offsets = [1, 0, 0, 0], sizes = [1, 2, 8, 4], strides = [1, 1, 1, 1]} : vector<8x2x8x4xf32> to vector<1x2x8x4xf32>
    %270 = vector.shape_cast %269 : vector<1x2x8x4xf32> to vector<2x8x4xf32>
    %271 = vector.shape_cast %270 : vector<2x8x4xf32> to vector<16x4xf32>
    %272 = vector.extract_strided_slice %265 {offsets = [2, 0, 0, 0], sizes = [1, 2, 8, 4], strides = [1, 1, 1, 1]} : vector<8x2x8x4xf32> to vector<1x2x8x4xf32>
    %273 = vector.shape_cast %272 : vector<1x2x8x4xf32> to vector<2x8x4xf32>
    %274 = vector.shape_cast %273 : vector<2x8x4xf32> to vector<16x4xf32>
    %275 = vector.extract_strided_slice %265 {offsets = [3, 0, 0, 0], sizes = [1, 2, 8, 4], strides = [1, 1, 1, 1]} : vector<8x2x8x4xf32> to vector<1x2x8x4xf32>
    %276 = vector.shape_cast %275 : vector<1x2x8x4xf32> to vector<2x8x4xf32>
    %277 = vector.shape_cast %276 : vector<2x8x4xf32> to vector<16x4xf32>
    %278 = vector.extract_strided_slice %265 {offsets = [4, 0, 0, 0], sizes = [1, 2, 8, 4], strides = [1, 1, 1, 1]} : vector<8x2x8x4xf32> to vector<1x2x8x4xf32>
    %279 = vector.shape_cast %278 : vector<1x2x8x4xf32> to vector<2x8x4xf32>
    %280 = vector.shape_cast %279 : vector<2x8x4xf32> to vector<16x4xf32>
    %281 = vector.extract_strided_slice %265 {offsets = [5, 0, 0, 0], sizes = [1, 2, 8, 4], strides = [1, 1, 1, 1]} : vector<8x2x8x4xf32> to vector<1x2x8x4xf32>
    %282 = vector.shape_cast %281 : vector<1x2x8x4xf32> to vector<2x8x4xf32>
    %283 = vector.shape_cast %282 : vector<2x8x4xf32> to vector<16x4xf32>
    %284 = vector.extract_strided_slice %265 {offsets = [6, 0, 0, 0], sizes = [1, 2, 8, 4], strides = [1, 1, 1, 1]} : vector<8x2x8x4xf32> to vector<1x2x8x4xf32>
    %285 = vector.shape_cast %284 : vector<1x2x8x4xf32> to vector<2x8x4xf32>
    %286 = vector.shape_cast %285 : vector<2x8x4xf32> to vector<16x4xf32>
    %287 = vector.extract_strided_slice %265 {offsets = [7, 0, 0, 0], sizes = [1, 2, 8, 4], strides = [1, 1, 1, 1]} : vector<8x2x8x4xf32> to vector<1x2x8x4xf32>
    %288 = vector.shape_cast %287 : vector<1x2x8x4xf32> to vector<2x8x4xf32>
    %289 = vector.shape_cast %288 : vector<2x8x4xf32> to vector<16x4xf32>
    %290 = tpu.concatenate %268, %271, %274, %277, %280, %283, %286, %289 in 1 : vector<16x4xf32>, vector<16x4xf32>, vector<16x4xf32>, vector<16x4xf32>, vector<16x4xf32>, vector<16x4xf32>, vector<16x4xf32>, vector<16x4xf32> -> vector<16x32xf32>
    %cst_44 = arith.constant dense<0.000000e+00> : vector<16x32xf32>
    %291 = tpu.matmul %290, %188, %cst_44 {dimension_numbers = #tpu.dot_dimension_numbers<[1], [0], [0], [1], [0, 0, 1, 1], [], []>} : vector<16x32xf32>, vector<32x32xf32>, vector<16x32xf32> -> vector<16x32xf32>
    %292 = vector.broadcast %192 : vector<1x32xf32> to vector<16x32xf32>
    %293 = arith.addf %291, %292 : vector<16x32xf32>
    %294 = arith.addf %182, %293 : vector<16x32xf32>
    %cst_45 = arith.constant dense<0.000000e+00> : vector<16xf32>
    %295 = vector.multi_reduction <add>, %294, %cst_45 [1] : vector<16x32xf32> to vector<16xf32>
    %296 = vector.shape_cast %295 : vector<16xf32> to vector<16x1xf32>
    %cst_46 = arith.constant 3.200000e+01 : f32
    %297 = vector.broadcast %cst_46 : f32 to vector<16x1xf32>
    %298 = arith.divf %296, %297 : vector<16x1xf32>
    %299 = arith.mulf %294, %294 : vector<16x32xf32>
    %cst_47 = arith.constant dense<0.000000e+00> : vector<16xf32>
    %300 = vector.multi_reduction <add>, %299, %cst_47 [1] : vector<16x32xf32> to vector<16xf32>
    %301 = vector.shape_cast %300 : vector<16xf32> to vector<16x1xf32>
    %cst_48 = arith.constant 3.200000e+01 : f32
    %302 = vector.broadcast %cst_48 : f32 to vector<16x1xf32>
    %303 = arith.divf %301, %302 : vector<16x1xf32>
    %304 = arith.mulf %298, %298 : vector<16x1xf32>
    %305 = arith.subf %303, %304 : vector<16x1xf32>
    %306 = vector.broadcast %298 : vector<16x1xf32> to vector<16x32xf32>
    %307 = arith.subf %294, %306 : vector<16x32xf32>
    %cst_49 = arith.constant 9.99999974E-6 : f32
    %308 = vector.broadcast %cst_49 : f32 to vector<16x1xf32>
    %309 = arith.addf %305, %308 : vector<16x1xf32>
    %310 = math.rsqrt %309 : vector<16x1xf32>
    %311 = vector.broadcast %310 : vector<16x1xf32> to vector<16x32xf32>
    %312 = arith.mulf %307, %311 : vector<16x32xf32>
    %313 = vector.broadcast %193 : vector<1x32xf32> to vector<16x32xf32>
    %314 = arith.mulf %312, %313 : vector<16x32xf32>
    %315 = vector.broadcast %194 : vector<1x32xf32> to vector<16x32xf32>
    %316 = arith.addf %314, %315 : vector<16x32xf32>
    %cst_50 = arith.constant dense<0.000000e+00> : vector<16x64xf32>
    %317 = tpu.matmul %316, %189, %cst_50 {dimension_numbers = #tpu.dot_dimension_numbers<[1], [0], [0], [1], [0, 0, 1, 1], [], []>} : vector<16x32xf32>, vector<32x64xf32>, vector<16x64xf32> -> vector<16x64xf32>
    %318 = vector.broadcast %195 : vector<1x64xf32> to vector<16x64xf32>
    %319 = arith.addf %317, %318 : vector<16x64xf32>
    %cst_51 = arith.constant 0.000000e+00 : f32
    %320 = vector.broadcast %cst_51 : f32 to vector<16x64xf32>
    %321 = arith.maximumf %319, %320 : vector<16x64xf32>
    %cst_52 = arith.constant dense<0.000000e+00> : vector<16x32xf32>
    %322 = tpu.matmul %321, %190, %cst_52 {dimension_numbers = #tpu.dot_dimension_numbers<[1], [0], [0], [1], [0, 0, 1, 1], [], []>} : vector<16x64xf32>, vector<64x32xf32>, vector<16x32xf32> -> vector<16x32xf32>
    %323 = vector.broadcast %196 : vector<1x32xf32> to vector<16x32xf32>
    %324 = arith.addf %322, %323 : vector<16x32xf32>
    %325 = arith.addf %316, %324 : vector<16x32xf32>
    %cst_53 = arith.constant dense<0.000000e+00> : vector<16xf32>
    %326 = vector.multi_reduction <add>, %325, %cst_53 [1] : vector<16x32xf32> to vector<16xf32>
    %327 = vector.shape_cast %326 : vector<16xf32> to vector<16x1xf32>
    %cst_54 = arith.constant 3.200000e+01 : f32
    %328 = vector.broadcast %cst_54 : f32 to vector<16x1xf32>
    %329 = arith.divf %327, %328 : vector<16x1xf32>
    %330 = arith.mulf %325, %325 : vector<16x32xf32>
    %cst_55 = arith.constant dense<0.000000e+00> : vector<16xf32>
    %331 = vector.multi_reduction <add>, %330, %cst_55 [1] : vector<16x32xf32> to vector<16xf32>
    %332 = vector.shape_cast %331 : vector<16xf32> to vector<16x1xf32>
    %cst_56 = arith.constant 3.200000e+01 : f32
    %333 = vector.broadcast %cst_56 : f32 to vector<16x1xf32>
    %334 = arith.divf %332, %333 : vector<16x1xf32>
    %335 = arith.mulf %329, %329 : vector<16x1xf32>
    %336 = arith.subf %334, %335 : vector<16x1xf32>
    %337 = vector.broadcast %329 : vector<16x1xf32> to vector<16x32xf32>
    %338 = arith.subf %325, %337 : vector<16x32xf32>
    %cst_57 = arith.constant 9.99999974E-6 : f32
    %339 = vector.broadcast %cst_57 : f32 to vector<16x1xf32>
    %340 = arith.addf %336, %339 : vector<16x1xf32>
    %341 = math.rsqrt %340 : vector<16x1xf32>
    %342 = vector.broadcast %341 : vector<16x1xf32> to vector<16x32xf32>
    %343 = arith.mulf %338, %342 : vector<16x32xf32>
    %344 = vector.broadcast %197 : vector<1x32xf32> to vector<16x32xf32>
    %345 = arith.mulf %343, %344 : vector<16x32xf32>
    %346 = vector.broadcast %198 : vector<1x32xf32> to vector<16x32xf32>
    %347 = arith.addf %345, %346 : vector<16x32xf32>
    %c2 = arith.constant 2 : index
    %c0_58 = arith.constant 0 : index
    %c0_59 = arith.constant 0 : index
    %348 = vector.load %arg2[%c2, %c0_58, %c0_59] : memref<6x160x96xf32, #tpu.memory_space<vmem>>, vector<1x160x96xf32>
    %349 = vector.shape_cast %348 : vector<1x160x96xf32> to vector<160x96xf32>
    %c2_60 = arith.constant 2 : index
    %c0_61 = arith.constant 0 : index
    %c0_62 = arith.constant 0 : index
    %350 = vector.load %arg3[%c2_60, %c0_61, %c0_62] : memref<6x8x96xf32, #tpu.memory_space<vmem>>, vector<1x8x96xf32>
    %351 = vector.shape_cast %350 : vector<1x8x96xf32> to vector<8x96xf32>
    %352 = vector.extract_strided_slice %349 {offsets = [0, 0], sizes = [32, 96], strides = [1, 1]} : vector<160x96xf32> to vector<32x96xf32>
    %353 = vector.extract_strided_slice %349 {offsets = [32, 0], sizes = [32, 32], strides = [1, 1]} : vector<160x96xf32> to vector<32x32xf32>
    %354 = vector.extract_strided_slice %349 {offsets = [64, 0], sizes = [32, 64], strides = [1, 1]} : vector<160x96xf32> to vector<32x64xf32>
    %355 = vector.extract_strided_slice %349 {offsets = [96, 0], sizes = [64, 32], strides = [1, 1]} : vector<160x96xf32> to vector<64x32xf32>
    %356 = vector.extract_strided_slice %351 {offsets = [0, 0], sizes = [1, 96], strides = [1, 1]} : vector<8x96xf32> to vector<1x96xf32>
    %357 = vector.extract_strided_slice %351 {offsets = [1, 0], sizes = [1, 32], strides = [1, 1]} : vector<8x96xf32> to vector<1x32xf32>
    %358 = vector.extract_strided_slice %351 {offsets = [2, 0], sizes = [1, 32], strides = [1, 1]} : vector<8x96xf32> to vector<1x32xf32>
    %359 = vector.extract_strided_slice %351 {offsets = [3, 0], sizes = [1, 32], strides = [1, 1]} : vector<8x96xf32> to vector<1x32xf32>
    %360 = vector.extract_strided_slice %351 {offsets = [4, 0], sizes = [1, 64], strides = [1, 1]} : vector<8x96xf32> to vector<1x64xf32>
    %361 = vector.extract_strided_slice %351 {offsets = [5, 0], sizes = [1, 32], strides = [1, 1]} : vector<8x96xf32> to vector<1x32xf32>
    %362 = vector.extract_strided_slice %351 {offsets = [6, 0], sizes = [1, 32], strides = [1, 1]} : vector<8x96xf32> to vector<1x32xf32>
    %363 = vector.extract_strided_slice %351 {offsets = [7, 0], sizes = [1, 32], strides = [1, 1]} : vector<8x96xf32> to vector<1x32xf32>
    %cst_63 = arith.constant dense<0.000000e+00> : vector<16x96xf32>
    %364 = tpu.matmul %347, %352, %cst_63 {dimension_numbers = #tpu.dot_dimension_numbers<[1], [0], [0], [1], [0, 0, 1, 1], [], []>} : vector<16x32xf32>, vector<32x96xf32>, vector<16x96xf32> -> vector<16x96xf32>
    %365 = vector.broadcast %356 : vector<1x96xf32> to vector<16x96xf32>
    %366 = arith.addf %364, %365 : vector<16x96xf32>
    %367 = vector.extract_strided_slice %366 {offsets = [0, 0], sizes = [16, 4], strides = [1, 1]} : vector<16x96xf32> to vector<16x4xf32>
    %368 = vector.shape_cast %367 : vector<16x4xf32> to vector<2x8x4xf32>
    %369 = vector.extract_strided_slice %366 {offsets = [0, 4], sizes = [16, 4], strides = [1, 1]} : vector<16x96xf32> to vector<16x4xf32>
    %370 = vector.shape_cast %369 : vector<16x4xf32> to vector<2x8x4xf32>
    %371 = vector.extract_strided_slice %366 {offsets = [0, 8], sizes = [16, 4], strides = [1, 1]} : vector<16x96xf32> to vector<16x4xf32>
    %372 = vector.shape_cast %371 : vector<16x4xf32> to vector<2x8x4xf32>
    %373 = vector.extract_strided_slice %366 {offsets = [0, 12], sizes = [16, 4], strides = [1, 1]} : vector<16x96xf32> to vector<16x4xf32>
    %374 = vector.shape_cast %373 : vector<16x4xf32> to vector<2x8x4xf32>
    %375 = vector.extract_strided_slice %366 {offsets = [0, 16], sizes = [16, 4], strides = [1, 1]} : vector<16x96xf32> to vector<16x4xf32>
    %376 = vector.shape_cast %375 : vector<16x4xf32> to vector<2x8x4xf32>
    %377 = vector.extract_strided_slice %366 {offsets = [0, 20], sizes = [16, 4], strides = [1, 1]} : vector<16x96xf32> to vector<16x4xf32>
    %378 = vector.shape_cast %377 : vector<16x4xf32> to vector<2x8x4xf32>
    %379 = vector.extract_strided_slice %366 {offsets = [0, 24], sizes = [16, 4], strides = [1, 1]} : vector<16x96xf32> to vector<16x4xf32>
    %380 = vector.shape_cast %379 : vector<16x4xf32> to vector<2x8x4xf32>
    %381 = vector.extract_strided_slice %366 {offsets = [0, 28], sizes = [16, 4], strides = [1, 1]} : vector<16x96xf32> to vector<16x4xf32>
    %382 = vector.shape_cast %381 : vector<16x4xf32> to vector<2x8x4xf32>
    %383 = tpu.concatenate %368, %370, %372, %374, %376, %378, %380, %382 in 0 : vector<2x8x4xf32>, vector<2x8x4xf32>, vector<2x8x4xf32>, vector<2x8x4xf32>, vector<2x8x4xf32>, vector<2x8x4xf32>, vector<2x8x4xf32>, vector<2x8x4xf32> -> vector<16x8x4xf32>
    %384 = vector.extract_strided_slice %366 {offsets = [0, 32], sizes = [16, 4], strides = [1, 1]} : vector<16x96xf32> to vector<16x4xf32>
    %385 = vector.shape_cast %384 : vector<16x4xf32> to vector<2x8x4xf32>
    %386 = vector.extract_strided_slice %366 {offsets = [0, 36], sizes = [16, 4], strides = [1, 1]} : vector<16x96xf32> to vector<16x4xf32>
    %387 = vector.shape_cast %386 : vector<16x4xf32> to vector<2x8x4xf32>
    %388 = vector.extract_strided_slice %366 {offsets = [0, 40], sizes = [16, 4], strides = [1, 1]} : vector<16x96xf32> to vector<16x4xf32>
    %389 = vector.shape_cast %388 : vector<16x4xf32> to vector<2x8x4xf32>
    %390 = vector.extract_strided_slice %366 {offsets = [0, 44], sizes = [16, 4], strides = [1, 1]} : vector<16x96xf32> to vector<16x4xf32>
    %391 = vector.shape_cast %390 : vector<16x4xf32> to vector<2x8x4xf32>
    %392 = vector.extract_strided_slice %366 {offsets = [0, 48], sizes = [16, 4], strides = [1, 1]} : vector<16x96xf32> to vector<16x4xf32>
    %393 = vector.shape_cast %392 : vector<16x4xf32> to vector<2x8x4xf32>
    %394 = vector.extract_strided_slice %366 {offsets = [0, 52], sizes = [16, 4], strides = [1, 1]} : vector<16x96xf32> to vector<16x4xf32>
    %395 = vector.shape_cast %394 : vector<16x4xf32> to vector<2x8x4xf32>
    %396 = vector.extract_strided_slice %366 {offsets = [0, 56], sizes = [16, 4], strides = [1, 1]} : vector<16x96xf32> to vector<16x4xf32>
    %397 = vector.shape_cast %396 : vector<16x4xf32> to vector<2x8x4xf32>
    %398 = vector.extract_strided_slice %366 {offsets = [0, 60], sizes = [16, 4], strides = [1, 1]} : vector<16x96xf32> to vector<16x4xf32>
    %399 = vector.shape_cast %398 : vector<16x4xf32> to vector<2x8x4xf32>
    %400 = tpu.concatenate %385, %387, %389, %391, %393, %395, %397, %399 in 0 : vector<2x8x4xf32>, vector<2x8x4xf32>, vector<2x8x4xf32>, vector<2x8x4xf32>, vector<2x8x4xf32>, vector<2x8x4xf32>, vector<2x8x4xf32>, vector<2x8x4xf32> -> vector<16x8x4xf32>
    %401 = vector.extract_strided_slice %366 {offsets = [0, 64], sizes = [16, 4], strides = [1, 1]} : vector<16x96xf32> to vector<16x4xf32>
    %402 = vector.shape_cast %401 : vector<16x4xf32> to vector<2x8x4xf32>
    %403 = vector.extract_strided_slice %366 {offsets = [0, 68], sizes = [16, 4], strides = [1, 1]} : vector<16x96xf32> to vector<16x4xf32>
    %404 = vector.shape_cast %403 : vector<16x4xf32> to vector<2x8x4xf32>
    %405 = vector.extract_strided_slice %366 {offsets = [0, 72], sizes = [16, 4], strides = [1, 1]} : vector<16x96xf32> to vector<16x4xf32>
    %406 = vector.shape_cast %405 : vector<16x4xf32> to vector<2x8x4xf32>
    %407 = vector.extract_strided_slice %366 {offsets = [0, 76], sizes = [16, 4], strides = [1, 1]} : vector<16x96xf32> to vector<16x4xf32>
    %408 = vector.shape_cast %407 : vector<16x4xf32> to vector<2x8x4xf32>
    %409 = vector.extract_strided_slice %366 {offsets = [0, 80], sizes = [16, 4], strides = [1, 1]} : vector<16x96xf32> to vector<16x4xf32>
    %410 = vector.shape_cast %409 : vector<16x4xf32> to vector<2x8x4xf32>
    %411 = vector.extract_strided_slice %366 {offsets = [0, 84], sizes = [16, 4], strides = [1, 1]} : vector<16x96xf32> to vector<16x4xf32>
    %412 = vector.shape_cast %411 : vector<16x4xf32> to vector<2x8x4xf32>
    %413 = vector.extract_strided_slice %366 {offsets = [0, 88], sizes = [16, 4], strides = [1, 1]} : vector<16x96xf32> to vector<16x4xf32>
    %414 = vector.shape_cast %413 : vector<16x4xf32> to vector<2x8x4xf32>
    %415 = vector.extract_strided_slice %366 {offsets = [0, 92], sizes = [16, 4], strides = [1, 1]} : vector<16x96xf32> to vector<16x4xf32>
    %416 = vector.shape_cast %415 : vector<16x4xf32> to vector<2x8x4xf32>
    %417 = tpu.concatenate %402, %404, %406, %408, %410, %412, %414, %416 in 0 : vector<2x8x4xf32>, vector<2x8x4xf32>, vector<2x8x4xf32>, vector<2x8x4xf32>, vector<2x8x4xf32>, vector<2x8x4xf32>, vector<2x8x4xf32>, vector<2x8x4xf32> -> vector<16x8x4xf32>
    "tpu.trace_start"() <{level = 10 : i32, message = "bqd,bkd->bqk"}> : () -> ()
    %cst_64 = arith.constant dense<0.000000e+00> : vector<16x8x8xf32>
    %418 = tpu.matmul %383, %400, %cst_64 {dimension_numbers = #tpu.dot_dimension_numbers<[2], [2], [1], [1], [0, 0, 0, 1, 1, 1], [0], [0]>} : vector<16x8x4xf32>, vector<16x8x4xf32>, vector<16x8x8xf32> -> vector<16x8x8xf32>
    "tpu.trace_stop"() : () -> ()
    %cst_65 = arith.constant dense<0xFF800000> : vector<16x8xf32>
    %419 = vector.multi_reduction <maximumf>, %418, %cst_65 [2] : vector<16x8x8xf32> to vector<16x8xf32>
    %420 = vector.shape_cast %419 : vector<16x8xf32> to vector<16x8x1xf32>
    %421 = vector.broadcast %420 : vector<16x8x1xf32> to vector<16x8x8xf32>
    %422 = arith.subf %418, %421 : vector<16x8x8xf32>
    %423 = math.exp %422 : vector<16x8x8xf32>
    %cst_66 = arith.constant dense<0.000000e+00> : vector<16x8xf32>
    %424 = vector.multi_reduction <add>, %423, %cst_66 [2] : vector<16x8x8xf32> to vector<16x8xf32>
    %425 = vector.shape_cast %424 : vector<16x8xf32> to vector<16x8x1xf32>
    %426 = tpu.reciprocal %425 {approx = true} : vector<16x8x1xf32> -> vector<16x8x1xf32>
    %427 = vector.broadcast %426 : vector<16x8x1xf32> to vector<16x8x8xf32>
    %428 = arith.mulf %423, %427 : vector<16x8x8xf32>
    "tpu.trace_start"() <{level = 10 : i32, message = "bqk,bkd->bqd"}> : () -> ()
    %cst_67 = arith.constant dense<0.000000e+00> : vector<16x8x4xf32>
    %429 = tpu.matmul %428, %417, %cst_67 {dimension_numbers = #tpu.dot_dimension_numbers<[2], [1], [1], [2], [0, 0, 0, 1, 1, 2], [0], [0]>} : vector<16x8x8xf32>, vector<16x8x4xf32>, vector<16x8x4xf32> -> vector<16x8x4xf32>
    "tpu.trace_stop"() : () -> ()
    %430 = vector.shape_cast %429 : vector<16x8x4xf32> to vector<8x2x8x4xf32>
    %431 = vector.extract_strided_slice %430 {offsets = [0, 0, 0, 0], sizes = [1, 2, 8, 4], strides = [1, 1, 1, 1]} : vector<8x2x8x4xf32> to vector<1x2x8x4xf32>
    %432 = vector.shape_cast %431 : vector<1x2x8x4xf32> to vector<2x8x4xf32>
    %433 = vector.shape_cast %432 : vector<2x8x4xf32> to vector<16x4xf32>
    %434 = vector.extract_strided_slice %430 {offsets = [1, 0, 0, 0], sizes = [1, 2, 8, 4], strides = [1, 1, 1, 1]} : vector<8x2x8x4xf32> to vector<1x2x8x4xf32>
    %435 = vector.shape_cast %434 : vector<1x2x8x4xf32> to vector<2x8x4xf32>
    %436 = vector.shape_cast %435 : vector<2x8x4xf32> to vector<16x4xf32>
    %437 = vector.extract_strided_slice %430 {offsets = [2, 0, 0, 0], sizes = [1, 2, 8, 4], strides = [1, 1, 1, 1]} : vector<8x2x8x4xf32> to vector<1x2x8x4xf32>
    %438 = vector.shape_cast %437 : vector<1x2x8x4xf32> to vector<2x8x4xf32>
    %439 = vector.shape_cast %438 : vector<2x8x4xf32> to vector<16x4xf32>
    %440 = vector.extract_strided_slice %430 {offsets = [3, 0, 0, 0], sizes = [1, 2, 8, 4], strides = [1, 1, 1, 1]} : vector<8x2x8x4xf32> to vector<1x2x8x4xf32>
    %441 = vector.shape_cast %440 : vector<1x2x8x4xf32> to vector<2x8x4xf32>
    %442 = vector.shape_cast %441 : vector<2x8x4xf32> to vector<16x4xf32>
    %443 = vector.extract_strided_slice %430 {offsets = [4, 0, 0, 0], sizes = [1, 2, 8, 4], strides = [1, 1, 1, 1]} : vector<8x2x8x4xf32> to vector<1x2x8x4xf32>
    %444 = vector.shape_cast %443 : vector<1x2x8x4xf32> to vector<2x8x4xf32>
    %445 = vector.shape_cast %444 : vector<2x8x4xf32> to vector<16x4xf32>
    %446 = vector.extract_strided_slice %430 {offsets = [5, 0, 0, 0], sizes = [1, 2, 8, 4], strides = [1, 1, 1, 1]} : vector<8x2x8x4xf32> to vector<1x2x8x4xf32>
    %447 = vector.shape_cast %446 : vector<1x2x8x4xf32> to vector<2x8x4xf32>
    %448 = vector.shape_cast %447 : vector<2x8x4xf32> to vector<16x4xf32>
    %449 = vector.extract_strided_slice %430 {offsets = [6, 0, 0, 0], sizes = [1, 2, 8, 4], strides = [1, 1, 1, 1]} : vector<8x2x8x4xf32> to vector<1x2x8x4xf32>
    %450 = vector.shape_cast %449 : vector<1x2x8x4xf32> to vector<2x8x4xf32>
    %451 = vector.shape_cast %450 : vector<2x8x4xf32> to vector<16x4xf32>
    %452 = vector.extract_strided_slice %430 {offsets = [7, 0, 0, 0], sizes = [1, 2, 8, 4], strides = [1, 1, 1, 1]} : vector<8x2x8x4xf32> to vector<1x2x8x4xf32>
    %453 = vector.shape_cast %452 : vector<1x2x8x4xf32> to vector<2x8x4xf32>
    %454 = vector.shape_cast %453 : vector<2x8x4xf32> to vector<16x4xf32>
    %455 = tpu.concatenate %433, %436, %439, %442, %445, %448, %451, %454 in 1 : vector<16x4xf32>, vector<16x4xf32>, vector<16x4xf32>, vector<16x4xf32>, vector<16x4xf32>, vector<16x4xf32>, vector<16x4xf32>, vector<16x4xf32> -> vector<16x32xf32>
    %cst_68 = arith.constant dense<0.000000e+00> : vector<16x32xf32>
    %456 = tpu.matmul %455, %353, %cst_68 {dimension_numbers = #tpu.dot_dimension_numbers<[1], [0], [0], [1], [0, 0, 1, 1], [], []>} : vector<16x32xf32>, vector<32x32xf32>, vector<16x32xf32> -> vector<16x32xf32>
    %457 = vector.broadcast %357 : vector<1x32xf32> to vector<16x32xf32>
    %458 = arith.addf %456, %457 : vector<16x32xf32>
    %459 = arith.addf %347, %458 : vector<16x32xf32>
    %cst_69 = arith.constant dense<0.000000e+00> : vector<16xf32>
    %460 = vector.multi_reduction <add>, %459, %cst_69 [1] : vector<16x32xf32> to vector<16xf32>
    %461 = vector.shape_cast %460 : vector<16xf32> to vector<16x1xf32>
    %cst_70 = arith.constant 3.200000e+01 : f32
    %462 = vector.broadcast %cst_70 : f32 to vector<16x1xf32>
    %463 = arith.divf %461, %462 : vector<16x1xf32>
    %464 = arith.mulf %459, %459 : vector<16x32xf32>
    %cst_71 = arith.constant dense<0.000000e+00> : vector<16xf32>
    %465 = vector.multi_reduction <add>, %464, %cst_71 [1] : vector<16x32xf32> to vector<16xf32>
    %466 = vector.shape_cast %465 : vector<16xf32> to vector<16x1xf32>
    %cst_72 = arith.constant 3.200000e+01 : f32
    %467 = vector.broadcast %cst_72 : f32 to vector<16x1xf32>
    %468 = arith.divf %466, %467 : vector<16x1xf32>
    %469 = arith.mulf %463, %463 : vector<16x1xf32>
    %470 = arith.subf %468, %469 : vector<16x1xf32>
    %471 = vector.broadcast %463 : vector<16x1xf32> to vector<16x32xf32>
    %472 = arith.subf %459, %471 : vector<16x32xf32>
    %cst_73 = arith.constant 9.99999974E-6 : f32
    %473 = vector.broadcast %cst_73 : f32 to vector<16x1xf32>
    %474 = arith.addf %470, %473 : vector<16x1xf32>
    %475 = math.rsqrt %474 : vector<16x1xf32>
    %476 = vector.broadcast %475 : vector<16x1xf32> to vector<16x32xf32>
    %477 = arith.mulf %472, %476 : vector<16x32xf32>
    %478 = vector.broadcast %358 : vector<1x32xf32> to vector<16x32xf32>
    %479 = arith.mulf %477, %478 : vector<16x32xf32>
    %480 = vector.broadcast %359 : vector<1x32xf32> to vector<16x32xf32>
    %481 = arith.addf %479, %480 : vector<16x32xf32>
    %cst_74 = arith.constant dense<0.000000e+00> : vector<16x64xf32>
    %482 = tpu.matmul %481, %354, %cst_74 {dimension_numbers = #tpu.dot_dimension_numbers<[1], [0], [0], [1], [0, 0, 1, 1], [], []>} : vector<16x32xf32>, vector<32x64xf32>, vector<16x64xf32> -> vector<16x64xf32>
    %483 = vector.broadcast %360 : vector<1x64xf32> to vector<16x64xf32>
    %484 = arith.addf %482, %483 : vector<16x64xf32>
    %cst_75 = arith.constant 0.000000e+00 : f32
    %485 = vector.broadcast %cst_75 : f32 to vector<16x64xf32>
    %486 = arith.maximumf %484, %485 : vector<16x64xf32>
    %cst_76 = arith.constant dense<0.000000e+00> : vector<16x32xf32>
    %487 = tpu.matmul %486, %355, %cst_76 {dimension_numbers = #tpu.dot_dimension_numbers<[1], [0], [0], [1], [0, 0, 1, 1], [], []>} : vector<16x64xf32>, vector<64x32xf32>, vector<16x32xf32> -> vector<16x32xf32>
    %488 = vector.broadcast %361 : vector<1x32xf32> to vector<16x32xf32>
    %489 = arith.addf %487, %488 : vector<16x32xf32>
    %490 = arith.addf %481, %489 : vector<16x32xf32>
    %cst_77 = arith.constant dense<0.000000e+00> : vector<16xf32>
    %491 = vector.multi_reduction <add>, %490, %cst_77 [1] : vector<16x32xf32> to vector<16xf32>
    %492 = vector.shape_cast %491 : vector<16xf32> to vector<16x1xf32>
    %cst_78 = arith.constant 3.200000e+01 : f32
    %493 = vector.broadcast %cst_78 : f32 to vector<16x1xf32>
    %494 = arith.divf %492, %493 : vector<16x1xf32>
    %495 = arith.mulf %490, %490 : vector<16x32xf32>
    %cst_79 = arith.constant dense<0.000000e+00> : vector<16xf32>
    %496 = vector.multi_reduction <add>, %495, %cst_79 [1] : vector<16x32xf32> to vector<16xf32>
    %497 = vector.shape_cast %496 : vector<16xf32> to vector<16x1xf32>
    %cst_80 = arith.constant 3.200000e+01 : f32
    %498 = vector.broadcast %cst_80 : f32 to vector<16x1xf32>
    %499 = arith.divf %497, %498 : vector<16x1xf32>
    %500 = arith.mulf %494, %494 : vector<16x1xf32>
    %501 = arith.subf %499, %500 : vector<16x1xf32>
    %502 = vector.broadcast %494 : vector<16x1xf32> to vector<16x32xf32>
    %503 = arith.subf %490, %502 : vector<16x32xf32>
    %cst_81 = arith.constant 9.99999974E-6 : f32
    %504 = vector.broadcast %cst_81 : f32 to vector<16x1xf32>
    %505 = arith.addf %501, %504 : vector<16x1xf32>
    %506 = math.rsqrt %505 : vector<16x1xf32>
    %507 = vector.broadcast %506 : vector<16x1xf32> to vector<16x32xf32>
    %508 = arith.mulf %503, %507 : vector<16x32xf32>
    %509 = vector.broadcast %362 : vector<1x32xf32> to vector<16x32xf32>
    %510 = arith.mulf %508, %509 : vector<16x32xf32>
    %511 = vector.broadcast %363 : vector<1x32xf32> to vector<16x32xf32>
    %512 = arith.addf %510, %511 : vector<16x32xf32>
    %c3 = arith.constant 3 : index
    %c0_82 = arith.constant 0 : index
    %c0_83 = arith.constant 0 : index
    %513 = vector.load %arg2[%c3, %c0_82, %c0_83] : memref<6x160x96xf32, #tpu.memory_space<vmem>>, vector<1x160x96xf32>
    %514 = vector.shape_cast %513 : vector<1x160x96xf32> to vector<160x96xf32>
    %c3_84 = arith.constant 3 : index
    %c0_85 = arith.constant 0 : index
    %c0_86 = arith.constant 0 : index
    %515 = vector.load %arg3[%c3_84, %c0_85, %c0_86] : memref<6x8x96xf32, #tpu.memory_space<vmem>>, vector<1x8x96xf32>
    %516 = vector.shape_cast %515 : vector<1x8x96xf32> to vector<8x96xf32>
    %517 = vector.extract_strided_slice %514 {offsets = [0, 0], sizes = [32, 96], strides = [1, 1]} : vector<160x96xf32> to vector<32x96xf32>
    %518 = vector.extract_strided_slice %514 {offsets = [32, 0], sizes = [32, 32], strides = [1, 1]} : vector<160x96xf32> to vector<32x32xf32>
    %519 = vector.extract_strided_slice %514 {offsets = [64, 0], sizes = [32, 64], strides = [1, 1]} : vector<160x96xf32> to vector<32x64xf32>
    %520 = vector.extract_strided_slice %514 {offsets = [96, 0], sizes = [64, 32], strides = [1, 1]} : vector<160x96xf32> to vector<64x32xf32>
    %521 = vector.extract_strided_slice %516 {offsets = [0, 0], sizes = [1, 96], strides = [1, 1]} : vector<8x96xf32> to vector<1x96xf32>
    %522 = vector.extract_strided_slice %516 {offsets = [1, 0], sizes = [1, 32], strides = [1, 1]} : vector<8x96xf32> to vector<1x32xf32>
    %523 = vector.extract_strided_slice %516 {offsets = [2, 0], sizes = [1, 32], strides = [1, 1]} : vector<8x96xf32> to vector<1x32xf32>
    %524 = vector.extract_strided_slice %516 {offsets = [3, 0], sizes = [1, 32], strides = [1, 1]} : vector<8x96xf32> to vector<1x32xf32>
    %525 = vector.extract_strided_slice %516 {offsets = [4, 0], sizes = [1, 64], strides = [1, 1]} : vector<8x96xf32> to vector<1x64xf32>
    %526 = vector.extract_strided_slice %516 {offsets = [5, 0], sizes = [1, 32], strides = [1, 1]} : vector<8x96xf32> to vector<1x32xf32>
    %527 = vector.extract_strided_slice %516 {offsets = [6, 0], sizes = [1, 32], strides = [1, 1]} : vector<8x96xf32> to vector<1x32xf32>
    %528 = vector.extract_strided_slice %516 {offsets = [7, 0], sizes = [1, 32], strides = [1, 1]} : vector<8x96xf32> to vector<1x32xf32>
    %cst_87 = arith.constant dense<0.000000e+00> : vector<16x96xf32>
    %529 = tpu.matmul %512, %517, %cst_87 {dimension_numbers = #tpu.dot_dimension_numbers<[1], [0], [0], [1], [0, 0, 1, 1], [], []>} : vector<16x32xf32>, vector<32x96xf32>, vector<16x96xf32> -> vector<16x96xf32>
    %530 = vector.broadcast %521 : vector<1x96xf32> to vector<16x96xf32>
    %531 = arith.addf %529, %530 : vector<16x96xf32>
    %532 = vector.extract_strided_slice %531 {offsets = [0, 0], sizes = [16, 4], strides = [1, 1]} : vector<16x96xf32> to vector<16x4xf32>
    %533 = vector.shape_cast %532 : vector<16x4xf32> to vector<2x8x4xf32>
    %534 = vector.extract_strided_slice %531 {offsets = [0, 4], sizes = [16, 4], strides = [1, 1]} : vector<16x96xf32> to vector<16x4xf32>
    %535 = vector.shape_cast %534 : vector<16x4xf32> to vector<2x8x4xf32>
    %536 = vector.extract_strided_slice %531 {offsets = [0, 8], sizes = [16, 4], strides = [1, 1]} : vector<16x96xf32> to vector<16x4xf32>
    %537 = vector.shape_cast %536 : vector<16x4xf32> to vector<2x8x4xf32>
    %538 = vector.extract_strided_slice %531 {offsets = [0, 12], sizes = [16, 4], strides = [1, 1]} : vector<16x96xf32> to vector<16x4xf32>
    %539 = vector.shape_cast %538 : vector<16x4xf32> to vector<2x8x4xf32>
    %540 = vector.extract_strided_slice %531 {offsets = [0, 16], sizes = [16, 4], strides = [1, 1]} : vector<16x96xf32> to vector<16x4xf32>
    %541 = vector.shape_cast %540 : vector<16x4xf32> to vector<2x8x4xf32>
    %542 = vector.extract_strided_slice %531 {offsets = [0, 20], sizes = [16, 4], strides = [1, 1]} : vector<16x96xf32> to vector<16x4xf32>
    %543 = vector.shape_cast %542 : vector<16x4xf32> to vector<2x8x4xf32>
    %544 = vector.extract_strided_slice %531 {offsets = [0, 24], sizes = [16, 4], strides = [1, 1]} : vector<16x96xf32> to vector<16x4xf32>
    %545 = vector.shape_cast %544 : vector<16x4xf32> to vector<2x8x4xf32>
    %546 = vector.extract_strided_slice %531 {offsets = [0, 28], sizes = [16, 4], strides = [1, 1]} : vector<16x96xf32> to vector<16x4xf32>
    %547 = vector.shape_cast %546 : vector<16x4xf32> to vector<2x8x4xf32>
    %548 = tpu.concatenate %533, %535, %537, %539, %541, %543, %545, %547 in 0 : vector<2x8x4xf32>, vector<2x8x4xf32>, vector<2x8x4xf32>, vector<2x8x4xf32>, vector<2x8x4xf32>, vector<2x8x4xf32>, vector<2x8x4xf32>, vector<2x8x4xf32> -> vector<16x8x4xf32>
    %549 = vector.extract_strided_slice %531 {offsets = [0, 32], sizes = [16, 4], strides = [1, 1]} : vector<16x96xf32> to vector<16x4xf32>
    %550 = vector.shape_cast %549 : vector<16x4xf32> to vector<2x8x4xf32>
    %551 = vector.extract_strided_slice %531 {offsets = [0, 36], sizes = [16, 4], strides = [1, 1]} : vector<16x96xf32> to vector<16x4xf32>
    %552 = vector.shape_cast %551 : vector<16x4xf32> to vector<2x8x4xf32>
    %553 = vector.extract_strided_slice %531 {offsets = [0, 40], sizes = [16, 4], strides = [1, 1]} : vector<16x96xf32> to vector<16x4xf32>
    %554 = vector.shape_cast %553 : vector<16x4xf32> to vector<2x8x4xf32>
    %555 = vector.extract_strided_slice %531 {offsets = [0, 44], sizes = [16, 4], strides = [1, 1]} : vector<16x96xf32> to vector<16x4xf32>
    %556 = vector.shape_cast %555 : vector<16x4xf32> to vector<2x8x4xf32>
    %557 = vector.extract_strided_slice %531 {offsets = [0, 48], sizes = [16, 4], strides = [1, 1]} : vector<16x96xf32> to vector<16x4xf32>
    %558 = vector.shape_cast %557 : vector<16x4xf32> to vector<2x8x4xf32>
    %559 = vector.extract_strided_slice %531 {offsets = [0, 52], sizes = [16, 4], strides = [1, 1]} : vector<16x96xf32> to vector<16x4xf32>
    %560 = vector.shape_cast %559 : vector<16x4xf32> to vector<2x8x4xf32>
    %561 = vector.extract_strided_slice %531 {offsets = [0, 56], sizes = [16, 4], strides = [1, 1]} : vector<16x96xf32> to vector<16x4xf32>
    %562 = vector.shape_cast %561 : vector<16x4xf32> to vector<2x8x4xf32>
    %563 = vector.extract_strided_slice %531 {offsets = [0, 60], sizes = [16, 4], strides = [1, 1]} : vector<16x96xf32> to vector<16x4xf32>
    %564 = vector.shape_cast %563 : vector<16x4xf32> to vector<2x8x4xf32>
    %565 = tpu.concatenate %550, %552, %554, %556, %558, %560, %562, %564 in 0 : vector<2x8x4xf32>, vector<2x8x4xf32>, vector<2x8x4xf32>, vector<2x8x4xf32>, vector<2x8x4xf32>, vector<2x8x4xf32>, vector<2x8x4xf32>, vector<2x8x4xf32> -> vector<16x8x4xf32>
    %566 = vector.extract_strided_slice %531 {offsets = [0, 64], sizes = [16, 4], strides = [1, 1]} : vector<16x96xf32> to vector<16x4xf32>
    %567 = vector.shape_cast %566 : vector<16x4xf32> to vector<2x8x4xf32>
    %568 = vector.extract_strided_slice %531 {offsets = [0, 68], sizes = [16, 4], strides = [1, 1]} : vector<16x96xf32> to vector<16x4xf32>
    %569 = vector.shape_cast %568 : vector<16x4xf32> to vector<2x8x4xf32>
    %570 = vector.extract_strided_slice %531 {offsets = [0, 72], sizes = [16, 4], strides = [1, 1]} : vector<16x96xf32> to vector<16x4xf32>
    %571 = vector.shape_cast %570 : vector<16x4xf32> to vector<2x8x4xf32>
    %572 = vector.extract_strided_slice %531 {offsets = [0, 76], sizes = [16, 4], strides = [1, 1]} : vector<16x96xf32> to vector<16x4xf32>
    %573 = vector.shape_cast %572 : vector<16x4xf32> to vector<2x8x4xf32>
    %574 = vector.extract_strided_slice %531 {offsets = [0, 80], sizes = [16, 4], strides = [1, 1]} : vector<16x96xf32> to vector<16x4xf32>
    %575 = vector.shape_cast %574 : vector<16x4xf32> to vector<2x8x4xf32>
    %576 = vector.extract_strided_slice %531 {offsets = [0, 84], sizes = [16, 4], strides = [1, 1]} : vector<16x96xf32> to vector<16x4xf32>
    %577 = vector.shape_cast %576 : vector<16x4xf32> to vector<2x8x4xf32>
    %578 = vector.extract_strided_slice %531 {offsets = [0, 88], sizes = [16, 4], strides = [1, 1]} : vector<16x96xf32> to vector<16x4xf32>
    %579 = vector.shape_cast %578 : vector<16x4xf32> to vector<2x8x4xf32>
    %580 = vector.extract_strided_slice %531 {offsets = [0, 92], sizes = [16, 4], strides = [1, 1]} : vector<16x96xf32> to vector<16x4xf32>
    %581 = vector.shape_cast %580 : vector<16x4xf32> to vector<2x8x4xf32>
    %582 = tpu.concatenate %567, %569, %571, %573, %575, %577, %579, %581 in 0 : vector<2x8x4xf32>, vector<2x8x4xf32>, vector<2x8x4xf32>, vector<2x8x4xf32>, vector<2x8x4xf32>, vector<2x8x4xf32>, vector<2x8x4xf32>, vector<2x8x4xf32> -> vector<16x8x4xf32>
    "tpu.trace_start"() <{level = 10 : i32, message = "bqd,bkd->bqk"}> : () -> ()
    %cst_88 = arith.constant dense<0.000000e+00> : vector<16x8x8xf32>
    %583 = tpu.matmul %548, %565, %cst_88 {dimension_numbers = #tpu.dot_dimension_numbers<[2], [2], [1], [1], [0, 0, 0, 1, 1, 1], [0], [0]>} : vector<16x8x4xf32>, vector<16x8x4xf32>, vector<16x8x8xf32> -> vector<16x8x8xf32>
    "tpu.trace_stop"() : () -> ()
    %cst_89 = arith.constant dense<0xFF800000> : vector<16x8xf32>
    %584 = vector.multi_reduction <maximumf>, %583, %cst_89 [2] : vector<16x8x8xf32> to vector<16x8xf32>
    %585 = vector.shape_cast %584 : vector<16x8xf32> to vector<16x8x1xf32>
    %586 = vector.broadcast %585 : vector<16x8x1xf32> to vector<16x8x8xf32>
    %587 = arith.subf %583, %586 : vector<16x8x8xf32>
    %588 = math.exp %587 : vector<16x8x8xf32>
    %cst_90 = arith.constant dense<0.000000e+00> : vector<16x8xf32>
    %589 = vector.multi_reduction <add>, %588, %cst_90 [2] : vector<16x8x8xf32> to vector<16x8xf32>
    %590 = vector.shape_cast %589 : vector<16x8xf32> to vector<16x8x1xf32>
    %591 = tpu.reciprocal %590 {approx = true} : vector<16x8x1xf32> -> vector<16x8x1xf32>
    %592 = vector.broadcast %591 : vector<16x8x1xf32> to vector<16x8x8xf32>
    %593 = arith.mulf %588, %592 : vector<16x8x8xf32>
    "tpu.trace_start"() <{level = 10 : i32, message = "bqk,bkd->bqd"}> : () -> ()
    %cst_91 = arith.constant dense<0.000000e+00> : vector<16x8x4xf32>
    %594 = tpu.matmul %593, %582, %cst_91 {dimension_numbers = #tpu.dot_dimension_numbers<[2], [1], [1], [2], [0, 0, 0, 1, 1, 2], [0], [0]>} : vector<16x8x8xf32>, vector<16x8x4xf32>, vector<16x8x4xf32> -> vector<16x8x4xf32>
    "tpu.trace_stop"() : () -> ()
    %595 = vector.shape_cast %594 : vector<16x8x4xf32> to vector<8x2x8x4xf32>
    %596 = vector.extract_strided_slice %595 {offsets = [0, 0, 0, 0], sizes = [1, 2, 8, 4], strides = [1, 1, 1, 1]} : vector<8x2x8x4xf32> to vector<1x2x8x4xf32>
    %597 = vector.shape_cast %596 : vector<1x2x8x4xf32> to vector<2x8x4xf32>
    %598 = vector.shape_cast %597 : vector<2x8x4xf32> to vector<16x4xf32>
    %599 = vector.extract_strided_slice %595 {offsets = [1, 0, 0, 0], sizes = [1, 2, 8, 4], strides = [1, 1, 1, 1]} : vector<8x2x8x4xf32> to vector<1x2x8x4xf32>
    %600 = vector.shape_cast %599 : vector<1x2x8x4xf32> to vector<2x8x4xf32>
    %601 = vector.shape_cast %600 : vector<2x8x4xf32> to vector<16x4xf32>
    %602 = vector.extract_strided_slice %595 {offsets = [2, 0, 0, 0], sizes = [1, 2, 8, 4], strides = [1, 1, 1, 1]} : vector<8x2x8x4xf32> to vector<1x2x8x4xf32>
    %603 = vector.shape_cast %602 : vector<1x2x8x4xf32> to vector<2x8x4xf32>
    %604 = vector.shape_cast %603 : vector<2x8x4xf32> to vector<16x4xf32>
    %605 = vector.extract_strided_slice %595 {offsets = [3, 0, 0, 0], sizes = [1, 2, 8, 4], strides = [1, 1, 1, 1]} : vector<8x2x8x4xf32> to vector<1x2x8x4xf32>
    %606 = vector.shape_cast %605 : vector<1x2x8x4xf32> to vector<2x8x4xf32>
    %607 = vector.shape_cast %606 : vector<2x8x4xf32> to vector<16x4xf32>
    %608 = vector.extract_strided_slice %595 {offsets = [4, 0, 0, 0], sizes = [1, 2, 8, 4], strides = [1, 1, 1, 1]} : vector<8x2x8x4xf32> to vector<1x2x8x4xf32>
    %609 = vector.shape_cast %608 : vector<1x2x8x4xf32> to vector<2x8x4xf32>
    %610 = vector.shape_cast %609 : vector<2x8x4xf32> to vector<16x4xf32>
    %611 = vector.extract_strided_slice %595 {offsets = [5, 0, 0, 0], sizes = [1, 2, 8, 4], strides = [1, 1, 1, 1]} : vector<8x2x8x4xf32> to vector<1x2x8x4xf32>
    %612 = vector.shape_cast %611 : vector<1x2x8x4xf32> to vector<2x8x4xf32>
    %613 = vector.shape_cast %612 : vector<2x8x4xf32> to vector<16x4xf32>
    %614 = vector.extract_strided_slice %595 {offsets = [6, 0, 0, 0], sizes = [1, 2, 8, 4], strides = [1, 1, 1, 1]} : vector<8x2x8x4xf32> to vector<1x2x8x4xf32>
    %615 = vector.shape_cast %614 : vector<1x2x8x4xf32> to vector<2x8x4xf32>
    %616 = vector.shape_cast %615 : vector<2x8x4xf32> to vector<16x4xf32>
    %617 = vector.extract_strided_slice %595 {offsets = [7, 0, 0, 0], sizes = [1, 2, 8, 4], strides = [1, 1, 1, 1]} : vector<8x2x8x4xf32> to vector<1x2x8x4xf32>
    %618 = vector.shape_cast %617 : vector<1x2x8x4xf32> to vector<2x8x4xf32>
    %619 = vector.shape_cast %618 : vector<2x8x4xf32> to vector<16x4xf32>
    %620 = tpu.concatenate %598, %601, %604, %607, %610, %613, %616, %619 in 1 : vector<16x4xf32>, vector<16x4xf32>, vector<16x4xf32>, vector<16x4xf32>, vector<16x4xf32>, vector<16x4xf32>, vector<16x4xf32>, vector<16x4xf32> -> vector<16x32xf32>
    %cst_92 = arith.constant dense<0.000000e+00> : vector<16x32xf32>
    %621 = tpu.matmul %620, %518, %cst_92 {dimension_numbers = #tpu.dot_dimension_numbers<[1], [0], [0], [1], [0, 0, 1, 1], [], []>} : vector<16x32xf32>, vector<32x32xf32>, vector<16x32xf32> -> vector<16x32xf32>
    %622 = vector.broadcast %522 : vector<1x32xf32> to vector<16x32xf32>
    %623 = arith.addf %621, %622 : vector<16x32xf32>
    %624 = arith.addf %512, %623 : vector<16x32xf32>
    %cst_93 = arith.constant dense<0.000000e+00> : vector<16xf32>
    %625 = vector.multi_reduction <add>, %624, %cst_93 [1] : vector<16x32xf32> to vector<16xf32>
    %626 = vector.shape_cast %625 : vector<16xf32> to vector<16x1xf32>
    %cst_94 = arith.constant 3.200000e+01 : f32
    %627 = vector.broadcast %cst_94 : f32 to vector<16x1xf32>
    %628 = arith.divf %626, %627 : vector<16x1xf32>
    %629 = arith.mulf %624, %624 : vector<16x32xf32>
    %cst_95 = arith.constant dense<0.000000e+00> : vector<16xf32>
    %630 = vector.multi_reduction <add>, %629, %cst_95 [1] : vector<16x32xf32> to vector<16xf32>
    %631 = vector.shape_cast %630 : vector<16xf32> to vector<16x1xf32>
    %cst_96 = arith.constant 3.200000e+01 : f32
    %632 = vector.broadcast %cst_96 : f32 to vector<16x1xf32>
    %633 = arith.divf %631, %632 : vector<16x1xf32>
    %634 = arith.mulf %628, %628 : vector<16x1xf32>
    %635 = arith.subf %633, %634 : vector<16x1xf32>
    %636 = vector.broadcast %628 : vector<16x1xf32> to vector<16x32xf32>
    %637 = arith.subf %624, %636 : vector<16x32xf32>
    %cst_97 = arith.constant 9.99999974E-6 : f32
    %638 = vector.broadcast %cst_97 : f32 to vector<16x1xf32>
    %639 = arith.addf %635, %638 : vector<16x1xf32>
    %640 = math.rsqrt %639 : vector<16x1xf32>
    %641 = vector.broadcast %640 : vector<16x1xf32> to vector<16x32xf32>
    %642 = arith.mulf %637, %641 : vector<16x32xf32>
    %643 = vector.broadcast %523 : vector<1x32xf32> to vector<16x32xf32>
    %644 = arith.mulf %642, %643 : vector<16x32xf32>
    %645 = vector.broadcast %524 : vector<1x32xf32> to vector<16x32xf32>
    %646 = arith.addf %644, %645 : vector<16x32xf32>
    %cst_98 = arith.constant dense<0.000000e+00> : vector<16x64xf32>
    %647 = tpu.matmul %646, %519, %cst_98 {dimension_numbers = #tpu.dot_dimension_numbers<[1], [0], [0], [1], [0, 0, 1, 1], [], []>} : vector<16x32xf32>, vector<32x64xf32>, vector<16x64xf32> -> vector<16x64xf32>
    %648 = vector.broadcast %525 : vector<1x64xf32> to vector<16x64xf32>
    %649 = arith.addf %647, %648 : vector<16x64xf32>
    %cst_99 = arith.constant 0.000000e+00 : f32
    %650 = vector.broadcast %cst_99 : f32 to vector<16x64xf32>
    %651 = arith.maximumf %649, %650 : vector<16x64xf32>
    %cst_100 = arith.constant dense<0.000000e+00> : vector<16x32xf32>
    %652 = tpu.matmul %651, %520, %cst_100 {dimension_numbers = #tpu.dot_dimension_numbers<[1], [0], [0], [1], [0, 0, 1, 1], [], []>} : vector<16x64xf32>, vector<64x32xf32>, vector<16x32xf32> -> vector<16x32xf32>
    %653 = vector.broadcast %526 : vector<1x32xf32> to vector<16x32xf32>
    %654 = arith.addf %652, %653 : vector<16x32xf32>
    %655 = arith.addf %646, %654 : vector<16x32xf32>
    %cst_101 = arith.constant dense<0.000000e+00> : vector<16xf32>
    %656 = vector.multi_reduction <add>, %655, %cst_101 [1] : vector<16x32xf32> to vector<16xf32>
    %657 = vector.shape_cast %656 : vector<16xf32> to vector<16x1xf32>
    %cst_102 = arith.constant 3.200000e+01 : f32
    %658 = vector.broadcast %cst_102 : f32 to vector<16x1xf32>
    %659 = arith.divf %657, %658 : vector<16x1xf32>
    %660 = arith.mulf %655, %655 : vector<16x32xf32>
    %cst_103 = arith.constant dense<0.000000e+00> : vector<16xf32>
    %661 = vector.multi_reduction <add>, %660, %cst_103 [1] : vector<16x32xf32> to vector<16xf32>
    %662 = vector.shape_cast %661 : vector<16xf32> to vector<16x1xf32>
    %cst_104 = arith.constant 3.200000e+01 : f32
    %663 = vector.broadcast %cst_104 : f32 to vector<16x1xf32>
    %664 = arith.divf %662, %663 : vector<16x1xf32>
    %665 = arith.mulf %659, %659 : vector<16x1xf32>
    %666 = arith.subf %664, %665 : vector<16x1xf32>
    %667 = vector.broadcast %659 : vector<16x1xf32> to vector<16x32xf32>
    %668 = arith.subf %655, %667 : vector<16x32xf32>
    %cst_105 = arith.constant 9.99999974E-6 : f32
    %669 = vector.broadcast %cst_105 : f32 to vector<16x1xf32>
    %670 = arith.addf %666, %669 : vector<16x1xf32>
    %671 = math.rsqrt %670 : vector<16x1xf32>
    %672 = vector.broadcast %671 : vector<16x1xf32> to vector<16x32xf32>
    %673 = arith.mulf %668, %672 : vector<16x32xf32>
    %674 = vector.broadcast %527 : vector<1x32xf32> to vector<16x32xf32>
    %675 = arith.mulf %673, %674 : vector<16x32xf32>
    %676 = vector.broadcast %528 : vector<1x32xf32> to vector<16x32xf32>
    %677 = arith.addf %675, %676 : vector<16x32xf32>
    %c4 = arith.constant 4 : index
    %c0_106 = arith.constant 0 : index
    %c0_107 = arith.constant 0 : index
    %678 = vector.load %arg2[%c4, %c0_106, %c0_107] : memref<6x160x96xf32, #tpu.memory_space<vmem>>, vector<1x160x96xf32>
    %679 = vector.shape_cast %678 : vector<1x160x96xf32> to vector<160x96xf32>
    %c4_108 = arith.constant 4 : index
    %c0_109 = arith.constant 0 : index
    %c0_110 = arith.constant 0 : index
    %680 = vector.load %arg3[%c4_108, %c0_109, %c0_110] : memref<6x8x96xf32, #tpu.memory_space<vmem>>, vector<1x8x96xf32>
    %681 = vector.shape_cast %680 : vector<1x8x96xf32> to vector<8x96xf32>
    %682 = vector.extract_strided_slice %679 {offsets = [0, 0], sizes = [32, 96], strides = [1, 1]} : vector<160x96xf32> to vector<32x96xf32>
    %683 = vector.extract_strided_slice %679 {offsets = [32, 0], sizes = [32, 32], strides = [1, 1]} : vector<160x96xf32> to vector<32x32xf32>
    %684 = vector.extract_strided_slice %679 {offsets = [64, 0], sizes = [32, 64], strides = [1, 1]} : vector<160x96xf32> to vector<32x64xf32>
    %685 = vector.extract_strided_slice %679 {offsets = [96, 0], sizes = [64, 32], strides = [1, 1]} : vector<160x96xf32> to vector<64x32xf32>
    %686 = vector.extract_strided_slice %681 {offsets = [0, 0], sizes = [1, 96], strides = [1, 1]} : vector<8x96xf32> to vector<1x96xf32>
    %687 = vector.extract_strided_slice %681 {offsets = [1, 0], sizes = [1, 32], strides = [1, 1]} : vector<8x96xf32> to vector<1x32xf32>
    %688 = vector.extract_strided_slice %681 {offsets = [2, 0], sizes = [1, 32], strides = [1, 1]} : vector<8x96xf32> to vector<1x32xf32>
    %689 = vector.extract_strided_slice %681 {offsets = [3, 0], sizes = [1, 32], strides = [1, 1]} : vector<8x96xf32> to vector<1x32xf32>
    %690 = vector.extract_strided_slice %681 {offsets = [4, 0], sizes = [1, 64], strides = [1, 1]} : vector<8x96xf32> to vector<1x64xf32>
    %691 = vector.extract_strided_slice %681 {offsets = [5, 0], sizes = [1, 32], strides = [1, 1]} : vector<8x96xf32> to vector<1x32xf32>
    %692 = vector.extract_strided_slice %681 {offsets = [6, 0], sizes = [1, 32], strides = [1, 1]} : vector<8x96xf32> to vector<1x32xf32>
    %693 = vector.extract_strided_slice %681 {offsets = [7, 0], sizes = [1, 32], strides = [1, 1]} : vector<8x96xf32> to vector<1x32xf32>
    %cst_111 = arith.constant dense<0.000000e+00> : vector<16x96xf32>
    %694 = tpu.matmul %677, %682, %cst_111 {dimension_numbers = #tpu.dot_dimension_numbers<[1], [0], [0], [1], [0, 0, 1, 1], [], []>} : vector<16x32xf32>, vector<32x96xf32>, vector<16x96xf32> -> vector<16x96xf32>
    %695 = vector.broadcast %686 : vector<1x96xf32> to vector<16x96xf32>
    %696 = arith.addf %694, %695 : vector<16x96xf32>
    %697 = vector.extract_strided_slice %696 {offsets = [0, 0], sizes = [16, 4], strides = [1, 1]} : vector<16x96xf32> to vector<16x4xf32>
    %698 = vector.shape_cast %697 : vector<16x4xf32> to vector<2x8x4xf32>
    %699 = vector.extract_strided_slice %696 {offsets = [0, 4], sizes = [16, 4], strides = [1, 1]} : vector<16x96xf32> to vector<16x4xf32>
    %700 = vector.shape_cast %699 : vector<16x4xf32> to vector<2x8x4xf32>
    %701 = vector.extract_strided_slice %696 {offsets = [0, 8], sizes = [16, 4], strides = [1, 1]} : vector<16x96xf32> to vector<16x4xf32>
    %702 = vector.shape_cast %701 : vector<16x4xf32> to vector<2x8x4xf32>
    %703 = vector.extract_strided_slice %696 {offsets = [0, 12], sizes = [16, 4], strides = [1, 1]} : vector<16x96xf32> to vector<16x4xf32>
    %704 = vector.shape_cast %703 : vector<16x4xf32> to vector<2x8x4xf32>
    %705 = vector.extract_strided_slice %696 {offsets = [0, 16], sizes = [16, 4], strides = [1, 1]} : vector<16x96xf32> to vector<16x4xf32>
    %706 = vector.shape_cast %705 : vector<16x4xf32> to vector<2x8x4xf32>
    %707 = vector.extract_strided_slice %696 {offsets = [0, 20], sizes = [16, 4], strides = [1, 1]} : vector<16x96xf32> to vector<16x4xf32>
    %708 = vector.shape_cast %707 : vector<16x4xf32> to vector<2x8x4xf32>
    %709 = vector.extract_strided_slice %696 {offsets = [0, 24], sizes = [16, 4], strides = [1, 1]} : vector<16x96xf32> to vector<16x4xf32>
    %710 = vector.shape_cast %709 : vector<16x4xf32> to vector<2x8x4xf32>
    %711 = vector.extract_strided_slice %696 {offsets = [0, 28], sizes = [16, 4], strides = [1, 1]} : vector<16x96xf32> to vector<16x4xf32>
    %712 = vector.shape_cast %711 : vector<16x4xf32> to vector<2x8x4xf32>
    %713 = tpu.concatenate %698, %700, %702, %704, %706, %708, %710, %712 in 0 : vector<2x8x4xf32>, vector<2x8x4xf32>, vector<2x8x4xf32>, vector<2x8x4xf32>, vector<2x8x4xf32>, vector<2x8x4xf32>, vector<2x8x4xf32>, vector<2x8x4xf32> -> vector<16x8x4xf32>
    %714 = vector.extract_strided_slice %696 {offsets = [0, 32], sizes = [16, 4], strides = [1, 1]} : vector<16x96xf32> to vector<16x4xf32>
    %715 = vector.shape_cast %714 : vector<16x4xf32> to vector<2x8x4xf32>
    %716 = vector.extract_strided_slice %696 {offsets = [0, 36], sizes = [16, 4], strides = [1, 1]} : vector<16x96xf32> to vector<16x4xf32>
    %717 = vector.shape_cast %716 : vector<16x4xf32> to vector<2x8x4xf32>
    %718 = vector.extract_strided_slice %696 {offsets = [0, 40], sizes = [16, 4], strides = [1, 1]} : vector<16x96xf32> to vector<16x4xf32>
    %719 = vector.shape_cast %718 : vector<16x4xf32> to vector<2x8x4xf32>
    %720 = vector.extract_strided_slice %696 {offsets = [0, 44], sizes = [16, 4], strides = [1, 1]} : vector<16x96xf32> to vector<16x4xf32>
    %721 = vector.shape_cast %720 : vector<16x4xf32> to vector<2x8x4xf32>
    %722 = vector.extract_strided_slice %696 {offsets = [0, 48], sizes = [16, 4], strides = [1, 1]} : vector<16x96xf32> to vector<16x4xf32>
    %723 = vector.shape_cast %722 : vector<16x4xf32> to vector<2x8x4xf32>
    %724 = vector.extract_strided_slice %696 {offsets = [0, 52], sizes = [16, 4], strides = [1, 1]} : vector<16x96xf32> to vector<16x4xf32>
    %725 = vector.shape_cast %724 : vector<16x4xf32> to vector<2x8x4xf32>
    %726 = vector.extract_strided_slice %696 {offsets = [0, 56], sizes = [16, 4], strides = [1, 1]} : vector<16x96xf32> to vector<16x4xf32>
    %727 = vector.shape_cast %726 : vector<16x4xf32> to vector<2x8x4xf32>
    %728 = vector.extract_strided_slice %696 {offsets = [0, 60], sizes = [16, 4], strides = [1, 1]} : vector<16x96xf32> to vector<16x4xf32>
    %729 = vector.shape_cast %728 : vector<16x4xf32> to vector<2x8x4xf32>
    %730 = tpu.concatenate %715, %717, %719, %721, %723, %725, %727, %729 in 0 : vector<2x8x4xf32>, vector<2x8x4xf32>, vector<2x8x4xf32>, vector<2x8x4xf32>, vector<2x8x4xf32>, vector<2x8x4xf32>, vector<2x8x4xf32>, vector<2x8x4xf32> -> vector<16x8x4xf32>
    %731 = vector.extract_strided_slice %696 {offsets = [0, 64], sizes = [16, 4], strides = [1, 1]} : vector<16x96xf32> to vector<16x4xf32>
    %732 = vector.shape_cast %731 : vector<16x4xf32> to vector<2x8x4xf32>
    %733 = vector.extract_strided_slice %696 {offsets = [0, 68], sizes = [16, 4], strides = [1, 1]} : vector<16x96xf32> to vector<16x4xf32>
    %734 = vector.shape_cast %733 : vector<16x4xf32> to vector<2x8x4xf32>
    %735 = vector.extract_strided_slice %696 {offsets = [0, 72], sizes = [16, 4], strides = [1, 1]} : vector<16x96xf32> to vector<16x4xf32>
    %736 = vector.shape_cast %735 : vector<16x4xf32> to vector<2x8x4xf32>
    %737 = vector.extract_strided_slice %696 {offsets = [0, 76], sizes = [16, 4], strides = [1, 1]} : vector<16x96xf32> to vector<16x4xf32>
    %738 = vector.shape_cast %737 : vector<16x4xf32> to vector<2x8x4xf32>
    %739 = vector.extract_strided_slice %696 {offsets = [0, 80], sizes = [16, 4], strides = [1, 1]} : vector<16x96xf32> to vector<16x4xf32>
    %740 = vector.shape_cast %739 : vector<16x4xf32> to vector<2x8x4xf32>
    %741 = vector.extract_strided_slice %696 {offsets = [0, 84], sizes = [16, 4], strides = [1, 1]} : vector<16x96xf32> to vector<16x4xf32>
    %742 = vector.shape_cast %741 : vector<16x4xf32> to vector<2x8x4xf32>
    %743 = vector.extract_strided_slice %696 {offsets = [0, 88], sizes = [16, 4], strides = [1, 1]} : vector<16x96xf32> to vector<16x4xf32>
    %744 = vector.shape_cast %743 : vector<16x4xf32> to vector<2x8x4xf32>
    %745 = vector.extract_strided_slice %696 {offsets = [0, 92], sizes = [16, 4], strides = [1, 1]} : vector<16x96xf32> to vector<16x4xf32>
    %746 = vector.shape_cast %745 : vector<16x4xf32> to vector<2x8x4xf32>
    %747 = tpu.concatenate %732, %734, %736, %738, %740, %742, %744, %746 in 0 : vector<2x8x4xf32>, vector<2x8x4xf32>, vector<2x8x4xf32>, vector<2x8x4xf32>, vector<2x8x4xf32>, vector<2x8x4xf32>, vector<2x8x4xf32>, vector<2x8x4xf32> -> vector<16x8x4xf32>
    "tpu.trace_start"() <{level = 10 : i32, message = "bqd,bkd->bqk"}> : () -> ()
    %cst_112 = arith.constant dense<0.000000e+00> : vector<16x8x8xf32>
    %748 = tpu.matmul %713, %730, %cst_112 {dimension_numbers = #tpu.dot_dimension_numbers<[2], [2], [1], [1], [0, 0, 0, 1, 1, 1], [0], [0]>} : vector<16x8x4xf32>, vector<16x8x4xf32>, vector<16x8x8xf32> -> vector<16x8x8xf32>
    "tpu.trace_stop"() : () -> ()
    %cst_113 = arith.constant dense<0xFF800000> : vector<16x8xf32>
    %749 = vector.multi_reduction <maximumf>, %748, %cst_113 [2] : vector<16x8x8xf32> to vector<16x8xf32>
    %750 = vector.shape_cast %749 : vector<16x8xf32> to vector<16x8x1xf32>
    %751 = vector.broadcast %750 : vector<16x8x1xf32> to vector<16x8x8xf32>
    %752 = arith.subf %748, %751 : vector<16x8x8xf32>
    %753 = math.exp %752 : vector<16x8x8xf32>
    %cst_114 = arith.constant dense<0.000000e+00> : vector<16x8xf32>
    %754 = vector.multi_reduction <add>, %753, %cst_114 [2] : vector<16x8x8xf32> to vector<16x8xf32>
    %755 = vector.shape_cast %754 : vector<16x8xf32> to vector<16x8x1xf32>
    %756 = tpu.reciprocal %755 {approx = true} : vector<16x8x1xf32> -> vector<16x8x1xf32>
    %757 = vector.broadcast %756 : vector<16x8x1xf32> to vector<16x8x8xf32>
    %758 = arith.mulf %753, %757 : vector<16x8x8xf32>
    "tpu.trace_start"() <{level = 10 : i32, message = "bqk,bkd->bqd"}> : () -> ()
    %cst_115 = arith.constant dense<0.000000e+00> : vector<16x8x4xf32>
    %759 = tpu.matmul %758, %747, %cst_115 {dimension_numbers = #tpu.dot_dimension_numbers<[2], [1], [1], [2], [0, 0, 0, 1, 1, 2], [0], [0]>} : vector<16x8x8xf32>, vector<16x8x4xf32>, vector<16x8x4xf32> -> vector<16x8x4xf32>
    "tpu.trace_stop"() : () -> ()
    %760 = vector.shape_cast %759 : vector<16x8x4xf32> to vector<8x2x8x4xf32>
    %761 = vector.extract_strided_slice %760 {offsets = [0, 0, 0, 0], sizes = [1, 2, 8, 4], strides = [1, 1, 1, 1]} : vector<8x2x8x4xf32> to vector<1x2x8x4xf32>
    %762 = vector.shape_cast %761 : vector<1x2x8x4xf32> to vector<2x8x4xf32>
    %763 = vector.shape_cast %762 : vector<2x8x4xf32> to vector<16x4xf32>
    %764 = vector.extract_strided_slice %760 {offsets = [1, 0, 0, 0], sizes = [1, 2, 8, 4], strides = [1, 1, 1, 1]} : vector<8x2x8x4xf32> to vector<1x2x8x4xf32>
    %765 = vector.shape_cast %764 : vector<1x2x8x4xf32> to vector<2x8x4xf32>
    %766 = vector.shape_cast %765 : vector<2x8x4xf32> to vector<16x4xf32>
    %767 = vector.extract_strided_slice %760 {offsets = [2, 0, 0, 0], sizes = [1, 2, 8, 4], strides = [1, 1, 1, 1]} : vector<8x2x8x4xf32> to vector<1x2x8x4xf32>
    %768 = vector.shape_cast %767 : vector<1x2x8x4xf32> to vector<2x8x4xf32>
    %769 = vector.shape_cast %768 : vector<2x8x4xf32> to vector<16x4xf32>
    %770 = vector.extract_strided_slice %760 {offsets = [3, 0, 0, 0], sizes = [1, 2, 8, 4], strides = [1, 1, 1, 1]} : vector<8x2x8x4xf32> to vector<1x2x8x4xf32>
    %771 = vector.shape_cast %770 : vector<1x2x8x4xf32> to vector<2x8x4xf32>
    %772 = vector.shape_cast %771 : vector<2x8x4xf32> to vector<16x4xf32>
    %773 = vector.extract_strided_slice %760 {offsets = [4, 0, 0, 0], sizes = [1, 2, 8, 4], strides = [1, 1, 1, 1]} : vector<8x2x8x4xf32> to vector<1x2x8x4xf32>
    %774 = vector.shape_cast %773 : vector<1x2x8x4xf32> to vector<2x8x4xf32>
    %775 = vector.shape_cast %774 : vector<2x8x4xf32> to vector<16x4xf32>
    %776 = vector.extract_strided_slice %760 {offsets = [5, 0, 0, 0], sizes = [1, 2, 8, 4], strides = [1, 1, 1, 1]} : vector<8x2x8x4xf32> to vector<1x2x8x4xf32>
    %777 = vector.shape_cast %776 : vector<1x2x8x4xf32> to vector<2x8x4xf32>
    %778 = vector.shape_cast %777 : vector<2x8x4xf32> to vector<16x4xf32>
    %779 = vector.extract_strided_slice %760 {offsets = [6, 0, 0, 0], sizes = [1, 2, 8, 4], strides = [1, 1, 1, 1]} : vector<8x2x8x4xf32> to vector<1x2x8x4xf32>
    %780 = vector.shape_cast %779 : vector<1x2x8x4xf32> to vector<2x8x4xf32>
    %781 = vector.shape_cast %780 : vector<2x8x4xf32> to vector<16x4xf32>
    %782 = vector.extract_strided_slice %760 {offsets = [7, 0, 0, 0], sizes = [1, 2, 8, 4], strides = [1, 1, 1, 1]} : vector<8x2x8x4xf32> to vector<1x2x8x4xf32>
    %783 = vector.shape_cast %782 : vector<1x2x8x4xf32> to vector<2x8x4xf32>
    %784 = vector.shape_cast %783 : vector<2x8x4xf32> to vector<16x4xf32>
    %785 = tpu.concatenate %763, %766, %769, %772, %775, %778, %781, %784 in 1 : vector<16x4xf32>, vector<16x4xf32>, vector<16x4xf32>, vector<16x4xf32>, vector<16x4xf32>, vector<16x4xf32>, vector<16x4xf32>, vector<16x4xf32> -> vector<16x32xf32>
    %cst_116 = arith.constant dense<0.000000e+00> : vector<16x32xf32>
    %786 = tpu.matmul %785, %683, %cst_116 {dimension_numbers = #tpu.dot_dimension_numbers<[1], [0], [0], [1], [0, 0, 1, 1], [], []>} : vector<16x32xf32>, vector<32x32xf32>, vector<16x32xf32> -> vector<16x32xf32>
    %787 = vector.broadcast %687 : vector<1x32xf32> to vector<16x32xf32>
    %788 = arith.addf %786, %787 : vector<16x32xf32>
    %789 = arith.addf %677, %788 : vector<16x32xf32>
    %cst_117 = arith.constant dense<0.000000e+00> : vector<16xf32>
    %790 = vector.multi_reduction <add>, %789, %cst_117 [1] : vector<16x32xf32> to vector<16xf32>
    %791 = vector.shape_cast %790 : vector<16xf32> to vector<16x1xf32>
    %cst_118 = arith.constant 3.200000e+01 : f32
    %792 = vector.broadcast %cst_118 : f32 to vector<16x1xf32>
    %793 = arith.divf %791, %792 : vector<16x1xf32>
    %794 = arith.mulf %789, %789 : vector<16x32xf32>
    %cst_119 = arith.constant dense<0.000000e+00> : vector<16xf32>
    %795 = vector.multi_reduction <add>, %794, %cst_119 [1] : vector<16x32xf32> to vector<16xf32>
    %796 = vector.shape_cast %795 : vector<16xf32> to vector<16x1xf32>
    %cst_120 = arith.constant 3.200000e+01 : f32
    %797 = vector.broadcast %cst_120 : f32 to vector<16x1xf32>
    %798 = arith.divf %796, %797 : vector<16x1xf32>
    %799 = arith.mulf %793, %793 : vector<16x1xf32>
    %800 = arith.subf %798, %799 : vector<16x1xf32>
    %801 = vector.broadcast %793 : vector<16x1xf32> to vector<16x32xf32>
    %802 = arith.subf %789, %801 : vector<16x32xf32>
    %cst_121 = arith.constant 9.99999974E-6 : f32
    %803 = vector.broadcast %cst_121 : f32 to vector<16x1xf32>
    %804 = arith.addf %800, %803 : vector<16x1xf32>
    %805 = math.rsqrt %804 : vector<16x1xf32>
    %806 = vector.broadcast %805 : vector<16x1xf32> to vector<16x32xf32>
    %807 = arith.mulf %802, %806 : vector<16x32xf32>
    %808 = vector.broadcast %688 : vector<1x32xf32> to vector<16x32xf32>
    %809 = arith.mulf %807, %808 : vector<16x32xf32>
    %810 = vector.broadcast %689 : vector<1x32xf32> to vector<16x32xf32>
    %811 = arith.addf %809, %810 : vector<16x32xf32>
    %cst_122 = arith.constant dense<0.000000e+00> : vector<16x64xf32>
    %812 = tpu.matmul %811, %684, %cst_122 {dimension_numbers = #tpu.dot_dimension_numbers<[1], [0], [0], [1], [0, 0, 1, 1], [], []>} : vector<16x32xf32>, vector<32x64xf32>, vector<16x64xf32> -> vector<16x64xf32>
    %813 = vector.broadcast %690 : vector<1x64xf32> to vector<16x64xf32>
    %814 = arith.addf %812, %813 : vector<16x64xf32>
    %cst_123 = arith.constant 0.000000e+00 : f32
    %815 = vector.broadcast %cst_123 : f32 to vector<16x64xf32>
    %816 = arith.maximumf %814, %815 : vector<16x64xf32>
    %cst_124 = arith.constant dense<0.000000e+00> : vector<16x32xf32>
    %817 = tpu.matmul %816, %685, %cst_124 {dimension_numbers = #tpu.dot_dimension_numbers<[1], [0], [0], [1], [0, 0, 1, 1], [], []>} : vector<16x64xf32>, vector<64x32xf32>, vector<16x32xf32> -> vector<16x32xf32>
    %818 = vector.broadcast %691 : vector<1x32xf32> to vector<16x32xf32>
    %819 = arith.addf %817, %818 : vector<16x32xf32>
    %820 = arith.addf %811, %819 : vector<16x32xf32>
    %cst_125 = arith.constant dense<0.000000e+00> : vector<16xf32>
    %821 = vector.multi_reduction <add>, %820, %cst_125 [1] : vector<16x32xf32> to vector<16xf32>
    %822 = vector.shape_cast %821 : vector<16xf32> to vector<16x1xf32>
    %cst_126 = arith.constant 3.200000e+01 : f32
    %823 = vector.broadcast %cst_126 : f32 to vector<16x1xf32>
    %824 = arith.divf %822, %823 : vector<16x1xf32>
    %825 = arith.mulf %820, %820 : vector<16x32xf32>
    %cst_127 = arith.constant dense<0.000000e+00> : vector<16xf32>
    %826 = vector.multi_reduction <add>, %825, %cst_127 [1] : vector<16x32xf32> to vector<16xf32>
    %827 = vector.shape_cast %826 : vector<16xf32> to vector<16x1xf32>
    %cst_128 = arith.constant 3.200000e+01 : f32
    %828 = vector.broadcast %cst_128 : f32 to vector<16x1xf32>
    %829 = arith.divf %827, %828 : vector<16x1xf32>
    %830 = arith.mulf %824, %824 : vector<16x1xf32>
    %831 = arith.subf %829, %830 : vector<16x1xf32>
    %832 = vector.broadcast %824 : vector<16x1xf32> to vector<16x32xf32>
    %833 = arith.subf %820, %832 : vector<16x32xf32>
    %cst_129 = arith.constant 9.99999974E-6 : f32
    %834 = vector.broadcast %cst_129 : f32 to vector<16x1xf32>
    %835 = arith.addf %831, %834 : vector<16x1xf32>
    %836 = math.rsqrt %835 : vector<16x1xf32>
    %837 = vector.broadcast %836 : vector<16x1xf32> to vector<16x32xf32>
    %838 = arith.mulf %833, %837 : vector<16x32xf32>
    %839 = vector.broadcast %692 : vector<1x32xf32> to vector<16x32xf32>
    %840 = arith.mulf %838, %839 : vector<16x32xf32>
    %841 = vector.broadcast %693 : vector<1x32xf32> to vector<16x32xf32>
    %842 = arith.addf %840, %841 : vector<16x32xf32>
    %c5 = arith.constant 5 : index
    %c0_130 = arith.constant 0 : index
    %c0_131 = arith.constant 0 : index
    %843 = vector.load %arg2[%c5, %c0_130, %c0_131] : memref<6x160x96xf32, #tpu.memory_space<vmem>>, vector<1x160x96xf32>
    %844 = vector.shape_cast %843 : vector<1x160x96xf32> to vector<160x96xf32>
    %c5_132 = arith.constant 5 : index
    %c0_133 = arith.constant 0 : index
    %c0_134 = arith.constant 0 : index
    %845 = vector.load %arg3[%c5_132, %c0_133, %c0_134] : memref<6x8x96xf32, #tpu.memory_space<vmem>>, vector<1x8x96xf32>
    %846 = vector.shape_cast %845 : vector<1x8x96xf32> to vector<8x96xf32>
    %847 = vector.extract_strided_slice %844 {offsets = [0, 0], sizes = [32, 96], strides = [1, 1]} : vector<160x96xf32> to vector<32x96xf32>
    %848 = vector.extract_strided_slice %844 {offsets = [32, 0], sizes = [32, 32], strides = [1, 1]} : vector<160x96xf32> to vector<32x32xf32>
    %849 = vector.extract_strided_slice %844 {offsets = [64, 0], sizes = [32, 64], strides = [1, 1]} : vector<160x96xf32> to vector<32x64xf32>
    %850 = vector.extract_strided_slice %844 {offsets = [96, 0], sizes = [64, 32], strides = [1, 1]} : vector<160x96xf32> to vector<64x32xf32>
    %851 = vector.extract_strided_slice %846 {offsets = [0, 0], sizes = [1, 96], strides = [1, 1]} : vector<8x96xf32> to vector<1x96xf32>
    %852 = vector.extract_strided_slice %846 {offsets = [1, 0], sizes = [1, 32], strides = [1, 1]} : vector<8x96xf32> to vector<1x32xf32>
    %853 = vector.extract_strided_slice %846 {offsets = [2, 0], sizes = [1, 32], strides = [1, 1]} : vector<8x96xf32> to vector<1x32xf32>
    %854 = vector.extract_strided_slice %846 {offsets = [3, 0], sizes = [1, 32], strides = [1, 1]} : vector<8x96xf32> to vector<1x32xf32>
    %855 = vector.extract_strided_slice %846 {offsets = [4, 0], sizes = [1, 64], strides = [1, 1]} : vector<8x96xf32> to vector<1x64xf32>
    %856 = vector.extract_strided_slice %846 {offsets = [5, 0], sizes = [1, 32], strides = [1, 1]} : vector<8x96xf32> to vector<1x32xf32>
    %857 = vector.extract_strided_slice %846 {offsets = [6, 0], sizes = [1, 32], strides = [1, 1]} : vector<8x96xf32> to vector<1x32xf32>
    %858 = vector.extract_strided_slice %846 {offsets = [7, 0], sizes = [1, 32], strides = [1, 1]} : vector<8x96xf32> to vector<1x32xf32>
    %cst_135 = arith.constant dense<0.000000e+00> : vector<16x96xf32>
    %859 = tpu.matmul %842, %847, %cst_135 {dimension_numbers = #tpu.dot_dimension_numbers<[1], [0], [0], [1], [0, 0, 1, 1], [], []>} : vector<16x32xf32>, vector<32x96xf32>, vector<16x96xf32> -> vector<16x96xf32>
    %860 = vector.broadcast %851 : vector<1x96xf32> to vector<16x96xf32>
    %861 = arith.addf %859, %860 : vector<16x96xf32>
    %862 = vector.extract_strided_slice %861 {offsets = [0, 0], sizes = [16, 4], strides = [1, 1]} : vector<16x96xf32> to vector<16x4xf32>
    %863 = vector.shape_cast %862 : vector<16x4xf32> to vector<2x8x4xf32>
    %864 = vector.extract_strided_slice %861 {offsets = [0, 4], sizes = [16, 4], strides = [1, 1]} : vector<16x96xf32> to vector<16x4xf32>
    %865 = vector.shape_cast %864 : vector<16x4xf32> to vector<2x8x4xf32>
    %866 = vector.extract_strided_slice %861 {offsets = [0, 8], sizes = [16, 4], strides = [1, 1]} : vector<16x96xf32> to vector<16x4xf32>
    %867 = vector.shape_cast %866 : vector<16x4xf32> to vector<2x8x4xf32>
    %868 = vector.extract_strided_slice %861 {offsets = [0, 12], sizes = [16, 4], strides = [1, 1]} : vector<16x96xf32> to vector<16x4xf32>
    %869 = vector.shape_cast %868 : vector<16x4xf32> to vector<2x8x4xf32>
    %870 = vector.extract_strided_slice %861 {offsets = [0, 16], sizes = [16, 4], strides = [1, 1]} : vector<16x96xf32> to vector<16x4xf32>
    %871 = vector.shape_cast %870 : vector<16x4xf32> to vector<2x8x4xf32>
    %872 = vector.extract_strided_slice %861 {offsets = [0, 20], sizes = [16, 4], strides = [1, 1]} : vector<16x96xf32> to vector<16x4xf32>
    %873 = vector.shape_cast %872 : vector<16x4xf32> to vector<2x8x4xf32>
    %874 = vector.extract_strided_slice %861 {offsets = [0, 24], sizes = [16, 4], strides = [1, 1]} : vector<16x96xf32> to vector<16x4xf32>
    %875 = vector.shape_cast %874 : vector<16x4xf32> to vector<2x8x4xf32>
    %876 = vector.extract_strided_slice %861 {offsets = [0, 28], sizes = [16, 4], strides = [1, 1]} : vector<16x96xf32> to vector<16x4xf32>
    %877 = vector.shape_cast %876 : vector<16x4xf32> to vector<2x8x4xf32>
    %878 = tpu.concatenate %863, %865, %867, %869, %871, %873, %875, %877 in 0 : vector<2x8x4xf32>, vector<2x8x4xf32>, vector<2x8x4xf32>, vector<2x8x4xf32>, vector<2x8x4xf32>, vector<2x8x4xf32>, vector<2x8x4xf32>, vector<2x8x4xf32> -> vector<16x8x4xf32>
    %879 = vector.extract_strided_slice %861 {offsets = [0, 32], sizes = [16, 4], strides = [1, 1]} : vector<16x96xf32> to vector<16x4xf32>
    %880 = vector.shape_cast %879 : vector<16x4xf32> to vector<2x8x4xf32>
    %881 = vector.extract_strided_slice %861 {offsets = [0, 36], sizes = [16, 4], strides = [1, 1]} : vector<16x96xf32> to vector<16x4xf32>
    %882 = vector.shape_cast %881 : vector<16x4xf32> to vector<2x8x4xf32>
    %883 = vector.extract_strided_slice %861 {offsets = [0, 40], sizes = [16, 4], strides = [1, 1]} : vector<16x96xf32> to vector<16x4xf32>
    %884 = vector.shape_cast %883 : vector<16x4xf32> to vector<2x8x4xf32>
    %885 = vector.extract_strided_slice %861 {offsets = [0, 44], sizes = [16, 4], strides = [1, 1]} : vector<16x96xf32> to vector<16x4xf32>
    %886 = vector.shape_cast %885 : vector<16x4xf32> to vector<2x8x4xf32>
    %887 = vector.extract_strided_slice %861 {offsets = [0, 48], sizes = [16, 4], strides = [1, 1]} : vector<16x96xf32> to vector<16x4xf32>
    %888 = vector.shape_cast %887 : vector<16x4xf32> to vector<2x8x4xf32>
    %889 = vector.extract_strided_slice %861 {offsets = [0, 52], sizes = [16, 4], strides = [1, 1]} : vector<16x96xf32> to vector<16x4xf32>
    %890 = vector.shape_cast %889 : vector<16x4xf32> to vector<2x8x4xf32>
    %891 = vector.extract_strided_slice %861 {offsets = [0, 56], sizes = [16, 4], strides = [1, 1]} : vector<16x96xf32> to vector<16x4xf32>
    %892 = vector.shape_cast %891 : vector<16x4xf32> to vector<2x8x4xf32>
    %893 = vector.extract_strided_slice %861 {offsets = [0, 60], sizes = [16, 4], strides = [1, 1]} : vector<16x96xf32> to vector<16x4xf32>
    %894 = vector.shape_cast %893 : vector<16x4xf32> to vector<2x8x4xf32>
    %895 = tpu.concatenate %880, %882, %884, %886, %888, %890, %892, %894 in 0 : vector<2x8x4xf32>, vector<2x8x4xf32>, vector<2x8x4xf32>, vector<2x8x4xf32>, vector<2x8x4xf32>, vector<2x8x4xf32>, vector<2x8x4xf32>, vector<2x8x4xf32> -> vector<16x8x4xf32>
    %896 = vector.extract_strided_slice %861 {offsets = [0, 64], sizes = [16, 4], strides = [1, 1]} : vector<16x96xf32> to vector<16x4xf32>
    %897 = vector.shape_cast %896 : vector<16x4xf32> to vector<2x8x4xf32>
    %898 = vector.extract_strided_slice %861 {offsets = [0, 68], sizes = [16, 4], strides = [1, 1]} : vector<16x96xf32> to vector<16x4xf32>
    %899 = vector.shape_cast %898 : vector<16x4xf32> to vector<2x8x4xf32>
    %900 = vector.extract_strided_slice %861 {offsets = [0, 72], sizes = [16, 4], strides = [1, 1]} : vector<16x96xf32> to vector<16x4xf32>
    %901 = vector.shape_cast %900 : vector<16x4xf32> to vector<2x8x4xf32>
    %902 = vector.extract_strided_slice %861 {offsets = [0, 76], sizes = [16, 4], strides = [1, 1]} : vector<16x96xf32> to vector<16x4xf32>
    %903 = vector.shape_cast %902 : vector<16x4xf32> to vector<2x8x4xf32>
    %904 = vector.extract_strided_slice %861 {offsets = [0, 80], sizes = [16, 4], strides = [1, 1]} : vector<16x96xf32> to vector<16x4xf32>
    %905 = vector.shape_cast %904 : vector<16x4xf32> to vector<2x8x4xf32>
    %906 = vector.extract_strided_slice %861 {offsets = [0, 84], sizes = [16, 4], strides = [1, 1]} : vector<16x96xf32> to vector<16x4xf32>
    %907 = vector.shape_cast %906 : vector<16x4xf32> to vector<2x8x4xf32>
    %908 = vector.extract_strided_slice %861 {offsets = [0, 88], sizes = [16, 4], strides = [1, 1]} : vector<16x96xf32> to vector<16x4xf32>
    %909 = vector.shape_cast %908 : vector<16x4xf32> to vector<2x8x4xf32>
    %910 = vector.extract_strided_slice %861 {offsets = [0, 92], sizes = [16, 4], strides = [1, 1]} : vector<16x96xf32> to vector<16x4xf32>
    %911 = vector.shape_cast %910 : vector<16x4xf32> to vector<2x8x4xf32>
    %912 = tpu.concatenate %897, %899, %901, %903, %905, %907, %909, %911 in 0 : vector<2x8x4xf32>, vector<2x8x4xf32>, vector<2x8x4xf32>, vector<2x8x4xf32>, vector<2x8x4xf32>, vector<2x8x4xf32>, vector<2x8x4xf32>, vector<2x8x4xf32> -> vector<16x8x4xf32>
    "tpu.trace_start"() <{level = 10 : i32, message = "bqd,bkd->bqk"}> : () -> ()
    %cst_136 = arith.constant dense<0.000000e+00> : vector<16x8x8xf32>
    %913 = tpu.matmul %878, %895, %cst_136 {dimension_numbers = #tpu.dot_dimension_numbers<[2], [2], [1], [1], [0, 0, 0, 1, 1, 1], [0], [0]>} : vector<16x8x4xf32>, vector<16x8x4xf32>, vector<16x8x8xf32> -> vector<16x8x8xf32>
    "tpu.trace_stop"() : () -> ()
    %cst_137 = arith.constant dense<0xFF800000> : vector<16x8xf32>
    %914 = vector.multi_reduction <maximumf>, %913, %cst_137 [2] : vector<16x8x8xf32> to vector<16x8xf32>
    %915 = vector.shape_cast %914 : vector<16x8xf32> to vector<16x8x1xf32>
    %916 = vector.broadcast %915 : vector<16x8x1xf32> to vector<16x8x8xf32>
    %917 = arith.subf %913, %916 : vector<16x8x8xf32>
    %918 = math.exp %917 : vector<16x8x8xf32>
    %cst_138 = arith.constant dense<0.000000e+00> : vector<16x8xf32>
    %919 = vector.multi_reduction <add>, %918, %cst_138 [2] : vector<16x8x8xf32> to vector<16x8xf32>
    %920 = vector.shape_cast %919 : vector<16x8xf32> to vector<16x8x1xf32>
    %921 = tpu.reciprocal %920 {approx = true} : vector<16x8x1xf32> -> vector<16x8x1xf32>
    %922 = vector.broadcast %921 : vector<16x8x1xf32> to vector<16x8x8xf32>
    %923 = arith.mulf %918, %922 : vector<16x8x8xf32>
    "tpu.trace_start"() <{level = 10 : i32, message = "bqk,bkd->bqd"}> : () -> ()
    %cst_139 = arith.constant dense<0.000000e+00> : vector<16x8x4xf32>
    %924 = tpu.matmul %923, %912, %cst_139 {dimension_numbers = #tpu.dot_dimension_numbers<[2], [1], [1], [2], [0, 0, 0, 1, 1, 2], [0], [0]>} : vector<16x8x8xf32>, vector<16x8x4xf32>, vector<16x8x4xf32> -> vector<16x8x4xf32>
    "tpu.trace_stop"() : () -> ()
    %925 = vector.shape_cast %924 : vector<16x8x4xf32> to vector<8x2x8x4xf32>
    %926 = vector.extract_strided_slice %925 {offsets = [0, 0, 0, 0], sizes = [1, 2, 8, 4], strides = [1, 1, 1, 1]} : vector<8x2x8x4xf32> to vector<1x2x8x4xf32>
    %927 = vector.shape_cast %926 : vector<1x2x8x4xf32> to vector<2x8x4xf32>
    %928 = vector.shape_cast %927 : vector<2x8x4xf32> to vector<16x4xf32>
    %929 = vector.extract_strided_slice %925 {offsets = [1, 0, 0, 0], sizes = [1, 2, 8, 4], strides = [1, 1, 1, 1]} : vector<8x2x8x4xf32> to vector<1x2x8x4xf32>
    %930 = vector.shape_cast %929 : vector<1x2x8x4xf32> to vector<2x8x4xf32>
    %931 = vector.shape_cast %930 : vector<2x8x4xf32> to vector<16x4xf32>
    %932 = vector.extract_strided_slice %925 {offsets = [2, 0, 0, 0], sizes = [1, 2, 8, 4], strides = [1, 1, 1, 1]} : vector<8x2x8x4xf32> to vector<1x2x8x4xf32>
    %933 = vector.shape_cast %932 : vector<1x2x8x4xf32> to vector<2x8x4xf32>
    %934 = vector.shape_cast %933 : vector<2x8x4xf32> to vector<16x4xf32>
    %935 = vector.extract_strided_slice %925 {offsets = [3, 0, 0, 0], sizes = [1, 2, 8, 4], strides = [1, 1, 1, 1]} : vector<8x2x8x4xf32> to vector<1x2x8x4xf32>
    %936 = vector.shape_cast %935 : vector<1x2x8x4xf32> to vector<2x8x4xf32>
    %937 = vector.shape_cast %936 : vector<2x8x4xf32> to vector<16x4xf32>
    %938 = vector.extract_strided_slice %925 {offsets = [4, 0, 0, 0], sizes = [1, 2, 8, 4], strides = [1, 1, 1, 1]} : vector<8x2x8x4xf32> to vector<1x2x8x4xf32>
    %939 = vector.shape_cast %938 : vector<1x2x8x4xf32> to vector<2x8x4xf32>
    %940 = vector.shape_cast %939 : vector<2x8x4xf32> to vector<16x4xf32>
    %941 = vector.extract_strided_slice %925 {offsets = [5, 0, 0, 0], sizes = [1, 2, 8, 4], strides = [1, 1, 1, 1]} : vector<8x2x8x4xf32> to vector<1x2x8x4xf32>
    %942 = vector.shape_cast %941 : vector<1x2x8x4xf32> to vector<2x8x4xf32>
    %943 = vector.shape_cast %942 : vector<2x8x4xf32> to vector<16x4xf32>
    %944 = vector.extract_strided_slice %925 {offsets = [6, 0, 0, 0], sizes = [1, 2, 8, 4], strides = [1, 1, 1, 1]} : vector<8x2x8x4xf32> to vector<1x2x8x4xf32>
    %945 = vector.shape_cast %944 : vector<1x2x8x4xf32> to vector<2x8x4xf32>
    %946 = vector.shape_cast %945 : vector<2x8x4xf32> to vector<16x4xf32>
    %947 = vector.extract_strided_slice %925 {offsets = [7, 0, 0, 0], sizes = [1, 2, 8, 4], strides = [1, 1, 1, 1]} : vector<8x2x8x4xf32> to vector<1x2x8x4xf32>
    %948 = vector.shape_cast %947 : vector<1x2x8x4xf32> to vector<2x8x4xf32>
    %949 = vector.shape_cast %948 : vector<2x8x4xf32> to vector<16x4xf32>
    %950 = tpu.concatenate %928, %931, %934, %937, %940, %943, %946, %949 in 1 : vector<16x4xf32>, vector<16x4xf32>, vector<16x4xf32>, vector<16x4xf32>, vector<16x4xf32>, vector<16x4xf32>, vector<16x4xf32>, vector<16x4xf32> -> vector<16x32xf32>
    %cst_140 = arith.constant dense<0.000000e+00> : vector<16x32xf32>
    %951 = tpu.matmul %950, %848, %cst_140 {dimension_numbers = #tpu.dot_dimension_numbers<[1], [0], [0], [1], [0, 0, 1, 1], [], []>} : vector<16x32xf32>, vector<32x32xf32>, vector<16x32xf32> -> vector<16x32xf32>
    %952 = vector.broadcast %852 : vector<1x32xf32> to vector<16x32xf32>
    %953 = arith.addf %951, %952 : vector<16x32xf32>
    %954 = arith.addf %842, %953 : vector<16x32xf32>
    %cst_141 = arith.constant dense<0.000000e+00> : vector<16xf32>
    %955 = vector.multi_reduction <add>, %954, %cst_141 [1] : vector<16x32xf32> to vector<16xf32>
    %956 = vector.shape_cast %955 : vector<16xf32> to vector<16x1xf32>
    %cst_142 = arith.constant 3.200000e+01 : f32
    %957 = vector.broadcast %cst_142 : f32 to vector<16x1xf32>
    %958 = arith.divf %956, %957 : vector<16x1xf32>
    %959 = arith.mulf %954, %954 : vector<16x32xf32>
    %cst_143 = arith.constant dense<0.000000e+00> : vector<16xf32>
    %960 = vector.multi_reduction <add>, %959, %cst_143 [1] : vector<16x32xf32> to vector<16xf32>
    %961 = vector.shape_cast %960 : vector<16xf32> to vector<16x1xf32>
    %cst_144 = arith.constant 3.200000e+01 : f32
    %962 = vector.broadcast %cst_144 : f32 to vector<16x1xf32>
    %963 = arith.divf %961, %962 : vector<16x1xf32>
    %964 = arith.mulf %958, %958 : vector<16x1xf32>
    %965 = arith.subf %963, %964 : vector<16x1xf32>
    %966 = vector.broadcast %958 : vector<16x1xf32> to vector<16x32xf32>
    %967 = arith.subf %954, %966 : vector<16x32xf32>
    %cst_145 = arith.constant 9.99999974E-6 : f32
    %968 = vector.broadcast %cst_145 : f32 to vector<16x1xf32>
    %969 = arith.addf %965, %968 : vector<16x1xf32>
    %970 = math.rsqrt %969 : vector<16x1xf32>
    %971 = vector.broadcast %970 : vector<16x1xf32> to vector<16x32xf32>
    %972 = arith.mulf %967, %971 : vector<16x32xf32>
    %973 = vector.broadcast %853 : vector<1x32xf32> to vector<16x32xf32>
    %974 = arith.mulf %972, %973 : vector<16x32xf32>
    %975 = vector.broadcast %854 : vector<1x32xf32> to vector<16x32xf32>
    %976 = arith.addf %974, %975 : vector<16x32xf32>
    %cst_146 = arith.constant dense<0.000000e+00> : vector<16x64xf32>
    %977 = tpu.matmul %976, %849, %cst_146 {dimension_numbers = #tpu.dot_dimension_numbers<[1], [0], [0], [1], [0, 0, 1, 1], [], []>} : vector<16x32xf32>, vector<32x64xf32>, vector<16x64xf32> -> vector<16x64xf32>
    %978 = vector.broadcast %855 : vector<1x64xf32> to vector<16x64xf32>
    %979 = arith.addf %977, %978 : vector<16x64xf32>
    %cst_147 = arith.constant 0.000000e+00 : f32
    %980 = vector.broadcast %cst_147 : f32 to vector<16x64xf32>
    %981 = arith.maximumf %979, %980 : vector<16x64xf32>
    %cst_148 = arith.constant dense<0.000000e+00> : vector<16x32xf32>
    %982 = tpu.matmul %981, %850, %cst_148 {dimension_numbers = #tpu.dot_dimension_numbers<[1], [0], [0], [1], [0, 0, 1, 1], [], []>} : vector<16x64xf32>, vector<64x32xf32>, vector<16x32xf32> -> vector<16x32xf32>
    %983 = vector.broadcast %856 : vector<1x32xf32> to vector<16x32xf32>
    %984 = arith.addf %982, %983 : vector<16x32xf32>
    %985 = arith.addf %976, %984 : vector<16x32xf32>
    %cst_149 = arith.constant dense<0.000000e+00> : vector<16xf32>
    %986 = vector.multi_reduction <add>, %985, %cst_149 [1] : vector<16x32xf32> to vector<16xf32>
    %987 = vector.shape_cast %986 : vector<16xf32> to vector<16x1xf32>
    %cst_150 = arith.constant 3.200000e+01 : f32
    %988 = vector.broadcast %cst_150 : f32 to vector<16x1xf32>
    %989 = arith.divf %987, %988 : vector<16x1xf32>
    %990 = arith.mulf %985, %985 : vector<16x32xf32>
    %cst_151 = arith.constant dense<0.000000e+00> : vector<16xf32>
    %991 = vector.multi_reduction <add>, %990, %cst_151 [1] : vector<16x32xf32> to vector<16xf32>
    %992 = vector.shape_cast %991 : vector<16xf32> to vector<16x1xf32>
    %cst_152 = arith.constant 3.200000e+01 : f32
    %993 = vector.broadcast %cst_152 : f32 to vector<16x1xf32>
    %994 = arith.divf %992, %993 : vector<16x1xf32>
    %995 = arith.mulf %989, %989 : vector<16x1xf32>
    %996 = arith.subf %994, %995 : vector<16x1xf32>
    %997 = vector.broadcast %989 : vector<16x1xf32> to vector<16x32xf32>
    %998 = arith.subf %985, %997 : vector<16x32xf32>
    %cst_153 = arith.constant 9.99999974E-6 : f32
    %999 = vector.broadcast %cst_153 : f32 to vector<16x1xf32>
    %1000 = arith.addf %996, %999 : vector<16x1xf32>
    %1001 = math.rsqrt %1000 : vector<16x1xf32>
    %1002 = vector.broadcast %1001 : vector<16x1xf32> to vector<16x32xf32>
    %1003 = arith.mulf %998, %1002 : vector<16x32xf32>
    %1004 = vector.broadcast %857 : vector<1x32xf32> to vector<16x32xf32>
    %1005 = arith.mulf %1003, %1004 : vector<16x32xf32>
    %1006 = vector.broadcast %858 : vector<1x32xf32> to vector<16x32xf32>
    %1007 = arith.addf %1005, %1006 : vector<16x32xf32>
    %1008 = vector.extract_strided_slice %1007 {offsets = [0, 0], sizes = [8, 32], strides = [1, 1]} : vector<16x32xf32> to vector<8x32xf32>
    %1009 = vector.shape_cast %1008 : vector<8x32xf32> to vector<8x1x32xf32>
    %1010 = vector.extract_strided_slice %1007 {offsets = [8, 0], sizes = [8, 32], strides = [1, 1]} : vector<16x32xf32> to vector<8x32xf32>
    %1011 = vector.shape_cast %1010 : vector<8x32xf32> to vector<8x1x32xf32>
    %1012 = tpu.concatenate %1009, %1011 in 1 : vector<8x1x32xf32>, vector<8x1x32xf32> -> vector<8x2x32xf32>
    %c0_154 = arith.constant 0 : index
    %c0_155 = arith.constant 0 : index
    %c0_156 = arith.constant 0 : index
    %1013 = vector.load %arg4[%c0_154, %c0_155, %c0_156] : memref<8x2x32xf32, #tpu.memory_space<vmem>>, vector<8x2x32xf32>
    tpu.vector_store %arg4[%c0_154, %c0_155, %c0_156], %1012 {strides = array<i32>} : memref<8x2x32xf32, #tpu.memory_space<vmem>>, vector<8x2x32xf32>,
    return
  }
}

</mosaic_0001>

<bundles_post_ra>
// kernel: kaleidoscope_forward.1
= control target key start
LH: loop header
LB: loop body
LE: loop exit
PB: predicated region body
PF: predicated region fallthrough
CT: control target
= control target key end

     0   :  { %9 = vsyncpa [#allocation3], 0  ;;  %s25612_s0 = inlined_call_operand.vmem [shape: f32[8,2,32], index: 0, kind: input, shape index: {}]   ;;  %s25613_s1 = inlined_call_operand.vmem [shape: f32[98,64], index: 1, kind: input, shape index: {}]   ;;  %s25614_s2 = inlined_call_operand.hbm [shape: f32[6,160,96], index: 2, kind: input, shape index: {}]   ;;  %s25615_s3 = inlined_call_operand.vmem [shape: f32[6,8,96], index: 3, kind: input, shape index: {}]   ;;  %s25616_s4 = inlined_call_operand.hbm [shape: f32[8,2,32], index: 4, kind: output, shape index: {}]  }
   0x1   :  { %10 = vsyncpa [#allocation4], 0  ;;  %s22147_s15 = smov [#allocation2]  }
   0x2   :  { %s20_s16 = sshll.u32 %s22147_s15, 4  ;;  %s21_s16 = int_to_ptr.vmem [resolvable:$true] %s20_s16 }
   0x3   :  { %s22111_s17 = scalar_lea.vmem %s21_s16, 15360  ;;  %p22116_p1 = scmp.lt.s32.totalorder %s21_s16, %s21_s16 }
   0x4   :  { %p22112_p0 = scmp.ne.s32.totalorder %s21_s16, %s22111_s17  ;;  %p22117_p2 = scmp.lt.s32.totalorder %s22111_s17, %s22111_s17 }
   0x6   :  { %p22118_p3 = por %p22117_p2, %p22116_p1 }
   0x8   :  { %p22119_p4 = pnand %p22118_p3, %p22112_p0 }
   0xa   :  { %22122 = shalt.err (!%p22119_p4)
}
   0xb   :  { %s22148_s18 = smov 128   ;;  %s22149_s19 = smov 8  }
   0xc   :  { %26 = dma.hbm_to_vmem [thread:$0]  %s25614_s2, 15360, %s21_s16, [#allocation3], %s22148_s18, %s22148_s18, %s22149_s19  }
   0xd   :  { %22143 = dma.done.wait [#allocation3], 15360  }
   0xe   :  { %22144 = vsyncadd [#allocation3], 4294951936  ;;  %v86_v0 = vld [vmem:[%s25613_s1 + $0x18] sm:$0xff]  ;;  %v85_v1 = vld [vmem:[%s25613_s1 + $0x10] sm:$0xff]  ;;  %vm49_vm0 = vcmask 1041409   ;;  %vm52_vm1 = vcmask 1042434  }
   0xf   :  { %20339 = vmatprep.subr.mxu1 %v86_v0  ;;  %v84_v2 = vld [vmem:[%s25613_s1 + $0x8] sm:$0xff]  ;;  %v32_v3 = vld [vmem:[%s25612_s0] sm:$0x3]  ;;  %v33_v4 = vld [vmem:[%s25612_s0 + $0x2] sm:$0x3]  ;;  %vm55_vm2 = vcmask 1043459  }
  0x10   :  { %20340 = vmatpush3.msra.mxu1 %v86_v0  ;;  %v34_v5 = vld [vmem:[%s25612_s0 + $0x4] sm:$0x3]  ;;  %v35_v6 = vld [vmem:[%s25612_s0 + $0x6] sm:$0x3]  ;;  %v36_v7 = vld [vmem:[%s25612_s0 + $0x8] sm:$0x3]  ;;  %v290_v0 = vlaneseq }
  0x11   :  { %20341 = vmatprep.subr.mxu1 %v85_v1  ;;  %v37_v8 = vld [vmem:[%s25612_s0 + $0xa] sm:$0x3]  ;;  %v83_v9 = vld [vmem:[%s25613_s1] sm:$0xff]  ;;  %v38_v10 = vld [vmem:[%s25612_s0 + $0xc] sm:$0x3]  ;;  %v48_v11 = vrot.slane %v33_v4, 7 }
  0x12   :  { %20342 = vmatpush3.msra.mxu1 %v85_v1  ;;  %v51_v12 = vrot.slane %v34_v5, 6  ;;  %v54_v13 = vrot.slane %v35_v6, 5  ;;  %v39_v14 = vld [vmem:[%s25612_s0 + $0xe] sm:$0x3]  ;;  %v57_v15 = vrot.slane %v36_v7, 4  ;;  %vm58_vm3 = vcmask 1044484  }
  0x13   :  { %20343 = vmatprep.subr.mxu1 %v84_v2  ;;  %vm61_vm4 = vcmask 1045509   ;;  %v69_v16 = vrot.slane %v32_v3, 1  ;;  %v50_v17 = vsel %vm49_vm0, %v48_v11, %v32_v3  ;;  %v60_v18 = vrot.slane %v37_v8, 3  ;;  %v94_v21 = vld [vmem:[%s25613_s1 + $0x58] sm:$0xff]  ;;  %v93_v41 = vld [vmem:[%s25613_s1 + $0x50] sm:$0xff]  ;;  %v92_v42 = vld [vmem:[%s25613_s1 + $0x48] sm:$0xff] }
  0x14   :  { %20344 = vmatpush3.msra.mxu1 %v84_v2  ;;  %v71_v19 = vrot.slane %v34_v5, 7  ;;  %v73_v20 = vrot.slane %v35_v6, 6  ;;  %v53_v22 = vsel %vm52_vm1, %v51_v12, %v50_v17  ;;  %v63_v23 = vrot.slane %v38_v10, 2  ;;  %v91_v43 = vld [vmem:[%s25613_s1 + $0x40] sm:$0xff]  ;;  %v90_v44 = vld [vmem:[%s25613_s1 + $0x38] sm:$0xff]  ;;  %v89_v45 = vld [vmem:[%s25613_s1 + $0x30] sm:$0xff] }
  0x15   :  { %20345 = vmatprep.subr.mxu1 %v83_v9  ;;  %vm64_vm5 = vcmask 1046534   ;;  %v75_v24 = vrot.slane %v36_v7, 5  ;;  %v56_v25 = vsel %vm55_vm2, %v54_v13, %v53_v22  ;;  %v66_v26 = vrot.slane %v39_v14, 1  ;;  %v88_v46 = vld [vmem:[%s25613_s1 + $0x28] sm:$0xff]  ;;  %v87_v47 = vld [vmem:[%s25613_s1 + $0x20] sm:$0xff]  ;;  %v272_v48 = vld [vmem:[#allocation2 + $0x18] sm:$0xff] }
  0x16   :  { %20346 = vmatpush3.msra.mxu1 %v83_v9  ;;  %v77_v27 = vrot.slane %v37_v8, 4  ;;  %v70_v28 = vsel %vm49_vm0, %v33_v4, %v69_v16  ;;  %v59_v29 = vsel %vm58_vm3, %v57_v15, %v56_v25  ;;  %vm67_vm6 = vcmask 1047559   ;;  %20369 = vmatprep.subr.mxu0 %v272_v48  ;;  %v19424_v49 = vld [vmem:[%s25613_s1 + $0x60] ss:$0 sm:$0xff]  ;;  %v271_v56 = vld [vmem:[#allocation2 + $0x10] sm:$0xff]  ;;  %v270_v57 = vld [vmem:[#allocation2 + $0x8] sm:$0xff] }
  0x17   :  { %v79_v30 = vrot.slane %v38_v10, 3  ;;  %v72_v31 = vsel %vm52_vm1, %v71_v19, %v70_v28  ;;  %20350 = vmatprep.subr.mxu1 %v94_v21  ;;  %v62_v32 = vsel %vm61_vm4, %v60_v18, %v59_v29  ;;  %v81_v33 = vrot.slane %v39_v14, 2  ;;  %20370 = vmatpush3.msra.mxu0 %v272_v48  ;;  %v269_v58 = vld [vmem:[#allocation2] sm:$0xff]  ;;  %s22151_s14 = smov 124   ;;  %s22152_s15 = smov 116  }
  0x18   :  { %vm101_vm7 = vcmask 261120   ;;  %v74_v34 = vsel %vm55_vm2, %v73_v20, %v72_v31  ;;  %v65_v35 = vsel %vm64_vm5, %v63_v23, %v62_v32  ;;  %vm187_vm8 = vcmask 523264   ;;  %20371 = vmatprep.subr.mxu0 %v271_v56  ;;  %v19427_v60 = vld [vmem:[%s25613_s1 + $0x61] ss:$0 sm:$0xff]  ;;  %s22150_s1 = smov 120   ;;  %s22153_s16 = smov 112  }
  0x19   :  { %v76_v36 = vsel %vm58_vm3, %v75_v24, %v74_v34  ;;  %v68_v37 = vsel %vm67_vm6, %v66_v26, %v65_v35  ;;  %20372 = vmatpush3.msra.mxu0 %v271_v56  ;;  %v22290_v1 = vshrl.u32 %v290_v0, 7  ;;  %v289_v3 = vld [vmem:[%s25615_s3] sm:$0xff]  ;;  %v22154_v9 = vmov 0.0   ;;  %s22155_s17 = smov 108   ;;  %s22157_s18 = smov 104  }
  0x1a   :  { %v78_v38 = vsel %vm61_vm4, %v77_v27, %v76_v36  ;;  %20347 = vmatprep.mubr.msk.f32.mxu1 %vm101_vm7, %v68_v37  ;;  %20373 = vmatprep.subr.mxu0 %v270_v57  ;;  %vm22156_vm9 = vmmov 0   ;;  %s22158_s20 = smov 100   ;;  %s22159_s21 = smov 96   ;;  %vm407_vm10 = vcmask 31744   ;;  %vm1622_vm11 = vcmask 64512  }
  0x1b   :  { %v80_v39 = vsel %vm64_vm5, %v79_v30, %v78_v38  ;;  %20374 = vmatpush3.msra.mxu0 %v270_v57  ;;  %v22293_v2 = vsub.s32 0, %v22290_v1  ;;  %s22160_s0 = smov 64   ;;  %s22161_s22 = smov 4   ;;  %vm3075_vm12 = vcmask 97280   ;;  %vm3078_vm13 = vcmask 130048  }
  0x1c   :  { %v82_v40 = vsel %vm67_vm6, %v81_v33, %v80_v39  ;;  %20375 = vmatprep.subr.mxu0 %v269_v58  ;;  %s22162_s23 = smov 12   ;;  %s22163_s24 = smov 16   ;;  %vm3081_vm14 = vcmask 162816   ;;  %vm3084_vm15 = vcmask 195584   ;;  %vm3087_vm0 = vcmask 228352  }
  0x1d   :  { %20348 = vmatmul.mubr.msk.f32.vlgmr.msra.gmra.mxu1 %vm101_vm7, %v82_v40  ;;  %20376 = vmatpush3.msra.mxu0 %v269_v58  ;;  %v293_v5 = vrot.slane %v289_v3, %v22293_v2  ;;  %s22164_s25 = smov 20   ;;  %s22165_s26 = smov 24   ;;  %vm19389_vm1 = vcmask 1040384   ;;  %vm19398_vm2 = vcmask 254976  }
  0x1e   :  { %20351 = vmatpush3.msra.mxu1 %v94_v21  ;;  %20380 = vmatprep.subr.mxu0 %v22154_v9  ;;  %s22166_s27 = smov 28  }
  0x1f   :  { %20352 = vmatprep.subr.mxu1 %v93_v41 }
  0x20   :  { %20353 = vmatpush3.msra.mxu1 %v93_v41 }
  0x21   :  { %20354 = vmatprep.subr.mxu1 %v92_v42 }
  0x22   :  { %20355 = vmatpush3.msra.mxu1 %v92_v42 }
  0x23   :  { %20356 = vmatprep.subr.mxu1 %v91_v43 }
  0x24   :  { %20357 = vmatpush3.msra.mxu1 %v91_v43 }
  0x25   :  { %20358 = vmatprep.subr.mxu1 %v90_v44 }
  0x26   :  { %20359 = vmatpush3.msra.mxu1 %v90_v44 }
  0x27   :  { %20360 = vmatprep.subr.mxu1 %v89_v45 }
  0x28   :  { %20361 = vmatpush3.msra.mxu1 %v89_v45 }
  0x29   :  { %20362 = vmatprep.subr.mxu1 %v88_v46 }
  0x2a   :  { %20363 = vmatpush3.msra.mxu1 %v88_v46 }
  0x2b   :  { %20364 = vmatprep.subr.mxu1 %v87_v47 }
  0x2c   :  { %20365 = vmatpush3.msra.mxu1 %v87_v47 }
  0x2d   :  { %20385 = vmatprep.subr.mxu1 %v22154_v9 }
  0xdd   :  { %v20349_v50 = vpop.f32.mrf.mxu1 }
  0xde   :  { %v178_v51 = vadd.f32 %v20349_v50, %v19424_v49 }
  0xdf   :  { %v172_v52 = vpop.f32.mrf.mxu1 }
  0xe0   :  { %v173_v53 = vadd.f32 %v19424_v49, %v172_v52  ;;  %v182_v55 = vmax.f32 %v178_v51, 0.0 }
  0xe2   :  { %v181_v54 = vmax.f32 %v173_v53, 0.0 }
  0xe4   :  { %20366 = vmatprep.mubr.msk.f32.mxu1 %vm187_vm8, %v181_v54 }
  0xe5   :  { %20367 = vmatmul.mubr.msk.f32.vlgmr.msra.gmra.mxu1 %vm187_vm8, %v182_v55 }
  0xe6   :  { %20387 = vmatprep.mubr.msk.f32.mxu1 %vm22156_vm9, %v22154_v9 }
 0x1a5   :  { %v20368_v59 = vpop.f32.mrf.mxu1 }
 0x1a6   :  { %v22284_v63 = vadd.f32 %v20368_v59, %v19427_v60 }
 0x1a7   :  { %v260_v61 = vpop.f32.mrf.mxu1 }
 0x1a8   :  { %v22282_v62 = vadd.f32 %v19427_v60, %v260_v61 }
 0x1aa   :  { %20377 = vmatprep.mubr.msk.f32.mxu0 %vm101_vm7, %v22282_v62 }
 0x1ab   :  { %20378 = vmatmul.mubr.msk.f32.vlgmr.msra.gmra.mxu0 %vm101_vm7, %v22284_v63 }
 0x1ac   :  { %20382 = vmatprep.mubr.msk.f32.mxu0 %vm22156_vm9, %v22154_v9 }
 0x26b   :  { %v20379_v4 = vpop.f32.mrf.mxu0 }
 0x26c   :  { %v22305_v8 = vadd.f32 %v20379_v4, %v293_v5 }
 0x26d   :  { %v366_v6 = vpop.f32.mrf.mxu0 }
 0x26e   :  { %v22299_v7 = vadd.f32 %v366_v6, %v293_v5 }
 0x270   :  { %381 = vrot.lane.b32.xlu1 %v22299_v7, %s22150_s1  ;;  %377 = vrot.lane.b32.xlu0 %v22299_v7, %s22151_s14 }
 0x274   :  { %383 = vrot.lane.b32.xlu1 %v22305_v8, %s22150_s1  ;;  %379 = vrot.lane.b32.xlu0 %v22305_v8, %s22151_s14 }
 0x278   :  { %387 = vrot.lane.b32.xlu1 %v22305_v8, %s22152_s15  ;;  %385 = vrot.lane.b32.xlu0 %v22299_v7, %s22152_s15 }
 0x27c   :  { %391 = vrot.lane.b32.xlu1 %v22305_v8, %s22153_s16  ;;  %389 = vrot.lane.b32.xlu0 %v22299_v7, %s22153_s16 }
 0x280   :  { %395 = vrot.lane.b32.xlu1 %v22305_v8, %s22155_s17  ;;  %393 = vrot.lane.b32.xlu0 %v22299_v7, %s22155_s17 }
 0x284   :  { %399 = vrot.lane.b32.xlu1 %v22305_v8, %s22157_s18  ;;  %397 = vrot.lane.b32.xlu0 %v22299_v7, %s22157_s18 }
 0x288   :  { %403 = vrot.lane.b32.xlu1 %v22305_v8, %s22158_s20  ;;  %401 = vrot.lane.b32.xlu0 %v22299_v7, %s22158_s20 }
 0x28c   :  { %482 = vrot.lane.b32.xlu1 %v22305_v8, %s22159_s21  ;;  %405 = vrot.lane.b32.xlu0 %v22299_v7, %s22159_s21 }
 0x2e2   :  { %v382_v10 = vpop.permute.xlu1 %381  ;;  %v378_v11 = vpop.permute.xlu0 %377 }
 0x2e3   :  { %558 = vrot.lane.b32.xlu0 %v378_v11, %s22159_s21 }
 0x2e6   :  { %v22342_v12 = vpop.permute.xlu1 %383  ;;  %v380_v13 = vpop.permute.xlu0 %379 }
 0x2e7   :  { %710 = vrot.lane.b32.xlu0 %v382_v10, %s22159_s21  ;;  %634 = vrot.lane.b32.xlu1 %v380_v13, %s22159_s21 }
 0x2ea   :  { %v22346_v14 = vpop.permute.xlu1 %387  ;;  %v22348_v15 = vpop.permute.xlu0 %385 }
 0x2eb   :  { %786 = vrot.lane.b32.xlu1 %v22342_v12, %s22159_s21  ;;  %862 = vrot.lane.b32.xlu0 %v22348_v15, %s22159_s21 }
 0x2ee   :  { %v22354_v16 = vpop.permute.xlu1 %391  ;;  %v22356_v17 = vpop.permute.xlu0 %389 }
 0x2ef   :  { %938 = vrot.lane.b32.xlu1 %v22346_v14, %s22159_s21  ;;  %1014 = vrot.lane.b32.xlu0 %v22356_v17, %s22159_s21 }
 0x2f2   :  { %v22362_v18 = vpop.permute.xlu1 %395  ;;  %v22364_v19 = vpop.permute.xlu0 %393 }
 0x2f3   :  { %1090 = vrot.lane.b32.xlu1 %v22354_v16, %s22159_s21  ;;  %1166 = vrot.lane.b32.xlu0 %v22364_v19, %s22159_s21 }
 0x2f6   :  { %v22370_v20 = vpop.permute.xlu1 %399  ;;  %v22372_v21 = vpop.permute.xlu0 %397 }
 0x2f7   :  { %1242 = vrot.lane.b32.xlu1 %v22362_v18, %s22159_s21  ;;  %1318 = vrot.lane.b32.xlu0 %v22372_v21, %s22159_s21 }
 0x2fa   :  { %v22378_v22 = vpop.permute.xlu1 %403  ;;  %v22380_v23 = vpop.permute.xlu0 %401 }
 0x2fb   :  { %1394 = vrot.lane.b32.xlu1 %v22370_v20, %s22159_s21  ;;  %1470 = vrot.lane.b32.xlu0 %v22380_v23, %s22159_s21 }
 0x2fe   :  { %v483_v24 = vpop.permute.xlu1 %482  ;;  %v406_v25 = vpop.permute.xlu0 %405 }
 0x2ff   :  { %20386 = vmatpush3.xpose.msk.msra.mxu1 %vm407_vm10, %v483_v24  ;;  %1546 = vrot.lane.b32.xlu1 %v22378_v22, %s22159_s21 }
 0x300   :  { %1875 = vrot.lane.b32.xlu0 %v22305_v8, %s22160_s0  ;;  %20381 = vmatpush3.xpose.msk.msra.mxu0 %vm407_vm10, %v406_v25 }
 0x301   :  { %20390 = vmatprep.subr.mxu0 %v22154_v9  ;;  %20395 = vmatprep.subr.mxu1 %v22154_v9 }
 0x302   :  { %20388 = vmatmul.mubr.msk.f32.vlgmr.msra.gmra.mxu1 %vm407_vm10, %v22305_v8 }
 0x303   :  { %20383 = vmatmul.mubr.msk.f32.vlgmr.msra.gmra.mxu0 %vm407_vm10, %v22299_v7  ;;  %20397 = vmatprep.mubr.msk.f32.mxu1 %vm22156_vm9, %v22154_v9 }
 0x304   :  { %1951 = vrot.lane.b32.xlu0 %v378_v11, %s22160_s0  ;;  %20392 = vmatprep.mubr.msk.f32.mxu0 %vm22156_vm9, %v22154_v9 }
 0x308   :  { %2027 = vrot.lane.b32.xlu0 %v380_v13, %s22160_s0 }
 0x30c   :  { %2103 = vrot.lane.b32.xlu0 %v382_v10, %s22160_s0 }
 0x310   :  { %2179 = vrot.lane.b32.xlu0 %v22342_v12, %s22160_s0 }
 0x314   :  { %2255 = vrot.lane.b32.xlu0 %v22348_v15, %s22160_s0 }
 0x318   :  { %2331 = vrot.lane.b32.xlu0 %v22346_v14, %s22160_s0 }
 0x31c   :  { %2407 = vrot.lane.b32.xlu0 %v22356_v17, %s22160_s0 }
 0x355   :  { %v559_v26 = vpop.permute.xlu0 %558 }
 0x356   :  { %20391 = vmatpush3.xpose.msk.msra.mxu0 %vm407_vm10, %v559_v26 }
 0x357   :  { %20400 = vmatprep.subr.mxu0 %v22154_v9 }
 0x359   :  { %v635_v27 = vpop.permute.xlu1 %634  ;;  %20393 = vmatmul.mubr.msk.f32.vlgmr.msra.gmra.mxu0 %vm407_vm10, %v378_v11  ;;  %v711_v28 = vpop.permute.xlu0 %710 }
 0x35a   :  { %20396 = vmatpush3.xpose.msk.msra.mxu1 %vm407_vm10, %v635_v27  ;;  %20401 = vmatpush3.xpose.msk.msra.mxu0 %vm407_vm10, %v711_v28 }
 0x35b   :  { %20402 = vmatprep.mubr.msk.f32.mxu0 %vm22156_vm9, %v22154_v9  ;;  %20405 = vmatprep.subr.mxu1 %v22154_v9 }
 0x35c   :  { %20410 = vmatprep.subr.mxu0 %v22154_v9 }
 0x35d   :  { %20398 = vmatmul.mubr.msk.f32.vlgmr.msra.gmra.mxu1 %vm407_vm10, %v380_v13  ;;  %v787_v29 = vpop.permute.xlu1 %786  ;;  %20403 = vmatmul.mubr.msk.f32.vlgmr.msra.gmra.mxu0 %vm407_vm10, %v382_v10  ;;  %v863_v30 = vpop.permute.xlu0 %862 }
 0x35e   :  { %20406 = vmatpush3.xpose.msk.msra.mxu1 %vm407_vm10, %v787_v29  ;;  %20411 = vmatpush3.xpose.msk.msra.mxu0 %vm407_vm10, %v863_v30 }
 0x35f   :  { %20407 = vmatprep.mubr.msk.f32.mxu1 %vm22156_vm9, %v22154_v9  ;;  %20412 = vmatprep.mubr.msk.f32.mxu0 %vm22156_vm9, %v22154_v9 }
 0x360   :  { %20415 = vmatprep.subr.mxu1 %v22154_v9  ;;  %20420 = vmatprep.subr.mxu0 %v22154_v9 }
 0x361   :  { %20408 = vmatmul.mubr.msk.f32.vlgmr.msra.gmra.mxu1 %vm407_vm10, %v22342_v12  ;;  %v939_v31 = vpop.permute.xlu1 %938  ;;  %20413 = vmatmul.mubr.msk.f32.vlgmr.msra.gmra.mxu0 %vm407_vm10, %v22348_v15  ;;  %v1015_v32 = vpop.permute.xlu0 %1014 }
 0x362   :  { %20416 = vmatpush3.xpose.msk.msra.mxu1 %vm407_vm10, %v939_v31  ;;  %20421 = vmatpush3.xpose.msk.msra.mxu0 %vm407_vm10, %v1015_v32 }
 0x363   :  { %20417 = vmatprep.mubr.msk.f32.mxu1 %vm22156_vm9, %v22154_v9  ;;  %20422 = vmatprep.mubr.msk.f32.mxu0 %vm22156_vm9, %v22154_v9 }
 0x364   :  { %20425 = vmatprep.subr.mxu1 %v22154_v9  ;;  %20430 = vmatprep.subr.mxu0 %v22154_v9 }
 0x365   :  { %20418 = vmatmul.mubr.msk.f32.vlgmr.msra.gmra.mxu1 %vm407_vm10, %v22346_v14  ;;  %v1091_v33 = vpop.permute.xlu1 %1090  ;;  %20423 = vmatmul.mubr.msk.f32.vlgmr.msra.gmra.mxu0 %vm407_vm10, %v22356_v17  ;;  %v1167_v34 = vpop.permute.xlu0 %1166 }
 0x366   :  { %20426 = vmatpush3.xpose.msk.msra.mxu1 %vm407_vm10, %v1091_v33  ;;  %20431 = vmatpush3.xpose.msk.msra.mxu0 %vm407_vm10, %v1167_v34 }
 0x367   :  { %20427 = vmatprep.mubr.msk.f32.mxu1 %vm22156_vm9, %v22154_v9  ;;  %20432 = vmatprep.mubr.msk.f32.mxu0 %vm22156_vm9, %v22154_v9 }
 0x368   :  { %20435 = vmatprep.subr.mxu1 %v22154_v9  ;;  %20440 = vmatprep.subr.mxu0 %v22154_v9 }
 0x369   :  { %20428 = vmatmul.mubr.msk.f32.vlgmr.msra.gmra.mxu1 %vm407_vm10, %v22354_v16  ;;  %v1243_v35 = vpop.permute.xlu1 %1242  ;;  %20433 = vmatmul.mubr.msk.f32.vlgmr.msra.gmra.mxu0 %vm407_vm10, %v22364_v19  ;;  %v1319_v36 = vpop.permute.xlu0 %1318 }
 0x36a   :  { %20436 = vmatpush3.xpose.msk.msra.mxu1 %vm407_vm10, %v1243_v35  ;;  %20441 = vmatpush3.xpose.msk.msra.mxu0 %vm407_vm10, %v1319_v36 }
 0x36b   :  { %20437 = vmatprep.mubr.msk.f32.mxu1 %vm22156_vm9, %v22154_v9  ;;  %20442 = vmatprep.mubr.msk.f32.mxu0 %vm22156_vm9, %v22154_v9 }
 0x36c   :  { %20445 = vmatprep.subr.mxu1 %v22154_v9  ;;  %20450 = vmatprep.subr.mxu0 %v22154_v9 }
 0x36d   :  { %20438 = vmatmul.mubr.msk.f32.vlgmr.msra.gmra.mxu1 %vm407_vm10, %v22362_v18  ;;  %v1395_v37 = vpop.permute.xlu1 %1394  ;;  %20443 = vmatmul.mubr.msk.f32.vlgmr.msra.gmra.mxu0 %vm407_vm10, %v22372_v21  ;;  %v1471_v38 = vpop.permute.xlu0 %1470 }
 0x36e   :  { %20446 = vmatpush3.xpose.msk.msra.mxu1 %vm407_vm10, %v1395_v37  ;;  %20451 = vmatpush3.xpose.msk.msra.mxu0 %vm407_vm10, %v1471_v38 }
 0x36f   :  { %20447 = vmatprep.mubr.msk.f32.mxu1 %vm22156_vm9, %v22154_v9  ;;  %20452 = vmatprep.mubr.msk.f32.mxu0 %vm22156_vm9, %v22154_v9 }
 0x370   :  { %20455 = vmatprep.subr.mxu1 %v22154_v9  ;;  %20460 = vmatprep.subr.mxu0 %v22154_v9 }
 0x371   :  { %20448 = vmatmul.mubr.msk.f32.vlgmr.msra.gmra.mxu1 %vm407_vm10, %v22370_v20  ;;  %v1547_v39 = vpop.permute.xlu1 %1546  ;;  %20453 = vmatmul.mubr.msk.f32.vlgmr.msra.gmra.mxu0 %vm407_vm10, %v22380_v23 }
 0x372   :  { %20456 = vmatpush3.xpose.msk.msra.mxu1 %vm407_vm10, %v1547_v39  ;;  %20457 = vmatprep.mubr.msk.f32.mxu1 %vm22156_vm9, %v22154_v9  ;;  %v1876_v40 = vpop.permute.xlu0 %1875 }
 0x373   :  { %20465 = vmatprep.subr.mxu1 %v22154_v9  ;;  %20462 = vmatprep.mubr.msk.f32.mxu0 %vm22156_vm9, %v22154_v9 }
 0x375   :  { %20458 = vmatmul.mubr.msk.f32.vlgmr.msra.gmra.mxu1 %vm407_vm10, %v22378_v22 }
 0x376   :  { %20466 = vmatpush3.msra.mxu1 %v1876_v40  ;;  %20467 = vmatprep.mubr.msk.f32.mxu1 %vm22156_vm9, %v22154_v9  ;;  %v22527_v3 = vpop.permute.xlu0 %1951 }
 0x377   :  { %20475 = vmatprep.subr.mxu1 %v22154_v9 }
 0x37a   :  { %v22541_v15 = vpop.permute.xlu0 %2027 }
 0x37e   :  { %v22555_v31 = vpop.permute.xlu0 %2103 }
 0x382   :  { %v22565_v39 = vpop.permute.xlu0 %2179 }
 0x3c2   :  { %v22495_v41 = vpop.f32.mrf.mxu1 }
 0x3c3   :  { %v22497_v42 = vpop.f32.mrf.mxu0  ;;  %v1626_v43 = vsel %vm1622_vm11, %v22495_v41, -inf }
 0x3c4   :  { %v20389_v44 = vpop.f32.mrf.mxu1  ;;  %1627 = vmax.xlane.f32.xlu1 %v1626_v43  ;;  %v1623_v45 = vsel %vm1622_vm11, %v22497_v42, -inf  ;;  %v22569_v43 = vpop.permute.xlu0 %2255 }
 0x3c5   :  { %1624 = vmax.xlane.f32.xlu0 %v1623_v45  ;;  %v20384_v46 = vpop.f32.mrf.mxu0 }
 0x3c8   :  { %v22571_v44 = vpop.permute.xlu0 %2331 }
 0x3cc   :  { %v22575_v45 = vpop.permute.xlu0 %2407 }
 0x3d5   :  { %1799 = vrot.lane.b32.xlu1 %v22299_v7, %s22160_s0 }
 0x419   :  { %v22505_v47 = vpop.f32.mrf.mxu0 }
 0x41a   :  { %v1629_v57 = vsel %vm1622_vm11, %v22505_v47, -inf }
 0x41b   :  { %v20394_v48 = vpop.f32.mrf.mxu0 }
 0x41d   :  { %v22507_v49 = vpop.f32.mrf.mxu1  ;;  %v22509_v50 = vpop.f32.mrf.mxu0 }
 0x41e   :  { %v1632_v51 = vsel %vm1622_vm11, %v22507_v49, -inf  ;;  %v1635_v52 = vsel %vm1622_vm11, %v22509_v50, -inf }
 0x41f   :  { %v20399_v53 = vpop.f32.mrf.mxu1  ;;  %1633 = vmax.xlane.f32.xlu0 %v1632_v51  ;;  %1636 = vmax.xlane.f32.xlu1 %v1635_v52  ;;  %v20404_v54 = vpop.f32.mrf.mxu0 }
 0x421   :  { %v22515_v55 = vpop.f32.mrf.mxu1  ;;  %v22517_v56 = vpop.f32.mrf.mxu0 }
 0x422   :  { %v1641_v58 = vsel %vm1622_vm11, %v22517_v56, -inf  ;;  %v1638_v4 = vsel %vm1622_vm11, %v22515_v55, -inf }
 0x423   :  { %v20409_v59 = vpop.f32.mrf.mxu1  ;;  %1630 = vmax.xlane.f32.xlu0 %v1629_v57  ;;  %1642 = vmax.xlane.f32.xlu1 %v1641_v58  ;;  %v20414_v60 = vpop.f32.mrf.mxu0 }
 0x425   :  { %v22523_v61 = vpop.f32.mrf.mxu1  ;;  %v22525_v0 = vpop.f32.mrf.mxu0 }
 0x426   :  { %v1647_v5 = vsel %vm1622_vm11, %v22525_v0, -inf  ;;  %v1644_v11 = vsel %vm1622_vm11, %v22523_v61, -inf }
 0x427   :  { %v20419_v6 = vpop.f32.mrf.mxu1  ;;  %1639 = vmax.xlane.f32.xlu0 %v1638_v4  ;;  %1648 = vmax.xlane.f32.xlu1 %v1647_v5  ;;  %v20424_v7 = vpop.f32.mrf.mxu0 }
 0x429   :  { %v22533_v8 = vpop.f32.mrf.mxu1  ;;  %v22535_v10 = vpop.f32.mrf.mxu0 }
 0x42a   :  { %v1653_v12 = vsel %vm1622_vm11, %v22535_v10, -inf  ;;  %v1650_v25 = vsel %vm1622_vm11, %v22533_v8, -inf }
 0x42b   :  { %v20429_v13 = vpop.f32.mrf.mxu1  ;;  %1645 = vmax.xlane.f32.xlu0 %v1644_v11  ;;  %1654 = vmax.xlane.f32.xlu1 %v1653_v12  ;;  %v20434_v14 = vpop.f32.mrf.mxu0 }
 0x42d   :  { %v22543_v17 = vpop.f32.mrf.mxu1  ;;  %v22545_v24 = vpop.f32.mrf.mxu0 }
 0x42e   :  { %v1659_v26 = vsel %vm1622_vm11, %v22545_v24, -inf  ;;  %v1656_v32 = vsel %vm1622_vm11, %v22543_v17, -inf }
 0x42f   :  { %v20439_v27 = vpop.f32.mrf.mxu1  ;;  %1651 = vmax.xlane.f32.xlu0 %v1650_v25  ;;  %1660 = vmax.xlane.f32.xlu1 %v1659_v26  ;;  %v20444_v28 = vpop.f32.mrf.mxu0 }
 0x431   :  { %v22551_v29 = vpop.f32.mrf.mxu1  ;;  %v22553_v30 = vpop.f32.mrf.mxu0 }
 0x432   :  { %v1665_v33 = vsel %vm1622_vm11, %v22553_v30, -inf  ;;  %v1662_v37 = vsel %vm1622_vm11, %v22551_v29, -inf }
 0x433   :  { %v20449_v34 = vpop.f32.mrf.mxu1  ;;  %1657 = vmax.xlane.f32.xlu0 %v1656_v32  ;;  %1666 = vmax.xlane.f32.xlu1 %v1665_v33  ;;  %v20454_v35 = vpop.f32.mrf.mxu0 }
 0x435   :  { %v22561_v36 = vpop.f32.mrf.mxu1 }
 0x436   :  { %v1668_v40 = vsel %vm1622_vm11, %v22561_v36, -inf }
 0x437   :  { %v20459_v38 = vpop.f32.mrf.mxu1  ;;  %1663 = vmax.xlane.f32.xlu0 %v1662_v37 }
 0x43b   :  { %1669 = vmax.xlane.f32.xlu0 %v1668_v40 }
 0x444   :  { %2483 = vrot.lane.b32.xlu1 %v22354_v16, %s22160_s0 }
 0x44d   :  { %v1628_v46 = vpop.xlane.xlu1 %1627 }
 0x44e   :  { %v1625_v48 = vpop.xlane.xlu0 %1624  ;;  %v1672_v16 = vsub.f32 %v22495_v41, %v1628_v46 }
 0x44f   :  { %v1671_v51 = vsub.f32 %v22497_v42, %v1625_v48 }
 0x450   :  { %v1689_v54 = vmul.f32 1.442695, %v1672_v16 }
 0x451   :  { %v1800_v52 = vpop.permute.xlu1 %1799  ;;  %2559 = vrot.lane.b32.xlu0 %v22364_v19, %s22160_s0  ;;  %v1687_v53 = vmul.f32 1.442695, %v1671_v51 }
 0x452   :  { %20461 = vmatpush3.msra.mxu0 %v1800_v52 }
 0x453   :  { %20470 = vmatprep.subr.mxu0 %v22154_v9  ;;  %21665 = vpow2.f32 %v1687_v53 }
 0x454   :  { %21667 = vpow2.f32 %v1689_v54 }
 0x455   :  { %2635 = vrot.lane.b32.xlu0 %v22362_v18, %s22160_s0 }
 0x459   :  { %2711 = vrot.lane.b32.xlu0 %v22372_v21, %s22160_s0 }
 0x45d   :  { %2787 = vrot.lane.b32.xlu0 %v22370_v20, %s22160_s0 }
 0x460   :  { %v22588_v42 = vpop.eup %21665 }
 0x461   :  { %v1719_v19 = vsel %vm1622_vm11, %v22588_v42, 0.0  ;;  %v22592_v57 = vpop.eup %21667 }
 0x462   :  { %v1722_v18 = vsel %vm1622_vm11, %v22592_v57, 0.0 }
 0x468   :  { %1720 = vadd.xlane.f32.xlu1 %v1719_v19 }
 0x47c   :  { %1723 = vadd.xlane.f32.xlu0 %v1722_v18 }
 0x4a8   :  { %v1637_v21 = vpop.xlane.xlu1 %1636  ;;  %v1634_v58 = vpop.xlane.xlu0 %1633 }
 0x4a9   :  { %v1674_v20 = vsub.f32 %v22507_v49, %v1634_v58  ;;  %v1675_v41 = vsub.f32 %v22509_v50, %v1637_v21 }
 0x4ab   :  { %v1693_v59 = vmul.f32 1.442695, %v1674_v20  ;;  %v1695_v7 = vmul.f32 1.442695, %v1675_v41 }
 0x4ac   :  { %v1643_v60 = vpop.xlane.xlu1 %1642  ;;  %v1631_v4 = vpop.xlane.xlu0 %1630 }
 0x4ad   :  { %v1673_v5 = vsub.f32 %v22505_v47, %v1631_v4  ;;  %21669 = vpow2.f32 %v1693_v59  ;;  %v1677_v11 = vsub.f32 %v22517_v56, %v1643_v60 }
 0x4af   :  { %v1691_v6 = vmul.f32 1.442695, %v1673_v5  ;;  %v1699_v49 = vmul.f32 1.442695, %v1677_v11 }
 0x4b0   :  { %v1649_v12 = vpop.xlane.xlu1 %1648  ;;  %v1640_v13 = vpop.xlane.xlu0 %1639 }
 0x4b1   :  { %v1676_v14 = vsub.f32 %v22515_v55, %v1640_v13  ;;  %21671 = vpow2.f32 %v1691_v6  ;;  %v1679_v26 = vsub.f32 %v22525_v0, %v1649_v12 }
 0x4b2   :  { %21673 = vpow2.f32 %v1695_v7 }
 0x4b3   :  { %v1697_v25 = vmul.f32 1.442695, %v1676_v14  ;;  %v1703_v32 = vmul.f32 1.442695, %v1679_v26 }
 0x4b4   :  { %v1655_v50 = vpop.xlane.xlu1 %1654  ;;  %v1646_v27 = vpop.xlane.xlu0 %1645 }
 0x4b5   :  { %v1678_v28 = vsub.f32 %v22523_v61, %v1646_v27  ;;  %21675 = vpow2.f32 %v1697_v25  ;;  %v1681_v56 = vsub.f32 %v22535_v10, %v1655_v50 }
 0x4b6   :  { %21677 = vpow2.f32 %v1699_v49 }
 0x4b7   :  { %v1701_v47 = vmul.f32 1.442695, %v1678_v28  ;;  %v1707_v0 = vmul.f32 1.442695, %v1681_v56 }
 0x4b8   :  { %v1661_v33 = vpop.xlane.xlu1 %1660  ;;  %v1652_v34 = vpop.xlane.xlu0 %1651 }
 0x4b9   :  { %v1680_v55 = vsub.f32 %v22533_v8, %v1652_v34  ;;  %21679 = vpow2.f32 %v1701_v47  ;;  %v1683_v38 = vsub.f32 %v22545_v24, %v1661_v33 }
 0x4ba   :  { %v22605_v35 = vpop.eup %21669  ;;  %21681 = vpow2.f32 %v1703_v32 }
 0x4bb   :  { %v1705_v37 = vmul.f32 1.442695, %v1680_v55  ;;  %v1728_v61 = vsel %vm1622_vm11, %v22605_v35, 0.0  ;;  %v1711_v51 = vmul.f32 1.442695, %v1683_v38 }
 0x4bc   :  { %v1658_v40 = vpop.xlane.xlu0 %1657  ;;  %v1667_v46 = vpop.xlane.xlu1 %1666  ;;  %1729 = vadd.xlane.f32.xlu0 %v1728_v61 }
 0x4bd   :  { %v1682_v10 = vsub.f32 %v22543_v17, %v1658_v40  ;;  %21683 = vpow2.f32 %v1705_v37  ;;  %v1685_v52 = vsub.f32 %v22553_v30, %v1667_v46 }
 0x4be   :  { %v22611_v48 = vpop.eup %21671  ;;  %21685 = vpow2.f32 %v1707_v0 }
 0x4bf   :  { %v1709_v8 = vmul.f32 1.442695, %v1682_v10  ;;  %v1725_v53 = vsel %vm1622_vm11, %v22611_v48, 0.0  ;;  %v22616_v16 = vpop.eup %21673  ;;  %v1715_v18 = vmul.f32 1.442695, %v1685_v52 }
 0x4c0   :  { %v1664_v24 = vpop.xlane.xlu0 %1663  ;;  %1726 = vadd.xlane.f32.xlu1 %v1725_v53  ;;  %v1731_v21 = vsel %vm1622_vm11, %v22616_v16, 0.0  ;;  %v22668_v56 = vpop.permute.xlu1 %2483 }
 0x4c1   :  { %v1684_v54 = vsub.f32 %v22551_v29, %v1664_v24  ;;  %21687 = vpow2.f32 %v1709_v8 }
 0x4c2   :  { %v22619_v19 = vpop.eup %21675  ;;  %21689 = vpow2.f32 %v1711_v51 }
 0x4c3   :  { %v1713_v17 = vmul.f32 1.442695, %v1684_v54  ;;  %v1734_v30 = vsel %vm1622_vm11, %v22619_v19, 0.0  ;;  %v22625_v20 = vpop.eup %21677 }
 0x4c4   :  { %v1670_v58 = vpop.xlane.xlu0 %1669  ;;  %1732 = vadd.xlane.f32.xlu1 %v1731_v21  ;;  %1735 = vadd.xlane.f32.xlu0 %v1734_v30  ;;  %v1737_v60 = vsel %vm1622_vm11, %v22625_v20, 0.0 }
 0x4c5   :  { %21691 = vpow2.f32 %v1713_v17  ;;  %v1686_v29 = vsub.f32 %v22561_v36, %v1670_v58 }
 0x4c6   :  { %v22628_v59 = vpop.eup %21679  ;;  %21693 = vpow2.f32 %v1715_v18 }
 0x4c7   :  { %v1717_v41 = vmul.f32 1.442695, %v1686_v29  ;;  %v1740_v4 = vsel %vm1622_vm11, %v22628_v59, 0.0  ;;  %v22634_v5 = vpop.eup %21681 }
 0x4c8   :  { %1738 = vadd.xlane.f32.xlu1 %v1737_v60  ;;  %1741 = vadd.xlane.f32.xlu0 %v1740_v4  ;;  %v1743_v36 = vsel %vm1622_vm11, %v22634_v5, 0.0  ;;  %v22670_v33 = vpop.permute.xlu0 %2559 }
 0x4c9   :  { %21695 = vpow2.f32 %v1717_v41 }
 0x4ca   :  { %v22636_v6 = vpop.eup %21683 }
 0x4cb   :  { %v1746_v7 = vsel %vm1622_vm11, %v22636_v6, 0.0  ;;  %v22642_v11 = vpop.eup %21685 }
 0x4cc   :  { %1744 = vadd.xlane.f32.xlu1 %v1743_v36  ;;  %1747 = vadd.xlane.f32.xlu0 %v1746_v7  ;;  %v1749_v13 = vsel %vm1622_vm11, %v22642_v11, 0.0  ;;  %v22674_v55 = vpop.permute.xlu0 %2635 }
 0x4ce   :  { %v22644_v12 = vpop.eup %21687 }
 0x4cf   :  { %v1752_v14 = vsel %vm1622_vm11, %v22644_v12, 0.0  ;;  %v22650_v25 = vpop.eup %21689 }
 0x4d0   :  { %1750 = vadd.xlane.f32.xlu1 %v1749_v13  ;;  %1753 = vadd.xlane.f32.xlu0 %v1752_v14  ;;  %v1755_v50 = vsel %vm1622_vm11, %v22650_v25, 0.0  ;;  %v22676_v37 = vpop.permute.xlu0 %2711 }
 0x4d2   :  { %v22652_v49 = vpop.eup %21691 }
 0x4d3   :  { %v1758_v26 = vsel %vm1622_vm11, %v22652_v49, 0.0  ;;  %v22658_v27 = vpop.eup %21693 }
 0x4d4   :  { %1756 = vadd.xlane.f32.xlu1 %v1755_v50  ;;  %1759 = vadd.xlane.f32.xlu0 %v1758_v26  ;;  %v1761_v32 = vsel %vm1622_vm11, %v22658_v27, 0.0  ;;  %v22679_v61 = vpop.permute.xlu0 %2787 }
 0x4d6   :  { %v22660_v28 = vpop.eup %21695 }
 0x4d7   :  { %v1764_v47 = vsel %vm1622_vm11, %v22660_v28, 0.0 }
 0x4d8   :  { %1762 = vadd.xlane.f32.xlu0 %v1761_v32  ;;  %1765 = vadd.xlane.f32.xlu1 %v1764_v47 }
 0x4e9   :  { %2863 = vrot.lane.b32.xlu1 %v22380_v23, %s22160_s0 }
 0x4ee   :  { %2939 = vrot.lane.b32.xlu0 %v22378_v22, %s22160_s0 }
 0x4f1   :  { %v1721_v34 = vpop.xlane.xlu1 %1720 }
 0x4f2   :  { %21697 = vrcp.f32 %v1721_v34 }
 0x4ff   :  { %v21698_v0 = vpop.eup %21697 }
 0x500   :  { %v1783_v38 = vmul.f32 %v21698_v0, %v22588_v42 }
 0x502   :  { %20463 = vmatmul.mubr.msk.f32.vlgmr.msra.gmra.mxu0 %vm1622_vm11, %v1783_v38  ;;  %v276_v38 = vld [vmem:[#allocation2 + $0x38] sm:$0xff] }
 0x503   :  { %20471 = vmatpush3.msra.mxu0 %v22527_v3  ;;  %20472 = vmatprep.mubr.msk.f32.mxu0 %vm22156_vm9, %v22154_v9 }
 0x504   :  { %20480 = vmatprep.subr.mxu0 %v22154_v9 }
 0x505   :  { %v1724_v22 = vpop.xlane.xlu0 %1723 }
 0x506   :  { %21699 = vrcp.f32 %v1724_v22 }
 0x513   :  { %v21700_v23 = vpop.eup %21699 }
 0x514   :  { %v1784_v40 = vmul.f32 %v21700_v23, %v22592_v57 }
 0x516   :  { %20468 = vmatmul.mubr.msk.f32.vlgmr.msra.gmra.mxu1 %vm1622_vm11, %v1784_v40 }
 0x517   :  { %20476 = vmatpush3.msra.mxu1 %v22541_v15  ;;  %20477 = vmatprep.mubr.msk.f32.mxu1 %vm22156_vm9, %v22154_v9 }
 0x518   :  { %20485 = vmatprep.subr.mxu1 %v22154_v9 }
 0x545   :  { %v1730_v3 = vpop.xlane.xlu0 %1729 }
 0x546   :  { %21701 = vrcp.f32 %v1730_v3  ;;  %v275_v3 = vld [vmem:[#allocation2 + $0x30] sm:$0xff] }
 0x549   :  { %v1727_v42 = vpop.xlane.xlu1 %1726 }
 0x54a   :  { %21703 = vrcp.f32 %v1727_v42  ;;  %v274_v42 = vld [vmem:[#allocation2 + $0x28] sm:$0xff] }
 0x54d   :  { %v1733_v46 = vpop.xlane.xlu1 %1732  ;;  %v1736_v10 = vpop.xlane.xlu0 %1735 }
 0x54e   :  { %21705 = vrcp.f32 %v1733_v46 }
 0x54f   :  { %21707 = vrcp.f32 %v1736_v10 }
 0x551   :  { %v1739_v8 = vpop.xlane.xlu1 %1738  ;;  %v1742_v51 = vpop.xlane.xlu0 %1741 }
 0x552   :  { %21709 = vrcp.f32 %v1739_v8 }
 0x553   :  { %v21702_v57 = vpop.eup %21701  ;;  %21711 = vrcp.f32 %v1742_v51 }
 0x554   :  { %v1786_v15 = vmul.f32 %v21702_v57, %v22605_v35  ;;  %v273_v57 = vld [vmem:[#allocation2 + $0x20] sm:$0xff] }
 0x555   :  { %v1745_v52 = vpop.xlane.xlu1 %1744  ;;  %v1748_v53 = vpop.xlane.xlu0 %1747 }
 0x556   :  { %21713 = vrcp.f32 %v1745_v52  ;;  %20478 = vmatmul.mubr.msk.f32.vlgmr.msra.gmra.mxu1 %vm1622_vm11, %v1786_v15 }
 0x557   :  { %v21704_v24 = vpop.eup %21703  ;;  %21715 = vrcp.f32 %v1748_v53  ;;  %20486 = vmatpush3.msra.mxu1 %v22565_v39  ;;  %20487 = vmatprep.mubr.msk.f32.mxu1 %vm22156_vm9, %v22154_v9 }
 0x558   :  { %v1785_v54 = vmul.f32 %v21704_v24, %v22611_v48  ;;  %20495 = vmatprep.subr.mxu1 %v22154_v9 }
 0x559   :  { %v1751_v17 = vpop.xlane.xlu1 %1750  ;;  %v1754_v18 = vpop.xlane.xlu0 %1753 }
 0x55a   :  { %21717 = vrcp.f32 %v1751_v17  ;;  %20473 = vmatmul.mubr.msk.f32.vlgmr.msra.gmra.mxu0 %vm1622_vm11, %v1785_v54 }
 0x55b   :  { %v21706_v35 = vpop.eup %21705  ;;  %21719 = vrcp.f32 %v1754_v18  ;;  %20481 = vmatpush3.msra.mxu0 %v22555_v31  ;;  %20482 = vmatprep.mubr.msk.f32.mxu0 %vm22156_vm9, %v22154_v9 }
 0x55c   :  { %v21708_v39 = vpop.eup %21707  ;;  %20490 = vmatprep.subr.mxu0 %v22154_v9  ;;  %v1787_v21 = vmul.f32 %v21706_v35, %v22616_v16 }
 0x55d   :  { %v1757_v48 = vpop.xlane.xlu1 %1756  ;;  %v1760_v30 = vpop.xlane.xlu0 %1759  ;;  %v1788_v58 = vmul.f32 %v21708_v39, %v22619_v19 }
 0x55e   :  { %21721 = vrcp.f32 %v1757_v48  ;;  %20483 = vmatmul.mubr.msk.f32.vlgmr.msra.gmra.mxu0 %vm1622_vm11, %v1787_v21 }
 0x55f   :  { %v21710_v29 = vpop.eup %21709  ;;  %21723 = vrcp.f32 %v1760_v30  ;;  %20488 = vmatmul.mubr.msk.f32.vlgmr.msra.gmra.mxu1 %vm1622_vm11, %v1788_v58  ;;  %20491 = vmatpush3.msra.mxu0 %v22569_v43 }
 0x560   :  { %v21712_v31 = vpop.eup %21711  ;;  %20496 = vmatpush3.msra.mxu1 %v22571_v44  ;;  %20492 = vmatprep.mubr.msk.f32.mxu0 %vm22156_vm9, %v22154_v9  ;;  %v1789_v16 = vmul.f32 %v21710_v29, %v22625_v20 }
 0x561   :  { %20500 = vmatprep.subr.mxu0 %v22154_v9  ;;  %v1766_v19 = vpop.xlane.xlu1 %1765  ;;  %20497 = vmatprep.mubr.msk.f32.mxu1 %vm22156_vm9, %v22154_v9  ;;  %v1763_v41 = vpop.xlane.xlu0 %1762  ;;  %v1790_v60 = vmul.f32 %v21712_v31, %v22628_v59 }
 0x562   :  { %21725 = vrcp.f32 %v1766_v19  ;;  %20505 = vmatprep.subr.mxu1 %v22154_v9  ;;  %20493 = vmatmul.mubr.msk.f32.vlgmr.msra.gmra.mxu0 %vm1622_vm11, %v1789_v16 }
 0x563   :  { %v21714_v43 = vpop.eup %21713  ;;  %21727 = vrcp.f32 %v1763_v41  ;;  %20498 = vmatmul.mubr.msk.f32.vlgmr.msra.gmra.mxu1 %vm1622_vm11, %v1790_v60  ;;  %20501 = vmatpush3.msra.mxu0 %v22575_v45 }
 0x564   :  { %v21716_v44 = vpop.eup %21715  ;;  %20506 = vmatpush3.msra.mxu1 %v22668_v56  ;;  %20502 = vmatprep.mubr.msk.f32.mxu0 %vm22156_vm9, %v22154_v9  ;;  %v1791_v20 = vmul.f32 %v21714_v43, %v22634_v5 }
 0x565   :  { %20510 = vmatprep.subr.mxu0 %v22154_v9  ;;  %20507 = vmatprep.mubr.msk.f32.mxu1 %vm22156_vm9, %v22154_v9  ;;  %v1792_v59 = vmul.f32 %v21716_v44, %v22636_v6  ;;  %v2864_v13 = vpop.permute.xlu1 %2863  ;;  %v2940_v26 = vpop.permute.xlu0 %2939 }
 0x566   :  { %20515 = vmatprep.subr.mxu1 %v22154_v9  ;;  %20503 = vmatmul.mubr.msk.f32.vlgmr.msra.gmra.mxu0 %vm1622_vm11, %v1791_v20 }
 0x567   :  { %v21718_v45 = vpop.eup %21717  ;;  %20508 = vmatmul.mubr.msk.f32.vlgmr.msra.gmra.mxu1 %vm1622_vm11, %v1792_v59  ;;  %20511 = vmatpush3.msra.mxu0 %v22670_v33 }
 0x568   :  { %v21720_v4 = vpop.eup %21719  ;;  %20516 = vmatpush3.msra.mxu1 %v22674_v55  ;;  %20512 = vmatprep.mubr.msk.f32.mxu0 %vm22156_vm9, %v22154_v9  ;;  %v1793_v5 = vmul.f32 %v21718_v45, %v22642_v11 }
 0x569   :  { %20517 = vmatprep.mubr.msk.f32.mxu1 %vm22156_vm9, %v22154_v9  ;;  %20520 = vmatprep.subr.mxu0 %v22154_v9  ;;  %v1794_v6 = vmul.f32 %v21720_v4, %v22644_v12 }
 0x56a   :  { %20525 = vmatprep.subr.mxu1 %v22154_v9  ;;  %20513 = vmatmul.mubr.msk.f32.vlgmr.msra.gmra.mxu0 %vm1622_vm11, %v1793_v5 }
 0x56b   :  { %v21722_v36 = vpop.eup %21721  ;;  %20518 = vmatmul.mubr.msk.f32.vlgmr.msra.gmra.mxu1 %vm1622_vm11, %v1794_v6  ;;  %20521 = vmatpush3.msra.mxu0 %v22676_v37 }
 0x56c   :  { %v21724_v7 = vpop.eup %21723  ;;  %20526 = vmatpush3.msra.mxu1 %v22679_v61  ;;  %20522 = vmatprep.mubr.msk.f32.mxu0 %vm22156_vm9, %v22154_v9  ;;  %v1795_v11 = vmul.f32 %v21722_v36, %v22650_v25 }
 0x56d   :  { %20527 = vmatprep.mubr.msk.f32.mxu1 %vm22156_vm9, %v22154_v9  ;;  %20530 = vmatprep.subr.mxu0 %v22154_v9  ;;  %v1796_v12 = vmul.f32 %v21724_v7, %v22652_v49 }
 0x56e   :  { %20535 = vmatprep.subr.mxu1 %v22154_v9  ;;  %20523 = vmatmul.mubr.msk.f32.vlgmr.msra.gmra.mxu0 %vm1622_vm11, %v1795_v11 }
 0x56f   :  { %v21726_v14 = vpop.eup %21725  ;;  %20528 = vmatmul.mubr.msk.f32.vlgmr.msra.gmra.mxu1 %vm1622_vm11, %v1796_v12  ;;  %20531 = vmatpush3.msra.mxu0 %v2864_v13 }
 0x570   :  { %v21728_v50 = vpop.eup %21727  ;;  %20536 = vmatpush3.msra.mxu1 %v2940_v26  ;;  %20532 = vmatprep.mubr.msk.f32.mxu0 %vm22156_vm9, %v22154_v9  ;;  %v1798_v25 = vmul.f32 %v21726_v14, %v22660_v28 }
 0x571   :  { %20537 = vmatprep.mubr.msk.f32.mxu1 %vm22156_vm9, %v22154_v9  ;;  %v1797_v49 = vmul.f32 %v21728_v50, %v22658_v27  ;;  %20540 = vmatprep.subr.mxu0 %v276_v38 }
 0x573   :  { %20533 = vmatmul.mubr.msk.f32.vlgmr.msra.gmra.mxu0 %vm1622_vm11, %v1797_v49  ;;  %20538 = vmatmul.mubr.msk.f32.vlgmr.msra.gmra.mxu1 %vm1622_vm11, %v1798_v25 }
 0x574   :  { %20541 = vmatpush3.msra.mxu0 %v276_v38 }
 0x575   :  { %20542 = vmatprep.subr.mxu0 %v275_v3 }
 0x576   :  { %20543 = vmatpush3.msra.mxu0 %v275_v3 }
 0x577   :  { %20544 = vmatprep.subr.mxu0 %v274_v42 }
 0x578   :  { %20545 = vmatpush3.msra.mxu0 %v274_v42 }
 0x579   :  { %20546 = vmatprep.subr.mxu0 %v273_v57 }
 0x57a   :  { %20547 = vmatpush3.msra.mxu0 %v273_v57  ;;  %v277_v57 = vld [vmem:[#allocation2 + $0x40] sm:$0xff] }
 0x5c2   :  { %v22764_v47 = vpop.f32.mrf.mxu0 }
 0x5c4   :  { %v20464_v32 = vpop.f32.mrf.mxu0 }
 0x5d6   :  { %v22766_v56 = vpop.f32.mrf.mxu1 }
 0x5d8   :  { %v20469_v33 = vpop.f32.mrf.mxu1 }
 0x616   :  { %v2099_v34 = vpop.f32.mrf.mxu1 }
 0x617   :  { %3019 = vrot.lane.b32.xlu0 %v2099_v34, %s22161_s22 }
 0x618   :  { %v20479_v28 = vpop.f32.mrf.mxu1 }
 0x619   :  { %v22801_v28 = vsub.s32 1, %v22290_v1 }
 0x61a   :  { %v2023_v55 = vpop.f32.mrf.mxu0 }
 0x61b   :  { %3017 = vrot.lane.b32.xlu1 %v2023_v55, %s22161_s22  ;;  %v22806_v55 = vld [vmem:[%s25615_s3] sm:$0xff] }
 0x61c   :  { %v20474_v37 = vpop.f32.mrf.mxu0 }
 0x61d   :  { %v3093_v37 = vrot.slane %v22806_v55, %v22801_v28 }
 0x61e   :  { %v2175_v27 = vpop.f32.mrf.mxu0 }
 0x61f   :  { %v2251_v0 = vpop.f32.mrf.mxu1  ;;  %3025 = vrot.lane.b32.xlu1 %v2175_v27, %s22149_s19 }
 0x620   :  { %3027 = vrot.lane.b32.xlu0 %v2251_v0, %s22149_s19  ;;  %v20484_v61 = vpop.f32.mrf.mxu0 }
 0x621   :  { %v20489_v22 = vpop.f32.mrf.mxu1 }
 0x622   :  { %v2327_v23 = vpop.f32.mrf.mxu0 }
 0x623   :  { %v2403_v40 = vpop.f32.mrf.mxu1  ;;  %3033 = vrot.lane.b32.xlu1 %v2327_v23, %s22162_s23 }
 0x624   :  { %3035 = vrot.lane.b32.xlu0 %v2403_v40, %s22162_s23  ;;  %v20494_v46 = vpop.f32.mrf.mxu0 }
 0x625   :  { %v20499_v10 = vpop.f32.mrf.mxu1 }
 0x626   :  { %v2479_v8 = vpop.f32.mrf.mxu0 }
 0x627   :  { %v2555_v51 = vpop.f32.mrf.mxu1  ;;  %3041 = vrot.lane.b32.xlu1 %v2479_v8, %s22163_s24  ;;  %v280_v8 = vld [vmem:[#allocation2 + $0x58] sm:$0xff] }
 0x628   :  { %3043 = vrot.lane.b32.xlu0 %v2555_v51, %s22163_s24  ;;  %v20504_v15 = vpop.f32.mrf.mxu0  ;;  %v279_v51 = vld [vmem:[#allocation2 + $0x50] sm:$0xff]  ;;  %20551 = vmatprep.subr.mxu1 %v280_v8 }
 0x629   :  { %v20509_v52 = vpop.f32.mrf.mxu1  ;;  %20552 = vmatpush3.msra.mxu1 %v280_v8  ;;  %v288_v15 = vld [vmem:[#allocation2 + $0x98] sm:$0xff] }
 0x62a   :  { %v2631_v53 = vpop.f32.mrf.mxu0  ;;  %20553 = vmatprep.subr.mxu1 %v279_v51  ;;  %v287_v52 = vld [vmem:[#allocation2 + $0x90] sm:$0xff]  ;;  %20562 = vmatprep.subr.mxu0 %v288_v15 }
 0x62b   :  { %v2707_v24 = vpop.f32.mrf.mxu1  ;;  %3049 = vrot.lane.b32.xlu1 %v2631_v53, %s22164_s25  ;;  %20554 = vmatpush3.msra.mxu1 %v279_v51  ;;  %v286_v53 = vld [vmem:[#allocation2 + $0x88] sm:$0xff] }
 0x62c   :  { %3051 = vrot.lane.b32.xlu0 %v2707_v24, %s22164_s25  ;;  %v20514_v54 = vpop.f32.mrf.mxu0  ;;  %v285_v24 = vld [vmem:[#allocation2 + $0x80] sm:$0xff] }
 0x62d   :  { %v20519_v17 = vpop.f32.mrf.mxu1 }
 0x62e   :  { %v2783_v18 = vpop.f32.mrf.mxu0 }
 0x62f   :  { %v2859_v35 = vpop.f32.mrf.mxu1  ;;  %3057 = vrot.lane.b32.xlu1 %v2783_v18, %s22165_s26 }
 0x630   :  { %3059 = vrot.lane.b32.xlu0 %v2859_v35, %s22165_s26  ;;  %v20524_v39 = vpop.f32.mrf.mxu0 }
 0x631   :  { %v20529_v21 = vpop.f32.mrf.mxu1 }
 0x633   :  { %v2935_v48 = vpop.f32.mrf.mxu0  ;;  %v3011_v30 = vpop.f32.mrf.mxu1 }
 0x634   :  { %3065 = vrot.lane.b32.xlu1 %v2935_v48, %s22166_s27  ;;  %3067 = vrot.lane.b32.xlu0 %v3011_v30, %s22166_s27 }
 0x635   :  { %v20534_v58 = vpop.f32.mrf.mxu0  ;;  %v20539_v29 = vpop.f32.mrf.mxu1 }
 0x689   :  { %v3020_v16 = vpop.permute.xlu0 %3019 }
 0x68a   :  { %v3072_v4 = vsel %vm407_vm10, %v22766_v56, %v3020_v16 }
 0x68d   :  { %v3018_v31 = vpop.permute.xlu1 %3017 }
 0x68e   :  { %v3071_v5 = vsel %vm407_vm10, %v22764_v47, %v3018_v31 }
 0x691   :  { %v3026_v19 = vpop.permute.xlu1 %3025 }
 0x692   :  { %v3028_v41 = vpop.permute.xlu0 %3027  ;;  %v3073_v36 = vsel %vm1622_vm11, %v3071_v5, %v3026_v19 }
 0x693   :  { %v3074_v7 = vsel %vm1622_vm11, %v3072_v4, %v3028_v41 }
 0x695   :  { %v3034_v60 = vpop.permute.xlu1 %3033 }
 0x696   :  { %v3036_v43 = vpop.permute.xlu0 %3035  ;;  %v3076_v12 = vsel %vm3075_vm12, %v3073_v36, %v3034_v60  ;;  %v22822_v60 = vsub.s32 2, %v22290_v1 }
 0x697   :  { %v3077_v13 = vsel %vm3075_vm12, %v3074_v7, %v3036_v43  ;;  %v22825_v43 = vsub.s32 3, %v22290_v1 }
 0x699   :  { %v3042_v44 = vpop.permute.xlu1 %3041  ;;  %v3217_v5 = vrot.slane %v22806_v55, %v22825_v43 }
 0x69a   :  { %v3044_v20 = vpop.permute.xlu0 %3043  ;;  %v3079_v14 = vsel %vm3078_vm13, %v3076_v12, %v3042_v44 }
 0x69b   :  { %v3080_v26 = vsel %vm3078_vm13, %v3077_v13, %v3044_v20  ;;  %v3211_v20 = vrot.slane %v22806_v55, %v22822_v60 }
 0x69d   :  { %v3050_v59 = vpop.permute.xlu1 %3049 }
 0x69e   :  { %v3052_v45 = vpop.permute.xlu0 %3051  ;;  %v3082_v50 = vsel %vm3081_vm14, %v3079_v14, %v3050_v59  ;;  %v284_v14 = vld [vmem:[#allocation2 + $0x78] sm:$0xff] }
 0x69f   :  { %v3083_v25 = vsel %vm3081_vm14, %v3080_v26, %v3052_v45  ;;  %v283_v26 = vld [vmem:[#allocation2 + $0x70] sm:$0xff] }
 0x6a1   :  { %v3058_v6 = vpop.permute.xlu1 %3057 }
 0x6a2   :  { %v3060_v11 = vpop.permute.xlu0 %3059  ;;  %v3085_v49 = vsel %vm3084_vm15, %v3082_v50, %v3058_v6  ;;  %v282_v50 = vld [vmem:[#allocation2 + $0x68] sm:$0xff] }
 0x6a3   :  { %v3086_v47 = vsel %vm3084_vm15, %v3083_v25, %v3060_v11  ;;  %v281_v25 = vld [vmem:[#allocation2 + $0x60] sm:$0xff] }
 0x6a6   :  { %v3066_v32 = vpop.permute.xlu1 %3065  ;;  %v3068_v56 = vpop.permute.xlu0 %3067 }
 0x6a7   :  { %v3088_v33 = vsel %vm3087_vm0, %v3085_v49, %v3066_v32  ;;  %v3089_v34 = vsel %vm3087_vm0, %v3086_v47, %v3068_v56  ;;  %v22836_v49 = vsub.s32 4, %v22290_v1 }
 0x6a8   :  { %20548 = vmatprep.mubr.msk.f32.mxu0 %vm101_vm7, %v3088_v33 }
 0x6a9   :  { %20549 = vmatmul.mubr.msk.f32.vlgmr.msra.gmra.mxu0 %vm101_vm7, %v3089_v34  ;;  %v3223_v47 = vrot.slane %v22806_v55, %v22836_v49 }
 0x6aa   :  { %20563 = vmatpush3.msra.mxu0 %v288_v15  ;;  %v3439_v15 = vld [vmem:[#allocation2 + $0xb0] sm:$0xff] }
 0x6ab   :  { %20564 = vmatprep.subr.mxu0 %v287_v52 }
 0x6ac   :  { %20565 = vmatpush3.msra.mxu0 %v287_v52  ;;  %v3438_v52 = vld [vmem:[#allocation2 + $0xa8] sm:$0xff] }
 0x6ad   :  { %20566 = vmatprep.subr.mxu0 %v286_v53 }
 0x6ae   :  { %20567 = vmatpush3.msra.mxu0 %v286_v53  ;;  %v3437_v53 = vld [vmem:[#allocation2 + $0xa0] sm:$0xff] }
 0x6af   :  { %20568 = vmatprep.subr.mxu0 %v285_v24 }
 0x6b0   :  { %20569 = vmatpush3.msra.mxu0 %v285_v24 }
 0x6b1   :  { %20570 = vmatprep.subr.mxu0 %v284_v14 }
 0x6b2   :  { %20571 = vmatpush3.msra.mxu0 %v284_v14 }
 0x6b3   :  { %20572 = vmatprep.subr.mxu0 %v283_v26 }
 0x6b4   :  { %20573 = vmatpush3.msra.mxu0 %v283_v26  ;;  %v19486_v26 = vld [vmem:[%s25615_s3 + $0x8] sm:$0xff] }
 0x6b5   :  { %20574 = vmatprep.subr.mxu0 %v282_v50 }
 0x6b6   :  { %20575 = vmatpush3.msra.mxu0 %v282_v50 }
 0x6b7   :  { %20576 = vmatprep.subr.mxu0 %v281_v25 }
 0x6b8   :  { %20577 = vmatpush3.msra.mxu0 %v281_v25 }
 0x6b9   :  { %20602 = vmatprep.subr.mxu0 %v22154_v9 }
 0x769   :  { %v20550_v27 = vpop.f32.mrf.mxu0 }
 0x76a   :  { %v3172_v0 = vadd.f32 %v20550_v27, %v3093_v37 }
 0x76b   :  { %v3166_v38 = vpop.f32.mrf.mxu0 }
 0x76c   :  { %v22811_v61 = vadd.f32 %v3172_v0, %v22284_v63  ;;  %v3167_v22 = vadd.f32 %v3166_v38, %v3093_v37  ;;  %v22845_v0 = vsub.s32 5, %v22290_v1 }
 0x76e   :  { %v3175_v23 = vadd.f32 %v3167_v22, %v22282_v62  ;;  %v3180_v40 = vsel %vm101_vm7, %v22811_v61, 0.0  ;;  %v3187_v46 = vmul.f32 %v22811_v61, %v22811_v61  ;;  %v278_v62 = vld [vmem:[#allocation2 + $0x48] sm:$0xff]  ;;  %v3310_v38 = vrot.slane %v22806_v55, %v22845_v0 }
 0x76f   :  { %3181 = vadd.xlane.f32.xlu0 %v3180_v40  ;;  %20555 = vmatprep.subr.mxu1 %v278_v62 }
 0x770   :  { %v3177_v3 = vsel %vm101_vm7, %v3175_v23, 0.0  ;;  %v3186_v42 = vmul.f32 %v3175_v23, %v3175_v23  ;;  %v3191_v63 = vsel %vm101_vm7, %v3187_v46, 0.0  ;;  %20556 = vmatpush3.msra.mxu1 %v278_v62 }
 0x771   :  { %3178 = vadd.xlane.f32.xlu1 %v3177_v3  ;;  %20557 = vmatprep.subr.mxu1 %v277_v57 }
 0x772   :  { %v3188_v10 = vsel %vm101_vm7, %v3186_v42, 0.0  ;;  %20558 = vmatpush3.msra.mxu1 %v277_v57  ;;  %v3440_v57 = vld [vmem:[#allocation2 + $0xb8] sm:$0xff] }
 0x773   :  { %3189 = vadd.xlane.f32.xlu0 %v3188_v10  ;;  %20581 = vmatprep.subr.mxu1 %v3440_v57 }
 0x775   :  { %3192 = vadd.xlane.f32.xlu1 %v3191_v63 }
 0x7f8   :  { %v3182_v54 = vpop.xlane.xlu0 %3181 }
 0x7f9   :  { %v3185_v18 = vmul.f32 0.03125, %v3182_v54 }
 0x7fa   :  { %v3179_v17 = vpop.xlane.xlu1 %3178 }
 0x7fb   :  { %v3184_v35 = vmul.f32 0.03125, %v3179_v17  ;;  %v3197_v58 = vmul.f32 %v3185_v18, %v3185_v18  ;;  %v3201_v45 = vsub.f32 %v22811_v61, %v3185_v18 }
 0x7fc   :  { %v3190_v39 = vpop.xlane.xlu0 %3189 }
 0x7fd   :  { %v3196_v21 = vmul.f32 %v3184_v35, %v3184_v35  ;;  %v3194_v48 = vmul.f32 0.03125, %v3190_v39  ;;  %v3200_v44 = vsub.f32 %v3175_v23, %v3184_v35 }
 0x7fe   :  { %v3193_v30 = vpop.xlane.xlu1 %3192 }
 0x7ff   :  { %v3198_v29 = vsub.f32 %v3194_v48, %v3196_v21  ;;  %v3195_v31 = vmul.f32 0.03125, %v3193_v30 }
 0x801   :  { %v3202_v16 = vadd.f32 1e-05, %v3198_v29  ;;  %v3199_v19 = vsub.f32 %v3195_v31, %v3197_v58 }
 0x803   :  { %21729 = vrsqrt.f32 %v3202_v16  ;;  %v3203_v41 = vadd.f32 1e-05, %v3199_v19 }
 0x805   :  { %21731 = vrsqrt.f32 %v3203_v41  ;;  %v22855_v41 = vsub.s32 6, %v22290_v1 }
 0x810   :  { %v21730_v59 = vpop.eup %21729 }
 0x811   :  { %v3206_v4 = vmul.f32 %v21730_v59, %v3200_v44  ;;  %v3427_v59 = vrot.slane %v22806_v55, %v22855_v41 }
 0x812   :  { %v21732_v6 = vpop.eup %21731 }
 0x813   :  { %v3207_v36 = vmul.f32 %v21732_v6, %v3201_v45  ;;  %v3212_v7 = vmul.f32 %v3211_v20, %v3206_v4  ;;  %v22860_v45 = vsub.s32 7, %v22290_v1 }
 0x815   :  { %v3213_v11 = vmul.f32 %v3211_v20, %v3207_v36  ;;  %v3218_v12 = vadd.f32 %v3217_v5, %v3212_v7 }
 0x817   :  { %v3219_v13 = vadd.f32 %v3217_v5, %v3213_v11  ;;  %20559 = vmatprep.mubr.msk.f32.mxu1 %vm101_vm7, %v3218_v12  ;;  %v3433_v11 = vrot.slane %v22806_v55, %v22860_v45  ;;  %v3462_v55 = vrot.slane %v19486_v26, %v22293_v2 }
 0x819   :  { %20560 = vmatmul.mubr.msk.f32.vlgmr.msra.gmra.mxu1 %vm101_vm7, %v3219_v13 }
 0x81a   :  { %20582 = vmatpush3.msra.mxu1 %v3440_v57 }
 0x81b   :  { %20583 = vmatprep.subr.mxu1 %v3439_v15 }
 0x81c   :  { %20584 = vmatpush3.msra.mxu1 %v3439_v15 }
 0x81d   :  { %20585 = vmatprep.subr.mxu1 %v3438_v52 }
 0x81e   :  { %20586 = vmatpush3.msra.mxu1 %v3438_v52 }
 0x81f   :  { %20587 = vmatprep.subr.mxu1 %v3437_v53 }
 0x820   :  { %20588 = vmatpush3.msra.mxu1 %v3437_v53 }
 0x821   :  { %20592 = vmatprep.subr.mxu1 %v22154_v9 }
 0x8d9   :  { %v20561_v32 = vpop.f32.mrf.mxu1 }
 0x8da   :  { %v3302_v56 = vadd.f32 %v20561_v32, %v3223_v47 }
 0x8db   :  { %v3296_v33 = vpop.f32.mrf.mxu1 }
 0x8dc   :  { %v3297_v34 = vadd.f32 %v3296_v33, %v3223_v47  ;;  %v3306_v27 = vmax.f32 %v3302_v56, 0.0 }
 0x8de   :  { %v3305_v37 = vmax.f32 %v3297_v34, 0.0 }
 0x8e0   :  { %20578 = vmatprep.mubr.msk.f32.mxu0 %vm187_vm8, %v3305_v37 }
 0x8e1   :  { %20579 = vmatmul.mubr.msk.f32.vlgmr.msra.gmra.mxu0 %vm187_vm8, %v3306_v27 }
 0x8e2   :  { %20604 = vmatprep.mubr.msk.f32.mxu0 %vm22156_vm9, %v22154_v9 }
 0x9a1   :  { %v20580_v61 = vpop.f32.mrf.mxu0 }
 0x9a2   :  { %v3389_v22 = vadd.f32 %v20580_v61, %v3310_v38 }
 0x9a3   :  { %v3383_v23 = vpop.f32.mrf.mxu0 }
 0x9a4   :  { %v3393_v40 = vadd.f32 %v3389_v22, %v3219_v13  ;;  %v3384_v3 = vadd.f32 %v3383_v23, %v3310_v38 }
 0x9a6   :  { %v3392_v42 = vadd.f32 %v3384_v3, %v3218_v12  ;;  %v3397_v46 = vsel %vm101_vm7, %v3393_v40, 0.0  ;;  %v3403_v10 = vmul.f32 %v3393_v40, %v3393_v40 }
 0x9a7   :  { %3398 = vadd.xlane.f32.xlu1 %v3397_v46 }
 0x9a8   :  { %v3394_v63 = vsel %vm101_vm7, %v3392_v42, 0.0  ;;  %v3402_v8 = vmul.f32 %v3392_v42, %v3392_v42  ;;  %v3407_v51 = vsel %vm101_vm7, %v3403_v10, 0.0 }
 0x9a9   :  { %3395 = vadd.xlane.f32.xlu0 %v3394_v63 }
 0x9aa   :  { %v3404_v62 = vsel %vm101_vm7, %v3402_v8, 0.0 }
 0x9ab   :  { %3408 = vadd.xlane.f32.xlu1 %v3407_v51 }
 0x9ad   :  { %3405 = vadd.xlane.f32.xlu0 %v3404_v62 }
 0xa30   :  { %v3399_v24 = vpop.xlane.xlu1 %3398 }
 0xa31   :  { %v3401_v54 = vmul.f32 0.03125, %v3399_v24 }
 0xa32   :  { %v3396_v17 = vpop.xlane.xlu0 %3395 }
 0xa33   :  { %v3400_v18 = vmul.f32 0.03125, %v3396_v17  ;;  %v3413_v39 = vmul.f32 %v3401_v54, %v3401_v54  ;;  %v3417_v44 = vsub.f32 %v3393_v40, %v3401_v54 }
 0xa34   :  { %v3409_v35 = vpop.xlane.xlu1 %3408 }
 0xa35   :  { %v3411_v21 = vmul.f32 0.03125, %v3409_v35  ;;  %v3412_v30 = vmul.f32 %v3400_v18, %v3400_v18  ;;  %v3416_v4 = vsub.f32 %v3392_v42, %v3400_v18 }
 0xa36   :  { %v3406_v48 = vpop.xlane.xlu0 %3405 }
 0xa37   :  { %v3415_v58 = vsub.f32 %v3411_v21, %v3413_v39  ;;  %v3410_v29 = vmul.f32 0.03125, %v3406_v48 }
 0xa39   :  { %v3419_v31 = vadd.f32 1e-05, %v3415_v58  ;;  %v3414_v16 = vsub.f32 %v3410_v29, %v3412_v30 }
 0xa3b   :  { %21733 = vrsqrt.f32 %v3419_v31  ;;  %v3418_v19 = vadd.f32 1e-05, %v3414_v16 }
 0xa3d   :  { %21735 = vrsqrt.f32 %v3418_v19 }
 0xa48   :  { %v21734_v20 = vpop.eup %21733 }
 0xa49   :  { %v3423_v5 = vmul.f32 %v21734_v20, %v3417_v44 }
 0xa4a   :  { %v21736_v6 = vpop.eup %21735 }
 0xa4b   :  { %v3422_v36 = vmul.f32 %v21736_v6, %v3416_v4  ;;  %v3429_v7 = vmul.f32 %v3427_v59, %v3423_v5 }
 0xa4d   :  { %v3428_v12 = vmul.f32 %v3427_v59, %v3422_v36  ;;  %v22866_v14 = vadd.f32 %v3433_v11, %v3429_v7 }
 0xa4f   :  { %v22864_v13 = vadd.f32 %v3433_v11, %v3428_v12 }
 0xa51   :  { %20589 = vmatprep.mubr.msk.f32.mxu1 %vm101_vm7, %v22864_v13 }
 0xa52   :  { %20590 = vmatmul.mubr.msk.f32.vlgmr.msra.gmra.mxu1 %vm101_vm7, %v22866_v14 }
 0xa53   :  { %20594 = vmatprep.mubr.msk.f32.mxu1 %vm22156_vm9, %v22154_v9 }
 0xb12   :  { %v20591_v50 = vpop.f32.mrf.mxu1 }
 0xb13   :  { %v22878_v25 = vadd.f32 %v20591_v50, %v3462_v55 }
 0xb14   :  { %v3535_v47 = vpop.f32.mrf.mxu1 }
 0xb15   :  { %v22880_v32 = vadd.f32 %v3535_v47, %v3462_v55  ;;  %3548 = vrot.lane.b32.xlu1 %v22878_v25, %s22151_s14 }
 0xb17   :  { %3546 = vrot.lane.b32.xlu0 %v22880_v32, %s22151_s14 }
 0xb19   :  { %3550 = vrot.lane.b32.xlu1 %v22880_v32, %s22150_s1 }
 0xb1b   :  { %3552 = vrot.lane.b32.xlu0 %v22878_v25, %s22150_s1 }
 0xb1d   :  { %3554 = vrot.lane.b32.xlu1 %v22880_v32, %s22152_s15 }
 0xb1f   :  { %3556 = vrot.lane.b32.xlu0 %v22878_v25, %s22152_s15 }
 0xb21   :  { %3558 = vrot.lane.b32.xlu1 %v22880_v32, %s22153_s16 }
 0xb23   :  { %3560 = vrot.lane.b32.xlu0 %v22878_v25, %s22153_s16 }
 0xb25   :  { %3562 = vrot.lane.b32.xlu1 %v22880_v32, %s22155_s17 }
 0xb27   :  { %3564 = vrot.lane.b32.xlu0 %v22878_v25, %s22155_s17 }
 0xb29   :  { %3566 = vrot.lane.b32.xlu1 %v22880_v32, %s22157_s18 }
 0xb2b   :  { %3568 = vrot.lane.b32.xlu0 %v22878_v25, %s22157_s18 }
 0xb2d   :  { %3570 = vrot.lane.b32.xlu1 %v22880_v32, %s22158_s20 }
 0xb2f   :  { %3572 = vrot.lane.b32.xlu0 %v22878_v25, %s22158_s20 }
 0xb31   :  { %3574 = vrot.lane.b32.xlu1 %v22880_v32, %s22159_s21 }
 0xb33   :  { %3650 = vrot.lane.b32.xlu0 %v22878_v25, %s22159_s21 }
 0xb87   :  { %v22914_v56 = vpop.permute.xlu1 %3548 }
 0xb88   :  { %3802 = vrot.lane.b32.xlu0 %v22914_v56, %s22159_s21 }
 0xb89   :  { %v22918_v33 = vpop.permute.xlu0 %3546 }
 0xb8a   :  { %3726 = vrot.lane.b32.xlu1 %v22918_v33, %s22159_s21 }
 0xb8b   :  { %v22922_v34 = vpop.permute.xlu1 %3550 }
 0xb8d   :  { %v22924_v37 = vpop.permute.xlu0 %3552 }
 0xb8e   :  { %3878 = vrot.lane.b32.xlu1 %v22922_v34, %s22159_s21  ;;  %3954 = vrot.lane.b32.xlu0 %v22924_v37, %s22159_s21 }
 0xb8f   :  { %v22930_v27 = vpop.permute.xlu1 %3554 }
 0xb91   :  { %v22932_v38 = vpop.permute.xlu0 %3556 }
 0xb92   :  { %4030 = vrot.lane.b32.xlu1 %v22930_v27, %s22159_s21  ;;  %4106 = vrot.lane.b32.xlu0 %v22932_v38, %s22159_s21 }
 0xb93   :  { %v22938_v61 = vpop.permute.xlu1 %3558 }
 0xb95   :  { %v22940_v22 = vpop.permute.xlu0 %3560 }
 0xb96   :  { %4182 = vrot.lane.b32.xlu1 %v22938_v61, %s22159_s21  ;;  %4258 = vrot.lane.b32.xlu0 %v22940_v22, %s22159_s21 }
 0xb97   :  { %v22946_v23 = vpop.permute.xlu1 %3562 }
 0xb99   :  { %v22948_v40 = vpop.permute.xlu0 %3564 }
 0xb9a   :  { %4334 = vrot.lane.b32.xlu1 %v22946_v23, %s22159_s21  ;;  %4410 = vrot.lane.b32.xlu0 %v22948_v40, %s22159_s21 }
 0xb9b   :  { %v22954_v3 = vpop.permute.xlu1 %3566 }
 0xb9d   :  { %v22956_v42 = vpop.permute.xlu0 %3568 }
 0xb9e   :  { %4486 = vrot.lane.b32.xlu1 %v22954_v3, %s22159_s21  ;;  %4562 = vrot.lane.b32.xlu0 %v22956_v42, %s22159_s21 }
 0xb9f   :  { %v22962_v46 = vpop.permute.xlu1 %3570 }
 0xba1   :  { %v22964_v10 = vpop.permute.xlu0 %3572 }
 0xba2   :  { %4638 = vrot.lane.b32.xlu1 %v22962_v46, %s22159_s21  ;;  %4714 = vrot.lane.b32.xlu0 %v22964_v10, %s22159_s21 }
 0xba3   :  { %v3575_v63 = vpop.permute.xlu1 %3574 }
 0xba4   :  { %20593 = vmatpush3.xpose.msk.msra.mxu1 %vm407_vm10, %v3575_v63 }
 0xba5   :  { %20597 = vmatprep.subr.mxu1 %v22154_v9  ;;  %v3651_v8 = vpop.permute.xlu0 %3650 }
 0xba7   :  { %20595 = vmatmul.mubr.msk.f32.vlgmr.msra.gmra.mxu1 %vm407_vm10, %v22880_v32 }
 0xba8   :  { %20598 = vmatpush3.xpose.msk.msra.mxu1 %vm407_vm10, %v3651_v8  ;;  %20599 = vmatprep.mubr.msk.f32.mxu1 %vm22156_vm9, %v22154_v9 }
 0xba9   :  { %20607 = vmatprep.subr.mxu1 %v22154_v9 }
 0xbab   :  { %20600 = vmatmul.mubr.msk.f32.vlgmr.msra.gmra.mxu1 %vm407_vm10, %v22878_v25 }
 0xbac   :  { %20609 = vmatprep.mubr.msk.f32.mxu1 %vm22156_vm9, %v22154_v9 }
 0xbfa   :  { %v3803_v51 = vpop.permute.xlu0 %3802 }
 0xbfb   :  { %20608 = vmatpush3.xpose.msk.msra.mxu1 %vm407_vm10, %v3803_v51 }
 0xbfc   :  { %v3727_v62 = vpop.permute.xlu1 %3726  ;;  %20617 = vmatprep.subr.mxu1 %v22154_v9 }
 0xbfd   :  { %20603 = vmatpush3.xpose.msk.msra.mxu0 %vm407_vm10, %v3727_v62 }
 0xbfe   :  { %20610 = vmatmul.mubr.msk.f32.vlgmr.msra.gmra.mxu1 %vm407_vm10, %v22914_v56  ;;  %20612 = vmatprep.subr.mxu0 %v22154_v9 }
 0xbff   :  { %20619 = vmatprep.mubr.msk.f32.mxu1 %vm22156_vm9, %v22154_v9 }
 0xc00   :  { %20605 = vmatmul.mubr.msk.f32.vlgmr.msra.gmra.mxu0 %vm407_vm10, %v22918_v33  ;;  %v3879_v57 = vpop.permute.xlu1 %3878  ;;  %v3955_v15 = vpop.permute.xlu0 %3954 }
 0xc01   :  { %20613 = vmatpush3.xpose.msk.msra.mxu0 %vm407_vm10, %v3879_v57  ;;  %20618 = vmatpush3.xpose.msk.msra.mxu1 %vm407_vm10, %v3955_v15 }
 0xc02   :  { %20614 = vmatprep.mubr.msk.f32.mxu0 %vm22156_vm9, %v22154_v9  ;;  %20622 = vmatprep.subr.mxu0 %v22154_v9 }
 0xc03   :  { %20627 = vmatprep.subr.mxu1 %v22154_v9 }
 0xc04   :  { %20615 = vmatmul.mubr.msk.f32.vlgmr.msra.gmra.mxu0 %vm407_vm10, %v22922_v34  ;;  %v4031_v52 = vpop.permute.xlu1 %4030  ;;  %20620 = vmatmul.mubr.msk.f32.vlgmr.msra.gmra.mxu1 %vm407_vm10, %v22924_v37  ;;  %v4107_v53 = vpop.permute.xlu0 %4106 }
 0xc05   :  { %20623 = vmatpush3.xpose.msk.msra.mxu0 %vm407_vm10, %v4031_v52  ;;  %20628 = vmatpush3.xpose.msk.msra.mxu1 %vm407_vm10, %v4107_v53 }
 0xc06   :  { %20624 = vmatprep.mubr.msk.f32.mxu0 %vm22156_vm9, %v22154_v9  ;;  %20629 = vmatprep.mubr.msk.f32.mxu1 %vm22156_vm9, %v22154_v9 }
 0xc07   :  { %20632 = vmatprep.subr.mxu0 %v22154_v9  ;;  %20637 = vmatprep.subr.mxu1 %v22154_v9 }
 0xc08   :  { %20625 = vmatmul.mubr.msk.f32.vlgmr.msra.gmra.mxu0 %vm407_vm10, %v22930_v27  ;;  %v4183_v24 = vpop.permute.xlu1 %4182  ;;  %20630 = vmatmul.mubr.msk.f32.vlgmr.msra.gmra.mxu1 %vm407_vm10, %v22932_v38  ;;  %v4259_v54 = vpop.permute.xlu0 %4258 }
 0xc09   :  { %20633 = vmatpush3.xpose.msk.msra.mxu0 %vm407_vm10, %v4183_v24  ;;  %20638 = vmatpush3.xpose.msk.msra.mxu1 %vm407_vm10, %v4259_v54 }
 0xc0a   :  { %20634 = vmatprep.mubr.msk.f32.mxu0 %vm22156_vm9, %v22154_v9  ;;  %20639 = vmatprep.mubr.msk.f32.mxu1 %vm22156_vm9, %v22154_v9 }
 0xc0b   :  { %20642 = vmatprep.subr.mxu0 %v22154_v9  ;;  %20647 = vmatprep.subr.mxu1 %v22154_v9 }
 0xc0c   :  { %20635 = vmatmul.mubr.msk.f32.vlgmr.msra.gmra.mxu0 %vm407_vm10, %v22938_v61  ;;  %v4335_v17 = vpop.permute.xlu1 %4334  ;;  %20640 = vmatmul.mubr.msk.f32.vlgmr.msra.gmra.mxu1 %vm407_vm10, %v22940_v22  ;;  %v4411_v18 = vpop.permute.xlu0 %4410 }
 0xc0d   :  { %20643 = vmatpush3.xpose.msk.msra.mxu0 %vm407_vm10, %v4335_v17  ;;  %20648 = vmatpush3.xpose.msk.msra.mxu1 %vm407_vm10, %v4411_v18 }
 0xc0e   :  { %20644 = vmatprep.mubr.msk.f32.mxu0 %vm22156_vm9, %v22154_v9  ;;  %20649 = vmatprep.mubr.msk.f32.mxu1 %vm22156_vm9, %v22154_v9 }
 0xc0f   :  { %20652 = vmatprep.subr.mxu0 %v22154_v9  ;;  %20657 = vmatprep.subr.mxu1 %v22154_v9 }
 0xc10   :  { %20645 = vmatmul.mubr.msk.f32.vlgmr.msra.gmra.mxu0 %vm407_vm10, %v22946_v23  ;;  %v4487_v35 = vpop.permute.xlu1 %4486  ;;  %20650 = vmatmul.mubr.msk.f32.vlgmr.msra.gmra.mxu1 %vm407_vm10, %v22948_v40  ;;  %v4563_v39 = vpop.permute.xlu0 %4562 }
 0xc11   :  { %20653 = vmatpush3.xpose.msk.msra.mxu0 %vm407_vm10, %v4487_v35  ;;  %20658 = vmatpush3.xpose.msk.msra.mxu1 %vm407_vm10, %v4563_v39 }
 0xc12   :  { %20654 = vmatprep.mubr.msk.f32.mxu0 %vm22156_vm9, %v22154_v9  ;;  %20659 = vmatprep.mubr.msk.f32.mxu1 %vm22156_vm9, %v22154_v9 }
 0xc13   :  { %20662 = vmatprep.subr.mxu0 %v22154_v9  ;;  %20667 = vmatprep.subr.mxu1 %v22154_v9 }
 0xc14   :  { %20655 = vmatmul.mubr.msk.f32.vlgmr.msra.gmra.mxu0 %vm407_vm10, %v22954_v3  ;;  %v4639_v21 = vpop.permute.xlu1 %4638  ;;  %20660 = vmatmul.mubr.msk.f32.vlgmr.msra.gmra.mxu1 %vm407_vm10, %v22956_v42  ;;  %v4715_v48 = vpop.permute.xlu0 %4714 }
 0xc15   :  { %20663 = vmatpush3.xpose.msk.msra.mxu0 %vm407_vm10, %v4639_v21  ;;  %20668 = vmatpush3.xpose.msk.msra.mxu1 %vm407_vm10, %v4715_v48 }
 0xc16   :  { %20664 = vmatprep.mubr.msk.f32.mxu0 %vm22156_vm9, %v22154_v9  ;;  %20669 = vmatprep.mubr.msk.f32.mxu1 %vm22156_vm9, %v22154_v9 }
 0xc17   :  { %20672 = vmatprep.subr.mxu0 %v22154_v9  ;;  %20677 = vmatprep.subr.mxu1 %v22154_v9 }
 0xc18   :  { %20665 = vmatmul.mubr.msk.f32.vlgmr.msra.gmra.mxu0 %vm407_vm10, %v22962_v46  ;;  %20670 = vmatmul.mubr.msk.f32.vlgmr.msra.gmra.mxu1 %vm407_vm10, %v22964_v10 }
 0xc19   :  { %20674 = vmatprep.mubr.msk.f32.mxu0 %vm22156_vm9, %v22154_v9  ;;  %20679 = vmatprep.mubr.msk.f32.mxu1 %vm22156_vm9, %v22154_v9 }
 0xc67   :  { %v23066_v30 = vpop.f32.mrf.mxu1 }
 0xc68   :  { %v4790_v58 = vsel %vm1622_vm11, %v23066_v30, -inf }
 0xc69   :  { %v20596_v29 = vpop.f32.mrf.mxu1  ;;  %4791 = vmax.xlane.f32.xlu1 %v4790_v58 }
 0xc6b   :  { %v23070_v31 = vpop.f32.mrf.mxu1 }
 0xc6c   :  { %v4793_v16 = vsel %vm1622_vm11, %v23070_v31, -inf }
 0xc6d   :  { %4794 = vmax.xlane.f32.xlu0 %v4793_v16  ;;  %v20601_v19 = vpop.f32.mrf.mxu1 }
 0xcbe   :  { %v23074_v44 = vpop.f32.mrf.mxu1 }
 0xcbf   :  { %v4799_v20 = vsel %vm1622_vm11, %v23074_v44, -inf }
 0xcc0   :  { %v23078_v59 = vpop.f32.mrf.mxu0  ;;  %4800 = vmax.xlane.f32.xlu1 %v4799_v20  ;;  %v20611_v4 = vpop.f32.mrf.mxu1 }
 0xcc1   :  { %v4796_v5 = vsel %vm1622_vm11, %v23078_v59, -inf }
 0xcc2   :  { %v20606_v6 = vpop.f32.mrf.mxu0  ;;  %4797 = vmax.xlane.f32.xlu0 %v4796_v5 }
 0xcc4   :  { %v23082_v36 = vpop.f32.mrf.mxu0  ;;  %v23084_v7 = vpop.f32.mrf.mxu1 }
 0xcc5   :  { %v4802_v11 = vsel %vm1622_vm11, %v23082_v36, -inf  ;;  %v4805_v12 = vsel %vm1622_vm11, %v23084_v7, -inf }
 0xcc6   :  { %v20616_v26 = vpop.f32.mrf.mxu0  ;;  %4803 = vmax.xlane.f32.xlu0 %v4802_v11  ;;  %4806 = vmax.xlane.f32.xlu1 %v4805_v12  ;;  %v20621_v55 = vpop.f32.mrf.mxu1 }
 0xcc8   :  { %v23090_v50 = vpop.f32.mrf.mxu0  ;;  %v23092_v47 = vpop.f32.mrf.mxu1 }
 0xcc9   :  { %v4808_v63 = vsel %vm1622_vm11, %v23090_v50, -inf  ;;  %v4811_v8 = vsel %vm1622_vm11, %v23092_v47, -inf }
 0xcca   :  { %v20626_v51 = vpop.f32.mrf.mxu0  ;;  %4809 = vmax.xlane.f32.xlu0 %v4808_v63  ;;  %4812 = vmax.xlane.f32.xlu1 %v4811_v8  ;;  %v20631_v62 = vpop.f32.mrf.mxu1 }
 0xccc   :  { %v23098_v57 = vpop.f32.mrf.mxu0  ;;  %v23100_v15 = vpop.f32.mrf.mxu1 }
 0xccd   :  { %v4814_v52 = vsel %vm1622_vm11, %v23098_v57, -inf  ;;  %v4817_v53 = vsel %vm1622_vm11, %v23100_v15, -inf }
 0xcce   :  { %v20636_v24 = vpop.f32.mrf.mxu0  ;;  %4815 = vmax.xlane.f32.xlu0 %v4814_v52  ;;  %4818 = vmax.xlane.f32.xlu1 %v4817_v53  ;;  %v20641_v54 = vpop.f32.mrf.mxu1 }
 0xcd0   :  { %v23106_v17 = vpop.f32.mrf.mxu0  ;;  %v23108_v18 = vpop.f32.mrf.mxu1 }
 0xcd1   :  { %v4820_v35 = vsel %vm1622_vm11, %v23106_v17, -inf  ;;  %v4823_v39 = vsel %vm1622_vm11, %v23108_v18, -inf }
 0xcd2   :  { %v20646_v21 = vpop.f32.mrf.mxu0  ;;  %4821 = vmax.xlane.f32.xlu0 %v4820_v35  ;;  %4824 = vmax.xlane.f32.xlu1 %v4823_v39  ;;  %v20651_v48 = vpop.f32.mrf.mxu1 }
 0xcd4   :  { %v23114_v58 = vpop.f32.mrf.mxu0  ;;  %v23116_v29 = vpop.f32.mrf.mxu1 }
 0xcd5   :  { %v4826_v16 = vsel %vm1622_vm11, %v23114_v58, -inf  ;;  %v4829_v19 = vsel %vm1622_vm11, %v23116_v29, -inf }
 0xcd6   :  { %v20656_v20 = vpop.f32.mrf.mxu0  ;;  %4827 = vmax.xlane.f32.xlu0 %v4826_v16  ;;  %4830 = vmax.xlane.f32.xlu1 %v4829_v19  ;;  %v20661_v4 = vpop.f32.mrf.mxu1 }
 0xcd8   :  { %v23122_v5 = vpop.f32.mrf.mxu0  ;;  %v23124_v6 = vpop.f32.mrf.mxu1 }
 0xcd9   :  { %v4832_v11 = vsel %vm1622_vm11, %v23122_v5, -inf  ;;  %v4835_v12 = vsel %vm1622_vm11, %v23124_v6, -inf }
 0xcda   :  { %v20666_v26 = vpop.f32.mrf.mxu0  ;;  %4833 = vmax.xlane.f32.xlu0 %v4832_v11  ;;  %4836 = vmax.xlane.f32.xlu1 %v4835_v12  ;;  %v20671_v55 = vpop.f32.mrf.mxu1 }
 0xceb   :  { %5042 = vrot.lane.b32.xlu1 %v22878_v25, %s22160_s0 }
 0xcef   :  { %5118 = vrot.lane.b32.xlu1 %v22918_v33, %s22160_s0 }
 0xcf0   :  { %4966 = vrot.lane.b32.xlu0 %v22880_v32, %s22160_s0 }
 0xcf2   :  { %v4792_v63 = vpop.xlane.xlu1 %4791 }
 0xcf3   :  { %5194 = vrot.lane.b32.xlu1 %v22914_v56, %s22160_s0  ;;  %v4838_v8 = vsub.f32 %v23066_v30, %v4792_v63 }
 0xcf5   :  { %v4854_v51 = vmul.f32 1.442695, %v4838_v8 }
 0xcf6   :  { %v4795_v56 = vpop.xlane.xlu0 %4794 }
 0xcf7   :  { %5270 = vrot.lane.b32.xlu1 %v22922_v34, %s22160_s0  ;;  %21737 = vpow2.f32 %v4854_v51  ;;  %v4839_v33 = vsub.f32 %v23070_v31, %v4795_v56 }
 0xcf9   :  { %v4856_v34 = vmul.f32 1.442695, %v4839_v33 }
 0xcfb   :  { %5346 = vrot.lane.b32.xlu1 %v22924_v37, %s22160_s0  ;;  %21739 = vpow2.f32 %v4856_v34 }
 0xcff   :  { %5422 = vrot.lane.b32.xlu1 %v22930_v27, %s22160_s0 }
 0xd03   :  { %5498 = vrot.lane.b32.xlu1 %v22932_v38, %s22160_s0 }
 0xd04   :  { %v23149_v25 = vpop.eup %21737 }
 0xd05   :  { %v4886_v32 = vsel %vm1622_vm11, %v23149_v25, 0.0 }
 0xd07   :  { %5574 = vrot.lane.b32.xlu1 %v22938_v61, %s22160_s0 }
 0xd08   :  { %v23156_v37 = vpop.eup %21739 }
 0xd09   :  { %v4889_v27 = vsel %vm1622_vm11, %v23156_v37, 0.0 }
 0xd0b   :  { %5650 = vrot.lane.b32.xlu1 %v22940_v22, %s22160_s0 }
 0xd0f   :  { %4887 = vadd.xlane.f32.xlu0 %v4886_v32 }
 0xd2f   :  { %4890 = vadd.xlane.f32.xlu1 %v4889_v27 }
 0xd49   :  { %v4801_v38 = vpop.xlane.xlu1 %4800 }
 0xd4a   :  { %v4841_v61 = vsub.f32 %v23074_v44, %v4801_v38 }
 0xd4b   :  { %v4798_v30 = vpop.xlane.xlu0 %4797 }
 0xd4c   :  { %v4860_v22 = vmul.f32 1.442695, %v4841_v61  ;;  %v4840_v62 = vsub.f32 %v23078_v59, %v4798_v30 }
 0xd4e   :  { %21741 = vpow2.f32 %v4860_v22  ;;  %v4858_v52 = vmul.f32 1.442695, %v4840_v62 }
 0xd4f   :  { %v4807_v53 = vpop.xlane.xlu1 %4806  ;;  %v4804_v24 = vpop.xlane.xlu0 %4803 }
 0xd50   :  { %21743 = vpow2.f32 %v4858_v52  ;;  %v4843_v31 = vsub.f32 %v23084_v7, %v4807_v53  ;;  %v4842_v54 = vsub.f32 %v23082_v36, %v4804_v24 }
 0xd52   :  { %v4864_v35 = vmul.f32 1.442695, %v4843_v31  ;;  %v4862_v39 = vmul.f32 1.442695, %v4842_v54 }
 0xd53   :  { %v4813_v21 = vpop.xlane.xlu1 %4812  ;;  %v4810_v48 = vpop.xlane.xlu0 %4809 }
 0xd54   :  { %21745 = vpow2.f32 %v4864_v35  ;;  %v4845_v44 = vsub.f32 %v23092_v47, %v4813_v21  ;;  %v4844_v16 = vsub.f32 %v23090_v50, %v4810_v48 }
 0xd55   :  { %21747 = vpow2.f32 %v4862_v39 }
 0xd56   :  { %v4868_v59 = vmul.f32 1.442695, %v4845_v44  ;;  %v4866_v19 = vmul.f32 1.442695, %v4844_v16 }
 0xd57   :  { %v4819_v20 = vpop.xlane.xlu1 %4818  ;;  %v4816_v4 = vpop.xlane.xlu0 %4815 }
 0xd58   :  { %21749 = vpow2.f32 %v4868_v59  ;;  %v4847_v11 = vsub.f32 %v23100_v15, %v4819_v20  ;;  %v4846_v7 = vsub.f32 %v23098_v57, %v4816_v4 }
 0xd59   :  { %21751 = vpow2.f32 %v4866_v19 }
 0xd5a   :  { %v4872_v36 = vmul.f32 1.442695, %v4847_v11  ;;  %v4870_v12 = vmul.f32 1.442695, %v4846_v7 }
 0xd5b   :  { %v23168_v26 = vpop.eup %21741  ;;  %v4825_v55 = vpop.xlane.xlu1 %4824 }
 0xd5c   :  { %v4822_v63 = vpop.xlane.xlu0 %4821  ;;  %21753 = vpow2.f32 %v4872_v36  ;;  %v4849_v50 = vsub.f32 %v23108_v18, %v4825_v55  ;;  %v4895_v8 = vsel %vm1622_vm11, %v23168_v26, 0.0 }
 0xd5d   :  { %v4848_v47 = vsub.f32 %v23106_v17, %v4822_v63  ;;  %v23174_v51 = vpop.eup %21743  ;;  %21755 = vpow2.f32 %v4870_v12  ;;  %4896 = vadd.xlane.f32.xlu1 %v4895_v8 }
 0xd5e   :  { %v4876_v57 = vmul.f32 1.442695, %v4849_v50  ;;  %v4892_v32 = vsel %vm1622_vm11, %v23174_v51, 0.0 }
 0xd5f   :  { %v4874_v15 = vmul.f32 1.442695, %v4848_v47  ;;  %v4831_v56 = vpop.xlane.xlu1 %4830  ;;  %4893 = vadd.xlane.f32.xlu0 %v4892_v32 }
 0xd60   :  { %v4828_v33 = vpop.xlane.xlu0 %4827  ;;  %21757 = vpow2.f32 %v4876_v57  ;;  %v4851_v18 = vsub.f32 %v23116_v29, %v4831_v56 }
 0xd61   :  { %v4850_v17 = vsub.f32 %v23114_v58, %v4828_v33  ;;  %v23180_v34 = vpop.eup %21745  ;;  %21759 = vpow2.f32 %v4874_v15 }
 0xd62   :  { %v23182_v27 = vpop.eup %21747  ;;  %v4880_v38 = vmul.f32 1.442695, %v4851_v18  ;;  %v4901_v30 = vsel %vm1622_vm11, %v23180_v34, 0.0 }
 0xd63   :  { %v4878_v61 = vmul.f32 1.442695, %v4850_v17  ;;  %v4837_v22 = vpop.xlane.xlu1 %4836  ;;  %4902 = vadd.xlane.f32.xlu1 %v4901_v30  ;;  %v4898_v62 = vsel %vm1622_vm11, %v23182_v27, 0.0 }
 0xd64   :  { %v4834_v52 = vpop.xlane.xlu0 %4833  ;;  %21761 = vpow2.f32 %v4880_v38  ;;  %v4853_v29 = vsub.f32 %v23124_v6, %v4837_v22  ;;  %4899 = vadd.xlane.f32.xlu0 %v4898_v62 }
 0xd65   :  { %v23189_v58 = vpop.eup %21749  ;;  %21763 = vpow2.f32 %v4878_v61  ;;  %v4852_v57 = vsub.f32 %v23122_v5, %v4834_v52 }
 0xd66   :  { %v23191_v53 = vpop.eup %21751  ;;  %v4884_v24 = vmul.f32 1.442695, %v4853_v29  ;;  %v4907_v31 = vsel %vm1622_vm11, %v23189_v58, 0.0 }
 0xd67   :  { %v5043_v54 = vpop.permute.xlu1 %5042  ;;  %4908 = vadd.xlane.f32.xlu1 %v4907_v31  ;;  %v4904_v35 = vsel %vm1622_vm11, %v23191_v53, 0.0  ;;  %v4882_v15 = vmul.f32 1.442695, %v4852_v57 }
 0xd68   :  { %v4967_v39 = vpop.permute.xlu0 %4966  ;;  %21765 = vpow2.f32 %v4884_v24  ;;  %4905 = vadd.xlane.f32.xlu0 %v4904_v35  ;;  %20678 = vmatpush3.msra.mxu1 %v5043_v54 }
 0xd69   :  { %20673 = vmatpush3.msra.mxu0 %v4967_v39  ;;  %v23197_v6 = vpop.eup %21753  ;;  %20687 = vmatprep.subr.mxu1 %v22154_v9 }
 0xd6a   :  { %20682 = vmatprep.subr.mxu0 %v22154_v9  ;;  %v23200_v21 = vpop.eup %21755  ;;  %v4913_v48 = vsel %vm1622_vm11, %v23197_v6, 0.0 }
 0xd6b   :  { %4914 = vadd.xlane.f32.xlu1 %v4913_v48  ;;  %v4910_v44 = vsel %vm1622_vm11, %v23200_v21, 0.0  ;;  %v5119_v63 = vpop.permute.xlu1 %5118 }
 0xd6c   :  { %4911 = vadd.xlane.f32.xlu0 %v4910_v44 }
 0xd6d   :  { %v23207_v16 = vpop.eup %21757 }
 0xd6e   :  { %v23209_v59 = vpop.eup %21759  ;;  %v4919_v19 = vsel %vm1622_vm11, %v23207_v16, 0.0 }
 0xd6f   :  { %4920 = vadd.xlane.f32.xlu1 %v4919_v19  ;;  %v4916_v20 = vsel %vm1622_vm11, %v23209_v59, 0.0  ;;  %v5195_v50 = vpop.permute.xlu1 %5194 }
 0xd70   :  { %4917 = vadd.xlane.f32.xlu0 %v4916_v20 }
 0xd71   :  { %v23215_v4 = vpop.eup %21761 }
 0xd72   :  { %v23217_v11 = vpop.eup %21763  ;;  %v4925_v7 = vsel %vm1622_vm11, %v23215_v4, 0.0 }
 0xd73   :  { %4926 = vadd.xlane.f32.xlu1 %v4925_v7  ;;  %v4922_v36 = vsel %vm1622_vm11, %v23217_v11, 0.0  ;;  %v5271_v47 = vpop.permute.xlu1 %5270 }
 0xd74   :  { %4923 = vadd.xlane.f32.xlu0 %v4922_v36 }
 0xd75   :  { %v23223_v12 = vpop.eup %21765 }
 0xd76   :  { %v4931_v55 = vsel %vm1622_vm11, %v23223_v12, 0.0 }
 0xd78   :  { %4932 = vadd.xlane.f32.xlu0 %v4931_v55 }
 0xd84   :  { %5802 = vrot.lane.b32.xlu1 %v22948_v40, %s22160_s0  ;;  %v5347_v40 = vpop.permute.xlu1 %5346 }
 0xd88   :  { %5878 = vrot.lane.b32.xlu1 %v22954_v3, %s22160_s0  ;;  %v23238_v32 = vpop.permute.xlu1 %5422 }
 0xd8c   :  { %5954 = vrot.lane.b32.xlu1 %v22956_v42, %s22160_s0  ;;  %v5499_v56 = vpop.permute.xlu1 %5498 }
 0xd8e   :  { %5726 = vrot.lane.b32.xlu0 %v22946_v23, %s22160_s0 }
 0xd90   :  { %6030 = vrot.lane.b32.xlu1 %v22962_v46, %s22160_s0  ;;  %v23245_v23 = vpop.permute.xlu1 %5574 }
 0xd94   :  { %v23251_v33 = vpop.permute.xlu1 %5650 }
 0xd98   :  { %v4888_v8 = vpop.xlane.xlu0 %4887 }
 0xd99   :  { %21767 = vrcp.f32 %v4888_v8 }
 0xd9a   :  { %21769 = vpow2.f32 %v4882_v15 }
 0xda6   :  { %v21768_v3 = vpop.eup %21767 }
 0xda7   :  { %v4950_v42 = vmul.f32 %v21768_v3, %v23149_v25  ;;  %v23247_v46 = vpop.eup %21769 }
 0xda8   :  { %v4928_v5 = vsel %vm1622_vm11, %v23247_v46, 0.0 }
 0xda9   :  { %20675 = vmatmul.mubr.msk.f32.vlgmr.msra.gmra.mxu0 %vm1622_vm11, %v4950_v42 }
 0xdaa   :  { %20683 = vmatpush3.msra.mxu0 %v5119_v63  ;;  %20684 = vmatprep.mubr.msk.f32.mxu0 %vm22156_vm9, %v22154_v9 }
 0xdab   :  { %20692 = vmatprep.subr.mxu0 %v22154_v9 }
 0xdb4   :  { %4929 = vadd.xlane.f32.xlu1 %v4928_v5 }
 0xdb8   :  { %v4891_v25 = vpop.xlane.xlu1 %4890 }
 0xdb9   :  { %21771 = vrcp.f32 %v4891_v25 }
 0xdc5   :  { %6106 = vrot.lane.b32.xlu1 %v22964_v10, %s22160_s0 }
 0xdc6   :  { %v21772_v18 = vpop.eup %21771 }
 0xdc7   :  { %v4951_v17 = vmul.f32 %v21772_v18, %v23156_v37 }
 0xdc9   :  { %20680 = vmatmul.mubr.msk.f32.vlgmr.msra.gmra.mxu1 %vm1622_vm11, %v4951_v17 }
 0xdca   :  { %20688 = vmatpush3.msra.mxu1 %v5195_v50  ;;  %20689 = vmatprep.mubr.msk.f32.mxu1 %vm22156_vm9, %v22154_v9 }
 0xdcb   :  { %20697 = vmatprep.subr.mxu1 %v22154_v9 }
 0xde6   :  { %v4897_v38 = vpop.xlane.xlu1 %4896 }
 0xde7   :  { %21773 = vrcp.f32 %v4897_v38 }
 0xde8   :  { %v4894_v61 = vpop.xlane.xlu0 %4893 }
 0xde9   :  { %21775 = vrcp.f32 %v4894_v61 }
 0xdec   :  { %v4903_v30 = vpop.xlane.xlu1 %4902 }
 0xded   :  { %21777 = vrcp.f32 %v4903_v30  ;;  %v4900_v22 = vpop.xlane.xlu0 %4899 }
 0xdee   :  { %21779 = vrcp.f32 %v4900_v22 }
 0xdf0   :  { %v4909_v10 = vpop.xlane.xlu1 %4908 }
 0xdf1   :  { %21781 = vrcp.f32 %v4909_v10  ;;  %v4906_v62 = vpop.xlane.xlu0 %4905 }
 0xdf2   :  { %21783 = vrcp.f32 %v4906_v62 }
 0xdf4   :  { %v21774_v37 = vpop.eup %21773  ;;  %v4915_v52 = vpop.xlane.xlu1 %4914 }
 0xdf5   :  { %21785 = vrcp.f32 %v4915_v52  ;;  %v4912_v29 = vpop.xlane.xlu0 %4911  ;;  %v4953_v24 = vmul.f32 %v21774_v37, %v23168_v26 }
 0xdf6   :  { %v21776_v31 = vpop.eup %21775  ;;  %21787 = vrcp.f32 %v4912_v29 }
 0xdf7   :  { %20690 = vmatmul.mubr.msk.f32.vlgmr.msra.gmra.mxu1 %vm1622_vm11, %v4953_v24  ;;  %v4952_v54 = vmul.f32 %v21776_v31, %v23174_v51 }
 0xdf8   :  { %20698 = vmatpush3.msra.mxu1 %v5347_v40  ;;  %v4921_v35 = vpop.xlane.xlu1 %4920  ;;  %20699 = vmatprep.mubr.msk.f32.mxu1 %vm22156_vm9, %v22154_v9 }
 0xdf9   :  { %21789 = vrcp.f32 %v4921_v35  ;;  %v4918_v39 = vpop.xlane.xlu0 %4917  ;;  %20685 = vmatmul.mubr.msk.f32.vlgmr.msra.gmra.mxu0 %vm1622_vm11, %v4952_v54  ;;  %20707 = vmatprep.subr.mxu1 %v22154_v9 }
 0xdfa   :  { %v21778_v48 = vpop.eup %21777  ;;  %21791 = vrcp.f32 %v4918_v39  ;;  %20693 = vmatpush3.msra.mxu0 %v5271_v47  ;;  %20694 = vmatprep.mubr.msk.f32.mxu0 %vm22156_vm9, %v22154_v9 }
 0xdfb   :  { %v21780_v26 = vpop.eup %21779  ;;  %20702 = vmatprep.subr.mxu0 %v22154_v9  ;;  %v4955_v51 = vmul.f32 %v21778_v48, %v23180_v34 }
 0xdfc   :  { %v4927_v44 = vpop.xlane.xlu1 %4926  ;;  %v4954_v19 = vmul.f32 %v21780_v26, %v23182_v27 }
 0xdfd   :  { %21793 = vrcp.f32 %v4927_v44  ;;  %v4924_v20 = vpop.xlane.xlu0 %4923  ;;  %20700 = vmatmul.mubr.msk.f32.vlgmr.msra.gmra.mxu1 %vm1622_vm11, %v4955_v51 }
 0xdfe   :  { %v21782_v7 = vpop.eup %21781  ;;  %21795 = vrcp.f32 %v4924_v20  ;;  %20695 = vmatmul.mubr.msk.f32.vlgmr.msra.gmra.mxu0 %vm1622_vm11, %v4954_v19  ;;  %20708 = vmatpush3.msra.mxu1 %v5499_v56 }
 0xdff   :  { %v21784_v36 = vpop.eup %21783  ;;  %20703 = vmatpush3.msra.mxu0 %v23238_v32  ;;  %20709 = vmatprep.mubr.msk.f32.mxu1 %vm22156_vm9, %v22154_v9  ;;  %v4957_v34 = vmul.f32 %v21782_v7, %v23189_v58 }
 0xe00   :  { %20717 = vmatprep.subr.mxu1 %v22154_v9  ;;  %v5803_v27 = vpop.permute.xlu1 %5802  ;;  %20704 = vmatprep.mubr.msk.f32.mxu0 %vm22156_vm9, %v22154_v9  ;;  %v4956_v55 = vmul.f32 %v21784_v36, %v23191_v53 }
 0xe01   :  { %20712 = vmatprep.subr.mxu0 %v22154_v9  ;;  %v4933_v63 = vpop.xlane.xlu0 %4932  ;;  %20710 = vmatmul.mubr.msk.f32.vlgmr.msra.gmra.mxu1 %vm1622_vm11, %v4957_v34 }
 0xe02   :  { %v21786_v50 = vpop.eup %21785  ;;  %20705 = vmatmul.mubr.msk.f32.vlgmr.msra.gmra.mxu0 %vm1622_vm11, %v4956_v55  ;;  %20718 = vmatpush3.msra.mxu1 %v23251_v33  ;;  %21797 = vrcp.f32 %v4933_v63  ;;  %v3444_v55 = vld [vmem:[#allocation2 + $0xd8] sm:$0xff]  ;;  %v3443_v63 = vld [vmem:[#allocation2 + $0xd0] sm:$0xff] }
 0xe03   :  { %v21788_v47 = vpop.eup %21787  ;;  %20713 = vmatpush3.msra.mxu0 %v23245_v23  ;;  %20719 = vmatprep.mubr.msk.f32.mxu1 %vm22156_vm9, %v22154_v9  ;;  %v4959_v58 = vmul.f32 %v21786_v50, %v23197_v6  ;;  %v3442_v50 = vld [vmem:[#allocation2 + $0xc8] sm:$0xff] }
 0xe04   :  { %20727 = vmatprep.subr.mxu1 %v22154_v9  ;;  %v5879_v53 = vpop.permute.xlu1 %5878  ;;  %20714 = vmatprep.mubr.msk.f32.mxu0 %vm22156_vm9, %v22154_v9  ;;  %v4958_v8 = vmul.f32 %v21788_v47, %v23200_v21  ;;  %v3441_v47 = vld [vmem:[#allocation2 + $0xc0] sm:$0xff] }
 0xe05   :  { %20722 = vmatprep.subr.mxu0 %v22154_v9  ;;  %v5727_v57 = vpop.permute.xlu0 %5726  ;;  %20720 = vmatmul.mubr.msk.f32.vlgmr.msra.gmra.mxu1 %vm1622_vm11, %v4959_v58 }
 0xe06   :  { %v21790_v40 = vpop.eup %21789  ;;  %20715 = vmatmul.mubr.msk.f32.vlgmr.msra.gmra.mxu0 %vm1622_vm11, %v4958_v8  ;;  %20728 = vmatpush3.msra.mxu1 %v5803_v27 }
 0xe07   :  { %v21792_v15 = vpop.eup %21791  ;;  %20723 = vmatpush3.msra.mxu0 %v5727_v57  ;;  %20729 = vmatprep.mubr.msk.f32.mxu1 %vm22156_vm9, %v22154_v9  ;;  %v4961_v6 = vmul.f32 %v21790_v40, %v23207_v16 }
 0xe08   :  { %20737 = vmatprep.subr.mxu1 %v22154_v9  ;;  %v5955_v32 = vpop.permute.xlu1 %5954  ;;  %20724 = vmatprep.mubr.msk.f32.mxu0 %vm22156_vm9, %v22154_v9  ;;  %v4960_v21 = vmul.f32 %v21792_v15, %v23209_v59 }
 0xe09   :  { %20732 = vmatprep.subr.mxu0 %v22154_v9  ;;  %20730 = vmatmul.mubr.msk.f32.vlgmr.msra.gmra.mxu1 %vm1622_vm11, %v4961_v6 }
 0xe0a   :  { %v21794_v3 = vpop.eup %21793  ;;  %20725 = vmatmul.mubr.msk.f32.vlgmr.msra.gmra.mxu0 %vm1622_vm11, %v4960_v21  ;;  %20738 = vmatpush3.msra.mxu1 %v5955_v32 }
 0xe0b   :  { %v21796_v42 = vpop.eup %21795  ;;  %20733 = vmatpush3.msra.mxu0 %v5879_v53  ;;  %20739 = vmatprep.mubr.msk.f32.mxu1 %vm22156_vm9, %v22154_v9  ;;  %v4963_v16 = vmul.f32 %v21794_v3, %v23215_v4 }
 0xe0c   :  { %v6031_v56 = vpop.permute.xlu1 %6030  ;;  %20734 = vmatprep.mubr.msk.f32.mxu0 %vm22156_vm9, %v22154_v9  ;;  %20742 = vmatprep.subr.mxu0 %v22154_v9  ;;  %v4962_v59 = vmul.f32 %v21796_v42, %v23217_v11 }
 0xe0d   :  { %20740 = vmatmul.mubr.msk.f32.vlgmr.msra.gmra.mxu1 %vm1622_vm11, %v4963_v16  ;;  %20747 = vmatprep.subr.mxu1 %v22154_v9 }
 0xe0e   :  { %20735 = vmatmul.mubr.msk.f32.vlgmr.msra.gmra.mxu0 %vm1622_vm11, %v4962_v59  ;;  %20749 = vmatprep.mubr.msk.f32.mxu1 %vm22156_vm9, %v22154_v9 }
 0xe0f   :  { %20743 = vmatpush3.msra.mxu0 %v6031_v56  ;;  %20744 = vmatprep.mubr.msk.f32.mxu0 %vm22156_vm9, %v22154_v9  ;;  %v21798_v23 = vpop.eup %21797 }
 0xe10   :  { %v4965_v11 = vmul.f32 %v21798_v23, %v23223_v12  ;;  %20752 = vmatprep.subr.mxu0 %v3444_v55 }
 0xe3d   :  { %v4930_v4 = vpop.xlane.xlu1 %4929 }
 0xe3e   :  { %21799 = vrcp.f32 %v4930_v4 }
 0xe41   :  { %v6107_v5 = vpop.permute.xlu1 %6106 }
 0xe42   :  { %20748 = vmatpush3.msra.mxu1 %v6107_v5 }
 0xe43   :  { %20750 = vmatmul.mubr.msk.f32.vlgmr.msra.gmra.mxu1 %vm1622_vm11, %v4965_v11 }
 0xe4b   :  { %v21800_v33 = vpop.eup %21799 }
 0xe4c   :  { %v4964_v25 = vmul.f32 %v21800_v33, %v23247_v46 }
 0xe4e   :  { %20745 = vmatmul.mubr.msk.f32.vlgmr.msra.gmra.mxu0 %vm1622_vm11, %v4964_v25 }
 0xe4f   :  { %20753 = vmatpush3.msra.mxu0 %v3444_v55  ;;  %v3456_v55 = vld [vmem:[#allocation2 + $0x138] sm:$0xff] }
 0xe50   :  { %20754 = vmatprep.subr.mxu0 %v3443_v63 }
 0xe51   :  { %20755 = vmatpush3.msra.mxu0 %v3443_v63  ;;  %v3455_v63 = vld [vmem:[#allocation2 + $0x130] sm:$0xff] }
 0xe52   :  { %20756 = vmatprep.subr.mxu0 %v3442_v50 }
 0xe53   :  { %20757 = vmatpush3.msra.mxu0 %v3442_v50  ;;  %v3454_v50 = vld [vmem:[#allocation2 + $0x128] sm:$0xff] }
 0xe54   :  { %20758 = vmatprep.subr.mxu0 %v3441_v47 }
 0xe55   :  { %20759 = vmatpush3.msra.mxu0 %v3441_v47  ;;  %v3453_v47 = vld [vmem:[#allocation2 + $0x120] sm:$0xff] }
 0xe56   :  { %20774 = vmatprep.subr.mxu0 %v3456_v55 }
 0xe69   :  { %v23325_v18 = vpop.f32.mrf.mxu0 }
 0xe6b   :  { %v20676_v17 = vpop.f32.mrf.mxu0 }
 0xe89   :  { %v23327_v38 = vpop.f32.mrf.mxu1 }
 0xe8b   :  { %v20681_v61 = vpop.f32.mrf.mxu1 }
 0xeb7   :  { %v5266_v30 = vpop.f32.mrf.mxu1 }
 0xeb8   :  { %6186 = vrot.lane.b32.xlu1 %v5266_v30, %s22161_s22 }
 0xeb9   :  { %v5190_v22 = vpop.f32.mrf.mxu0  ;;  %v20691_v10 = vpop.f32.mrf.mxu1 }
 0xeba   :  { %6184 = vrot.lane.b32.xlu0 %v5190_v22, %s22161_s22 }
 0xebb   :  { %v20686_v12 = vpop.f32.mrf.mxu0 }
 0xebd   :  { %v5418_v62 = vpop.f32.mrf.mxu1 }
 0xebe   :  { %v5342_v37 = vpop.f32.mrf.mxu0  ;;  %6194 = vrot.lane.b32.xlu1 %v5418_v62, %s22149_s19 }
 0xebf   :  { %6192 = vrot.lane.b32.xlu0 %v5342_v37, %s22149_s19  ;;  %v20701_v46 = vpop.f32.mrf.mxu1 }
 0xec0   :  { %v20696_v52 = vpop.f32.mrf.mxu0 }
 0xec1   :  { %v5570_v29 = vpop.f32.mrf.mxu1 }
 0xec2   :  { %v5494_v24 = vpop.f32.mrf.mxu0  ;;  %6202 = vrot.lane.b32.xlu1 %v5570_v29, %s22162_s23  ;;  %v23364_v29 = vld [vmem:[%s25615_s3 + $0x8] sm:$0xff] }
 0xec3   :  { %6200 = vrot.lane.b32.xlu0 %v5494_v24, %s22162_s23  ;;  %v20711_v31 = vpop.f32.mrf.mxu1  ;;  %v6255_v24 = vrot.slane %v23364_v29, %v22801_v28 }
 0xec4   :  { %v20706_v54 = vpop.f32.mrf.mxu0 }
 0xec5   :  { %v5722_v35 = vpop.f32.mrf.mxu1 }
 0xec6   :  { %v5646_v39 = vpop.f32.mrf.mxu0  ;;  %6210 = vrot.lane.b32.xlu1 %v5722_v35, %s22163_s24 }
 0xec7   :  { %6208 = vrot.lane.b32.xlu0 %v5646_v39, %s22163_s24  ;;  %v20721_v48 = vpop.f32.mrf.mxu1 }
 0xec8   :  { %v20716_v26 = vpop.f32.mrf.mxu0 }
 0xec9   :  { %v5874_v51 = vpop.f32.mrf.mxu1 }
 0xeca   :  { %v5798_v44 = vpop.f32.mrf.mxu0  ;;  %6218 = vrot.lane.b32.xlu1 %v5874_v51, %s22164_s25 }
 0xecb   :  { %6216 = vrot.lane.b32.xlu0 %v5798_v44, %s22164_s25  ;;  %v20731_v19 = vpop.f32.mrf.mxu1 }
 0xecc   :  { %v20726_v20 = vpop.f32.mrf.mxu0 }
 0xecd   :  { %v6026_v7 = vpop.f32.mrf.mxu1 }
 0xece   :  { %v5950_v36 = vpop.f32.mrf.mxu0  ;;  %6226 = vrot.lane.b32.xlu1 %v6026_v7, %s22165_s26 }
 0xecf   :  { %6224 = vrot.lane.b32.xlu0 %v5950_v36, %s22165_s26  ;;  %v20741_v34 = vpop.f32.mrf.mxu1 }
 0xed0   :  { %v20736_v27 = vpop.f32.mrf.mxu0  ;;  %v3448_v34 = vld [vmem:[#allocation2 + $0xf8] sm:$0xff] }
 0xed1   :  { %v3447_v27 = vld [vmem:[#allocation2 + $0xf0] sm:$0xff]  ;;  %20763 = vmatprep.subr.mxu1 %v3448_v34 }
 0xed2   :  { %20764 = vmatpush3.msra.mxu1 %v3448_v34 }
 0xed3   :  { %20765 = vmatprep.subr.mxu1 %v3447_v27 }
 0xed4   :  { %20766 = vmatpush3.msra.mxu1 %v3447_v27 }
 0xf03   :  { %v6178_v58 = vpop.f32.mrf.mxu1 }
 0xf04   :  { %6234 = vrot.lane.b32.xlu1 %v6178_v58, %s22166_s27 }
 0xf05   :  { %v20751_v53 = vpop.f32.mrf.mxu1 }
 0xf0e   :  { %v6102_v8 = vpop.f32.mrf.mxu0 }
 0xf0f   :  { %6232 = vrot.lane.b32.xlu0 %v6102_v8, %s22166_s27 }
 0xf10   :  { %v20746_v57 = vpop.f32.mrf.mxu0 }
 0xf2a   :  { %v6187_v15 = vpop.permute.xlu1 %6186 }
 0xf2b   :  { %v6239_v5 = vsel %vm407_vm10, %v23327_v38, %v6187_v15 }
 0xf2c   :  { %v6185_v40 = vpop.permute.xlu0 %6184 }
 0xf2d   :  { %v6238_v4 = vsel %vm407_vm10, %v23325_v18, %v6185_v40 }
 0xf30   :  { %v6195_v6 = vpop.permute.xlu1 %6194 }
 0xf31   :  { %v6193_v32 = vpop.permute.xlu0 %6192  ;;  %v6241_v25 = vsel %vm1622_vm11, %v6239_v5, %v6195_v6 }
 0xf32   :  { %v6240_v11 = vsel %vm1622_vm11, %v6238_v4, %v6193_v32 }
 0xf34   :  { %v6203_v21 = vpop.permute.xlu1 %6202 }
 0xf35   :  { %v6201_v3 = vpop.permute.xlu0 %6200  ;;  %v6243_v61 = vsel %vm3075_vm12, %v6241_v25, %v6203_v21 }
 0xf36   :  { %v6242_v17 = vsel %vm3075_vm12, %v6240_v11, %v6201_v3 }
 0xf38   :  { %v6211_v42 = vpop.permute.xlu1 %6210 }
 0xf39   :  { %v6209_v16 = vpop.permute.xlu0 %6208  ;;  %v6245_v22 = vsel %vm3078_vm13, %v6243_v61, %v6211_v42 }
 0xf3a   :  { %v6244_v30 = vsel %vm3078_vm13, %v6242_v17, %v6209_v16 }
 0xf3c   :  { %v6219_v56 = vpop.permute.xlu1 %6218 }
 0xf3d   :  { %v6217_v59 = vpop.permute.xlu0 %6216  ;;  %v6247_v12 = vsel %vm3081_vm14, %v6245_v22, %v6219_v56 }
 0xf3e   :  { %v6246_v10 = vsel %vm3081_vm14, %v6244_v30, %v6217_v59 }
 0xf40   :  { %v6227_v23 = vpop.permute.xlu1 %6226 }
 0xf41   :  { %v6225_v33 = vpop.permute.xlu0 %6224  ;;  %v6249_v37 = vsel %vm3084_vm15, %v6247_v12, %v6227_v23  ;;  %v6372_v23 = vrot.slane %v23364_v29, %v22822_v60  ;;  %v3452_v12 = vld [vmem:[#allocation2 + $0x118] sm:$0xff] }
 0xf42   :  { %v6248_v38 = vsel %vm3084_vm15, %v6246_v10, %v6225_v33  ;;  %v6378_v33 = vrot.slane %v23364_v29, %v22825_v43 }
 0xf76   :  { %v6235_v18 = vpop.permute.xlu1 %6234 }
 0xf77   :  { %v6251_v52 = vsel %vm3087_vm0, %v6249_v37, %v6235_v18  ;;  %v3449_v37 = vld [vmem:[#allocation2 + $0x100] sm:$0xff] }
 0xf81   :  { %v6233_v62 = vpop.permute.xlu0 %6232 }
 0xf82   :  { %v6250_v46 = vsel %vm3087_vm0, %v6248_v38, %v6233_v62  ;;  %v3451_v38 = vld [vmem:[#allocation2 + $0x110] sm:$0xff]  ;;  %v3450_v62 = vld [vmem:[#allocation2 + $0x108] sm:$0xff] }
 0xf83   :  { %20760 = vmatprep.mubr.msk.f32.mxu0 %vm101_vm7, %v6250_v46  ;;  %v6384_v46 = vrot.slane %v23364_v29, %v22836_v49 }
 0xf84   :  { %20761 = vmatmul.mubr.msk.f32.vlgmr.msra.gmra.mxu0 %vm101_vm7, %v6251_v52 }
 0xf85   :  { %20775 = vmatpush3.msra.mxu0 %v3456_v55 }
 0xf86   :  { %20776 = vmatprep.subr.mxu0 %v3455_v63 }
 0xf87   :  { %20777 = vmatpush3.msra.mxu0 %v3455_v63  ;;  %v6601_v63 = vld [vmem:[#allocation2 + $0x158] sm:$0xff] }
 0xf88   :  { %20778 = vmatprep.subr.mxu0 %v3454_v50 }
 0xf89   :  { %20779 = vmatpush3.msra.mxu0 %v3454_v50  ;;  %v6600_v50 = vld [vmem:[#allocation2 + $0x150] sm:$0xff] }
 0xf8a   :  { %20780 = vmatprep.subr.mxu0 %v3453_v47 }
 0xf8b   :  { %20781 = vmatpush3.msra.mxu0 %v3453_v47  ;;  %v6599_v47 = vld [vmem:[#allocation2 + $0x148] sm:$0xff] }
 0xf8c   :  { %20782 = vmatprep.subr.mxu0 %v3452_v12 }
 0xf8d   :  { %20783 = vmatpush3.msra.mxu0 %v3452_v12 }
 0xf8e   :  { %20784 = vmatprep.subr.mxu0 %v3451_v38 }
 0xf8f   :  { %20785 = vmatpush3.msra.mxu0 %v3451_v38  ;;  %v19543_v38 = vld [vmem:[%s25615_s3 + $0x10] sm:$0xff] }
 0xf90   :  { %20786 = vmatprep.subr.mxu0 %v3450_v62 }
 0xf91   :  { %20787 = vmatpush3.msra.mxu0 %v3450_v62 }
 0xf92   :  { %20788 = vmatprep.subr.mxu0 %v3449_v37 }
 0xf93   :  { %20789 = vmatpush3.msra.mxu0 %v3449_v37 }
 0xf94   :  { %20814 = vmatprep.subr.mxu0 %v22154_v9 }
0x1044   :  { %v20762_v31 = vpop.f32.mrf.mxu0 }
0x1045   :  { %v6334_v54 = vadd.f32 %v20762_v31, %v6255_v24 }
0x1046   :  { %v6328_v35 = vpop.f32.mrf.mxu0 }
0x1047   :  { %v6338_v39 = vadd.f32 %v6334_v54, %v22866_v14  ;;  %v6329_v48 = vadd.f32 %v6328_v35, %v6255_v24  ;;  %v3446_v14 = vld [vmem:[#allocation2 + $0xe8] sm:$0xff] }
0x1048   :  { %20767 = vmatprep.subr.mxu1 %v3446_v14 }
0x1049   :  { %v6337_v26 = vadd.f32 %v6329_v48, %v22864_v13  ;;  %v6342_v51 = vsel %vm101_vm7, %v6338_v39, 0.0  ;;  %v6348_v7 = vmul.f32 %v6338_v39, %v6338_v39  ;;  %20768 = vmatpush3.msra.mxu1 %v3446_v14  ;;  %v3445_v13 = vld [vmem:[#allocation2 + $0xe0] sm:$0xff]  ;;  %v6471_v48 = vrot.slane %v23364_v29, %v22845_v0 }
0x104a   :  { %6343 = vadd.xlane.f32.xlu1 %v6342_v51  ;;  %20769 = vmatprep.subr.mxu1 %v3445_v13 }
0x104b   :  { %v6339_v44 = vsel %vm101_vm7, %v6337_v26, 0.0  ;;  %v6347_v19 = vmul.f32 %v6337_v26, %v6337_v26  ;;  %v6352_v36 = vsel %vm101_vm7, %v6348_v7, 0.0  ;;  %20770 = vmatpush3.msra.mxu1 %v3445_v13 }
0x104c   :  { %6340 = vadd.xlane.f32.xlu0 %v6339_v44  ;;  %20793 = vmatprep.subr.mxu1 %v6601_v63 }
0x104d   :  { %v6349_v20 = vsel %vm101_vm7, %v6347_v19, 0.0 }
0x1050   :  { %6350 = vadd.xlane.f32.xlu0 %v6349_v20 }
0x1054   :  { %6353 = vadd.xlane.f32.xlu0 %v6352_v36 }
0x10d3   :  { %v6344_v8 = vpop.xlane.xlu1 %6343 }
0x10d4   :  { %v6346_v40 = vmul.f32 0.03125, %v6344_v8 }
0x10d5   :  { %v6341_v58 = vpop.xlane.xlu0 %6340 }
0x10d6   :  { %v6345_v53 = vmul.f32 0.03125, %v6341_v58  ;;  %v6358_v3 = vmul.f32 %v6346_v40, %v6346_v40  ;;  %v6362_v25 = vsub.f32 %v6338_v39, %v6346_v40  ;;  %v6598_v58 = vld [vmem:[#allocation2 + $0x140] sm:$0xff] }
0x10d8   :  { %v6357_v15 = vmul.f32 %v6345_v53, %v6345_v53  ;;  %v6361_v4 = vsub.f32 %v6337_v26, %v6345_v53 }
0x10d9   :  { %v6351_v57 = vpop.xlane.xlu0 %6350 }
0x10da   :  { %v6355_v6 = vmul.f32 0.03125, %v6351_v57 }
0x10dc   :  { %v6359_v32 = vsub.f32 %v6355_v6, %v6357_v15 }
0x10dd   :  { %v6354_v21 = vpop.xlane.xlu0 %6353 }
0x10de   :  { %v6363_v42 = vadd.f32 1e-05, %v6359_v32  ;;  %v6356_v16 = vmul.f32 0.03125, %v6354_v21 }
0x10e0   :  { %21801 = vrsqrt.f32 %v6363_v42  ;;  %v6360_v56 = vsub.f32 %v6356_v16, %v6358_v3 }
0x10e2   :  { %v6364_v59 = vadd.f32 1e-05, %v6360_v56 }
0x10e4   :  { %21803 = vrsqrt.f32 %v6364_v59 }
0x10ed   :  { %v21802_v5 = vpop.eup %21801 }
0x10ee   :  { %v6367_v11 = vmul.f32 %v21802_v5, %v6361_v4 }
0x10f0   :  { %v6373_v17 = vmul.f32 %v6372_v23, %v6367_v11  ;;  %v6588_v11 = vrot.slane %v23364_v29, %v22855_v41 }
0x10f1   :  { %v21804_v61 = vpop.eup %21803 }
0x10f2   :  { %v6368_v30 = vmul.f32 %v21804_v61, %v6362_v25  ;;  %v6379_v22 = vadd.f32 %v6378_v33, %v6373_v17 }
0x10f4   :  { %v6374_v10 = vmul.f32 %v6372_v23, %v6368_v30  ;;  %20771 = vmatprep.mubr.msk.f32.mxu1 %vm101_vm7, %v6379_v22 }
0x10f6   :  { %v6380_v18 = vadd.f32 %v6378_v33, %v6374_v10 }
0x10f8   :  { %20772 = vmatmul.mubr.msk.f32.vlgmr.msra.gmra.mxu1 %vm101_vm7, %v6380_v18 }
0x10f9   :  { %20794 = vmatpush3.msra.mxu1 %v6601_v63 }
0x10fa   :  { %20795 = vmatprep.subr.mxu1 %v6600_v50 }
0x10fb   :  { %20796 = vmatpush3.msra.mxu1 %v6600_v50 }
0x10fc   :  { %20797 = vmatprep.subr.mxu1 %v6599_v47 }
0x10fd   :  { %20798 = vmatpush3.msra.mxu1 %v6599_v47 }
0x10fe   :  { %20799 = vmatprep.subr.mxu1 %v6598_v58 }
0x10ff   :  { %20800 = vmatpush3.msra.mxu1 %v6598_v58 }
0x1100   :  { %20804 = vmatprep.subr.mxu1 %v22154_v9 }
0x11b8   :  { %v20773_v52 = vpop.f32.mrf.mxu1 }
0x11b9   :  { %v6463_v24 = vadd.f32 %v20773_v52, %v6384_v46 }
0x11ba   :  { %v6457_v31 = vpop.f32.mrf.mxu1 }
0x11bb   :  { %v6458_v54 = vadd.f32 %v6457_v31, %v6384_v46  ;;  %v6467_v39 = vmax.f32 %v6463_v24, 0.0 }
0x11bd   :  { %v6466_v35 = vmax.f32 %v6458_v54, 0.0 }
0x11bf   :  { %20790 = vmatprep.mubr.msk.f32.mxu0 %vm187_vm8, %v6466_v35 }
0x11c0   :  { %20791 = vmatmul.mubr.msk.f32.vlgmr.msra.gmra.mxu0 %vm187_vm8, %v6467_v39 }
0x11c1   :  { %20816 = vmatprep.mubr.msk.f32.mxu0 %vm22156_vm9, %v22154_v9 }
0x1280   :  { %v20792_v26 = vpop.f32.mrf.mxu0 }
0x1281   :  { %v6550_v51 = vadd.f32 %v20792_v26, %v6471_v48 }
0x1282   :  { %v6544_v44 = vpop.f32.mrf.mxu0 }
0x1283   :  { %v6554_v19 = vadd.f32 %v6550_v51, %v6380_v18  ;;  %v6545_v20 = vadd.f32 %v6544_v44, %v6471_v48 }
0x1285   :  { %v6553_v7 = vadd.f32 %v6545_v20, %v6379_v22  ;;  %v6558_v36 = vsel %vm101_vm7, %v6554_v19, 0.0  ;;  %v6564_v34 = vmul.f32 %v6554_v19, %v6554_v19  ;;  %v6594_v22 = vrot.slane %v23364_v29, %v22860_v45 }
0x1286   :  { %6559 = vadd.xlane.f32.xlu0 %v6558_v36  ;;  %v6623_v29 = vrot.slane %v19543_v38, %v22293_v2 }
0x1287   :  { %v6555_v27 = vsel %vm101_vm7, %v6553_v7, 0.0  ;;  %v6563_v14 = vmul.f32 %v6553_v7, %v6553_v7  ;;  %v6568_v13 = vsel %vm101_vm7, %v6564_v34, 0.0 }
0x1288   :  { %6556 = vadd.xlane.f32.xlu1 %v6555_v27 }
0x1289   :  { %v6565_v55 = vsel %vm101_vm7, %v6563_v14, 0.0 }
0x128a   :  { %6569 = vadd.xlane.f32.xlu0 %v6568_v13 }
0x128c   :  { %6566 = vadd.xlane.f32.xlu1 %v6565_v55 }
0x130f   :  { %v6560_v53 = vpop.xlane.xlu0 %6559 }
0x1310   :  { %v6562_v8 = vmul.f32 0.03125, %v6560_v53 }
0x1311   :  { %v6557_v57 = vpop.xlane.xlu1 %6556 }
0x1312   :  { %v6561_v40 = vmul.f32 0.03125, %v6557_v57  ;;  %v6574_v6 = vmul.f32 %v6562_v8, %v6562_v8  ;;  %v6578_v23 = vsub.f32 %v6554_v19, %v6562_v8 }
0x1313   :  { %v6570_v15 = vpop.xlane.xlu0 %6569 }
0x1314   :  { %v6572_v32 = vmul.f32 0.03125, %v6570_v15  ;;  %v6573_v3 = vmul.f32 %v6561_v40, %v6561_v40  ;;  %v6577_v33 = vsub.f32 %v6553_v7, %v6561_v40 }
0x1315   :  { %v6567_v21 = vpop.xlane.xlu1 %6566 }
0x1316   :  { %v6576_v42 = vsub.f32 %v6572_v32, %v6574_v6  ;;  %v6571_v16 = vmul.f32 0.03125, %v6567_v21 }
0x1318   :  { %v6580_v56 = vadd.f32 1e-05, %v6576_v42  ;;  %v6575_v59 = vsub.f32 %v6571_v16, %v6573_v3 }
0x131a   :  { %21805 = vrsqrt.f32 %v6580_v56  ;;  %v6579_v4 = vadd.f32 1e-05, %v6575_v59 }
0x131c   :  { %21807 = vrsqrt.f32 %v6579_v4 }
0x1327   :  { %v21806_v5 = vpop.eup %21805 }
0x1328   :  { %v6584_v25 = vmul.f32 %v21806_v5, %v6578_v23 }
0x1329   :  { %v21808_v17 = vpop.eup %21807 }
0x132a   :  { %v6583_v61 = vmul.f32 %v21808_v17, %v6577_v33  ;;  %v6590_v30 = vmul.f32 %v6588_v11, %v6584_v25 }
0x132c   :  { %v6589_v10 = vmul.f32 %v6588_v11, %v6583_v61  ;;  %v23400_v12 = vadd.f32 %v6594_v22, %v6590_v30 }
0x132e   :  { %v23398_v18 = vadd.f32 %v6594_v22, %v6589_v10 }
0x1330   :  { %20801 = vmatprep.mubr.msk.f32.mxu1 %vm101_vm7, %v23398_v18 }
0x1331   :  { %20802 = vmatmul.mubr.msk.f32.vlgmr.msra.gmra.mxu1 %vm101_vm7, %v23400_v12 }
0x1332   :  { %20806 = vmatprep.mubr.msk.f32.mxu1 %vm22156_vm9, %v22154_v9 }
0x13f1   :  { %v20803_v62 = vpop.f32.mrf.mxu1 }
0x13f2   :  { %v23412_v37 = vadd.f32 %v20803_v62, %v6623_v29 }
0x13f3   :  { %v6696_v46 = vpop.f32.mrf.mxu1 }
0x13f4   :  { %v23414_v52 = vadd.f32 %v6696_v46, %v6623_v29  ;;  %6709 = vrot.lane.b32.xlu0 %v23412_v37, %s22151_s14 }
0x13f6   :  { %6707 = vrot.lane.b32.xlu1 %v23414_v52, %s22151_s14 }
0x13f8   :  { %6715 = vrot.lane.b32.xlu0 %v23414_v52, %s22152_s15 }
0x13fa   :  { %6711 = vrot.lane.b32.xlu1 %v23414_v52, %s22150_s1 }
0x13fc   :  { %6719 = vrot.lane.b32.xlu0 %v23414_v52, %s22153_s16 }
0x13fe   :  { %6713 = vrot.lane.b32.xlu1 %v23412_v37, %s22150_s1 }
0x1400   :  { %6723 = vrot.lane.b32.xlu0 %v23414_v52, %s22155_s17 }
0x1402   :  { %6717 = vrot.lane.b32.xlu1 %v23412_v37, %s22152_s15 }
0x1404   :  { %6727 = vrot.lane.b32.xlu0 %v23414_v52, %s22157_s18 }
0x1406   :  { %6721 = vrot.lane.b32.xlu1 %v23412_v37, %s22153_s16 }
0x1408   :  { %6731 = vrot.lane.b32.xlu0 %v23414_v52, %s22158_s20 }
0x140a   :  { %6725 = vrot.lane.b32.xlu1 %v23412_v37, %s22155_s17 }
0x140c   :  { %6735 = vrot.lane.b32.xlu0 %v23414_v52, %s22159_s21 }
0x140e   :  { %6729 = vrot.lane.b32.xlu1 %v23412_v37, %s22157_s18 }
0x1412   :  { %6733 = vrot.lane.b32.xlu1 %v23412_v37, %s22158_s20 }
0x1416   :  { %6811 = vrot.lane.b32.xlu1 %v23412_v37, %s22159_s21 }
0x1466   :  { %v23448_v24 = vpop.permute.xlu0 %6709 }
0x1467   :  { %6963 = vrot.lane.b32.xlu1 %v23448_v24, %s22159_s21 }
0x1468   :  { %v23452_v31 = vpop.permute.xlu1 %6707 }
0x1469   :  { %6887 = vrot.lane.b32.xlu0 %v23452_v31, %s22159_s21 }
0x146a   :  { %v23456_v54 = vpop.permute.xlu0 %6715 }
0x146c   :  { %v23458_v35 = vpop.permute.xlu1 %6711 }
0x146d   :  { %7039 = vrot.lane.b32.xlu0 %v23458_v35, %s22159_s21 }
0x146e   :  { %v23462_v39 = vpop.permute.xlu0 %6719 }
0x1470   :  { %v23464_v48 = vpop.permute.xlu1 %6713 }
0x1471   :  { %7191 = vrot.lane.b32.xlu0 %v23456_v54, %s22159_s21  ;;  %7115 = vrot.lane.b32.xlu1 %v23464_v48, %s22159_s21 }
0x1472   :  { %v23470_v26 = vpop.permute.xlu0 %6723 }
0x1474   :  { %v23472_v51 = vpop.permute.xlu1 %6717 }
0x1475   :  { %7343 = vrot.lane.b32.xlu0 %v23462_v39, %s22159_s21  ;;  %7267 = vrot.lane.b32.xlu1 %v23472_v51, %s22159_s21 }
0x1476   :  { %v23478_v44 = vpop.permute.xlu0 %6727 }
0x1478   :  { %v23480_v19 = vpop.permute.xlu1 %6721 }
0x1479   :  { %7495 = vrot.lane.b32.xlu0 %v23470_v26, %s22159_s21  ;;  %7419 = vrot.lane.b32.xlu1 %v23480_v19, %s22159_s21 }
0x147a   :  { %v23486_v20 = vpop.permute.xlu0 %6731 }
0x147c   :  { %v23488_v7 = vpop.permute.xlu1 %6725 }
0x147d   :  { %7647 = vrot.lane.b32.xlu0 %v23478_v44, %s22159_s21  ;;  %7571 = vrot.lane.b32.xlu1 %v23488_v7, %s22159_s21 }
0x147e   :  { %v6736_v36 = vpop.permute.xlu0 %6735 }
0x147f   :  { %20805 = vmatpush3.xpose.msk.msra.mxu1 %vm407_vm10, %v6736_v36 }
0x1480   :  { %v23495_v34 = vpop.permute.xlu1 %6729  ;;  %20809 = vmatprep.subr.mxu1 %v22154_v9 }
0x1481   :  { %7799 = vrot.lane.b32.xlu0 %v23486_v20, %s22159_s21  ;;  %7723 = vrot.lane.b32.xlu1 %v23495_v34, %s22159_s21 }
0x1482   :  { %20807 = vmatmul.mubr.msk.f32.vlgmr.msra.gmra.mxu1 %vm407_vm10, %v23414_v52 }
0x1483   :  { %20811 = vmatprep.mubr.msk.f32.mxu1 %vm22156_vm9, %v22154_v9 }
0x1484   :  { %v23506_v27 = vpop.permute.xlu1 %6733 }
0x1485   :  { %7875 = vrot.lane.b32.xlu1 %v23506_v27, %s22159_s21 }
0x1488   :  { %v6812_v14 = vpop.permute.xlu1 %6811 }
0x1489   :  { %20810 = vmatpush3.xpose.msk.msra.mxu1 %vm407_vm10, %v6812_v14 }
0x148a   :  { %20819 = vmatprep.subr.mxu1 %v22154_v9 }
0x148c   :  { %20812 = vmatmul.mubr.msk.f32.vlgmr.msra.gmra.mxu1 %vm407_vm10, %v23412_v37 }
0x148d   :  { %20821 = vmatprep.mubr.msk.f32.mxu1 %vm22156_vm9, %v22154_v9 }
0x14d9   :  { %v6964_v13 = vpop.permute.xlu1 %6963 }
0x14da   :  { %20820 = vmatpush3.xpose.msk.msra.mxu1 %vm407_vm10, %v6964_v13 }
0x14db   :  { %v6888_v55 = vpop.permute.xlu0 %6887  ;;  %20829 = vmatprep.subr.mxu1 %v22154_v9 }
0x14dc   :  { %20815 = vmatpush3.xpose.msk.msra.mxu0 %vm407_vm10, %v6888_v55 }
0x14dd   :  { %20822 = vmatmul.mubr.msk.f32.vlgmr.msra.gmra.mxu1 %vm407_vm10, %v23448_v24  ;;  %20824 = vmatprep.subr.mxu0 %v22154_v9 }
0x14de   :  { %20831 = vmatprep.mubr.msk.f32.mxu1 %vm22156_vm9, %v22154_v9 }
0x14df   :  { %20817 = vmatmul.mubr.msk.f32.vlgmr.msra.gmra.mxu0 %vm407_vm10, %v23452_v31  ;;  %v7040_v63 = vpop.permute.xlu0 %7039 }
0x14e0   :  { %20825 = vmatpush3.xpose.msk.msra.mxu0 %vm407_vm10, %v7040_v63  ;;  %20826 = vmatprep.mubr.msk.f32.mxu0 %vm22156_vm9, %v22154_v9 }
0x14e1   :  { %20834 = vmatprep.subr.mxu0 %v22154_v9 }
0x14e3   :  { %20827 = vmatmul.mubr.msk.f32.vlgmr.msra.gmra.mxu0 %vm407_vm10, %v23458_v35  ;;  %v7192_v50 = vpop.permute.xlu0 %7191  ;;  %v7116_v47 = vpop.permute.xlu1 %7115 }
0x14e4   :  { %20830 = vmatpush3.xpose.msk.msra.mxu1 %vm407_vm10, %v7116_v47  ;;  %20835 = vmatpush3.xpose.msk.msra.mxu0 %vm407_vm10, %v7192_v50 }
0x14e5   :  { %20836 = vmatprep.mubr.msk.f32.mxu0 %vm22156_vm9, %v22154_v9  ;;  %20844 = vmatprep.subr.mxu0 %v22154_v9 }
0x14e6   :  { %20839 = vmatprep.subr.mxu1 %v22154_v9 }
0x14e7   :  { %20837 = vmatmul.mubr.msk.f32.vlgmr.msra.gmra.mxu0 %vm407_vm10, %v23456_v54  ;;  %v7344_v58 = vpop.permute.xlu0 %7343  ;;  %20832 = vmatmul.mubr.msk.f32.vlgmr.msra.gmra.mxu1 %vm407_vm10, %v23464_v48  ;;  %v7268_v53 = vpop.permute.xlu1 %7267 }
0x14e8   :  { %20840 = vmatpush3.xpose.msk.msra.mxu1 %vm407_vm10, %v7268_v53  ;;  %20845 = vmatpush3.xpose.msk.msra.mxu0 %vm407_vm10, %v7344_v58 }
0x14e9   :  { %20841 = vmatprep.mubr.msk.f32.mxu1 %vm22156_vm9, %v22154_v9  ;;  %20846 = vmatprep.mubr.msk.f32.mxu0 %vm22156_vm9, %v22154_v9 }
0x14ea   :  { %20854 = vmatprep.subr.mxu0 %v22154_v9  ;;  %20849 = vmatprep.subr.mxu1 %v22154_v9 }
0x14eb   :  { %20847 = vmatmul.mubr.msk.f32.vlgmr.msra.gmra.mxu0 %vm407_vm10, %v23462_v39  ;;  %v7496_v8 = vpop.permute.xlu0 %7495  ;;  %20842 = vmatmul.mubr.msk.f32.vlgmr.msra.gmra.mxu1 %vm407_vm10, %v23472_v51  ;;  %v7420_v57 = vpop.permute.xlu1 %7419 }
0x14ec   :  { %20850 = vmatpush3.xpose.msk.msra.mxu1 %vm407_vm10, %v7420_v57  ;;  %20855 = vmatpush3.xpose.msk.msra.mxu0 %vm407_vm10, %v7496_v8 }
0x14ed   :  { %20851 = vmatprep.mubr.msk.f32.mxu1 %vm22156_vm9, %v22154_v9  ;;  %20856 = vmatprep.mubr.msk.f32.mxu0 %vm22156_vm9, %v22154_v9 }
0x14ee   :  { %20864 = vmatprep.subr.mxu0 %v22154_v9  ;;  %20859 = vmatprep.subr.mxu1 %v22154_v9 }
0x14ef   :  { %20857 = vmatmul.mubr.msk.f32.vlgmr.msra.gmra.mxu0 %vm407_vm10, %v23470_v26  ;;  %v7648_v40 = vpop.permute.xlu0 %7647  ;;  %20852 = vmatmul.mubr.msk.f32.vlgmr.msra.gmra.mxu1 %vm407_vm10, %v23480_v19  ;;  %v7572_v15 = vpop.permute.xlu1 %7571 }
0x14f0   :  { %20860 = vmatpush3.xpose.msk.msra.mxu1 %vm407_vm10, %v7572_v15  ;;  %20865 = vmatpush3.xpose.msk.msra.mxu0 %vm407_vm10, %v7648_v40 }
0x14f1   :  { %20861 = vmatprep.mubr.msk.f32.mxu1 %vm22156_vm9, %v22154_v9  ;;  %20866 = vmatprep.mubr.msk.f32.mxu0 %vm22156_vm9, %v22154_v9 }
0x14f2   :  { %20874 = vmatprep.subr.mxu0 %v22154_v9  ;;  %20869 = vmatprep.subr.mxu1 %v22154_v9 }
0x14f3   :  { %20867 = vmatmul.mubr.msk.f32.vlgmr.msra.gmra.mxu0 %vm407_vm10, %v23478_v44  ;;  %v7800_v6 = vpop.permute.xlu0 %7799  ;;  %20862 = vmatmul.mubr.msk.f32.vlgmr.msra.gmra.mxu1 %vm407_vm10, %v23488_v7  ;;  %v7724_v32 = vpop.permute.xlu1 %7723 }
0x14f4   :  { %20870 = vmatpush3.xpose.msk.msra.mxu1 %vm407_vm10, %v7724_v32  ;;  %20875 = vmatpush3.xpose.msk.msra.mxu0 %vm407_vm10, %v7800_v6 }
0x14f5   :  { %20871 = vmatprep.mubr.msk.f32.mxu1 %vm22156_vm9, %v22154_v9  ;;  %20876 = vmatprep.mubr.msk.f32.mxu0 %vm22156_vm9, %v22154_v9 }
0x14f6   :  { %20879 = vmatprep.subr.mxu1 %v22154_v9  ;;  %20884 = vmatprep.subr.mxu0 %v22154_v9 }
0x14f7   :  { %20872 = vmatmul.mubr.msk.f32.vlgmr.msra.gmra.mxu1 %vm407_vm10, %v23495_v34  ;;  %20877 = vmatmul.mubr.msk.f32.vlgmr.msra.gmra.mxu0 %vm407_vm10, %v23486_v20  ;;  %v7876_v21 = vpop.permute.xlu1 %7875 }
0x14f8   :  { %20880 = vmatpush3.xpose.msk.msra.mxu1 %vm407_vm10, %v7876_v21  ;;  %20881 = vmatprep.mubr.msk.f32.mxu1 %vm22156_vm9, %v22154_v9 }
0x14f9   :  { %20889 = vmatprep.subr.mxu1 %v22154_v9  ;;  %20886 = vmatprep.mubr.msk.f32.mxu0 %vm22156_vm9, %v22154_v9 }
0x14fb   :  { %20882 = vmatmul.mubr.msk.f32.vlgmr.msra.gmra.mxu1 %vm407_vm10, %v23506_v27 }
0x14fc   :  { %20891 = vmatprep.mubr.msk.f32.mxu1 %vm22156_vm9, %v22154_v9 }
0x1542   :  { %v23600_v3 = vpop.f32.mrf.mxu1 }
0x1543   :  { %v7951_v42 = vsel %vm1622_vm11, %v23600_v3, -inf }
0x1544   :  { %v20808_v16 = vpop.f32.mrf.mxu1  ;;  %7952 = vmax.xlane.f32.xlu0 %v7951_v42 }
0x154c   :  { %v23604_v56 = vpop.f32.mrf.mxu1 }
0x154d   :  { %v7954_v59 = vsel %vm1622_vm11, %v23604_v56, -inf }
0x154e   :  { %7955 = vmax.xlane.f32.xlu1 %v7954_v59  ;;  %v20813_v4 = vpop.f32.mrf.mxu1 }
0x155a   :  { %8203 = vrot.lane.b32.xlu0 %v23412_v37, %s22160_s0 }
0x155e   :  { %8279 = vrot.lane.b32.xlu0 %v23452_v31, %s22160_s0 }
0x155f   :  { %8127 = vrot.lane.b32.xlu1 %v23414_v52, %s22160_s0 }
0x1562   :  { %8355 = vrot.lane.b32.xlu0 %v23448_v24, %s22160_s0 }
0x1566   :  { %8431 = vrot.lane.b32.xlu0 %v23458_v35, %s22160_s0 }
0x156a   :  { %8507 = vrot.lane.b32.xlu0 %v23464_v48, %s22160_s0 }
0x156e   :  { %8583 = vrot.lane.b32.xlu0 %v23456_v54, %s22160_s0 }
0x1572   :  { %8659 = vrot.lane.b32.xlu0 %v23472_v51, %s22160_s0 }
0x1576   :  { %8735 = vrot.lane.b32.xlu0 %v23462_v39, %s22160_s0 }
0x159d   :  { %v23626_v23 = vpop.f32.mrf.mxu1 }
0x159e   :  { %v7960_v5 = vsel %vm1622_vm11, %v23626_v23, -inf }
0x159f   :  { %v23630_v11 = vpop.f32.mrf.mxu0  ;;  %7961 = vmax.xlane.f32.xlu0 %v7960_v5  ;;  %v20823_v33 = vpop.f32.mrf.mxu1 }
0x15a0   :  { %v7957_v17 = vsel %vm1622_vm11, %v23630_v11, -inf }
0x15a1   :  { %v20818_v25 = vpop.f32.mrf.mxu0 }
0x15a3   :  { %v23634_v61 = vpop.f32.mrf.mxu0  ;;  %7958 = vmax.xlane.f32.xlu0 %v7957_v17 }
0x15a4   :  { %v7963_v30 = vsel %vm1622_vm11, %v23634_v61, -inf }
0x15a5   :  { %v20828_v22 = vpop.f32.mrf.mxu0  ;;  %7964 = vmax.xlane.f32.xlu1 %v7963_v30 }
0x15a7   :  { %v23638_v10 = vpop.f32.mrf.mxu1  ;;  %v23640_v38 = vpop.f32.mrf.mxu0 }
0x15a8   :  { %v7969_v29 = vsel %vm1622_vm11, %v23640_v38, -inf  ;;  %v7966_v62 = vsel %vm1622_vm11, %v23638_v10, -inf }
0x15a9   :  { %v20838_v37 = vpop.f32.mrf.mxu0  ;;  %7970 = vmax.xlane.f32.xlu1 %v7969_v29  ;;  %7967 = vmax.xlane.f32.xlu0 %v7966_v62  ;;  %v20833_v46 = vpop.f32.mrf.mxu1 }
0x15ab   :  { %v23646_v52 = vpop.f32.mrf.mxu1  ;;  %v23648_v24 = vpop.f32.mrf.mxu0 }
0x15ac   :  { %v7975_v31 = vsel %vm1622_vm11, %v23648_v24, -inf  ;;  %v7972_v54 = vsel %vm1622_vm11, %v23646_v52, -inf }
0x15ad   :  { %v20848_v35 = vpop.f32.mrf.mxu0  ;;  %7976 = vmax.xlane.f32.xlu1 %v7975_v31  ;;  %7973 = vmax.xlane.f32.xlu0 %v7972_v54  ;;  %v20843_v39 = vpop.f32.mrf.mxu1 }
0x15af   :  { %v23654_v48 = vpop.f32.mrf.mxu1  ;;  %v23656_v51 = vpop.f32.mrf.mxu0 }
0x15b0   :  { %v7981_v36 = vsel %vm1622_vm11, %v23656_v51, -inf  ;;  %v7978_v14 = vsel %vm1622_vm11, %v23654_v48, -inf }
0x15b1   :  { %v20858_v13 = vpop.f32.mrf.mxu0  ;;  %7982 = vmax.xlane.f32.xlu1 %v7981_v36  ;;  %7979 = vmax.xlane.f32.xlu0 %v7978_v14  ;;  %v20853_v55 = vpop.f32.mrf.mxu1 }
0x15b3   :  { %v23662_v63 = vpop.f32.mrf.mxu1  ;;  %v23664_v50 = vpop.f32.mrf.mxu0 }
0x15b4   :  { %v7987_v47 = vsel %vm1622_vm11, %v23664_v50, -inf  ;;  %v7984_v58 = vsel %vm1622_vm11, %v23662_v63, -inf }
0x15b5   :  { %v20868_v53 = vpop.f32.mrf.mxu0  ;;  %7988 = vmax.xlane.f32.xlu1 %v7987_v47  ;;  %7985 = vmax.xlane.f32.xlu0 %v7984_v58  ;;  %v20863_v8 = vpop.f32.mrf.mxu1 }
0x15b7   :  { %v23670_v57 = vpop.f32.mrf.mxu1  ;;  %v23672_v40 = vpop.f32.mrf.mxu0 }
0x15b8   :  { %v7993_v15 = vsel %vm1622_vm11, %v23672_v40, -inf  ;;  %v7990_v6 = vsel %vm1622_vm11, %v23670_v57, -inf }
0x15b9   :  { %v20878_v32 = vpop.f32.mrf.mxu0  ;;  %7994 = vmax.xlane.f32.xlu1 %v7993_v15  ;;  %7991 = vmax.xlane.f32.xlu0 %v7990_v6  ;;  %v20873_v21 = vpop.f32.mrf.mxu1 }
0x15bb   :  { %v23678_v42 = vpop.f32.mrf.mxu1 }
0x15bc   :  { %v7996_v16 = vsel %vm1622_vm11, %v23678_v42, -inf }
0x15bd   :  { %7997 = vmax.xlane.f32.xlu0 %v7996_v16  ;;  %v20883_v59 = vpop.f32.mrf.mxu1 }
0x15ca   :  { %8811 = vrot.lane.b32.xlu1 %v23480_v19, %s22160_s0 }
0x15cd   :  { %v7953_v4 = vpop.xlane.xlu0 %7952 }
0x15ce   :  { %v7999_v33 = vsub.f32 %v23600_v3, %v7953_v4 }
0x15d0   :  { %v8015_v17 = vmul.f32 1.442695, %v7999_v33 }
0x15d1   :  { %v8204_v5 = vpop.permute.xlu0 %8203 }
0x15d2   :  { %20890 = vmatpush3.msra.mxu1 %v8204_v5  ;;  %21809 = vpow2.f32 %v8015_v17 }
0x15d3   :  { %8887 = vrot.lane.b32.xlu0 %v23470_v26, %s22160_s0  ;;  %20899 = vmatprep.subr.mxu1 %v22154_v9 }
0x15d5   :  { %v23704_v29 = vpop.permute.xlu0 %8279 }
0x15d7   :  { %8963 = vrot.lane.b32.xlu0 %v23488_v7, %s22160_s0  ;;  %v7956_v25 = vpop.xlane.xlu1 %7955 }
0x15d8   :  { %v8000_v26 = vsub.f32 %v23604_v56, %v7956_v25 }
0x15d9   :  { %v23706_v62 = vpop.permute.xlu0 %8355 }
0x15da   :  { %v8017_v19 = vmul.f32 1.442695, %v8000_v26 }
0x15db   :  { %9039 = vrot.lane.b32.xlu0 %v23478_v44, %s22160_s0  ;;  %v8128_v30 = vpop.permute.xlu1 %8127 }
0x15dc   :  { %20885 = vmatpush3.msra.mxu0 %v8128_v30  ;;  %21811 = vpow2.f32 %v8017_v19 }
0x15dd   :  { %20894 = vmatprep.subr.mxu0 %v22154_v9 }
0x15df   :  { %9115 = vrot.lane.b32.xlu0 %v23495_v34, %s22160_s0  ;;  %v23696_v3 = vpop.eup %21809  ;;  %v23708_v34 = vpop.permute.xlu0 %8431 }
0x15e0   :  { %v8047_v7 = vsel %vm1622_vm11, %v23696_v3, 0.0 }
0x15e3   :  { %v23710_v56 = vpop.permute.xlu0 %8507 }
0x15e7   :  { %v23712_v37 = vpop.permute.xlu0 %8583 }
0x15e9   :  { %v23700_v22 = vpop.eup %21811 }
0x15ea   :  { %v8050_v44 = vsel %vm1622_vm11, %v23700_v22, 0.0 }
0x15eb   :  { %v23714_v46 = vpop.permute.xlu0 %8659 }
0x15ee   :  { %8048 = vadd.xlane.f32.xlu1 %v8047_v7 }
0x15ef   :  { %v23716_v31 = vpop.permute.xlu0 %8735 }
0x15fe   :  { %8051 = vadd.xlane.f32.xlu0 %v8050_v44 }
0x1628   :  { %v7962_v54 = vpop.xlane.xlu0 %7961 }
0x1629   :  { %v8002_v35 = vsub.f32 %v23626_v23, %v7962_v54 }
0x162b   :  { %v8021_v39 = vmul.f32 1.442695, %v8002_v35 }
0x162c   :  { %v7959_v36 = vpop.xlane.xlu0 %7958 }
0x162d   :  { %21813 = vpow2.f32 %v8021_v39  ;;  %v8001_v14 = vsub.f32 %v23630_v11, %v7959_v36 }
0x162e   :  { %v7965_v13 = vpop.xlane.xlu1 %7964 }
0x162f   :  { %v8019_v55 = vmul.f32 1.442695, %v8001_v14  ;;  %v8003_v47 = vsub.f32 %v23634_v61, %v7965_v13 }
0x1631   :  { %21815 = vpow2.f32 %v8019_v55  ;;  %v8023_v58 = vmul.f32 1.442695, %v8003_v47 }
0x1632   :  { %v7968_v53 = vpop.xlane.xlu0 %7967  ;;  %v7971_v8 = vpop.xlane.xlu1 %7970 }
0x1633   :  { %21817 = vpow2.f32 %v8023_v58  ;;  %v8004_v15 = vsub.f32 %v23638_v10, %v7968_v53  ;;  %v8005_v6 = vsub.f32 %v23640_v38, %v7971_v8 }
0x1635   :  { %v8025_v32 = vmul.f32 1.442695, %v8004_v15  ;;  %v8027_v23 = vmul.f32 1.442695, %v8005_v6 }
0x1636   :  { %v7974_v21 = vpop.xlane.xlu0 %7973  ;;  %v7977_v16 = vpop.xlane.xlu1 %7976 }
0x1637   :  { %21819 = vpow2.f32 %v8025_v32  ;;  %v8006_v11 = vsub.f32 %v23646_v52, %v7974_v21  ;;  %v8007_v59 = vsub.f32 %v23648_v24, %v7977_v16 }
0x1638   :  { %21821 = vpow2.f32 %v8027_v23 }
0x1639   :  { %v8029_v61 = vmul.f32 1.442695, %v8006_v11  ;;  %v8031_v4 = vmul.f32 1.442695, %v8007_v59 }
0x163a   :  { %v23725_v5 = vpop.eup %21813  ;;  %v7980_v33 = vpop.xlane.xlu0 %7979 }
0x163b   :  { %v7983_v25 = vpop.xlane.xlu1 %7982  ;;  %21823 = vpow2.f32 %v8029_v61  ;;  %v8008_v10 = vsub.f32 %v23654_v48, %v7980_v33  ;;  %v8056_v17 = vsel %vm1622_vm11, %v23725_v5, 0.0 }
0x163c   :  { %v8009_v38 = vsub.f32 %v23656_v51, %v7983_v25  ;;  %21825 = vpow2.f32 %v8031_v4  ;;  %8057 = vadd.xlane.f32.xlu0 %v8056_v17 }
0x163d   :  { %v8033_v52 = vmul.f32 1.442695, %v8008_v10 }
0x163e   :  { %v8035_v30 = vmul.f32 1.442695, %v8009_v38  ;;  %v23731_v24 = vpop.eup %21815  ;;  %v7986_v26 = vpop.xlane.xlu0 %7985 }
0x163f   :  { %v7989_v19 = vpop.xlane.xlu1 %7988  ;;  %21827 = vpow2.f32 %v8033_v52  ;;  %v8010_v7 = vsub.f32 %v23662_v63, %v7986_v26  ;;  %v8053_v48 = vsel %vm1622_vm11, %v23731_v24, 0.0 }
0x1640   :  { %v8011_v44 = vsub.f32 %v23664_v50, %v7989_v19  ;;  %v23737_v51 = vpop.eup %21817  ;;  %21829 = vpow2.f32 %v8035_v30  ;;  %8054 = vadd.xlane.f32.xlu1 %v8053_v48 }
0x1641   :  { %v8037_v54 = vmul.f32 1.442695, %v8010_v7  ;;  %v8059_v63 = vsel %vm1622_vm11, %v23737_v51, 0.0 }
0x1642   :  { %v8039_v35 = vmul.f32 1.442695, %v8011_v44  ;;  %v7992_v39 = vpop.xlane.xlu0 %7991 }
0x1643   :  { %v7995_v36 = vpop.xlane.xlu1 %7994  ;;  %21831 = vpow2.f32 %v8037_v54  ;;  %v8012_v14 = vsub.f32 %v23670_v57, %v7992_v39 }
0x1644   :  { %v8013_v13 = vsub.f32 %v23672_v40, %v7995_v36  ;;  %v23743_v50 = vpop.eup %21819  ;;  %21833 = vpow2.f32 %v8039_v35  ;;  %8060 = vadd.xlane.f32.xlu1 %v8059_v63 }
0x1645   :  { %v23745_v55 = vpop.eup %21821  ;;  %v8041_v47 = vmul.f32 1.442695, %v8012_v14  ;;  %v8062_v53 = vsel %vm1622_vm11, %v23743_v50, 0.0 }
0x1646   :  { %v8043_v58 = vmul.f32 1.442695, %v8013_v13  ;;  %v7998_v8 = vpop.xlane.xlu0 %7997  ;;  %8063 = vadd.xlane.f32.xlu0 %v8062_v53  ;;  %v8065_v40 = vsel %vm1622_vm11, %v23745_v55, 0.0 }
0x1647   :  { %21835 = vpow2.f32 %v8041_v47  ;;  %v8014_v57 = vsub.f32 %v23678_v42, %v7998_v8  ;;  %v23794_v7 = vpop.permute.xlu1 %8811 }
0x1648   :  { %v23752_v15 = vpop.eup %21823  ;;  %8066 = vadd.xlane.f32.xlu1 %v8065_v40  ;;  %21837 = vpow2.f32 %v8043_v58 }
0x1649   :  { %v23754_v6 = vpop.eup %21825  ;;  %v8045_v32 = vmul.f32 1.442695, %v8014_v57  ;;  %v8068_v23 = vsel %vm1622_vm11, %v23752_v15, 0.0 }
0x164a   :  { %8069 = vadd.xlane.f32.xlu0 %v8068_v23  ;;  %v8071_v21 = vsel %vm1622_vm11, %v23754_v6, 0.0  ;;  %v23792_v19 = vpop.permute.xlu0 %8887 }
0x164b   :  { %21839 = vpow2.f32 %v8045_v32 }
0x164c   :  { %v23760_v16 = vpop.eup %21827  ;;  %8072 = vadd.xlane.f32.xlu1 %v8071_v21 }
0x164d   :  { %v23762_v42 = vpop.eup %21829  ;;  %v8074_v11 = vsel %vm1622_vm11, %v23760_v16, 0.0 }
0x164e   :  { %8075 = vadd.xlane.f32.xlu0 %v8074_v11  ;;  %v8077_v59 = vsel %vm1622_vm11, %v23762_v42, 0.0  ;;  %v23796_v44 = vpop.permute.xlu0 %8963 }
0x1650   :  { %v23768_v61 = vpop.eup %21831  ;;  %8078 = vadd.xlane.f32.xlu1 %v8077_v59 }
0x1651   :  { %v23770_v4 = vpop.eup %21833  ;;  %v8080_v33 = vsel %vm1622_vm11, %v23768_v61, 0.0 }
0x1652   :  { %8081 = vadd.xlane.f32.xlu0 %v8080_v33  ;;  %v8083_v25 = vsel %vm1622_vm11, %v23770_v4, 0.0  ;;  %v23798_v54 = vpop.permute.xlu0 %9039 }
0x1654   :  { %v23776_v10 = vpop.eup %21835  ;;  %8084 = vadd.xlane.f32.xlu1 %v8083_v25 }
0x1655   :  { %v8086_v38 = vsel %vm1622_vm11, %v23776_v10, 0.0  ;;  %v23780_v17 = vpop.eup %21837 }
0x1656   :  { %8087 = vadd.xlane.f32.xlu0 %v8086_v38  ;;  %v8089_v26 = vsel %vm1622_vm11, %v23780_v17, 0.0  ;;  %v23800_v35 = vpop.permute.xlu0 %9115 }
0x1658   :  { %v23782_v52 = vpop.eup %21839 }
0x1659   :  { %v8092_v30 = vsel %vm1622_vm11, %v23782_v52, 0.0 }
0x165a   :  { %8093 = vadd.xlane.f32.xlu1 %v8092_v30  ;;  %8090 = vadd.xlane.f32.xlu0 %v8089_v26 }
0x166b   :  { %9191 = vrot.lane.b32.xlu1 %v23486_v20, %s22160_s0 }
0x1670   :  { %9267 = vrot.lane.b32.xlu0 %v23506_v27, %s22160_s0 }
0x1677   :  { %v8049_v48 = vpop.xlane.xlu1 %8048 }
0x1678   :  { %21841 = vrcp.f32 %v8049_v48 }
0x1685   :  { %v21842_v39 = vpop.eup %21841 }
0x1686   :  { %v8111_v36 = vmul.f32 %v21842_v39, %v23696_v3 }
0x1687   :  { %v8052_v14 = vpop.xlane.xlu0 %8051 }
0x1688   :  { %21843 = vrcp.f32 %v8052_v14  ;;  %20887 = vmatmul.mubr.msk.f32.vlgmr.msra.gmra.mxu0 %vm1622_vm11, %v8111_v36 }
0x1689   :  { %20895 = vmatpush3.msra.mxu0 %v23704_v29  ;;  %20896 = vmatprep.mubr.msk.f32.mxu0 %vm22156_vm9, %v22154_v9 }
0x168a   :  { %20904 = vmatprep.subr.mxu0 %v22154_v9 }
0x1695   :  { %v21844_v20 = vpop.eup %21843 }
0x1696   :  { %v8112_v27 = vmul.f32 %v21844_v20, %v23700_v22 }
0x1698   :  { %20892 = vmatmul.mubr.msk.f32.vlgmr.msra.gmra.mxu1 %vm1622_vm11, %v8112_v27 }
0x1699   :  { %20900 = vmatpush3.msra.mxu1 %v23706_v62  ;;  %20901 = vmatprep.mubr.msk.f32.mxu1 %vm22156_vm9, %v22154_v9 }
0x169a   :  { %20909 = vmatprep.subr.mxu1 %v22154_v9 }
0x16c5   :  { %v8058_v3 = vpop.xlane.xlu0 %8057 }
0x16c6   :  { %21845 = vrcp.f32 %v8058_v3 }
0x16c9   :  { %v8055_v29 = vpop.xlane.xlu1 %8054 }
0x16ca   :  { %21847 = vrcp.f32 %v8055_v29 }
0x16cd   :  { %v8061_v13 = vpop.xlane.xlu1 %8060 }
0x16ce   :  { %21849 = vrcp.f32 %v8061_v13 }
0x16cf   :  { %v8064_v63 = vpop.xlane.xlu0 %8063 }
0x16d0   :  { %21851 = vrcp.f32 %v8064_v63 }
0x16d1   :  { %v8067_v47 = vpop.xlane.xlu1 %8066 }
0x16d2   :  { %21853 = vrcp.f32 %v8067_v47 }
0x16d3   :  { %v21846_v22 = vpop.eup %21845  ;;  %v8070_v58 = vpop.xlane.xlu0 %8069 }
0x16d4   :  { %21855 = vrcp.f32 %v8070_v58  ;;  %v8114_v62 = vmul.f32 %v21846_v22, %v23725_v5  ;;  %v6605_v22 = vld [vmem:[#allocation2 + $0x178] sm:$0xff] }
0x16d5   :  { %v8073_v53 = vpop.xlane.xlu1 %8072 }
0x16d6   :  { %21857 = vrcp.f32 %v8073_v53  ;;  %20902 = vmatmul.mubr.msk.f32.vlgmr.msra.gmra.mxu1 %vm1622_vm11, %v8114_v62  ;;  %v6604_v53 = vld [vmem:[#allocation2 + $0x170] sm:$0xff] }
0x16d7   :  { %v21848_v8 = vpop.eup %21847  ;;  %20910 = vmatpush3.msra.mxu1 %v23710_v56  ;;  %v8076_v57 = vpop.xlane.xlu0 %8075  ;;  %20911 = vmatprep.mubr.msk.f32.mxu1 %vm22156_vm9, %v22154_v9 }
0x16d8   :  { %21859 = vrcp.f32 %v8076_v57  ;;  %v8113_v40 = vmul.f32 %v21848_v8, %v23731_v24  ;;  %20919 = vmatprep.subr.mxu1 %v22154_v9  ;;  %v6603_v8 = vld [vmem:[#allocation2 + $0x168] sm:$0xff] }
0x16d9   :  { %v8079_v32 = vpop.xlane.xlu1 %8078 }
0x16da   :  { %21861 = vrcp.f32 %v8079_v32  ;;  %20897 = vmatmul.mubr.msk.f32.vlgmr.msra.gmra.mxu0 %vm1622_vm11, %v8113_v40 }
0x16db   :  { %v21850_v5 = vpop.eup %21849  ;;  %20905 = vmatpush3.msra.mxu0 %v23708_v34  ;;  %v8082_v23 = vpop.xlane.xlu0 %8081  ;;  %20906 = vmatprep.mubr.msk.f32.mxu0 %vm22156_vm9, %v22154_v9 }
0x16dc   :  { %21863 = vrcp.f32 %v8082_v23  ;;  %20914 = vmatprep.subr.mxu0 %v22154_v9  ;;  %v8115_v56 = vmul.f32 %v21850_v5, %v23737_v51  ;;  %v6602_v23 = vld [vmem:[#allocation2 + $0x160] sm:$0xff] }
0x16dd   :  { %v21852_v21 = vpop.eup %21851  ;;  %v8085_v24 = vpop.xlane.xlu1 %8084 }
0x16de   :  { %21865 = vrcp.f32 %v8085_v24  ;;  %20907 = vmatmul.mubr.msk.f32.vlgmr.msra.gmra.mxu0 %vm1622_vm11, %v8115_v56  ;;  %v8116_v11 = vmul.f32 %v21852_v21, %v23743_v50 }
0x16df   :  { %v21854_v59 = vpop.eup %21853  ;;  %20915 = vmatpush3.msra.mxu0 %v23712_v37  ;;  %v8088_v34 = vpop.xlane.xlu0 %8087  ;;  %20916 = vmatprep.mubr.msk.f32.mxu0 %vm22156_vm9, %v22154_v9 }
0x16e0   :  { %21867 = vrcp.f32 %v8088_v34  ;;  %20912 = vmatmul.mubr.msk.f32.vlgmr.msra.gmra.mxu1 %vm1622_vm11, %v8116_v11  ;;  %20924 = vmatprep.subr.mxu0 %v22154_v9  ;;  %v8117_v51 = vmul.f32 %v21854_v59, %v23745_v55 }
0x16e1   :  { %v21856_v33 = vpop.eup %21855  ;;  %20920 = vmatpush3.msra.mxu1 %v23714_v46  ;;  %20921 = vmatprep.mubr.msk.f32.mxu1 %vm22156_vm9, %v22154_v9 }
0x16e2   :  { %20917 = vmatmul.mubr.msk.f32.vlgmr.msra.gmra.mxu0 %vm1622_vm11, %v8117_v51  ;;  %20929 = vmatprep.subr.mxu1 %v22154_v9  ;;  %v8118_v37 = vmul.f32 %v21856_v33, %v23752_v15 }
0x16e3   :  { %v21858_v50 = vpop.eup %21857  ;;  %20925 = vmatpush3.msra.mxu0 %v23716_v31  ;;  %v8091_v25 = vpop.xlane.xlu0 %8090  ;;  %20926 = vmatprep.mubr.msk.f32.mxu0 %vm22156_vm9, %v22154_v9 }
0x16e4   :  { %v8094_v38 = vpop.xlane.xlu1 %8093  ;;  %21869 = vrcp.f32 %v8091_v25  ;;  %20922 = vmatmul.mubr.msk.f32.vlgmr.msra.gmra.mxu1 %vm1622_vm11, %v8118_v37  ;;  %20934 = vmatprep.subr.mxu0 %v22154_v9  ;;  %v8119_v46 = vmul.f32 %v21858_v50, %v23754_v6 }
0x16e5   :  { %v21860_v55 = vpop.eup %21859  ;;  %21871 = vrcp.f32 %v8094_v38  ;;  %20930 = vmatpush3.msra.mxu1 %v23794_v7  ;;  %20931 = vmatprep.mubr.msk.f32.mxu1 %vm22156_vm9, %v22154_v9 }
0x16e6   :  { %20927 = vmatmul.mubr.msk.f32.vlgmr.msra.gmra.mxu0 %vm1622_vm11, %v8119_v46  ;;  %20939 = vmatprep.subr.mxu1 %v22154_v9  ;;  %v8120_v31 = vmul.f32 %v21860_v55, %v23760_v16 }
0x16e7   :  { %v21862_v15 = vpop.eup %21861  ;;  %20935 = vmatpush3.msra.mxu0 %v23792_v19  ;;  %20936 = vmatprep.mubr.msk.f32.mxu0 %vm22156_vm9, %v22154_v9 }
0x16e8   :  { %20932 = vmatmul.mubr.msk.f32.vlgmr.msra.gmra.mxu1 %vm1622_vm11, %v8120_v31  ;;  %20944 = vmatprep.subr.mxu0 %v22154_v9  ;;  %v8121_v6 = vmul.f32 %v21862_v15, %v23762_v42  ;;  %v9192_v7 = vpop.permute.xlu1 %9191 }
0x16e9   :  { %v21864_v30 = vpop.eup %21863  ;;  %20940 = vmatpush3.msra.mxu1 %v23796_v44  ;;  %20941 = vmatprep.mubr.msk.f32.mxu1 %vm22156_vm9, %v22154_v9  ;;  %v9268_v44 = vpop.permute.xlu0 %9267 }
0x16ea   :  { %20937 = vmatmul.mubr.msk.f32.vlgmr.msra.gmra.mxu0 %vm1622_vm11, %v8121_v6  ;;  %20949 = vmatprep.subr.mxu1 %v22154_v9  ;;  %v8122_v16 = vmul.f32 %v21864_v30, %v23768_v61 }
0x16eb   :  { %v21866_v26 = vpop.eup %21865  ;;  %20945 = vmatpush3.msra.mxu0 %v23798_v54  ;;  %20946 = vmatprep.mubr.msk.f32.mxu0 %vm22156_vm9, %v22154_v9 }
0x16ec   :  { %20942 = vmatmul.mubr.msk.f32.vlgmr.msra.gmra.mxu1 %vm1622_vm11, %v8122_v16  ;;  %20954 = vmatprep.subr.mxu0 %v22154_v9  ;;  %v8123_v42 = vmul.f32 %v21866_v26, %v23770_v4 }
0x16ed   :  { %v21868_v19 = vpop.eup %21867  ;;  %20950 = vmatpush3.msra.mxu1 %v23800_v35  ;;  %20951 = vmatprep.mubr.msk.f32.mxu1 %vm22156_vm9, %v22154_v9 }
0x16ee   :  { %20947 = vmatmul.mubr.msk.f32.vlgmr.msra.gmra.mxu0 %vm1622_vm11, %v8123_v42  ;;  %20959 = vmatprep.subr.mxu1 %v22154_v9  ;;  %v8124_v61 = vmul.f32 %v21868_v19, %v23776_v10 }
0x16ef   :  { %20955 = vmatpush3.msra.mxu0 %v9192_v7  ;;  %20956 = vmatprep.mubr.msk.f32.mxu0 %vm22156_vm9, %v22154_v9 }
0x16f0   :  { %20952 = vmatmul.mubr.msk.f32.vlgmr.msra.gmra.mxu1 %vm1622_vm11, %v8124_v61  ;;  %20964 = vmatprep.subr.mxu0 %v6605_v22 }
0x16f1   :  { %v21870_v4 = vpop.eup %21869  ;;  %20960 = vmatpush3.msra.mxu1 %v9268_v44  ;;  %20961 = vmatprep.mubr.msk.f32.mxu1 %vm22156_vm9, %v22154_v9 }
0x16f2   :  { %v21872_v48 = vpop.eup %21871  ;;  %v8125_v54 = vmul.f32 %v21870_v4, %v23780_v17 }
0x16f3   :  { %v8126_v35 = vmul.f32 %v21872_v48, %v23782_v52 }
0x16f4   :  { %20957 = vmatmul.mubr.msk.f32.vlgmr.msra.gmra.mxu0 %vm1622_vm11, %v8125_v54 }
0x16f5   :  { %20962 = vmatmul.mubr.msk.f32.vlgmr.msra.gmra.mxu1 %vm1622_vm11, %v8126_v35  ;;  %20965 = vmatpush3.msra.mxu0 %v6605_v22 }
0x16f6   :  { %20966 = vmatprep.subr.mxu0 %v6604_v53 }
0x16f7   :  { %20967 = vmatpush3.msra.mxu0 %v6604_v53 }
0x16f8   :  { %20968 = vmatprep.subr.mxu0 %v6603_v8 }
0x16f9   :  { %20969 = vmatpush3.msra.mxu0 %v6603_v8 }
0x16fa   :  { %20970 = vmatprep.subr.mxu0 %v6602_v23 }
0x16fb   :  { %20971 = vmatpush3.msra.mxu0 %v6602_v23 }
0x1748   :  { %v23886_v10 = vpop.f32.mrf.mxu0 }
0x174a   :  { %v20888_v39 = vpop.f32.mrf.mxu0 }
0x1758   :  { %v23888_v36 = vpop.f32.mrf.mxu1 }
0x175a   :  { %v20893_v14 = vpop.f32.mrf.mxu1 }
0x1796   :  { %v8427_v20 = vpop.f32.mrf.mxu1 }
0x1797   :  { %9347 = vrot.lane.b32.xlu0 %v8427_v20, %s22161_s22 }
0x1798   :  { %v20903_v27 = vpop.f32.mrf.mxu1 }
0x179a   :  { %v8351_v3 = vpop.f32.mrf.mxu0 }
0x179b   :  { %9345 = vrot.lane.b32.xlu1 %v8351_v3, %s22161_s22 }
0x179c   :  { %v20898_v17 = vpop.f32.mrf.mxu0 }
0x179e   :  { %v8503_v29 = vpop.f32.mrf.mxu0 }
0x179f   :  { %9353 = vrot.lane.b32.xlu1 %v8503_v29, %s22149_s19 }
0x17a0   :  { %v20908_v52 = vpop.f32.mrf.mxu0  ;;  %v8579_v13 = vpop.f32.mrf.mxu1 }
0x17a1   :  { %9355 = vrot.lane.b32.xlu0 %v8579_v13, %s22149_s19 }
0x17a2   :  { %v20913_v63 = vpop.f32.mrf.mxu1  ;;  %v8655_v47 = vpop.f32.mrf.mxu0 }
0x17a3   :  { %9361 = vrot.lane.b32.xlu1 %v8655_v47, %s22162_s23  ;;  %v23925_v47 = vld [vmem:[%s25615_s3 + $0x10] sm:$0xff] }
0x17a4   :  { %v20918_v58 = vpop.f32.mrf.mxu0  ;;  %v8731_v62 = vpop.f32.mrf.mxu1  ;;  %v9416_v22 = vrot.slane %v23925_v47, %v22801_v28 }
0x17a5   :  { %9363 = vrot.lane.b32.xlu0 %v8731_v62, %s22162_s23 }
0x17a6   :  { %v20923_v57 = vpop.f32.mrf.mxu1  ;;  %v8807_v40 = vpop.f32.mrf.mxu0 }
0x17a7   :  { %9369 = vrot.lane.b32.xlu1 %v8807_v40, %s22163_s24 }
0x17a8   :  { %v20928_v32 = vpop.f32.mrf.mxu0  ;;  %v8883_v5 = vpop.f32.mrf.mxu1 }
0x17a9   :  { %9371 = vrot.lane.b32.xlu0 %v8883_v5, %s22163_s24 }
0x17aa   :  { %v20933_v56 = vpop.f32.mrf.mxu1  ;;  %v8959_v21 = vpop.f32.mrf.mxu0 }
0x17ab   :  { %9377 = vrot.lane.b32.xlu1 %v8959_v21, %s22164_s25 }
0x17ac   :  { %v20938_v24 = vpop.f32.mrf.mxu0  ;;  %v9035_v11 = vpop.f32.mrf.mxu1 }
0x17ad   :  { %9379 = vrot.lane.b32.xlu0 %v9035_v11, %s22164_s25  ;;  %v6609_v11 = vld [vmem:[#allocation2 + $0x198] sm:$0xff] }
0x17ae   :  { %v20943_v59 = vpop.f32.mrf.mxu1  ;;  %v9111_v34 = vpop.f32.mrf.mxu0  ;;  %20975 = vmatprep.subr.mxu1 %v6609_v11 }
0x17af   :  { %9385 = vrot.lane.b32.xlu1 %v9111_v34, %s22165_s26  ;;  %v6608_v59 = vld [vmem:[#allocation2 + $0x190] sm:$0xff]  ;;  %20976 = vmatpush3.msra.mxu1 %v6609_v11  ;;  %v6617_v34 = vld [vmem:[#allocation2 + $0x1d8] sm:$0xff] }
0x17b0   :  { %v20948_v51 = vpop.f32.mrf.mxu0  ;;  %v9187_v33 = vpop.f32.mrf.mxu1  ;;  %20977 = vmatprep.subr.mxu1 %v6608_v59  ;;  %20986 = vmatprep.subr.mxu0 %v6617_v34 }
0x17b1   :  { %9387 = vrot.lane.b32.xlu0 %v9187_v33, %s22165_s26  ;;  %20978 = vmatpush3.msra.mxu1 %v6608_v59  ;;  %v6616_v51 = vld [vmem:[#allocation2 + $0x1d0] sm:$0xff]  ;;  %v6615_v33 = vld [vmem:[#allocation2 + $0x1c8] sm:$0xff] }
0x17b2   :  { %v20953_v37 = vpop.f32.mrf.mxu1 }
0x17b3   :  { %v6614_v37 = vld [vmem:[#allocation2 + $0x1c0] sm:$0xff] }
0x17b4   :  { %v9263_v50 = vpop.f32.mrf.mxu0 }
0x17b5   :  { %v9339_v25 = vpop.f32.mrf.mxu1  ;;  %9393 = vrot.lane.b32.xlu1 %v9263_v50, %s22166_s27 }
0x17b6   :  { %9395 = vrot.lane.b32.xlu0 %v9339_v25, %s22166_s27  ;;  %v20958_v38 = vpop.f32.mrf.mxu0 }
0x17b7   :  { %v20963_v46 = vpop.f32.mrf.mxu1 }
0x1809   :  { %v9348_v31 = vpop.permute.xlu0 %9347 }
0x180a   :  { %v9400_v44 = vsel %vm407_vm10, %v23888_v36, %v9348_v31 }
0x180d   :  { %v9346_v55 = vpop.permute.xlu1 %9345 }
0x180e   :  { %v9399_v61 = vsel %vm407_vm10, %v23886_v10, %v9346_v55 }
0x1811   :  { %v9354_v15 = vpop.permute.xlu1 %9353 }
0x1812   :  { %v9401_v4 = vsel %vm1622_vm11, %v9399_v61, %v9354_v15 }
0x1813   :  { %v9356_v6 = vpop.permute.xlu0 %9355 }
0x1814   :  { %v9402_v35 = vsel %vm1622_vm11, %v9400_v44, %v9356_v6  ;;  %v9533_v44 = vrot.slane %v23925_v47, %v22822_v60 }
0x1815   :  { %v9362_v30 = vpop.permute.xlu1 %9361 }
0x1816   :  { %v9403_v39 = vsel %vm3075_vm12, %v9401_v4, %v9362_v30 }
0x1817   :  { %v9364_v16 = vpop.permute.xlu0 %9363 }
0x1818   :  { %v9404_v14 = vsel %vm3075_vm12, %v9402_v35, %v9364_v16  ;;  %v9539_v35 = vrot.slane %v23925_v47, %v22825_v43 }
0x1819   :  { %v9370_v26 = vpop.permute.xlu1 %9369 }
0x181a   :  { %v9405_v20 = vsel %vm3078_vm13, %v9403_v39, %v9370_v26 }
0x181b   :  { %v9372_v42 = vpop.permute.xlu0 %9371 }
0x181c   :  { %v9406_v27 = vsel %vm3078_vm13, %v9404_v14, %v9372_v42 }
0x181d   :  { %v9378_v19 = vpop.permute.xlu1 %9377 }
0x181e   :  { %v9407_v3 = vsel %vm3081_vm14, %v9405_v20, %v9378_v19 }
0x181f   :  { %v9380_v7 = vpop.permute.xlu0 %9379 }
0x1820   :  { %v9408_v10 = vsel %vm3081_vm14, %v9406_v27, %v9380_v7 }
0x1821   :  { %v9386_v48 = vpop.permute.xlu1 %9385 }
0x1822   :  { %v9409_v36 = vsel %vm3084_vm15, %v9407_v3, %v9386_v48 }
0x1823   :  { %v9388_v54 = vpop.permute.xlu0 %9387 }
0x1824   :  { %v9410_v29 = vsel %vm3084_vm15, %v9408_v10, %v9388_v54 }
0x1827   :  { %v9394_v17 = vpop.permute.xlu1 %9393 }
0x1828   :  { %v9396_v52 = vpop.permute.xlu0 %9395  ;;  %v9411_v13 = vsel %vm3087_vm0, %v9409_v36, %v9394_v17  ;;  %v6613_v36 = vld [vmem:[#allocation2 + $0x1b8] sm:$0xff]  ;;  %v6612_v17 = vld [vmem:[#allocation2 + $0x1b0] sm:$0xff] }
0x1829   :  { %v9412_v63 = vsel %vm3087_vm0, %v9410_v29, %v9396_v52  ;;  %20972 = vmatprep.mubr.msk.f32.mxu0 %vm101_vm7, %v9411_v13  ;;  %v6611_v29 = vld [vmem:[#allocation2 + $0x1a8] sm:$0xff]  ;;  %v6610_v52 = vld [vmem:[#allocation2 + $0x1a0] sm:$0xff]  ;;  %v9545_v13 = vrot.slane %v23925_v47, %v22836_v49 }
0x182a   :  { %20973 = vmatmul.mubr.msk.f32.vlgmr.msra.gmra.mxu0 %vm101_vm7, %v9412_v63 }
0x182b   :  { %20987 = vmatpush3.msra.mxu0 %v6617_v34 }
0x182c   :  { %20988 = vmatprep.subr.mxu0 %v6616_v51 }
0x182d   :  { %20989 = vmatpush3.msra.mxu0 %v6616_v51  ;;  %v9762_v51 = vld [vmem:[#allocation2 + $0x1f8] sm:$0xff] }
0x182e   :  { %20990 = vmatprep.subr.mxu0 %v6615_v33 }
0x182f   :  { %20991 = vmatpush3.msra.mxu0 %v6615_v33  ;;  %v9761_v33 = vld [vmem:[#allocation2 + $0x1f0] sm:$0xff] }
0x1830   :  { %20992 = vmatprep.subr.mxu0 %v6614_v37 }
0x1831   :  { %20993 = vmatpush3.msra.mxu0 %v6614_v37  ;;  %v9760_v37 = vld [vmem:[#allocation2 + $0x1e8] sm:$0xff] }
0x1832   :  { %20994 = vmatprep.subr.mxu0 %v6613_v36 }
0x1833   :  { %20995 = vmatpush3.msra.mxu0 %v6613_v36 }
0x1834   :  { %20996 = vmatprep.subr.mxu0 %v6612_v17 }
0x1835   :  { %20997 = vmatpush3.msra.mxu0 %v6612_v17  ;;  %v19600_v17 = vld [vmem:[%s25615_s3 + $0x18] sm:$0xff] }
0x1836   :  { %20998 = vmatprep.subr.mxu0 %v6611_v29 }
0x1837   :  { %20999 = vmatpush3.msra.mxu0 %v6611_v29 }
0x1838   :  { %21000 = vmatprep.subr.mxu0 %v6610_v52 }
0x1839   :  { %21001 = vmatpush3.msra.mxu0 %v6610_v52 }
0x183a   :  { %21026 = vmatprep.subr.mxu0 %v22154_v9 }
0x18ea   :  { %v20974_v58 = vpop.f32.mrf.mxu0 }
0x18eb   :  { %v9495_v62 = vadd.f32 %v20974_v58, %v9416_v22 }
0x18ec   :  { %v9489_v53 = vpop.f32.mrf.mxu0 }
0x18ed   :  { %v9499_v8 = vadd.f32 %v9495_v62, %v23400_v12  ;;  %v9490_v57 = vadd.f32 %v9489_v53, %v9416_v22  ;;  %v6607_v12 = vld [vmem:[#allocation2 + $0x188] sm:$0xff] }
0x18ee   :  { %20979 = vmatprep.subr.mxu1 %v6607_v12 }
0x18ef   :  { %v9498_v40 = vadd.f32 %v9490_v57, %v23398_v18  ;;  %v9503_v32 = vsel %vm101_vm7, %v9499_v8, 0.0  ;;  %v9509_v56 = vmul.f32 %v9499_v8, %v9499_v8  ;;  %v6606_v18 = vld [vmem:[#allocation2 + $0x180] sm:$0xff]  ;;  %20980 = vmatpush3.msra.mxu1 %v6607_v12  ;;  %v9632_v57 = vrot.slane %v23925_v47, %v22845_v0 }
0x18f0   :  { %9504 = vadd.xlane.f32.xlu0 %v9503_v32  ;;  %20981 = vmatprep.subr.mxu1 %v6606_v18 }
0x18f1   :  { %v9500_v5 = vsel %vm101_vm7, %v9498_v40, 0.0  ;;  %v9508_v23 = vmul.f32 %v9498_v40, %v9498_v40  ;;  %v9513_v24 = vsel %vm101_vm7, %v9509_v56, 0.0  ;;  %20982 = vmatpush3.msra.mxu1 %v6606_v18 }
0x18f2   :  { %9501 = vadd.xlane.f32.xlu1 %v9500_v5  ;;  %21005 = vmatprep.subr.mxu1 %v9762_v51 }
0x18f3   :  { %v9510_v21 = vsel %vm101_vm7, %v9508_v23, 0.0 }
0x18f4   :  { %9511 = vadd.xlane.f32.xlu0 %v9510_v21 }
0x18f6   :  { %9514 = vadd.xlane.f32.xlu1 %v9513_v24 }
0x1979   :  { %v9505_v50 = vpop.xlane.xlu0 %9504 }
0x197a   :  { %v9507_v38 = vmul.f32 0.03125, %v9505_v50  ;;  %v9759_v50 = vld [vmem:[#allocation2 + $0x1e0] sm:$0xff] }
0x197b   :  { %v9502_v25 = vpop.xlane.xlu1 %9501 }
0x197c   :  { %v9506_v46 = vmul.f32 0.03125, %v9502_v25  ;;  %v9519_v30 = vmul.f32 %v9507_v38, %v9507_v38  ;;  %v9523_v48 = vsub.f32 %v9499_v8, %v9507_v38 }
0x197d   :  { %v9512_v55 = vpop.xlane.xlu0 %9511 }
0x197e   :  { %v9518_v31 = vmul.f32 %v9506_v46, %v9506_v46  ;;  %v9516_v15 = vmul.f32 0.03125, %v9512_v55  ;;  %v9522_v61 = vsub.f32 %v9498_v40, %v9506_v46 }
0x197f   :  { %v9515_v6 = vpop.xlane.xlu1 %9514 }
0x1980   :  { %v9520_v16 = vsub.f32 %v9516_v15, %v9518_v31  ;;  %v9517_v26 = vmul.f32 0.03125, %v9515_v6 }
0x1982   :  { %v9524_v42 = vadd.f32 1e-05, %v9520_v16  ;;  %v9521_v19 = vsub.f32 %v9517_v26, %v9519_v30 }
0x1984   :  { %21873 = vrsqrt.f32 %v9524_v42  ;;  %v9525_v7 = vadd.f32 1e-05, %v9521_v19 }
0x1986   :  { %21875 = vrsqrt.f32 %v9525_v7 }
0x1991   :  { %v21874_v4 = vpop.eup %21873 }
0x1992   :  { %v9528_v54 = vmul.f32 %v21874_v4, %v9522_v61 }
0x1993   :  { %v21876_v39 = vpop.eup %21875 }
0x1994   :  { %v9529_v14 = vmul.f32 %v21876_v39, %v9523_v48  ;;  %v9534_v20 = vmul.f32 %v9533_v44, %v9528_v54  ;;  %v9749_v48 = vrot.slane %v23925_v47, %v22855_v41 }
0x1996   :  { %v9535_v27 = vmul.f32 %v9533_v44, %v9529_v14  ;;  %v9540_v3 = vadd.f32 %v9539_v35, %v9534_v20 }
0x1998   :  { %v9541_v10 = vadd.f32 %v9539_v35, %v9535_v27  ;;  %20983 = vmatprep.mubr.msk.f32.mxu1 %vm101_vm7, %v9540_v3  ;;  %v9755_v27 = vrot.slane %v23925_v47, %v22860_v45  ;;  %v9784_v47 = vrot.slane %v19600_v17, %v22293_v2 }
0x199a   :  { %20984 = vmatmul.mubr.msk.f32.vlgmr.msra.gmra.mxu1 %vm101_vm7, %v9541_v10 }
0x199b   :  { %21006 = vmatpush3.msra.mxu1 %v9762_v51 }
0x199c   :  { %21007 = vmatprep.subr.mxu1 %v9761_v33 }
0x199d   :  { %21008 = vmatpush3.msra.mxu1 %v9761_v33 }
0x199e   :  { %21009 = vmatprep.subr.mxu1 %v9760_v37 }
0x199f   :  { %21010 = vmatpush3.msra.mxu1 %v9760_v37 }
0x19a0   :  { %21011 = vmatprep.subr.mxu1 %v9759_v50 }
0x19a1   :  { %21012 = vmatpush3.msra.mxu1 %v9759_v50 }
0x19a2   :  { %21016 = vmatprep.subr.mxu1 %v22154_v9 }
0x1a5a   :  { %v20985_v63 = vpop.f32.mrf.mxu1 }
0x1a5b   :  { %v9624_v22 = vadd.f32 %v20985_v63, %v9545_v13 }
0x1a5c   :  { %v9618_v58 = vpop.f32.mrf.mxu1 }
0x1a5d   :  { %v9619_v62 = vadd.f32 %v9618_v58, %v9545_v13  ;;  %v9628_v8 = vmax.f32 %v9624_v22, 0.0 }
0x1a5f   :  { %v9627_v53 = vmax.f32 %v9619_v62, 0.0 }
0x1a61   :  { %21002 = vmatprep.mubr.msk.f32.mxu0 %vm187_vm8, %v9627_v53 }
0x1a62   :  { %21003 = vmatmul.mubr.msk.f32.vlgmr.msra.gmra.mxu0 %vm187_vm8, %v9628_v8 }
0x1a63   :  { %21028 = vmatprep.mubr.msk.f32.mxu0 %vm22156_vm9, %v22154_v9 }
0x1b22   :  { %v21004_v40 = vpop.f32.mrf.mxu0 }
0x1b23   :  { %v9711_v32 = vadd.f32 %v21004_v40, %v9632_v57 }
0x1b24   :  { %v9705_v5 = vpop.f32.mrf.mxu0 }
0x1b25   :  { %v9715_v23 = vadd.f32 %v9711_v32, %v9541_v10  ;;  %v9706_v56 = vadd.f32 %v9705_v5, %v9632_v57 }
0x1b27   :  { %v9714_v21 = vadd.f32 %v9706_v56, %v9540_v3  ;;  %v9719_v24 = vsel %vm101_vm7, %v9715_v23, 0.0  ;;  %v9725_v11 = vmul.f32 %v9715_v23, %v9715_v23 }
0x1b28   :  { %9720 = vadd.xlane.f32.xlu1 %v9719_v24 }
0x1b29   :  { %v9716_v59 = vsel %vm101_vm7, %v9714_v21, 0.0  ;;  %v9724_v12 = vmul.f32 %v9714_v21, %v9714_v21  ;;  %v9729_v18 = vsel %vm101_vm7, %v9725_v11, 0.0 }
0x1b2a   :  { %9717 = vadd.xlane.f32.xlu0 %v9716_v59 }
0x1b2b   :  { %v9726_v34 = vsel %vm101_vm7, %v9724_v12, 0.0 }
0x1b2c   :  { %9730 = vadd.xlane.f32.xlu1 %v9729_v18 }
0x1b2e   :  { %9727 = vadd.xlane.f32.xlu0 %v9726_v34 }
0x1bb1   :  { %v9721_v25 = vpop.xlane.xlu1 %9720 }
0x1bb2   :  { %v9723_v38 = vmul.f32 0.03125, %v9721_v25 }
0x1bb3   :  { %v9718_v46 = vpop.xlane.xlu0 %9717 }
0x1bb4   :  { %v9722_v55 = vmul.f32 0.03125, %v9718_v46  ;;  %v9735_v15 = vmul.f32 %v9723_v38, %v9723_v38  ;;  %v9739_v44 = vsub.f32 %v9715_v23, %v9723_v38 }
0x1bb5   :  { %v9731_v31 = vpop.xlane.xlu1 %9730 }
0x1bb6   :  { %v9733_v6 = vmul.f32 0.03125, %v9731_v31  ;;  %v9734_v16 = vmul.f32 %v9722_v55, %v9722_v55  ;;  %v9738_v54 = vsub.f32 %v9714_v21, %v9722_v55 }
0x1bb7   :  { %v9728_v30 = vpop.xlane.xlu0 %9727 }
0x1bb8   :  { %v9737_v26 = vsub.f32 %v9733_v6, %v9735_v15  ;;  %v9732_v42 = vmul.f32 0.03125, %v9728_v30 }
0x1bba   :  { %v9741_v19 = vadd.f32 1e-05, %v9737_v26  ;;  %v9736_v7 = vsub.f32 %v9732_v42, %v9734_v16 }
0x1bbc   :  { %21877 = vrsqrt.f32 %v9741_v19  ;;  %v9740_v61 = vadd.f32 1e-05, %v9736_v7 }
0x1bbe   :  { %21879 = vrsqrt.f32 %v9740_v61 }
0x1bc9   :  { %v21878_v4 = vpop.eup %21877 }
0x1bca   :  { %v9745_v35 = vmul.f32 %v21878_v4, %v9739_v44 }
0x1bcb   :  { %v21880_v39 = vpop.eup %21879 }
0x1bcc   :  { %v9744_v14 = vmul.f32 %v21880_v39, %v9738_v54  ;;  %v9751_v20 = vmul.f32 %v9749_v48, %v9745_v35 }
0x1bce   :  { %v9750_v3 = vmul.f32 %v9749_v48, %v9744_v14  ;;  %v23961_v36 = vadd.f32 %v9755_v27, %v9751_v20 }
0x1bd0   :  { %v23959_v10 = vadd.f32 %v9755_v27, %v9750_v3 }
0x1bd2   :  { %21013 = vmatprep.mubr.msk.f32.mxu1 %vm101_vm7, %v23959_v10 }
0x1bd3   :  { %21014 = vmatmul.mubr.msk.f32.vlgmr.msra.gmra.mxu1 %vm101_vm7, %v23961_v36 }
0x1bd4   :  { %21018 = vmatprep.mubr.msk.f32.mxu1 %vm22156_vm9, %v22154_v9 }
0x1c93   :  { %v21015_v29 = vpop.f32.mrf.mxu1 }
0x1c94   :  { %v23973_v52 = vadd.f32 %v21015_v29, %v9784_v47 }
0x1c95   :  { %v9857_v13 = vpop.f32.mrf.mxu1 }
0x1c96   :  { %v23975_v63 = vadd.f32 %v9857_v13, %v9784_v47  ;;  %9870 = vrot.lane.b32.xlu1 %v23973_v52, %s22151_s14 }
0x1c98   :  { %9868 = vrot.lane.b32.xlu0 %v23975_v63, %s22151_s14 }
0x1c9a   :  { %9872 = vrot.lane.b32.xlu1 %v23975_v63, %s22150_s1 }
0x1c9c   :  { %9874 = vrot.lane.b32.xlu0 %v23973_v52, %s22150_s1 }
0x1c9e   :  { %9876 = vrot.lane.b32.xlu1 %v23975_v63, %s22152_s15 }
0x1ca0   :  { %9878 = vrot.lane.b32.xlu0 %v23973_v52, %s22152_s15 }
0x1ca2   :  { %9880 = vrot.lane.b32.xlu1 %v23975_v63, %s22153_s16 }
0x1ca4   :  { %9882 = vrot.lane.b32.xlu0 %v23973_v52, %s22153_s16 }
0x1ca6   :  { %9884 = vrot.lane.b32.xlu1 %v23975_v63, %s22155_s17 }
0x1ca8   :  { %9886 = vrot.lane.b32.xlu0 %v23973_v52, %s22155_s17 }
0x1caa   :  { %9888 = vrot.lane.b32.xlu1 %v23975_v63, %s22157_s18 }
0x1cac   :  { %9890 = vrot.lane.b32.xlu0 %v23973_v52, %s22157_s18 }
0x1cae   :  { %9892 = vrot.lane.b32.xlu1 %v23975_v63, %s22158_s20 }
0x1cb0   :  { %9894 = vrot.lane.b32.xlu0 %v23973_v52, %s22158_s20 }
0x1cb2   :  { %9896 = vrot.lane.b32.xlu1 %v23975_v63, %s22159_s21 }
0x1cb4   :  { %9972 = vrot.lane.b32.xlu0 %v23973_v52, %s22159_s21 }
0x1d08   :  { %v24009_v22 = vpop.permute.xlu1 %9870 }
0x1d09   :  { %10124 = vrot.lane.b32.xlu0 %v24009_v22, %s22159_s21 }
0x1d0a   :  { %v24013_v58 = vpop.permute.xlu0 %9868 }
0x1d0b   :  { %10048 = vrot.lane.b32.xlu1 %v24013_v58, %s22159_s21 }
0x1d0c   :  { %v24017_v62 = vpop.permute.xlu1 %9872 }
0x1d0e   :  { %v24019_v53 = vpop.permute.xlu0 %9874 }
0x1d0f   :  { %10200 = vrot.lane.b32.xlu1 %v24017_v62, %s22159_s21  ;;  %10276 = vrot.lane.b32.xlu0 %v24019_v53, %s22159_s21 }
0x1d10   :  { %v24025_v8 = vpop.permute.xlu1 %9876 }
0x1d12   :  { %v24027_v57 = vpop.permute.xlu0 %9878 }
0x1d13   :  { %10352 = vrot.lane.b32.xlu1 %v24025_v8, %s22159_s21  ;;  %10428 = vrot.lane.b32.xlu0 %v24027_v57, %s22159_s21 }
0x1d14   :  { %v24033_v40 = vpop.permute.xlu1 %9880 }
0x1d16   :  { %v24035_v32 = vpop.permute.xlu0 %9882 }
0x1d17   :  { %10504 = vrot.lane.b32.xlu1 %v24033_v40, %s22159_s21  ;;  %10580 = vrot.lane.b32.xlu0 %v24035_v32, %s22159_s21 }
0x1d18   :  { %v24041_v5 = vpop.permute.xlu1 %9884 }
0x1d1a   :  { %v24043_v23 = vpop.permute.xlu0 %9886 }
0x1d1b   :  { %10656 = vrot.lane.b32.xlu1 %v24041_v5, %s22159_s21  ;;  %10732 = vrot.lane.b32.xlu0 %v24043_v23, %s22159_s21 }
0x1d1c   :  { %v24049_v56 = vpop.permute.xlu1 %9888 }
0x1d1e   :  { %v24051_v21 = vpop.permute.xlu0 %9890 }
0x1d1f   :  { %10808 = vrot.lane.b32.xlu1 %v24049_v56, %s22159_s21  ;;  %10884 = vrot.lane.b32.xlu0 %v24051_v21, %s22159_s21 }
0x1d20   :  { %v24057_v24 = vpop.permute.xlu1 %9892 }
0x1d22   :  { %v24059_v11 = vpop.permute.xlu0 %9894 }
0x1d23   :  { %10960 = vrot.lane.b32.xlu1 %v24057_v24, %s22159_s21  ;;  %11036 = vrot.lane.b32.xlu0 %v24059_v11, %s22159_s21 }
0x1d24   :  { %v9897_v59 = vpop.permute.xlu1 %9896 }
0x1d25   :  { %21017 = vmatpush3.xpose.msk.msra.mxu1 %vm407_vm10, %v9897_v59 }
0x1d26   :  { %21021 = vmatprep.subr.mxu1 %v22154_v9  ;;  %v9973_v12 = vpop.permute.xlu0 %9972 }
0x1d28   :  { %21019 = vmatmul.mubr.msk.f32.vlgmr.msra.gmra.mxu1 %vm407_vm10, %v23975_v63 }
0x1d29   :  { %21022 = vmatpush3.xpose.msk.msra.mxu1 %vm407_vm10, %v9973_v12  ;;  %21023 = vmatprep.mubr.msk.f32.mxu1 %vm22156_vm9, %v22154_v9 }
0x1d2a   :  { %21031 = vmatprep.subr.mxu1 %v22154_v9 }
0x1d2c   :  { %21024 = vmatmul.mubr.msk.f32.vlgmr.msra.gmra.mxu1 %vm407_vm10, %v23973_v52 }
0x1d2d   :  { %21033 = vmatprep.mubr.msk.f32.mxu1 %vm22156_vm9, %v22154_v9 }
0x1d7b   :  { %v10125_v18 = vpop.permute.xlu0 %10124 }
0x1d7c   :  { %21032 = vmatpush3.xpose.msk.msra.mxu1 %vm407_vm10, %v10125_v18 }
0x1d7d   :  { %v10049_v34 = vpop.permute.xlu1 %10048  ;;  %21041 = vmatprep.subr.mxu1 %v22154_v9 }
0x1d7e   :  { %21027 = vmatpush3.xpose.msk.msra.mxu0 %vm407_vm10, %v10049_v34 }
0x1d7f   :  { %21034 = vmatmul.mubr.msk.f32.vlgmr.msra.gmra.mxu1 %vm407_vm10, %v24009_v22  ;;  %21036 = vmatprep.subr.mxu0 %v22154_v9 }
0x1d80   :  { %21043 = vmatprep.mubr.msk.f32.mxu1 %vm22156_vm9, %v22154_v9 }
0x1d81   :  { %21029 = vmatmul.mubr.msk.f32.vlgmr.msra.gmra.mxu0 %vm407_vm10, %v24013_v58  ;;  %v10201_v51 = vpop.permute.xlu1 %10200  ;;  %v10277_v33 = vpop.permute.xlu0 %10276 }
0x1d82   :  { %21037 = vmatpush3.xpose.msk.msra.mxu0 %vm407_vm10, %v10201_v51  ;;  %21042 = vmatpush3.xpose.msk.msra.mxu1 %vm407_vm10, %v10277_v33 }
0x1d83   :  { %21038 = vmatprep.mubr.msk.f32.mxu0 %vm22156_vm9, %v22154_v9  ;;  %21046 = vmatprep.subr.mxu0 %v22154_v9 }
0x1d84   :  { %21051 = vmatprep.subr.mxu1 %v22154_v9 }
0x1d85   :  { %21039 = vmatmul.mubr.msk.f32.vlgmr.msra.gmra.mxu0 %vm407_vm10, %v24017_v62  ;;  %v10353_v37 = vpop.permute.xlu1 %10352  ;;  %21044 = vmatmul.mubr.msk.f32.vlgmr.msra.gmra.mxu1 %vm407_vm10, %v24019_v53  ;;  %v10429_v50 = vpop.permute.xlu0 %10428 }
0x1d86   :  { %21047 = vmatpush3.xpose.msk.msra.mxu0 %vm407_vm10, %v10353_v37  ;;  %21052 = vmatpush3.xpose.msk.msra.mxu1 %vm407_vm10, %v10429_v50 }
0x1d87   :  { %21048 = vmatprep.mubr.msk.f32.mxu0 %vm22156_vm9, %v22154_v9  ;;  %21053 = vmatprep.mubr.msk.f32.mxu1 %vm22156_vm9, %v22154_v9 }
0x1d88   :  { %21056 = vmatprep.subr.mxu0 %v22154_v9  ;;  %21061 = vmatprep.subr.mxu1 %v22154_v9 }
0x1d89   :  { %21049 = vmatmul.mubr.msk.f32.vlgmr.msra.gmra.mxu0 %vm407_vm10, %v24025_v8  ;;  %v10505_v25 = vpop.permute.xlu1 %10504  ;;  %21054 = vmatmul.mubr.msk.f32.vlgmr.msra.gmra.mxu1 %vm407_vm10, %v24027_v57  ;;  %v10581_v38 = vpop.permute.xlu0 %10580 }
0x1d8a   :  { %21057 = vmatpush3.xpose.msk.msra.mxu0 %vm407_vm10, %v10505_v25  ;;  %21062 = vmatpush3.xpose.msk.msra.mxu1 %vm407_vm10, %v10581_v38 }
0x1d8b   :  { %21058 = vmatprep.mubr.msk.f32.mxu0 %vm22156_vm9, %v22154_v9  ;;  %21063 = vmatprep.mubr.msk.f32.mxu1 %vm22156_vm9, %v22154_v9 }
0x1d8c   :  { %21066 = vmatprep.subr.mxu0 %v22154_v9  ;;  %21071 = vmatprep.subr.mxu1 %v22154_v9 }
0x1d8d   :  { %21059 = vmatmul.mubr.msk.f32.vlgmr.msra.gmra.mxu0 %vm407_vm10, %v24033_v40  ;;  %v10657_v46 = vpop.permute.xlu1 %10656  ;;  %21064 = vmatmul.mubr.msk.f32.vlgmr.msra.gmra.mxu1 %vm407_vm10, %v24035_v32  ;;  %v10733_v55 = vpop.permute.xlu0 %10732 }
0x1d8e   :  { %21067 = vmatpush3.xpose.msk.msra.mxu0 %vm407_vm10, %v10657_v46  ;;  %21072 = vmatpush3.xpose.msk.msra.mxu1 %vm407_vm10, %v10733_v55 }
0x1d8f   :  { %21068 = vmatprep.mubr.msk.f32.mxu0 %vm22156_vm9, %v22154_v9  ;;  %21073 = vmatprep.mubr.msk.f32.mxu1 %vm22156_vm9, %v22154_v9 }
0x1d90   :  { %21076 = vmatprep.subr.mxu0 %v22154_v9  ;;  %21081 = vmatprep.subr.mxu1 %v22154_v9 }
0x1d91   :  { %21069 = vmatmul.mubr.msk.f32.vlgmr.msra.gmra.mxu0 %vm407_vm10, %v24041_v5  ;;  %v10809_v31 = vpop.permute.xlu1 %10808  ;;  %21074 = vmatmul.mubr.msk.f32.vlgmr.msra.gmra.mxu1 %vm407_vm10, %v24043_v23  ;;  %v10885_v15 = vpop.permute.xlu0 %10884 }
0x1d92   :  { %21077 = vmatpush3.xpose.msk.msra.mxu0 %vm407_vm10, %v10809_v31  ;;  %21082 = vmatpush3.xpose.msk.msra.mxu1 %vm407_vm10, %v10885_v15 }
0x1d93   :  { %21078 = vmatprep.mubr.msk.f32.mxu0 %vm22156_vm9, %v22154_v9  ;;  %21083 = vmatprep.mubr.msk.f32.mxu1 %vm22156_vm9, %v22154_v9 }
0x1d94   :  { %21086 = vmatprep.subr.mxu0 %v22154_v9  ;;  %21091 = vmatprep.subr.mxu1 %v22154_v9 }
0x1d95   :  { %21079 = vmatmul.mubr.msk.f32.vlgmr.msra.gmra.mxu0 %vm407_vm10, %v24049_v56  ;;  %v10961_v6 = vpop.permute.xlu1 %10960  ;;  %21084 = vmatmul.mubr.msk.f32.vlgmr.msra.gmra.mxu1 %vm407_vm10, %v24051_v21  ;;  %v11037_v30 = vpop.permute.xlu0 %11036 }
0x1d96   :  { %21087 = vmatpush3.xpose.msk.msra.mxu0 %vm407_vm10, %v10961_v6  ;;  %21092 = vmatpush3.xpose.msk.msra.mxu1 %vm407_vm10, %v11037_v30 }
0x1d97   :  { %21088 = vmatprep.mubr.msk.f32.mxu0 %vm22156_vm9, %v22154_v9  ;;  %21093 = vmatprep.mubr.msk.f32.mxu1 %vm22156_vm9, %v22154_v9 }
0x1d98   :  { %21096 = vmatprep.subr.mxu0 %v22154_v9  ;;  %21101 = vmatprep.subr.mxu1 %v22154_v9 }
0x1d99   :  { %21089 = vmatmul.mubr.msk.f32.vlgmr.msra.gmra.mxu0 %vm407_vm10, %v24057_v24  ;;  %21094 = vmatmul.mubr.msk.f32.vlgmr.msra.gmra.mxu1 %vm407_vm10, %v24059_v11 }
0x1d9a   :  { %21098 = vmatprep.mubr.msk.f32.mxu0 %vm22156_vm9, %v22154_v9  ;;  %21103 = vmatprep.mubr.msk.f32.mxu1 %vm22156_vm9, %v22154_v9 }
0x1de8   :  { %v24161_v16 = vpop.f32.mrf.mxu1 }
0x1de9   :  { %v11112_v26 = vsel %vm1622_vm11, %v24161_v16, -inf }
0x1dea   :  { %v21020_v42 = vpop.f32.mrf.mxu1  ;;  %11113 = vmax.xlane.f32.xlu1 %v11112_v26 }
0x1dec   :  { %v24165_v19 = vpop.f32.mrf.mxu1 }
0x1ded   :  { %v11115_v7 = vsel %vm1622_vm11, %v24165_v19, -inf }
0x1dee   :  { %11116 = vmax.xlane.f32.xlu0 %v11115_v7  ;;  %v21025_v61 = vpop.f32.mrf.mxu1 }
0x1e3f   :  { %v24169_v44 = vpop.f32.mrf.mxu1 }
0x1e40   :  { %v11121_v4 = vsel %vm1622_vm11, %v24169_v44, -inf }
0x1e41   :  { %v24173_v48 = vpop.f32.mrf.mxu0  ;;  %11122 = vmax.xlane.f32.xlu1 %v11121_v4  ;;  %v21035_v54 = vpop.f32.mrf.mxu1 }
0x1e42   :  { %v11118_v35 = vsel %vm1622_vm11, %v24173_v48, -inf }
0x1e43   :  { %v21030_v39 = vpop.f32.mrf.mxu0  ;;  %11119 = vmax.xlane.f32.xlu0 %v11118_v35 }
0x1e45   :  { %v24177_v14 = vpop.f32.mrf.mxu0  ;;  %v24179_v20 = vpop.f32.mrf.mxu1 }
0x1e46   :  { %v11124_v27 = vsel %vm1622_vm11, %v24177_v14, -inf  ;;  %v11127_v3 = vsel %vm1622_vm11, %v24179_v20, -inf }
0x1e47   :  { %v21040_v17 = vpop.f32.mrf.mxu0  ;;  %11125 = vmax.xlane.f32.xlu0 %v11124_v27  ;;  %11128 = vmax.xlane.f32.xlu1 %v11127_v3  ;;  %v21045_v47 = vpop.f32.mrf.mxu1 }
0x1e49   :  { %v24185_v29 = vpop.f32.mrf.mxu0  ;;  %v24187_v13 = vpop.f32.mrf.mxu1 }
0x1e4a   :  { %v11130_v59 = vsel %vm1622_vm11, %v24185_v29, -inf  ;;  %v11133_v12 = vsel %vm1622_vm11, %v24187_v13, -inf }
0x1e4b   :  { %v21050_v18 = vpop.f32.mrf.mxu0  ;;  %11131 = vmax.xlane.f32.xlu0 %v11130_v59  ;;  %11134 = vmax.xlane.f32.xlu1 %v11133_v12  ;;  %v21055_v34 = vpop.f32.mrf.mxu1 }
0x1e4d   :  { %v24193_v51 = vpop.f32.mrf.mxu0  ;;  %v24195_v33 = vpop.f32.mrf.mxu1 }
0x1e4e   :  { %v11136_v37 = vsel %vm1622_vm11, %v24193_v51, -inf  ;;  %v11139_v50 = vsel %vm1622_vm11, %v24195_v33, -inf }
0x1e4f   :  { %v21060_v25 = vpop.f32.mrf.mxu0  ;;  %11137 = vmax.xlane.f32.xlu0 %v11136_v37  ;;  %11140 = vmax.xlane.f32.xlu1 %v11139_v50  ;;  %v21065_v38 = vpop.f32.mrf.mxu1 }
0x1e51   :  { %v24201_v46 = vpop.f32.mrf.mxu0  ;;  %v24203_v55 = vpop.f32.mrf.mxu1 }
0x1e52   :  { %v11142_v31 = vsel %vm1622_vm11, %v24201_v46, -inf  ;;  %v11145_v15 = vsel %vm1622_vm11, %v24203_v55, -inf }
0x1e53   :  { %v21070_v6 = vpop.f32.mrf.mxu0  ;;  %11143 = vmax.xlane.f32.xlu0 %v11142_v31  ;;  %11146 = vmax.xlane.f32.xlu1 %v11145_v15  ;;  %v21075_v30 = vpop.f32.mrf.mxu1 }
0x1e55   :  { %v24209_v26 = vpop.f32.mrf.mxu0  ;;  %v24211_v42 = vpop.f32.mrf.mxu1 }
0x1e56   :  { %v11148_v7 = vsel %vm1622_vm11, %v24209_v26, -inf  ;;  %v11151_v61 = vsel %vm1622_vm11, %v24211_v42, -inf }
0x1e57   :  { %v21080_v4 = vpop.f32.mrf.mxu0  ;;  %11149 = vmax.xlane.f32.xlu0 %v11148_v7  ;;  %11152 = vmax.xlane.f32.xlu1 %v11151_v61  ;;  %v21085_v54 = vpop.f32.mrf.mxu1 }
0x1e59   :  { %v24217_v35 = vpop.f32.mrf.mxu0  ;;  %v24219_v39 = vpop.f32.mrf.mxu1 }
0x1e5a   :  { %v11154_v27 = vsel %vm1622_vm11, %v24217_v35, -inf  ;;  %v11157_v3 = vsel %vm1622_vm11, %v24219_v39, -inf }
0x1e5b   :  { %v21090_v17 = vpop.f32.mrf.mxu0  ;;  %11155 = vmax.xlane.f32.xlu0 %v11154_v27  ;;  %11158 = vmax.xlane.f32.xlu1 %v11157_v3  ;;  %v21095_v47 = vpop.f32.mrf.mxu1 }
0x1e6c   :  { %11364 = vrot.lane.b32.xlu1 %v23973_v52, %s22160_s0 }
0x1e70   :  { %11440 = vrot.lane.b32.xlu1 %v24013_v58, %s22160_s0 }
0x1e71   :  { %11288 = vrot.lane.b32.xlu0 %v23975_v63, %s22160_s0 }
0x1e73   :  { %v11114_v59 = vpop.xlane.xlu1 %11113 }
0x1e74   :  { %11516 = vrot.lane.b32.xlu1 %v24009_v22, %s22160_s0  ;;  %v11160_v12 = vsub.f32 %v24161_v16, %v11114_v59 }
0x1e76   :  { %v11176_v18 = vmul.f32 1.442695, %v11160_v12 }
0x1e77   :  { %v11117_v22 = vpop.xlane.xlu0 %11116 }
0x1e78   :  { %11592 = vrot.lane.b32.xlu1 %v24017_v62, %s22160_s0  ;;  %21881 = vpow2.f32 %v11176_v18  ;;  %v11161_v58 = vsub.f32 %v24165_v19, %v11117_v22 }
0x1e7a   :  { %v11178_v62 = vmul.f32 1.442695, %v11161_v58 }
0x1e7c   :  { %11668 = vrot.lane.b32.xlu1 %v24019_v53, %s22160_s0  ;;  %21883 = vpow2.f32 %v11178_v62 }
0x1e80   :  { %11744 = vrot.lane.b32.xlu1 %v24025_v8, %s22160_s0 }
0x1e84   :  { %11820 = vrot.lane.b32.xlu1 %v24027_v57, %s22160_s0 }
0x1e85   :  { %v24244_v52 = vpop.eup %21881 }
0x1e86   :  { %v11208_v63 = vsel %vm1622_vm11, %v24244_v52, 0.0 }
0x1e88   :  { %11896 = vrot.lane.b32.xlu1 %v24033_v40, %s22160_s0 }
0x1e89   :  { %v24251_v53 = vpop.eup %21883 }
0x1e8a   :  { %v11211_v8 = vsel %vm1622_vm11, %v24251_v53, 0.0 }
0x1e8c   :  { %11972 = vrot.lane.b32.xlu1 %v24035_v32, %s22160_s0 }
0x1e90   :  { %11209 = vadd.xlane.f32.xlu0 %v11208_v63 }
0x1eb0   :  { %11212 = vadd.xlane.f32.xlu1 %v11211_v8 }
0x1eca   :  { %v11123_v57 = vpop.xlane.xlu1 %11122 }
0x1ecb   :  { %v11163_v40 = vsub.f32 %v24169_v44, %v11123_v57 }
0x1ecc   :  { %v11120_v16 = vpop.xlane.xlu0 %11119 }
0x1ecd   :  { %v11182_v32 = vmul.f32 1.442695, %v11163_v40  ;;  %v11162_v34 = vsub.f32 %v24173_v48, %v11120_v16 }
0x1ecf   :  { %21885 = vpow2.f32 %v11182_v32  ;;  %v11180_v37 = vmul.f32 1.442695, %v11162_v34 }
0x1ed0   :  { %v11129_v50 = vpop.xlane.xlu1 %11128  ;;  %v11126_v25 = vpop.xlane.xlu0 %11125 }
0x1ed1   :  { %21887 = vpow2.f32 %v11180_v37  ;;  %v11165_v19 = vsub.f32 %v24179_v20, %v11129_v50  ;;  %v11164_v38 = vsub.f32 %v24177_v14, %v11126_v25 }
0x1ed3   :  { %v11186_v31 = vmul.f32 1.442695, %v11165_v19  ;;  %v11184_v15 = vmul.f32 1.442695, %v11164_v38 }
0x1ed4   :  { %v11135_v6 = vpop.xlane.xlu1 %11134  ;;  %v11132_v30 = vpop.xlane.xlu0 %11131 }
0x1ed5   :  { %21889 = vpow2.f32 %v11186_v31  ;;  %v11167_v44 = vsub.f32 %v24187_v13, %v11135_v6  ;;  %v11166_v7 = vsub.f32 %v24185_v29, %v11132_v30 }
0x1ed6   :  { %21891 = vpow2.f32 %v11184_v15 }
0x1ed7   :  { %v11190_v48 = vmul.f32 1.442695, %v11167_v44  ;;  %v11188_v61 = vmul.f32 1.442695, %v11166_v7 }
0x1ed8   :  { %v11141_v4 = vpop.xlane.xlu1 %11140  ;;  %v11138_v54 = vpop.xlane.xlu0 %11137 }
0x1ed9   :  { %21893 = vpow2.f32 %v11190_v48  ;;  %v11169_v27 = vsub.f32 %v24195_v33, %v11141_v4  ;;  %v11168_v20 = vsub.f32 %v24193_v51, %v11138_v54 }
0x1eda   :  { %21895 = vpow2.f32 %v11188_v61 }
0x1edb   :  { %v11194_v14 = vmul.f32 1.442695, %v11169_v27  ;;  %v11192_v3 = vmul.f32 1.442695, %v11168_v20 }
0x1edc   :  { %v24263_v17 = vpop.eup %21885  ;;  %v11147_v47 = vpop.xlane.xlu1 %11146 }
0x1edd   :  { %v11144_v59 = vpop.xlane.xlu0 %11143  ;;  %21897 = vpow2.f32 %v11194_v14  ;;  %v11171_v29 = vsub.f32 %v24203_v55, %v11147_v47  ;;  %v11217_v12 = vsel %vm1622_vm11, %v24263_v17, 0.0 }
0x1ede   :  { %v11170_v13 = vsub.f32 %v24201_v46, %v11144_v59  ;;  %v24269_v18 = vpop.eup %21887  ;;  %21899 = vpow2.f32 %v11192_v3  ;;  %11218 = vadd.xlane.f32.xlu1 %v11217_v12 }
0x1edf   :  { %v11198_v51 = vmul.f32 1.442695, %v11171_v29  ;;  %v11214_v63 = vsel %vm1622_vm11, %v24269_v18, 0.0 }
0x1ee0   :  { %v11196_v33 = vmul.f32 1.442695, %v11170_v13  ;;  %v11153_v22 = vpop.xlane.xlu1 %11152  ;;  %11215 = vadd.xlane.f32.xlu0 %v11214_v63 }
0x1ee1   :  { %v11150_v58 = vpop.xlane.xlu0 %11149  ;;  %21901 = vpow2.f32 %v11198_v51  ;;  %v11173_v55 = vsub.f32 %v24211_v42, %v11153_v22 }
0x1ee2   :  { %v11172_v46 = vsub.f32 %v24209_v26, %v11150_v58  ;;  %v24275_v62 = vpop.eup %21889  ;;  %21903 = vpow2.f32 %v11196_v33 }
0x1ee3   :  { %v24277_v8 = vpop.eup %21891  ;;  %v11202_v57 = vmul.f32 1.442695, %v11173_v55  ;;  %v11223_v16 = vsel %vm1622_vm11, %v24275_v62, 0.0 }
0x1ee4   :  { %v11200_v40 = vmul.f32 1.442695, %v11172_v46  ;;  %v11159_v32 = vpop.xlane.xlu1 %11158  ;;  %11224 = vadd.xlane.f32.xlu1 %v11223_v16  ;;  %v11220_v34 = vsel %vm1622_vm11, %v24277_v8, 0.0 }
0x1ee5   :  { %v11156_v37 = vpop.xlane.xlu0 %11155  ;;  %21905 = vpow2.f32 %v11202_v57  ;;  %v11175_v42 = vsub.f32 %v24219_v39, %v11159_v32  ;;  %11221 = vadd.xlane.f32.xlu0 %v11220_v34 }
0x1ee6   :  { %v24284_v26 = vpop.eup %21893  ;;  %21907 = vpow2.f32 %v11200_v40  ;;  %v11174_v51 = vsub.f32 %v24217_v35, %v11156_v37 }
0x1ee7   :  { %v24286_v50 = vpop.eup %21895  ;;  %v11206_v25 = vmul.f32 1.442695, %v11175_v42  ;;  %v11229_v19 = vsel %vm1622_vm11, %v24284_v26, 0.0 }
0x1ee8   :  { %v11365_v38 = vpop.permute.xlu1 %11364  ;;  %11230 = vadd.xlane.f32.xlu1 %v11229_v19  ;;  %v11226_v31 = vsel %vm1622_vm11, %v24286_v50, 0.0  ;;  %v11204_v33 = vmul.f32 1.442695, %v11174_v51 }
0x1ee9   :  { %v11289_v15 = vpop.permute.xlu0 %11288  ;;  %21909 = vpow2.f32 %v11206_v25  ;;  %11227 = vadd.xlane.f32.xlu0 %v11226_v31  ;;  %21102 = vmatpush3.msra.mxu1 %v11365_v38 }
0x1eea   :  { %21097 = vmatpush3.msra.mxu0 %v11289_v15  ;;  %v24292_v39 = vpop.eup %21897  ;;  %21111 = vmatprep.subr.mxu1 %v22154_v9 }
0x1eeb   :  { %21106 = vmatprep.subr.mxu0 %v22154_v9  ;;  %v24295_v6 = vpop.eup %21899  ;;  %v11235_v30 = vsel %vm1622_vm11, %v24292_v39, 0.0 }
0x1eec   :  { %11236 = vadd.xlane.f32.xlu1 %v11235_v30  ;;  %v11232_v44 = vsel %vm1622_vm11, %v24295_v6, 0.0  ;;  %v11441_v59 = vpop.permute.xlu1 %11440 }
0x1eed   :  { %11233 = vadd.xlane.f32.xlu0 %v11232_v44 }
0x1eee   :  { %v24302_v7 = vpop.eup %21901 }
0x1eef   :  { %v24304_v48 = vpop.eup %21903  ;;  %v11241_v61 = vsel %vm1622_vm11, %v24302_v7, 0.0 }
0x1ef0   :  { %11242 = vadd.xlane.f32.xlu1 %v11241_v61  ;;  %v11238_v4 = vsel %vm1622_vm11, %v24304_v48, 0.0  ;;  %v11517_v29 = vpop.permute.xlu1 %11516 }
0x1ef1   :  { %11239 = vadd.xlane.f32.xlu0 %v11238_v4 }
0x1ef2   :  { %v24310_v54 = vpop.eup %21905 }
0x1ef3   :  { %v24312_v27 = vpop.eup %21907  ;;  %v11247_v20 = vsel %vm1622_vm11, %v24310_v54, 0.0 }
0x1ef4   :  { %11248 = vadd.xlane.f32.xlu1 %v11247_v20  ;;  %v11244_v14 = vsel %vm1622_vm11, %v24312_v27, 0.0  ;;  %v11593_v13 = vpop.permute.xlu1 %11592 }
0x1ef5   :  { %11245 = vadd.xlane.f32.xlu0 %v11244_v14 }
0x1ef6   :  { %v24318_v3 = vpop.eup %21909 }
0x1ef7   :  { %v11253_v47 = vsel %vm1622_vm11, %v24318_v3, 0.0 }
0x1ef9   :  { %11254 = vadd.xlane.f32.xlu0 %v11253_v47 }
0x1f05   :  { %12124 = vrot.lane.b32.xlu1 %v24043_v23, %s22160_s0  ;;  %v11669_v23 = vpop.permute.xlu1 %11668 }
0x1f09   :  { %12200 = vrot.lane.b32.xlu1 %v24049_v56, %s22160_s0  ;;  %v24333_v63 = vpop.permute.xlu1 %11744 }
0x1f0d   :  { %12276 = vrot.lane.b32.xlu1 %v24051_v21, %s22160_s0  ;;  %v11821_v22 = vpop.permute.xlu1 %11820 }
0x1f0f   :  { %12048 = vrot.lane.b32.xlu0 %v24041_v5, %s22160_s0 }
0x1f11   :  { %12352 = vrot.lane.b32.xlu1 %v24057_v24, %s22160_s0  ;;  %v24340_v5 = vpop.permute.xlu1 %11896 }
0x1f15   :  { %v24346_v58 = vpop.permute.xlu1 %11972 }
0x1f19   :  { %v11210_v12 = vpop.xlane.xlu0 %11209 }
0x1f1a   :  { %21911 = vrcp.f32 %v11210_v12 }
0x1f1b   :  { %21913 = vpow2.f32 %v11204_v33 }
0x1f27   :  { %v21912_v56 = vpop.eup %21911 }
0x1f28   :  { %v11272_v21 = vmul.f32 %v21912_v56, %v24244_v52  ;;  %v24342_v24 = vpop.eup %21913 }
0x1f29   :  { %v11250_v35 = vsel %vm1622_vm11, %v24342_v24, 0.0 }
0x1f2a   :  { %21099 = vmatmul.mubr.msk.f32.vlgmr.msra.gmra.mxu0 %vm1622_vm11, %v11272_v21 }
0x1f2b   :  { %21107 = vmatpush3.msra.mxu0 %v11441_v59  ;;  %21108 = vmatprep.mubr.msk.f32.mxu0 %vm22156_vm9, %v22154_v9 }
0x1f2c   :  { %21116 = vmatprep.subr.mxu0 %v22154_v9 }
0x1f35   :  { %11251 = vadd.xlane.f32.xlu1 %v11250_v35 }
0x1f39   :  { %v11213_v52 = vpop.xlane.xlu1 %11212 }
0x1f3a   :  { %21915 = vrcp.f32 %v11213_v52 }
0x1f46   :  { %12428 = vrot.lane.b32.xlu1 %v24059_v11, %s22160_s0 }
0x1f47   :  { %v21916_v55 = vpop.eup %21915 }
0x1f48   :  { %v11273_v46 = vmul.f32 %v21916_v55, %v24251_v53 }
0x1f4a   :  { %21104 = vmatmul.mubr.msk.f32.vlgmr.msra.gmra.mxu1 %vm1622_vm11, %v11273_v46 }
0x1f4b   :  { %21112 = vmatpush3.msra.mxu1 %v11517_v29  ;;  %21113 = vmatprep.mubr.msk.f32.mxu1 %vm22156_vm9, %v22154_v9 }
0x1f4c   :  { %21121 = vmatprep.subr.mxu1 %v22154_v9 }
0x1f67   :  { %v11219_v57 = vpop.xlane.xlu1 %11218 }
0x1f68   :  { %21917 = vrcp.f32 %v11219_v57 }
0x1f69   :  { %v11216_v40 = vpop.xlane.xlu0 %11215 }
0x1f6a   :  { %21919 = vrcp.f32 %v11216_v40 }
0x1f6d   :  { %v11225_v16 = vpop.xlane.xlu1 %11224 }
0x1f6e   :  { %21921 = vrcp.f32 %v11225_v16  ;;  %v11222_v32 = vpop.xlane.xlu0 %11221 }
0x1f6f   :  { %21923 = vrcp.f32 %v11222_v32 }
0x1f71   :  { %v11231_v11 = vpop.xlane.xlu1 %11230 }
0x1f72   :  { %21925 = vrcp.f32 %v11231_v11  ;;  %v11228_v34 = vpop.xlane.xlu0 %11227 }
0x1f73   :  { %21927 = vrcp.f32 %v11228_v34 }
0x1f75   :  { %v21918_v53 = vpop.eup %21917  ;;  %v11237_v37 = vpop.xlane.xlu1 %11236 }
0x1f76   :  { %v11275_v42 = vmul.f32 %v21918_v53, %v24263_v17  ;;  %21929 = vrcp.f32 %v11237_v37  ;;  %v11234_v25 = vpop.xlane.xlu0 %11233 }
0x1f77   :  { %v21920_v19 = vpop.eup %21919  ;;  %21931 = vrcp.f32 %v11234_v25 }
0x1f78   :  { %v11274_v38 = vmul.f32 %v21920_v19, %v24269_v18  ;;  %21114 = vmatmul.mubr.msk.f32.vlgmr.msra.gmra.mxu1 %vm1622_vm11, %v11275_v42 }
0x1f79   :  { %21122 = vmatpush3.msra.mxu1 %v11669_v23  ;;  %v11243_v31 = vpop.xlane.xlu1 %11242  ;;  %21123 = vmatprep.mubr.msk.f32.mxu1 %vm22156_vm9, %v22154_v9 }
0x1f7a   :  { %21933 = vrcp.f32 %v11243_v31  ;;  %v11240_v15 = vpop.xlane.xlu0 %11239  ;;  %21109 = vmatmul.mubr.msk.f32.vlgmr.msra.gmra.mxu0 %vm1622_vm11, %v11274_v38  ;;  %21131 = vmatprep.subr.mxu1 %v22154_v9 }
0x1f7b   :  { %v21922_v17 = vpop.eup %21921  ;;  %21935 = vrcp.f32 %v11240_v15  ;;  %21117 = vmatpush3.msra.mxu0 %v11593_v13  ;;  %21118 = vmatprep.mubr.msk.f32.mxu0 %vm22156_vm9, %v22154_v9 }
0x1f7c   :  { %v21924_v18 = vpop.eup %21923  ;;  %v11277_v30 = vmul.f32 %v21922_v17, %v24275_v62  ;;  %21126 = vmatprep.subr.mxu0 %v22154_v9 }
0x1f7d   :  { %v11276_v44 = vmul.f32 %v21924_v18, %v24277_v8  ;;  %v11249_v61 = vpop.xlane.xlu1 %11248 }
0x1f7e   :  { %21937 = vrcp.f32 %v11249_v61  ;;  %v11246_v4 = vpop.xlane.xlu0 %11245  ;;  %21124 = vmatmul.mubr.msk.f32.vlgmr.msra.gmra.mxu1 %vm1622_vm11, %v11277_v30 }
0x1f7f   :  { %v21926_v20 = vpop.eup %21925  ;;  %21939 = vrcp.f32 %v11246_v4  ;;  %21119 = vmatmul.mubr.msk.f32.vlgmr.msra.gmra.mxu0 %vm1622_vm11, %v11276_v44  ;;  %21132 = vmatpush3.msra.mxu1 %v11821_v22 }
0x1f80   :  { %v21928_v14 = vpop.eup %21927  ;;  %v11279_v47 = vmul.f32 %v21926_v20, %v24284_v26  ;;  %21127 = vmatpush3.msra.mxu0 %v24333_v63  ;;  %21133 = vmatprep.mubr.msk.f32.mxu1 %vm22156_vm9, %v22154_v9 }
0x1f81   :  { %v11278_v62 = vmul.f32 %v21928_v14, %v24286_v50  ;;  %21141 = vmatprep.subr.mxu1 %v22154_v9  ;;  %v12125_v8 = vpop.permute.xlu1 %12124  ;;  %21128 = vmatprep.mubr.msk.f32.mxu0 %vm22156_vm9, %v22154_v9 }
0x1f82   :  { %21136 = vmatprep.subr.mxu0 %v22154_v9  ;;  %v11255_v59 = vpop.xlane.xlu0 %11254  ;;  %21134 = vmatmul.mubr.msk.f32.vlgmr.msra.gmra.mxu1 %vm1622_vm11, %v11279_v47 }
0x1f83   :  { %v21930_v29 = vpop.eup %21929  ;;  %21129 = vmatmul.mubr.msk.f32.vlgmr.msra.gmra.mxu0 %vm1622_vm11, %v11278_v62  ;;  %21142 = vmatpush3.msra.mxu1 %v24346_v58  ;;  %21941 = vrcp.f32 %v11255_v59  ;;  %v9765_v59 = vld [vmem:[#allocation2 + $0x210] sm:$0xff] }
0x1f84   :  { %v21932_v26 = vpop.eup %21931  ;;  %v11281_v13 = vmul.f32 %v21930_v29, %v24292_v39  ;;  %21137 = vmatpush3.msra.mxu0 %v24340_v5  ;;  %21143 = vmatprep.mubr.msk.f32.mxu1 %vm22156_vm9, %v22154_v9  ;;  %v9764_v29 = vld [vmem:[#allocation2 + $0x208] sm:$0xff] }
0x1f85   :  { %v11280_v50 = vmul.f32 %v21932_v26, %v24295_v6  ;;  %21151 = vmatprep.subr.mxu1 %v22154_v9  ;;  %v12201_v12 = vpop.permute.xlu1 %12200  ;;  %21138 = vmatprep.mubr.msk.f32.mxu0 %vm22156_vm9, %v22154_v9  ;;  %v9763_v26 = vld [vmem:[#allocation2 + $0x200] sm:$0xff] }
0x1f86   :  { %21146 = vmatprep.subr.mxu0 %v22154_v9  ;;  %v12049_v51 = vpop.permute.xlu0 %12048  ;;  %21144 = vmatmul.mubr.msk.f32.vlgmr.msra.gmra.mxu1 %vm1622_vm11, %v11281_v13 }
0x1f87   :  { %v21934_v23 = vpop.eup %21933  ;;  %21139 = vmatmul.mubr.msk.f32.vlgmr.msra.gmra.mxu0 %vm1622_vm11, %v11280_v50  ;;  %21152 = vmatpush3.msra.mxu1 %v12125_v8  ;;  %v9766_v8 = vld [vmem:[#allocation2 + $0x218] sm:$0xff] }
0x1f88   :  { %v21936_v39 = vpop.eup %21935  ;;  %v11283_v33 = vmul.f32 %v21934_v23, %v24302_v7  ;;  %21147 = vmatpush3.msra.mxu0 %v12049_v51  ;;  %21153 = vmatprep.mubr.msk.f32.mxu1 %vm22156_vm9, %v22154_v9 }
0x1f89   :  { %v11282_v6 = vmul.f32 %v21936_v39, %v24304_v48  ;;  %21161 = vmatprep.subr.mxu1 %v22154_v9  ;;  %v12277_v63 = vpop.permute.xlu1 %12276  ;;  %21148 = vmatprep.mubr.msk.f32.mxu0 %vm22156_vm9, %v22154_v9 }
0x1f8a   :  { %21156 = vmatprep.subr.mxu0 %v22154_v9  ;;  %21154 = vmatmul.mubr.msk.f32.vlgmr.msra.gmra.mxu1 %vm1622_vm11, %v11283_v33 }
0x1f8b   :  { %v21938_v56 = vpop.eup %21937  ;;  %21149 = vmatmul.mubr.msk.f32.vlgmr.msra.gmra.mxu0 %vm1622_vm11, %v11282_v6  ;;  %21162 = vmatpush3.msra.mxu1 %v12277_v63 }
0x1f8c   :  { %v21940_v7 = vpop.eup %21939  ;;  %v11285_v21 = vmul.f32 %v21938_v56, %v24310_v54  ;;  %21157 = vmatpush3.msra.mxu0 %v12201_v12  ;;  %21163 = vmatprep.mubr.msk.f32.mxu1 %vm22156_vm9, %v22154_v9 }
0x1f8d   :  { %v11284_v48 = vmul.f32 %v21940_v7, %v24312_v27  ;;  %v12353_v22 = vpop.permute.xlu1 %12352  ;;  %21158 = vmatprep.mubr.msk.f32.mxu0 %vm22156_vm9, %v22154_v9  ;;  %21166 = vmatprep.subr.mxu0 %v22154_v9 }
0x1f8e   :  { %21164 = vmatmul.mubr.msk.f32.vlgmr.msra.gmra.mxu1 %vm1622_vm11, %v11285_v21  ;;  %21171 = vmatprep.subr.mxu1 %v22154_v9 }
0x1f8f   :  { %21159 = vmatmul.mubr.msk.f32.vlgmr.msra.gmra.mxu0 %vm1622_vm11, %v11284_v48  ;;  %21173 = vmatprep.mubr.msk.f32.mxu1 %vm22156_vm9, %v22154_v9 }
0x1f90   :  { %21167 = vmatpush3.msra.mxu0 %v12353_v22  ;;  %21168 = vmatprep.mubr.msk.f32.mxu0 %vm22156_vm9, %v22154_v9  ;;  %v21942_v27 = vpop.eup %21941 }
0x1f91   :  { %v11287_v5 = vmul.f32 %v21942_v27, %v24318_v3  ;;  %21176 = vmatprep.subr.mxu0 %v9766_v8 }
0x1fbe   :  { %v11252_v54 = vpop.xlane.xlu1 %11251 }
0x1fbf   :  { %21943 = vrcp.f32 %v11252_v54 }
0x1fc2   :  { %v12429_v35 = vpop.permute.xlu1 %12428 }
0x1fc3   :  { %21172 = vmatpush3.msra.mxu1 %v12429_v35 }
0x1fc4   :  { %21174 = vmatmul.mubr.msk.f32.vlgmr.msra.gmra.mxu1 %vm1622_vm11, %v11287_v5 }
0x1fcc   :  { %v21944_v58 = vpop.eup %21943 }
0x1fcd   :  { %v11286_v52 = vmul.f32 %v21944_v58, %v24342_v24 }
0x1fcf   :  { %21169 = vmatmul.mubr.msk.f32.vlgmr.msra.gmra.mxu0 %vm1622_vm11, %v11286_v52 }
0x1fd0   :  { %21177 = vmatpush3.msra.mxu0 %v9766_v8  ;;  %v9778_v8 = vld [vmem:[#allocation2 + $0x278] sm:$0xff] }
0x1fd1   :  { %21178 = vmatprep.subr.mxu0 %v9765_v59 }
0x1fd2   :  { %21179 = vmatpush3.msra.mxu0 %v9765_v59  ;;  %v9777_v59 = vld [vmem:[#allocation2 + $0x270] sm:$0xff] }
0x1fd3   :  { %21180 = vmatprep.subr.mxu0 %v9764_v29 }
0x1fd4   :  { %21181 = vmatpush3.msra.mxu0 %v9764_v29  ;;  %v9776_v29 = vld [vmem:[#allocation2 + $0x268] sm:$0xff] }
0x1fd5   :  { %21182 = vmatprep.subr.mxu0 %v9763_v26 }
0x1fd6   :  { %21183 = vmatpush3.msra.mxu0 %v9763_v26  ;;  %v9775_v26 = vld [vmem:[#allocation2 + $0x260] sm:$0xff] }
0x1fd7   :  { %21198 = vmatprep.subr.mxu0 %v9778_v8 }
0x1fea   :  { %v24420_v55 = vpop.f32.mrf.mxu0 }
0x1fec   :  { %v21100_v46 = vpop.f32.mrf.mxu0 }
0x200a   :  { %v24422_v57 = vpop.f32.mrf.mxu1 }
0x200c   :  { %v21105_v40 = vpop.f32.mrf.mxu1 }
0x2038   :  { %v11588_v16 = vpop.f32.mrf.mxu1 }
0x2039   :  { %12508 = vrot.lane.b32.xlu1 %v11588_v16, %s22161_s22 }
0x203a   :  { %v11512_v32 = vpop.f32.mrf.mxu0  ;;  %v21115_v3 = vpop.f32.mrf.mxu1 }
0x203b   :  { %12506 = vrot.lane.b32.xlu0 %v11512_v32, %s22161_s22 }
0x203c   :  { %v21110_v11 = vpop.f32.mrf.mxu0 }
0x203e   :  { %v11740_v34 = vpop.f32.mrf.mxu1 }
0x203f   :  { %v11664_v53 = vpop.f32.mrf.mxu0  ;;  %12516 = vrot.lane.b32.xlu1 %v11740_v34, %s22149_s19 }
0x2040   :  { %12514 = vrot.lane.b32.xlu0 %v11664_v53, %s22149_s19  ;;  %v21125_v24 = vpop.f32.mrf.mxu1 }
0x2041   :  { %v21120_v37 = vpop.f32.mrf.mxu0 }
0x2042   :  { %v11892_v42 = vpop.f32.mrf.mxu1 }
0x2043   :  { %v11816_v25 = vpop.f32.mrf.mxu0  ;;  %12524 = vrot.lane.b32.xlu1 %v11892_v42, %s22162_s23  ;;  %v24459_v42 = vld [vmem:[%s25615_s3 + $0x18] sm:$0xff] }
0x2044   :  { %12522 = vrot.lane.b32.xlu0 %v11816_v25, %s22162_s23  ;;  %v21135_v19 = vpop.f32.mrf.mxu1  ;;  %v12577_v25 = vrot.slane %v24459_v42, %v22801_v28 }
0x2045   :  { %v21130_v38 = vpop.f32.mrf.mxu0 }
0x2046   :  { %v12044_v31 = vpop.f32.mrf.mxu1 }
0x2047   :  { %v11968_v15 = vpop.f32.mrf.mxu0  ;;  %12532 = vrot.lane.b32.xlu1 %v12044_v31, %s22163_s24 }
0x2048   :  { %12530 = vrot.lane.b32.xlu0 %v11968_v15, %s22163_s24  ;;  %v21145_v17 = vpop.f32.mrf.mxu1 }
0x2049   :  { %v21140_v18 = vpop.f32.mrf.mxu0 }
0x204a   :  { %v12196_v30 = vpop.f32.mrf.mxu1 }
0x204b   :  { %v12120_v44 = vpop.f32.mrf.mxu0  ;;  %12540 = vrot.lane.b32.xlu1 %v12196_v30, %s22164_s25 }
0x204c   :  { %12538 = vrot.lane.b32.xlu0 %v12120_v44, %s22164_s25  ;;  %v21155_v61 = vpop.f32.mrf.mxu1 }
0x204d   :  { %v21150_v4 = vpop.f32.mrf.mxu0 }
0x204e   :  { %v12348_v20 = vpop.f32.mrf.mxu1 }
0x204f   :  { %v12272_v14 = vpop.f32.mrf.mxu0  ;;  %12548 = vrot.lane.b32.xlu1 %v12348_v20, %s22165_s26 }
0x2050   :  { %12546 = vrot.lane.b32.xlu0 %v12272_v14, %s22165_s26  ;;  %v21165_v47 = vpop.f32.mrf.mxu1 }
0x2051   :  { %v21160_v62 = vpop.f32.mrf.mxu0  ;;  %v9770_v47 = vld [vmem:[#allocation2 + $0x238] sm:$0xff] }
0x2052   :  { %v9769_v62 = vld [vmem:[#allocation2 + $0x230] sm:$0xff]  ;;  %21187 = vmatprep.subr.mxu1 %v9770_v47 }
0x2053   :  { %21188 = vmatpush3.msra.mxu1 %v9770_v47 }
0x2054   :  { %21189 = vmatprep.subr.mxu1 %v9769_v62 }
0x2055   :  { %21190 = vmatpush3.msra.mxu1 %v9769_v62 }
0x2084   :  { %v12500_v13 = vpop.f32.mrf.mxu1 }
0x2085   :  { %12556 = vrot.lane.b32.xlu1 %v12500_v13, %s22166_s27 }
0x2086   :  { %v21175_v50 = vpop.f32.mrf.mxu1 }
0x208f   :  { %v12424_v12 = vpop.f32.mrf.mxu0 }
0x2090   :  { %12554 = vrot.lane.b32.xlu0 %v12424_v12, %s22166_s27 }
0x2091   :  { %v21170_v51 = vpop.f32.mrf.mxu0 }
0x20ab   :  { %v12509_v39 = vpop.permute.xlu1 %12508 }
0x20ac   :  { %v12561_v5 = vsel %vm407_vm10, %v24422_v57, %v12509_v39 }
0x20ad   :  { %v12507_v23 = vpop.permute.xlu0 %12506 }
0x20ae   :  { %v12560_v54 = vsel %vm407_vm10, %v24420_v55, %v12507_v23 }
0x20b1   :  { %v12517_v33 = vpop.permute.xlu1 %12516 }
0x20b2   :  { %v12515_v6 = vpop.permute.xlu0 %12514  ;;  %v12563_v52 = vsel %vm1622_vm11, %v12561_v5, %v12517_v33 }
0x20b3   :  { %v12562_v35 = vsel %vm1622_vm11, %v12560_v54, %v12515_v6 }
0x20b5   :  { %v12525_v63 = vpop.permute.xlu1 %12524 }
0x20b6   :  { %v12523_v56 = vpop.permute.xlu0 %12522  ;;  %v12565_v40 = vsel %vm3075_vm12, %v12563_v52, %v12525_v63 }
0x20b7   :  { %v12564_v46 = vsel %vm3075_vm12, %v12562_v35, %v12523_v56 }
0x20b9   :  { %v12533_v7 = vpop.permute.xlu1 %12532 }
0x20ba   :  { %v12531_v21 = vpop.permute.xlu0 %12530  ;;  %v12567_v32 = vsel %vm3078_vm13, %v12565_v40, %v12533_v7 }
0x20bb   :  { %v12566_v16 = vsel %vm3078_vm13, %v12564_v46, %v12531_v21 }
0x20bd   :  { %v12541_v48 = vpop.permute.xlu1 %12540 }
0x20be   :  { %v12539_v22 = vpop.permute.xlu0 %12538  ;;  %v12569_v11 = vsel %vm3081_vm14, %v12567_v32, %v12541_v48 }
0x20bf   :  { %v12568_v3 = vsel %vm3081_vm14, %v12566_v16, %v12539_v22 }
0x20c1   :  { %v12549_v27 = vpop.permute.xlu1 %12548 }
0x20c2   :  { %v12547_v58 = vpop.permute.xlu0 %12546  ;;  %v12571_v53 = vsel %vm3084_vm15, %v12569_v11, %v12549_v27  ;;  %v12694_v27 = vrot.slane %v24459_v42, %v22822_v60  ;;  %v9774_v11 = vld [vmem:[#allocation2 + $0x258] sm:$0xff] }
0x20c3   :  { %v12570_v57 = vsel %vm3084_vm15, %v12568_v3, %v12547_v58  ;;  %v12700_v58 = vrot.slane %v24459_v42, %v22825_v43 }
0x20f7   :  { %v12557_v55 = vpop.permute.xlu1 %12556 }
0x20f8   :  { %v12573_v37 = vsel %vm3087_vm0, %v12571_v53, %v12557_v55  ;;  %v9771_v53 = vld [vmem:[#allocation2 + $0x240] sm:$0xff] }
0x2102   :  { %v12555_v34 = vpop.permute.xlu0 %12554 }
0x2103   :  { %v12572_v24 = vsel %vm3087_vm0, %v12570_v57, %v12555_v34  ;;  %v9773_v57 = vld [vmem:[#allocation2 + $0x250] sm:$0xff]  ;;  %v9772_v34 = vld [vmem:[#allocation2 + $0x248] sm:$0xff] }
0x2104   :  { %21184 = vmatprep.mubr.msk.f32.mxu0 %vm101_vm7, %v12572_v24  ;;  %v12706_v24 = vrot.slane %v24459_v42, %v22836_v49 }
0x2105   :  { %21185 = vmatmul.mubr.msk.f32.vlgmr.msra.gmra.mxu0 %vm101_vm7, %v12573_v37 }
0x2106   :  { %21199 = vmatpush3.msra.mxu0 %v9778_v8 }
0x2107   :  { %21200 = vmatprep.subr.mxu0 %v9777_v59 }
0x2108   :  { %21201 = vmatpush3.msra.mxu0 %v9777_v59  ;;  %v12923_v59 = vld [vmem:[#allocation2 + $0x298] sm:$0xff] }
0x2109   :  { %21202 = vmatprep.subr.mxu0 %v9776_v29 }
0x210a   :  { %21203 = vmatpush3.msra.mxu0 %v9776_v29  ;;  %v12922_v29 = vld [vmem:[#allocation2 + $0x290] sm:$0xff] }
0x210b   :  { %21204 = vmatprep.subr.mxu0 %v9775_v26 }
0x210c   :  { %21205 = vmatpush3.msra.mxu0 %v9775_v26  ;;  %v12921_v26 = vld [vmem:[#allocation2 + $0x288] sm:$0xff] }
0x210d   :  { %21206 = vmatprep.subr.mxu0 %v9774_v11 }
0x210e   :  { %21207 = vmatpush3.msra.mxu0 %v9774_v11 }
0x210f   :  { %21208 = vmatprep.subr.mxu0 %v9773_v57 }
0x2110   :  { %21209 = vmatpush3.msra.mxu0 %v9773_v57  ;;  %v19657_v57 = vld [vmem:[%s25615_s3 + $0x20] sm:$0xff] }
0x2111   :  { %21210 = vmatprep.subr.mxu0 %v9772_v34 }
0x2112   :  { %21211 = vmatpush3.msra.mxu0 %v9772_v34 }
0x2113   :  { %21212 = vmatprep.subr.mxu0 %v9771_v53 }
0x2114   :  { %21213 = vmatpush3.msra.mxu0 %v9771_v53 }
0x2115   :  { %21238 = vmatprep.subr.mxu0 %v22154_v9 }
0x21c5   :  { %v21186_v19 = vpop.f32.mrf.mxu0 }
0x21c6   :  { %v12656_v38 = vadd.f32 %v21186_v19, %v12577_v25 }
0x21c7   :  { %v12650_v31 = vpop.f32.mrf.mxu0 }
0x21c8   :  { %v12660_v15 = vadd.f32 %v12656_v38, %v23961_v36  ;;  %v12651_v17 = vadd.f32 %v12650_v31, %v12577_v25  ;;  %v9768_v36 = vld [vmem:[#allocation2 + $0x228] sm:$0xff] }
0x21c9   :  { %21191 = vmatprep.subr.mxu1 %v9768_v36 }
0x21ca   :  { %v12659_v18 = vadd.f32 %v12651_v17, %v23959_v10  ;;  %v12664_v30 = vsel %vm101_vm7, %v12660_v15, 0.0  ;;  %v12670_v20 = vmul.f32 %v12660_v15, %v12660_v15  ;;  %21192 = vmatpush3.msra.mxu1 %v9768_v36  ;;  %v9767_v10 = vld [vmem:[#allocation2 + $0x220] sm:$0xff]  ;;  %v12793_v17 = vrot.slane %v24459_v42, %v22845_v0 }
0x21cb   :  { %12665 = vadd.xlane.f32.xlu1 %v12664_v30  ;;  %21193 = vmatprep.subr.mxu1 %v9767_v10 }
0x21cc   :  { %v12661_v44 = vsel %vm101_vm7, %v12659_v18, 0.0  ;;  %v12669_v61 = vmul.f32 %v12659_v18, %v12659_v18  ;;  %v12674_v14 = vsel %vm101_vm7, %v12670_v20, 0.0  ;;  %21194 = vmatpush3.msra.mxu1 %v9767_v10 }
0x21cd   :  { %12662 = vadd.xlane.f32.xlu0 %v12661_v44  ;;  %21217 = vmatprep.subr.mxu1 %v12923_v59 }
0x21ce   :  { %v12671_v4 = vsel %vm101_vm7, %v12669_v61, 0.0 }
0x21d1   :  { %12672 = vadd.xlane.f32.xlu0 %v12671_v4 }
0x21d5   :  { %12675 = vadd.xlane.f32.xlu0 %v12674_v14 }
0x2254   :  { %v12666_v12 = vpop.xlane.xlu1 %12665 }
0x2255   :  { %v12668_v23 = vmul.f32 0.03125, %v12666_v12 }
0x2256   :  { %v12663_v13 = vpop.xlane.xlu0 %12662 }
0x2257   :  { %v12667_v50 = vmul.f32 0.03125, %v12663_v13  ;;  %v12680_v56 = vmul.f32 %v12668_v23, %v12668_v23  ;;  %v12684_v52 = vsub.f32 %v12660_v15, %v12668_v23  ;;  %v12920_v13 = vld [vmem:[#allocation2 + $0x280] sm:$0xff] }
0x2259   :  { %v12679_v39 = vmul.f32 %v12667_v50, %v12667_v50  ;;  %v12683_v54 = vsub.f32 %v12659_v18, %v12667_v50 }
0x225a   :  { %v12673_v51 = vpop.xlane.xlu0 %12672 }
0x225b   :  { %v12677_v33 = vmul.f32 0.03125, %v12673_v51 }
0x225d   :  { %v12681_v6 = vsub.f32 %v12677_v33, %v12679_v39 }
0x225e   :  { %v12676_v63 = vpop.xlane.xlu0 %12675 }
0x225f   :  { %v12685_v7 = vadd.f32 1e-05, %v12681_v6  ;;  %v12678_v21 = vmul.f32 0.03125, %v12676_v63 }
0x2261   :  { %21945 = vrsqrt.f32 %v12685_v7  ;;  %v12682_v48 = vsub.f32 %v12678_v21, %v12680_v56 }
0x2263   :  { %v12686_v22 = vadd.f32 1e-05, %v12682_v48 }
0x2265   :  { %21947 = vrsqrt.f32 %v12686_v22 }
0x226e   :  { %v21946_v5 = vpop.eup %21945 }
0x226f   :  { %v12689_v35 = vmul.f32 %v21946_v5, %v12683_v54 }
0x2271   :  { %v12695_v46 = vmul.f32 %v12694_v27, %v12689_v35  ;;  %v12910_v35 = vrot.slane %v24459_v42, %v22855_v41 }
0x2272   :  { %v21948_v40 = vpop.eup %21947 }
0x2273   :  { %v12690_v16 = vmul.f32 %v21948_v40, %v12684_v52  ;;  %v12701_v32 = vadd.f32 %v12700_v58, %v12695_v46 }
0x2275   :  { %v12696_v3 = vmul.f32 %v12694_v27, %v12690_v16  ;;  %21195 = vmatprep.mubr.msk.f32.mxu1 %vm101_vm7, %v12701_v32 }
0x2277   :  { %v12702_v55 = vadd.f32 %v12700_v58, %v12696_v3 }
0x2279   :  { %21196 = vmatmul.mubr.msk.f32.vlgmr.msra.gmra.mxu1 %vm101_vm7, %v12702_v55 }
0x227a   :  { %21218 = vmatpush3.msra.mxu1 %v12923_v59 }
0x227b   :  { %21219 = vmatprep.subr.mxu1 %v12922_v29 }
0x227c   :  { %21220 = vmatpush3.msra.mxu1 %v12922_v29 }
0x227d   :  { %21221 = vmatprep.subr.mxu1 %v12921_v26 }
0x227e   :  { %21222 = vmatpush3.msra.mxu1 %v12921_v26 }
0x227f   :  { %21223 = vmatprep.subr.mxu1 %v12920_v13 }
0x2280   :  { %21224 = vmatpush3.msra.mxu1 %v12920_v13 }
0x2281   :  { %21228 = vmatprep.subr.mxu1 %v22154_v9 }
0x2339   :  { %v21197_v37 = vpop.f32.mrf.mxu1 }
0x233a   :  { %v12785_v25 = vadd.f32 %v21197_v37, %v12706_v24 }
0x233b   :  { %v12779_v19 = vpop.f32.mrf.mxu1 }
0x233c   :  { %v12780_v38 = vadd.f32 %v12779_v19, %v12706_v24  ;;  %v12789_v15 = vmax.f32 %v12785_v25, 0.0 }
0x233e   :  { %v12788_v31 = vmax.f32 %v12780_v38, 0.0 }
0x2340   :  { %21214 = vmatprep.mubr.msk.f32.mxu0 %vm187_vm8, %v12788_v31 }
0x2341   :  { %21215 = vmatmul.mubr.msk.f32.vlgmr.msra.gmra.mxu0 %vm187_vm8, %v12789_v15 }
0x2342   :  { %21240 = vmatprep.mubr.msk.f32.mxu0 %vm22156_vm9, %v22154_v9 }
0x2401   :  { %v21216_v18 = vpop.f32.mrf.mxu0 }
0x2402   :  { %v12872_v30 = vadd.f32 %v21216_v18, %v12793_v17 }
0x2403   :  { %v12866_v44 = vpop.f32.mrf.mxu0 }
0x2404   :  { %v12876_v61 = vadd.f32 %v12872_v30, %v12702_v55  ;;  %v12867_v4 = vadd.f32 %v12866_v44, %v12793_v17 }
0x2406   :  { %v12875_v20 = vadd.f32 %v12867_v4, %v12701_v32  ;;  %v12880_v14 = vsel %vm101_vm7, %v12876_v61, 0.0  ;;  %v12886_v47 = vmul.f32 %v12876_v61, %v12876_v61  ;;  %v12916_v32 = vrot.slane %v24459_v42, %v22860_v45 }
0x2407   :  { %12881 = vadd.xlane.f32.xlu0 %v12880_v14  ;;  %v12945_v42 = vrot.slane %v19657_v57, %v22293_v2 }
0x2408   :  { %v12877_v62 = vsel %vm101_vm7, %v12875_v20, 0.0  ;;  %v12885_v36 = vmul.f32 %v12875_v20, %v12875_v20  ;;  %v12890_v10 = vsel %vm101_vm7, %v12886_v47, 0.0 }
0x2409   :  { %12878 = vadd.xlane.f32.xlu1 %v12877_v62 }
0x240a   :  { %v12887_v8 = vsel %vm101_vm7, %v12885_v36, 0.0 }
0x240b   :  { %12891 = vadd.xlane.f32.xlu0 %v12890_v10 }
0x240d   :  { %12888 = vadd.xlane.f32.xlu1 %v12887_v8 }
0x2490   :  { %v12882_v50 = vpop.xlane.xlu0 %12881 }
0x2491   :  { %v12884_v12 = vmul.f32 0.03125, %v12882_v50 }
0x2492   :  { %v12879_v51 = vpop.xlane.xlu1 %12878 }
0x2493   :  { %v12883_v23 = vmul.f32 0.03125, %v12879_v51  ;;  %v12896_v33 = vmul.f32 %v12884_v12, %v12884_v12  ;;  %v12900_v27 = vsub.f32 %v12876_v61, %v12884_v12 }
0x2494   :  { %v12892_v39 = vpop.xlane.xlu0 %12891 }
0x2495   :  { %v12894_v6 = vmul.f32 0.03125, %v12892_v39  ;;  %v12895_v56 = vmul.f32 %v12883_v23, %v12883_v23  ;;  %v12899_v58 = vsub.f32 %v12875_v20, %v12883_v23 }
0x2496   :  { %v12889_v63 = vpop.xlane.xlu1 %12888 }
0x2497   :  { %v12898_v7 = vsub.f32 %v12894_v6, %v12896_v33  ;;  %v12893_v21 = vmul.f32 0.03125, %v12889_v63 }
0x2499   :  { %v12902_v48 = vadd.f32 1e-05, %v12898_v7  ;;  %v12897_v22 = vsub.f32 %v12893_v21, %v12895_v56 }
0x249b   :  { %21949 = vrsqrt.f32 %v12902_v48  ;;  %v12901_v54 = vadd.f32 1e-05, %v12897_v22 }
0x249d   :  { %21951 = vrsqrt.f32 %v12901_v54 }
0x24a8   :  { %v21950_v5 = vpop.eup %21949 }
0x24a9   :  { %v12906_v52 = vmul.f32 %v21950_v5, %v12900_v27 }
0x24aa   :  { %v21952_v46 = vpop.eup %21951 }
0x24ab   :  { %v12905_v40 = vmul.f32 %v21952_v46, %v12899_v58  ;;  %v12912_v16 = vmul.f32 %v12910_v35, %v12906_v52 }
0x24ad   :  { %v12911_v3 = vmul.f32 %v12910_v35, %v12905_v40  ;;  %v24495_v11 = vadd.f32 %v12916_v32, %v12912_v16 }
0x24af   :  { %v24493_v55 = vadd.f32 %v12916_v32, %v12911_v3 }
0x24b1   :  { %21225 = vmatprep.mubr.msk.f32.mxu1 %vm101_vm7, %v24493_v55 }
0x24b2   :  { %21226 = vmatmul.mubr.msk.f32.vlgmr.msra.gmra.mxu1 %vm101_vm7, %v24495_v11 }
0x24b3   :  { %21230 = vmatprep.mubr.msk.f32.mxu1 %vm22156_vm9, %v22154_v9 }
0x2572   :  { %v21227_v34 = vpop.f32.mrf.mxu1 }
0x2573   :  { %v24507_v53 = vadd.f32 %v21227_v34, %v12945_v42 }
0x2574   :  { %v13018_v24 = vpop.f32.mrf.mxu1 }
0x2575   :  { %v24509_v37 = vadd.f32 %v13018_v24, %v12945_v42  ;;  %13031 = vrot.lane.b32.xlu0 %v24507_v53, %s22151_s14 }
0x2577   :  { %13029 = vrot.lane.b32.xlu1 %v24509_v37, %s22151_s14 }
0x2579   :  { %13037 = vrot.lane.b32.xlu0 %v24509_v37, %s22152_s15 }
0x257b   :  { %13033 = vrot.lane.b32.xlu1 %v24509_v37, %s22150_s1 }
0x257d   :  { %13041 = vrot.lane.b32.xlu0 %v24509_v37, %s22153_s16 }
0x257f   :  { %13035 = vrot.lane.b32.xlu1 %v24507_v53, %s22150_s1 }
0x2581   :  { %13045 = vrot.lane.b32.xlu0 %v24509_v37, %s22155_s17 }
0x2583   :  { %13039 = vrot.lane.b32.xlu1 %v24507_v53, %s22152_s15 }
0x2585   :  { %13049 = vrot.lane.b32.xlu0 %v24509_v37, %s22157_s18 }
0x2587   :  { %13043 = vrot.lane.b32.xlu1 %v24507_v53, %s22153_s16 }
0x2589   :  { %13053 = vrot.lane.b32.xlu0 %v24509_v37, %s22158_s20 }
0x258b   :  { %13047 = vrot.lane.b32.xlu1 %v24507_v53, %s22155_s17 }
0x258d   :  { %13057 = vrot.lane.b32.xlu0 %v24509_v37, %s22159_s21 }
0x258f   :  { %13051 = vrot.lane.b32.xlu1 %v24507_v53, %s22157_s18 }
0x2593   :  { %13055 = vrot.lane.b32.xlu1 %v24507_v53, %s22158_s20 }
0x2597   :  { %13133 = vrot.lane.b32.xlu1 %v24507_v53, %s22159_s21 }
0x25e7   :  { %v24543_v25 = vpop.permute.xlu0 %13031 }
0x25e8   :  { %13285 = vrot.lane.b32.xlu1 %v24543_v25, %s22159_s21 }
0x25e9   :  { %v24547_v19 = vpop.permute.xlu1 %13029 }
0x25ea   :  { %13209 = vrot.lane.b32.xlu0 %v24547_v19, %s22159_s21 }
0x25eb   :  { %v24551_v38 = vpop.permute.xlu0 %13037 }
0x25ed   :  { %v24553_v31 = vpop.permute.xlu1 %13033 }
0x25ee   :  { %13361 = vrot.lane.b32.xlu0 %v24553_v31, %s22159_s21 }
0x25ef   :  { %v24557_v15 = vpop.permute.xlu0 %13041 }
0x25f1   :  { %v24559_v17 = vpop.permute.xlu1 %13035 }
0x25f2   :  { %13513 = vrot.lane.b32.xlu0 %v24551_v38, %s22159_s21  ;;  %13437 = vrot.lane.b32.xlu1 %v24559_v17, %s22159_s21 }
0x25f3   :  { %v24565_v18 = vpop.permute.xlu0 %13045 }
0x25f5   :  { %v24567_v30 = vpop.permute.xlu1 %13039 }
0x25f6   :  { %13665 = vrot.lane.b32.xlu0 %v24557_v15, %s22159_s21  ;;  %13589 = vrot.lane.b32.xlu1 %v24567_v30, %s22159_s21 }
0x25f7   :  { %v24573_v44 = vpop.permute.xlu0 %13049 }
0x25f9   :  { %v24575_v61 = vpop.permute.xlu1 %13043 }
0x25fa   :  { %13817 = vrot.lane.b32.xlu0 %v24565_v18, %s22159_s21  ;;  %13741 = vrot.lane.b32.xlu1 %v24575_v61, %s22159_s21 }
0x25fb   :  { %v24581_v4 = vpop.permute.xlu0 %13053 }
0x25fd   :  { %v24583_v20 = vpop.permute.xlu1 %13047 }
0x25fe   :  { %13969 = vrot.lane.b32.xlu0 %v24573_v44, %s22159_s21  ;;  %13893 = vrot.lane.b32.xlu1 %v24583_v20, %s22159_s21 }
0x25ff   :  { %v13058_v14 = vpop.permute.xlu0 %13057 }
0x2600   :  { %21229 = vmatpush3.xpose.msk.msra.mxu1 %vm407_vm10, %v13058_v14 }
0x2601   :  { %v24590_v47 = vpop.permute.xlu1 %13051  ;;  %21233 = vmatprep.subr.mxu1 %v22154_v9 }
0x2602   :  { %14121 = vrot.lane.b32.xlu0 %v24581_v4, %s22159_s21  ;;  %14045 = vrot.lane.b32.xlu1 %v24590_v47, %s22159_s21 }
0x2603   :  { %21231 = vmatmul.mubr.msk.f32.vlgmr.msra.gmra.mxu1 %vm407_vm10, %v24509_v37 }
0x2604   :  { %21235 = vmatprep.mubr.msk.f32.mxu1 %vm22156_vm9, %v22154_v9 }
0x2605   :  { %v24601_v62 = vpop.permute.xlu1 %13055 }
0x2606   :  { %14197 = vrot.lane.b32.xlu1 %v24601_v62, %s22159_s21 }
0x2609   :  { %v13134_v36 = vpop.permute.xlu1 %13133 }
0x260a   :  { %21234 = vmatpush3.xpose.msk.msra.mxu1 %vm407_vm10, %v13134_v36 }
0x260b   :  { %21243 = vmatprep.subr.mxu1 %v22154_v9 }
0x260d   :  { %21236 = vmatmul.mubr.msk.f32.vlgmr.msra.gmra.mxu1 %vm407_vm10, %v24507_v53 }
0x260e   :  { %21245 = vmatprep.mubr.msk.f32.mxu1 %vm22156_vm9, %v22154_v9 }
0x265a   :  { %v13286_v10 = vpop.permute.xlu1 %13285 }
0x265b   :  { %21244 = vmatpush3.xpose.msk.msra.mxu1 %vm407_vm10, %v13286_v10 }
0x265c   :  { %v13210_v8 = vpop.permute.xlu0 %13209  ;;  %21253 = vmatprep.subr.mxu1 %v22154_v9 }
0x265d   :  { %21239 = vmatpush3.xpose.msk.msra.mxu0 %vm407_vm10, %v13210_v8 }
0x265e   :  { %21246 = vmatmul.mubr.msk.f32.vlgmr.msra.gmra.mxu1 %vm407_vm10, %v24543_v25  ;;  %21248 = vmatprep.subr.mxu0 %v22154_v9 }
0x265f   :  { %21255 = vmatprep.mubr.msk.f32.mxu1 %vm22156_vm9, %v22154_v9 }
0x2660   :  { %21241 = vmatmul.mubr.msk.f32.vlgmr.msra.gmra.mxu0 %vm407_vm10, %v24547_v19  ;;  %v13362_v59 = vpop.permute.xlu0 %13361 }
0x2661   :  { %21249 = vmatpush3.xpose.msk.msra.mxu0 %vm407_vm10, %v13362_v59  ;;  %21250 = vmatprep.mubr.msk.f32.mxu0 %vm22156_vm9, %v22154_v9 }
0x2662   :  { %21258 = vmatprep.subr.mxu0 %v22154_v9 }
0x2664   :  { %21251 = vmatmul.mubr.msk.f32.vlgmr.msra.gmra.mxu0 %vm407_vm10, %v24553_v31  ;;  %v13514_v29 = vpop.permute.xlu0 %13513  ;;  %v13438_v26 = vpop.permute.xlu1 %13437 }
0x2665   :  { %21254 = vmatpush3.xpose.msk.msra.mxu1 %vm407_vm10, %v13438_v26  ;;  %21259 = vmatpush3.xpose.msk.msra.mxu0 %vm407_vm10, %v13514_v29 }
0x2666   :  { %21260 = vmatprep.mubr.msk.f32.mxu0 %vm22156_vm9, %v22154_v9  ;;  %21268 = vmatprep.subr.mxu0 %v22154_v9 }
0x2667   :  { %21263 = vmatprep.subr.mxu1 %v22154_v9 }
0x2668   :  { %21261 = vmatmul.mubr.msk.f32.vlgmr.msra.gmra.mxu0 %vm407_vm10, %v24551_v38  ;;  %v13666_v13 = vpop.permute.xlu0 %13665  ;;  %21256 = vmatmul.mubr.msk.f32.vlgmr.msra.gmra.mxu1 %vm407_vm10, %v24559_v17  ;;  %v13590_v50 = vpop.permute.xlu1 %13589 }
0x2669   :  { %21264 = vmatpush3.xpose.msk.msra.mxu1 %vm407_vm10, %v13590_v50  ;;  %21269 = vmatpush3.xpose.msk.msra.mxu0 %vm407_vm10, %v13666_v13 }
0x266a   :  { %21265 = vmatprep.mubr.msk.f32.mxu1 %vm22156_vm9, %v22154_v9  ;;  %21270 = vmatprep.mubr.msk.f32.mxu0 %vm22156_vm9, %v22154_v9 }
0x266b   :  { %21278 = vmatprep.subr.mxu0 %v22154_v9  ;;  %21273 = vmatprep.subr.mxu1 %v22154_v9 }
0x266c   :  { %21271 = vmatmul.mubr.msk.f32.vlgmr.msra.gmra.mxu0 %vm407_vm10, %v24557_v15  ;;  %v13818_v12 = vpop.permute.xlu0 %13817  ;;  %21266 = vmatmul.mubr.msk.f32.vlgmr.msra.gmra.mxu1 %vm407_vm10, %v24567_v30  ;;  %v13742_v51 = vpop.permute.xlu1 %13741 }
0x266d   :  { %21274 = vmatpush3.xpose.msk.msra.mxu1 %vm407_vm10, %v13742_v51  ;;  %21279 = vmatpush3.xpose.msk.msra.mxu0 %vm407_vm10, %v13818_v12 }
0x266e   :  { %21275 = vmatprep.mubr.msk.f32.mxu1 %vm22156_vm9, %v22154_v9  ;;  %21280 = vmatprep.mubr.msk.f32.mxu0 %vm22156_vm9, %v22154_v9 }
0x266f   :  { %21288 = vmatprep.subr.mxu0 %v22154_v9  ;;  %21283 = vmatprep.subr.mxu1 %v22154_v9 }
0x2670   :  { %21281 = vmatmul.mubr.msk.f32.vlgmr.msra.gmra.mxu0 %vm407_vm10, %v24565_v18  ;;  %v13970_v23 = vpop.permute.xlu0 %13969  ;;  %21276 = vmatmul.mubr.msk.f32.vlgmr.msra.gmra.mxu1 %vm407_vm10, %v24575_v61  ;;  %v13894_v39 = vpop.permute.xlu1 %13893 }
0x2671   :  { %21284 = vmatpush3.xpose.msk.msra.mxu1 %vm407_vm10, %v13894_v39  ;;  %21289 = vmatpush3.xpose.msk.msra.mxu0 %vm407_vm10, %v13970_v23 }
0x2672   :  { %21285 = vmatprep.mubr.msk.f32.mxu1 %vm22156_vm9, %v22154_v9  ;;  %21290 = vmatprep.mubr.msk.f32.mxu0 %vm22156_vm9, %v22154_v9 }
0x2673   :  { %21298 = vmatprep.subr.mxu0 %v22154_v9  ;;  %21293 = vmatprep.subr.mxu1 %v22154_v9 }
0x2674   :  { %21291 = vmatmul.mubr.msk.f32.vlgmr.msra.gmra.mxu0 %vm407_vm10, %v24573_v44  ;;  %v14122_v33 = vpop.permute.xlu0 %14121  ;;  %21286 = vmatmul.mubr.msk.f32.vlgmr.msra.gmra.mxu1 %vm407_vm10, %v24583_v20  ;;  %v14046_v6 = vpop.permute.xlu1 %14045 }
0x2675   :  { %21294 = vmatpush3.xpose.msk.msra.mxu1 %vm407_vm10, %v14046_v6  ;;  %21299 = vmatpush3.xpose.msk.msra.mxu0 %vm407_vm10, %v14122_v33 }
0x2676   :  { %21295 = vmatprep.mubr.msk.f32.mxu1 %vm22156_vm9, %v22154_v9  ;;  %21300 = vmatprep.mubr.msk.f32.mxu0 %vm22156_vm9, %v22154_v9 }
0x2677   :  { %21303 = vmatprep.subr.mxu1 %v22154_v9  ;;  %21308 = vmatprep.subr.mxu0 %v22154_v9 }
0x2678   :  { %21296 = vmatmul.mubr.msk.f32.vlgmr.msra.gmra.mxu1 %vm407_vm10, %v24590_v47  ;;  %21301 = vmatmul.mubr.msk.f32.vlgmr.msra.gmra.mxu0 %vm407_vm10, %v24581_v4  ;;  %v14198_v63 = vpop.permute.xlu1 %14197 }
0x2679   :  { %21304 = vmatpush3.xpose.msk.msra.mxu1 %vm407_vm10, %v14198_v63  ;;  %21305 = vmatprep.mubr.msk.f32.mxu1 %vm22156_vm9, %v22154_v9 }
0x267a   :  { %21313 = vmatprep.subr.mxu1 %v22154_v9  ;;  %21310 = vmatprep.mubr.msk.f32.mxu0 %vm22156_vm9, %v22154_v9 }
0x267c   :  { %21306 = vmatmul.mubr.msk.f32.vlgmr.msra.gmra.mxu1 %vm407_vm10, %v24601_v62 }
0x267d   :  { %21315 = vmatprep.mubr.msk.f32.mxu1 %vm22156_vm9, %v22154_v9 }
0x26c3   :  { %v24695_v56 = vpop.f32.mrf.mxu1 }
0x26c4   :  { %v14273_v7 = vsel %vm1622_vm11, %v24695_v56, -inf }
0x26c5   :  { %v21232_v21 = vpop.f32.mrf.mxu1  ;;  %14274 = vmax.xlane.f32.xlu0 %v14273_v7 }
0x26cd   :  { %v24699_v48 = vpop.f32.mrf.mxu1 }
0x26ce   :  { %v14276_v22 = vsel %vm1622_vm11, %v24699_v48, -inf }
0x26cf   :  { %14277 = vmax.xlane.f32.xlu1 %v14276_v22  ;;  %v21237_v54 = vpop.f32.mrf.mxu1 }
0x26db   :  { %14525 = vrot.lane.b32.xlu0 %v24507_v53, %s22160_s0 }
0x26df   :  { %14601 = vrot.lane.b32.xlu0 %v24547_v19, %s22160_s0 }
0x26e0   :  { %14449 = vrot.lane.b32.xlu1 %v24509_v37, %s22160_s0 }
0x26e3   :  { %14677 = vrot.lane.b32.xlu0 %v24543_v25, %s22160_s0 }
0x26e7   :  { %14753 = vrot.lane.b32.xlu0 %v24553_v31, %s22160_s0 }
0x26eb   :  { %14829 = vrot.lane.b32.xlu0 %v24559_v17, %s22160_s0 }
0x26ef   :  { %14905 = vrot.lane.b32.xlu0 %v24551_v38, %s22160_s0 }
0x26f3   :  { %14981 = vrot.lane.b32.xlu0 %v24567_v30, %s22160_s0 }
0x26f7   :  { %15057 = vrot.lane.b32.xlu0 %v24557_v15, %s22160_s0 }
0x271e   :  { %v24721_v27 = vpop.f32.mrf.mxu1 }
0x271f   :  { %v14282_v5 = vsel %vm1622_vm11, %v24721_v27, -inf }
0x2720   :  { %v24725_v35 = vpop.f32.mrf.mxu0  ;;  %14283 = vmax.xlane.f32.xlu0 %v14282_v5  ;;  %v21247_v58 = vpop.f32.mrf.mxu1 }
0x2721   :  { %v14279_v46 = vsel %vm1622_vm11, %v24725_v35, -inf }
0x2722   :  { %v21242_v52 = vpop.f32.mrf.mxu0 }
0x2724   :  { %v24729_v40 = vpop.f32.mrf.mxu0  ;;  %14280 = vmax.xlane.f32.xlu0 %v14279_v46 }
0x2725   :  { %v14285_v16 = vsel %vm1622_vm11, %v24729_v40, -inf }
0x2726   :  { %v21252_v32 = vpop.f32.mrf.mxu0  ;;  %14286 = vmax.xlane.f32.xlu1 %v14285_v16 }
0x2728   :  { %v24733_v3 = vpop.f32.mrf.mxu1  ;;  %v24735_v57 = vpop.f32.mrf.mxu0 }
0x2729   :  { %v14291_v42 = vsel %vm1622_vm11, %v24735_v57, -inf  ;;  %v14288_v34 = vsel %vm1622_vm11, %v24733_v3, -inf }
0x272a   :  { %v21262_v53 = vpop.f32.mrf.mxu0  ;;  %14292 = vmax.xlane.f32.xlu1 %v14291_v42  ;;  %14289 = vmax.xlane.f32.xlu0 %v14288_v34  ;;  %v21257_v24 = vpop.f32.mrf.mxu1 }
0x272c   :  { %v24741_v37 = vpop.f32.mrf.mxu1  ;;  %v24743_v25 = vpop.f32.mrf.mxu0 }
0x272d   :  { %v14297_v19 = vsel %vm1622_vm11, %v24743_v25, -inf  ;;  %v14294_v38 = vsel %vm1622_vm11, %v24741_v37, -inf }
0x272e   :  { %v21272_v31 = vpop.f32.mrf.mxu0  ;;  %14298 = vmax.xlane.f32.xlu1 %v14297_v19  ;;  %14295 = vmax.xlane.f32.xlu0 %v14294_v38  ;;  %v21267_v15 = vpop.f32.mrf.mxu1 }
0x2730   :  { %v24749_v17 = vpop.f32.mrf.mxu1  ;;  %v24751_v30 = vpop.f32.mrf.mxu0 }
0x2731   :  { %v14303_v14 = vsel %vm1622_vm11, %v24751_v30, -inf  ;;  %v14300_v36 = vsel %vm1622_vm11, %v24749_v17, -inf }
0x2732   :  { %v21282_v10 = vpop.f32.mrf.mxu0  ;;  %14304 = vmax.xlane.f32.xlu1 %v14303_v14  ;;  %14301 = vmax.xlane.f32.xlu0 %v14300_v36  ;;  %v21277_v8 = vpop.f32.mrf.mxu1 }
0x2734   :  { %v24757_v59 = vpop.f32.mrf.mxu1  ;;  %v24759_v29 = vpop.f32.mrf.mxu0 }
0x2735   :  { %v14309_v26 = vsel %vm1622_vm11, %v24759_v29, -inf  ;;  %v14306_v13 = vsel %vm1622_vm11, %v24757_v59, -inf }
0x2736   :  { %v21292_v50 = vpop.f32.mrf.mxu0  ;;  %14310 = vmax.xlane.f32.xlu1 %v14309_v26  ;;  %14307 = vmax.xlane.f32.xlu0 %v14306_v13  ;;  %v21287_v12 = vpop.f32.mrf.mxu1 }
0x2738   :  { %v24765_v51 = vpop.f32.mrf.mxu1  ;;  %v24767_v23 = vpop.f32.mrf.mxu0 }
0x2739   :  { %v14315_v39 = vsel %vm1622_vm11, %v24767_v23, -inf  ;;  %v14312_v33 = vsel %vm1622_vm11, %v24765_v51, -inf }
0x273a   :  { %v21302_v6 = vpop.f32.mrf.mxu0  ;;  %14316 = vmax.xlane.f32.xlu1 %v14315_v39  ;;  %14313 = vmax.xlane.f32.xlu0 %v14312_v33  ;;  %v21297_v63 = vpop.f32.mrf.mxu1 }
0x273c   :  { %v24773_v7 = vpop.f32.mrf.mxu1 }
0x273d   :  { %v14318_v21 = vsel %vm1622_vm11, %v24773_v7, -inf }
0x273e   :  { %14319 = vmax.xlane.f32.xlu0 %v14318_v21  ;;  %v21307_v22 = vpop.f32.mrf.mxu1 }
0x274b   :  { %15133 = vrot.lane.b32.xlu1 %v24575_v61, %s22160_s0 }
0x274e   :  { %v14275_v54 = vpop.xlane.xlu0 %14274 }
0x274f   :  { %v14321_v58 = vsub.f32 %v24695_v56, %v14275_v54 }
0x2751   :  { %v14337_v46 = vmul.f32 1.442695, %v14321_v58 }
0x2752   :  { %v14526_v5 = vpop.permute.xlu0 %14525 }
0x2753   :  { %21314 = vmatpush3.msra.mxu1 %v14526_v5  ;;  %21953 = vpow2.f32 %v14337_v46 }
0x2754   :  { %15209 = vrot.lane.b32.xlu0 %v24565_v18, %s22160_s0  ;;  %21323 = vmatprep.subr.mxu1 %v22154_v9 }
0x2756   :  { %v24799_v42 = vpop.permute.xlu0 %14601 }
0x2758   :  { %15285 = vrot.lane.b32.xlu0 %v24583_v20, %s22160_s0  ;;  %v14278_v52 = vpop.xlane.xlu1 %14277 }
0x2759   :  { %v14322_v18 = vsub.f32 %v24699_v48, %v14278_v52 }
0x275a   :  { %v24801_v34 = vpop.permute.xlu0 %14677 }
0x275b   :  { %v14339_v61 = vmul.f32 1.442695, %v14322_v18 }
0x275c   :  { %15361 = vrot.lane.b32.xlu0 %v24573_v44, %s22160_s0  ;;  %v14450_v16 = vpop.permute.xlu1 %14449 }
0x275d   :  { %21309 = vmatpush3.msra.mxu0 %v14450_v16  ;;  %21955 = vpow2.f32 %v14339_v61 }
0x275e   :  { %21318 = vmatprep.subr.mxu0 %v22154_v9 }
0x2760   :  { %15437 = vrot.lane.b32.xlu0 %v24590_v47, %s22160_s0  ;;  %v24791_v56 = vpop.eup %21953  ;;  %v24803_v47 = vpop.permute.xlu0 %14753 }
0x2761   :  { %v14369_v20 = vsel %vm1622_vm11, %v24791_v56, 0.0 }
0x2764   :  { %v24805_v48 = vpop.permute.xlu0 %14829 }
0x2768   :  { %v24807_v53 = vpop.permute.xlu0 %14905 }
0x276a   :  { %v24795_v32 = vpop.eup %21955 }
0x276b   :  { %v14372_v44 = vsel %vm1622_vm11, %v24795_v32, 0.0 }
0x276c   :  { %v24809_v24 = vpop.permute.xlu0 %14981 }
0x276f   :  { %14370 = vadd.xlane.f32.xlu1 %v14369_v20 }
0x2770   :  { %v24811_v19 = vpop.permute.xlu0 %15057 }
0x277f   :  { %14373 = vadd.xlane.f32.xlu0 %v14372_v44 }
0x27a9   :  { %v14284_v38 = vpop.xlane.xlu0 %14283 }
0x27aa   :  { %v14324_v31 = vsub.f32 %v24721_v27, %v14284_v38 }
0x27ac   :  { %v14343_v15 = vmul.f32 1.442695, %v14324_v31 }
0x27ad   :  { %v14281_v14 = vpop.xlane.xlu0 %14280 }
0x27ae   :  { %21957 = vpow2.f32 %v14343_v15  ;;  %v14323_v36 = vsub.f32 %v24725_v35, %v14281_v14 }
0x27af   :  { %v14287_v10 = vpop.xlane.xlu1 %14286 }
0x27b0   :  { %v14341_v8 = vmul.f32 1.442695, %v14323_v36  ;;  %v14325_v26 = vsub.f32 %v24729_v40, %v14287_v10 }
0x27b2   :  { %21959 = vpow2.f32 %v14341_v8  ;;  %v14345_v13 = vmul.f32 1.442695, %v14325_v26 }
0x27b3   :  { %v14290_v50 = vpop.xlane.xlu0 %14289  ;;  %v14293_v12 = vpop.xlane.xlu1 %14292 }
0x27b4   :  { %21961 = vpow2.f32 %v14345_v13  ;;  %v14326_v39 = vsub.f32 %v24733_v3, %v14290_v50  ;;  %v14327_v33 = vsub.f32 %v24735_v57, %v14293_v12 }
0x27b6   :  { %v14347_v6 = vmul.f32 1.442695, %v14326_v39  ;;  %v14349_v27 = vmul.f32 1.442695, %v14327_v33 }
0x27b7   :  { %v14296_v63 = vpop.xlane.xlu0 %14295  ;;  %v14299_v21 = vpop.xlane.xlu1 %14298 }
0x27b8   :  { %21963 = vpow2.f32 %v14347_v6  ;;  %v14328_v35 = vsub.f32 %v24741_v37, %v14296_v63  ;;  %v14329_v22 = vsub.f32 %v24743_v25, %v14299_v21 }
0x27b9   :  { %21965 = vpow2.f32 %v14349_v27 }
0x27ba   :  { %v14351_v40 = vmul.f32 1.442695, %v14328_v35  ;;  %v14353_v54 = vmul.f32 1.442695, %v14329_v22 }
0x27bb   :  { %v24820_v5 = vpop.eup %21957  ;;  %v14302_v58 = vpop.xlane.xlu0 %14301 }
0x27bc   :  { %v14305_v52 = vpop.xlane.xlu1 %14304  ;;  %21967 = vpow2.f32 %v14351_v40  ;;  %v14330_v3 = vsub.f32 %v24749_v17, %v14302_v58  ;;  %v14378_v46 = vsel %vm1622_vm11, %v24820_v5, 0.0 }
0x27bd   :  { %v14331_v57 = vsub.f32 %v24751_v30, %v14305_v52  ;;  %21969 = vpow2.f32 %v14353_v54  ;;  %14379 = vadd.xlane.f32.xlu0 %v14378_v46 }
0x27be   :  { %v14355_v37 = vmul.f32 1.442695, %v14330_v3 }
0x27bf   :  { %v14357_v16 = vmul.f32 1.442695, %v14331_v57  ;;  %v24826_v25 = vpop.eup %21959  ;;  %v14308_v18 = vpop.xlane.xlu0 %14307 }
0x27c0   :  { %v14311_v61 = vpop.xlane.xlu1 %14310  ;;  %21971 = vpow2.f32 %v14355_v37  ;;  %v14332_v20 = vsub.f32 %v24757_v59, %v14308_v18  ;;  %v14375_v17 = vsel %vm1622_vm11, %v24826_v25, 0.0 }
0x27c1   :  { %v14333_v44 = vsub.f32 %v24759_v29, %v14311_v61  ;;  %v24832_v30 = vpop.eup %21961  ;;  %21973 = vpow2.f32 %v14357_v16  ;;  %14376 = vadd.xlane.f32.xlu1 %v14375_v17 }
0x27c2   :  { %v14359_v38 = vmul.f32 1.442695, %v14332_v20  ;;  %v14381_v59 = vsel %vm1622_vm11, %v24832_v30, 0.0 }
0x27c3   :  { %v14361_v31 = vmul.f32 1.442695, %v14333_v44  ;;  %v14314_v15 = vpop.xlane.xlu0 %14313 }
0x27c4   :  { %v14317_v14 = vpop.xlane.xlu1 %14316  ;;  %21975 = vpow2.f32 %v14359_v38  ;;  %v14334_v36 = vsub.f32 %v24765_v51, %v14314_v15 }
0x27c5   :  { %v14335_v10 = vsub.f32 %v24767_v23, %v14317_v14  ;;  %v24838_v29 = vpop.eup %21963  ;;  %21977 = vpow2.f32 %v14361_v31  ;;  %14382 = vadd.xlane.f32.xlu1 %v14381_v59 }
0x27c6   :  { %v24840_v8 = vpop.eup %21965  ;;  %v14363_v26 = vmul.f32 1.442695, %v14334_v36  ;;  %v14384_v50 = vsel %vm1622_vm11, %v24838_v29, 0.0 }
0x27c7   :  { %v14365_v13 = vmul.f32 1.442695, %v14335_v10  ;;  %v14320_v12 = vpop.xlane.xlu0 %14319  ;;  %14385 = vadd.xlane.f32.xlu0 %v14384_v50  ;;  %v14387_v23 = vsel %vm1622_vm11, %v24840_v8, 0.0 }
0x27c8   :  { %21979 = vpow2.f32 %v14363_v26  ;;  %v14336_v51 = vsub.f32 %v24773_v7, %v14320_v12  ;;  %v24889_v20 = vpop.permute.xlu1 %15133 }
0x27c9   :  { %v24847_v39 = vpop.eup %21967  ;;  %14388 = vadd.xlane.f32.xlu1 %v14387_v23  ;;  %21981 = vpow2.f32 %v14365_v13 }
0x27ca   :  { %v24849_v33 = vpop.eup %21969  ;;  %v14367_v6 = vmul.f32 1.442695, %v14336_v51  ;;  %v14390_v27 = vsel %vm1622_vm11, %v24847_v39, 0.0 }
0x27cb   :  { %14391 = vadd.xlane.f32.xlu0 %v14390_v27  ;;  %v14393_v63 = vsel %vm1622_vm11, %v24849_v33, 0.0  ;;  %v24887_v61 = vpop.permute.xlu0 %15209 }
0x27cc   :  { %21983 = vpow2.f32 %v14367_v6 }
0x27cd   :  { %v24855_v21 = vpop.eup %21971  ;;  %14394 = vadd.xlane.f32.xlu1 %v14393_v63 }
0x27ce   :  { %v24857_v7 = vpop.eup %21973  ;;  %v14396_v35 = vsel %vm1622_vm11, %v24855_v21, 0.0 }
0x27cf   :  { %14397 = vadd.xlane.f32.xlu0 %v14396_v35  ;;  %v14399_v22 = vsel %vm1622_vm11, %v24857_v7, 0.0  ;;  %v24891_v44 = vpop.permute.xlu0 %15285 }
0x27d1   :  { %v24863_v40 = vpop.eup %21975  ;;  %14400 = vadd.xlane.f32.xlu1 %v14399_v22 }
0x27d2   :  { %v24865_v54 = vpop.eup %21977  ;;  %v14402_v58 = vsel %vm1622_vm11, %v24863_v40, 0.0 }
0x27d3   :  { %14403 = vadd.xlane.f32.xlu0 %v14402_v58  ;;  %v14405_v52 = vsel %vm1622_vm11, %v24865_v54, 0.0  ;;  %v24893_v38 = vpop.permute.xlu0 %15361 }
0x27d5   :  { %v24871_v3 = vpop.eup %21979  ;;  %14406 = vadd.xlane.f32.xlu1 %v14405_v52 }
0x27d6   :  { %v14408_v57 = vsel %vm1622_vm11, %v24871_v3, 0.0  ;;  %v24875_v46 = vpop.eup %21981 }
0x27d7   :  { %14409 = vadd.xlane.f32.xlu0 %v14408_v57  ;;  %v14411_v18 = vsel %vm1622_vm11, %v24875_v46, 0.0  ;;  %v24895_v31 = vpop.permute.xlu0 %15437 }
0x27d9   :  { %v24877_v37 = vpop.eup %21983 }
0x27da   :  { %v14414_v16 = vsel %vm1622_vm11, %v24877_v37, 0.0 }
0x27db   :  { %14415 = vadd.xlane.f32.xlu1 %v14414_v16  ;;  %14412 = vadd.xlane.f32.xlu0 %v14411_v18 }
0x27ec   :  { %15513 = vrot.lane.b32.xlu1 %v24581_v4, %s22160_s0 }
0x27f1   :  { %15589 = vrot.lane.b32.xlu0 %v24601_v62, %s22160_s0 }
0x27f8   :  { %v14371_v17 = vpop.xlane.xlu1 %14370 }
0x27f9   :  { %21985 = vrcp.f32 %v14371_v17 }
0x2806   :  { %v21986_v15 = vpop.eup %21985 }
0x2807   :  { %v14433_v14 = vmul.f32 %v21986_v15, %v24791_v56 }
0x2808   :  { %v14374_v36 = vpop.xlane.xlu0 %14373 }
0x2809   :  { %21987 = vrcp.f32 %v14374_v36  ;;  %21311 = vmatmul.mubr.msk.f32.vlgmr.msra.gmra.mxu0 %vm1622_vm11, %v14433_v14 }
0x280a   :  { %21319 = vmatpush3.msra.mxu0 %v24799_v42  ;;  %21320 = vmatprep.mubr.msk.f32.mxu0 %vm22156_vm9, %v22154_v9 }
0x280b   :  { %21328 = vmatprep.subr.mxu0 %v22154_v9 }
0x2816   :  { %v21988_v4 = vpop.eup %21987 }
0x2817   :  { %v14434_v62 = vmul.f32 %v21988_v4, %v24795_v32 }
0x2819   :  { %21316 = vmatmul.mubr.msk.f32.vlgmr.msra.gmra.mxu1 %vm1622_vm11, %v14434_v62 }
0x281a   :  { %21324 = vmatpush3.msra.mxu1 %v24801_v34  ;;  %21325 = vmatprep.mubr.msk.f32.mxu1 %vm22156_vm9, %v22154_v9 }
0x281b   :  { %21333 = vmatprep.subr.mxu1 %v22154_v9 }
0x2846   :  { %v14380_v56 = vpop.xlane.xlu0 %14379 }
0x2847   :  { %21989 = vrcp.f32 %v14380_v56 }
0x284a   :  { %v14377_v42 = vpop.xlane.xlu1 %14376 }
0x284b   :  { %21991 = vrcp.f32 %v14377_v42 }
0x284e   :  { %v14383_v10 = vpop.xlane.xlu1 %14382 }
0x284f   :  { %21993 = vrcp.f32 %v14383_v10 }
0x2850   :  { %v14386_v59 = vpop.xlane.xlu0 %14385 }
0x2851   :  { %21995 = vrcp.f32 %v14386_v59 }
0x2852   :  { %v14389_v26 = vpop.xlane.xlu1 %14388 }
0x2853   :  { %21997 = vrcp.f32 %v14389_v26 }
0x2854   :  { %v21990_v32 = vpop.eup %21989  ;;  %v14392_v13 = vpop.xlane.xlu0 %14391 }
0x2855   :  { %v14436_v50 = vmul.f32 %v21990_v32, %v24820_v5  ;;  %21999 = vrcp.f32 %v14392_v13  ;;  %v12927_v32 = vld [vmem:[#allocation2 + $0x2b8] sm:$0xff] }
0x2856   :  { %v14395_v34 = vpop.xlane.xlu1 %14394 }
0x2857   :  { %22001 = vrcp.f32 %v14395_v34  ;;  %21326 = vmatmul.mubr.msk.f32.vlgmr.msra.gmra.mxu1 %vm1622_vm11, %v14436_v50  ;;  %v12926_v34 = vld [vmem:[#allocation2 + $0x2b0] sm:$0xff] }
0x2858   :  { %v21992_v12 = vpop.eup %21991  ;;  %21334 = vmatpush3.msra.mxu1 %v24805_v48  ;;  %v14398_v51 = vpop.xlane.xlu0 %14397  ;;  %21335 = vmatprep.mubr.msk.f32.mxu1 %vm22156_vm9, %v22154_v9 }
0x2859   :  { %v14435_v23 = vmul.f32 %v21992_v12, %v24826_v25  ;;  %22003 = vrcp.f32 %v14398_v51  ;;  %21343 = vmatprep.subr.mxu1 %v22154_v9  ;;  %v12925_v12 = vld [vmem:[#allocation2 + $0x2a8] sm:$0xff] }
0x285a   :  { %v14401_v6 = vpop.xlane.xlu1 %14400 }
0x285b   :  { %22005 = vrcp.f32 %v14401_v6  ;;  %21321 = vmatmul.mubr.msk.f32.vlgmr.msra.gmra.mxu0 %vm1622_vm11, %v14435_v23 }
0x285c   :  { %v21994_v5 = vpop.eup %21993  ;;  %21329 = vmatpush3.msra.mxu0 %v24803_v47  ;;  %v14404_v27 = vpop.xlane.xlu0 %14403  ;;  %21330 = vmatprep.mubr.msk.f32.mxu0 %vm22156_vm9, %v22154_v9 }
0x285d   :  { %v14437_v48 = vmul.f32 %v21994_v5, %v24832_v30  ;;  %22007 = vrcp.f32 %v14404_v27  ;;  %21338 = vmatprep.subr.mxu0 %v22154_v9  ;;  %v12924_v27 = vld [vmem:[#allocation2 + $0x2a0] sm:$0xff] }
0x285e   :  { %v21996_v25 = vpop.eup %21995  ;;  %v14407_v63 = vpop.xlane.xlu1 %14406 }
0x285f   :  { %v14438_v35 = vmul.f32 %v21996_v25, %v24838_v29  ;;  %22009 = vrcp.f32 %v14407_v63  ;;  %21331 = vmatmul.mubr.msk.f32.vlgmr.msra.gmra.mxu0 %vm1622_vm11, %v14437_v48 }
0x2860   :  { %v21998_v22 = vpop.eup %21997  ;;  %21339 = vmatpush3.msra.mxu0 %v24807_v53  ;;  %v14410_v47 = vpop.xlane.xlu0 %14409  ;;  %21340 = vmatprep.mubr.msk.f32.mxu0 %vm22156_vm9, %v22154_v9 }
0x2861   :  { %v14439_v58 = vmul.f32 %v21998_v22, %v24840_v8  ;;  %22011 = vrcp.f32 %v14410_v47  ;;  %21336 = vmatmul.mubr.msk.f32.vlgmr.msra.gmra.mxu1 %vm1622_vm11, %v14438_v35  ;;  %21348 = vmatprep.subr.mxu0 %v22154_v9 }
0x2862   :  { %v22000_v30 = vpop.eup %21999  ;;  %21344 = vmatpush3.msra.mxu1 %v24809_v24  ;;  %21345 = vmatprep.mubr.msk.f32.mxu1 %vm22156_vm9, %v22154_v9 }
0x2863   :  { %v14440_v29 = vmul.f32 %v22000_v30, %v24847_v39  ;;  %21341 = vmatmul.mubr.msk.f32.vlgmr.msra.gmra.mxu0 %vm1622_vm11, %v14439_v58  ;;  %21353 = vmatprep.subr.mxu1 %v22154_v9 }
0x2864   :  { %v22002_v53 = vpop.eup %22001  ;;  %21349 = vmatpush3.msra.mxu0 %v24811_v19  ;;  %v14413_v8 = vpop.xlane.xlu0 %14412  ;;  %21350 = vmatprep.mubr.msk.f32.mxu0 %vm22156_vm9, %v22154_v9 }
0x2865   :  { %v14416_v52 = vpop.xlane.xlu1 %14415  ;;  %v14441_v57 = vmul.f32 %v22002_v53, %v24849_v33  ;;  %22013 = vrcp.f32 %v14413_v8  ;;  %21346 = vmatmul.mubr.msk.f32.vlgmr.msra.gmra.mxu1 %vm1622_vm11, %v14440_v29  ;;  %21358 = vmatprep.subr.mxu0 %v22154_v9 }
0x2866   :  { %v22004_v24 = vpop.eup %22003  ;;  %22015 = vrcp.f32 %v14416_v52  ;;  %21354 = vmatpush3.msra.mxu1 %v24889_v20  ;;  %21355 = vmatprep.mubr.msk.f32.mxu1 %vm22156_vm9, %v22154_v9 }
0x2867   :  { %v14442_v19 = vmul.f32 %v22004_v24, %v24855_v21  ;;  %21351 = vmatmul.mubr.msk.f32.vlgmr.msra.gmra.mxu0 %vm1622_vm11, %v14441_v57  ;;  %21363 = vmatprep.subr.mxu1 %v22154_v9 }
0x2868   :  { %v22006_v39 = vpop.eup %22005  ;;  %21359 = vmatpush3.msra.mxu0 %v24887_v61  ;;  %21360 = vmatprep.mubr.msk.f32.mxu0 %vm22156_vm9, %v22154_v9 }
0x2869   :  { %v14443_v33 = vmul.f32 %v22006_v39, %v24857_v7  ;;  %21356 = vmatmul.mubr.msk.f32.vlgmr.msra.gmra.mxu1 %vm1622_vm11, %v14442_v19  ;;  %21368 = vmatprep.subr.mxu0 %v22154_v9  ;;  %v15514_v20 = vpop.permute.xlu1 %15513 }
0x286a   :  { %v22008_v16 = vpop.eup %22007  ;;  %21364 = vmatpush3.msra.mxu1 %v24891_v44  ;;  %21365 = vmatprep.mubr.msk.f32.mxu1 %vm22156_vm9, %v22154_v9 }
0x286b   :  { %v14444_v21 = vmul.f32 %v22008_v16, %v24863_v40  ;;  %21361 = vmatmul.mubr.msk.f32.vlgmr.msra.gmra.mxu0 %vm1622_vm11, %v14443_v33  ;;  %21373 = vmatprep.subr.mxu1 %v22154_v9 }
0x286c   :  { %v22010_v18 = vpop.eup %22009  ;;  %21369 = vmatpush3.msra.mxu0 %v24893_v38  ;;  %21370 = vmatprep.mubr.msk.f32.mxu0 %vm22156_vm9, %v22154_v9 }
0x286d   :  { %v14445_v7 = vmul.f32 %v22010_v18, %v24865_v54  ;;  %21366 = vmatmul.mubr.msk.f32.vlgmr.msra.gmra.mxu1 %vm1622_vm11, %v14444_v21  ;;  %21378 = vmatprep.subr.mxu0 %v22154_v9  ;;  %v15590_v54 = vpop.permute.xlu0 %15589 }
0x286e   :  { %v22012_v61 = vpop.eup %22011  ;;  %21374 = vmatpush3.msra.mxu1 %v24895_v31  ;;  %21375 = vmatprep.mubr.msk.f32.mxu1 %vm22156_vm9, %v22154_v9 }
0x286f   :  { %v14446_v40 = vmul.f32 %v22012_v61, %v24871_v3  ;;  %21371 = vmatmul.mubr.msk.f32.vlgmr.msra.gmra.mxu0 %vm1622_vm11, %v14445_v7  ;;  %21383 = vmatprep.subr.mxu1 %v22154_v9 }
0x2870   :  { %21379 = vmatpush3.msra.mxu0 %v15514_v20  ;;  %21380 = vmatprep.mubr.msk.f32.mxu0 %vm22156_vm9, %v22154_v9 }
0x2871   :  { %21376 = vmatmul.mubr.msk.f32.vlgmr.msra.gmra.mxu1 %vm1622_vm11, %v14446_v40  ;;  %21388 = vmatprep.subr.mxu0 %v12927_v32 }
0x2872   :  { %v22014_v44 = vpop.eup %22013  ;;  %21384 = vmatpush3.msra.mxu1 %v15590_v54  ;;  %21385 = vmatprep.mubr.msk.f32.mxu1 %vm22156_vm9, %v22154_v9 }
0x2873   :  { %v22016_v17 = vpop.eup %22015  ;;  %v14447_v3 = vmul.f32 %v22014_v44, %v24875_v46 }
0x2874   :  { %v14448_v38 = vmul.f32 %v22016_v17, %v24877_v37 }
0x2875   :  { %21381 = vmatmul.mubr.msk.f32.vlgmr.msra.gmra.mxu0 %vm1622_vm11, %v14447_v3 }
0x2876   :  { %21386 = vmatmul.mubr.msk.f32.vlgmr.msra.gmra.mxu1 %vm1622_vm11, %v14448_v38  ;;  %21389 = vmatpush3.msra.mxu0 %v12927_v32 }
0x2877   :  { %21390 = vmatprep.subr.mxu0 %v12926_v34 }
0x2878   :  { %21391 = vmatpush3.msra.mxu0 %v12926_v34 }
0x2879   :  { %21392 = vmatprep.subr.mxu0 %v12925_v12 }
0x287a   :  { %21393 = vmatpush3.msra.mxu0 %v12925_v12 }
0x287b   :  { %21394 = vmatprep.subr.mxu0 %v12924_v27 }
0x287c   :  { %21395 = vmatpush3.msra.mxu0 %v12924_v27 }
0x28c9   :  { %v24981_v31 = vpop.f32.mrf.mxu0 }
0x28cb   :  { %v21312_v15 = vpop.f32.mrf.mxu0 }
0x28d9   :  { %v24983_v14 = vpop.f32.mrf.mxu1 }
0x28db   :  { %v21317_v36 = vpop.f32.mrf.mxu1 }
0x2917   :  { %v14749_v4 = vpop.f32.mrf.mxu1 }
0x2918   :  { %15669 = vrot.lane.b32.xlu0 %v14749_v4, %s22161_s22 }
0x2919   :  { %v21327_v62 = vpop.f32.mrf.mxu1 }
0x291b   :  { %v14673_v56 = vpop.f32.mrf.mxu0 }
0x291c   :  { %15667 = vrot.lane.b32.xlu1 %v14673_v56, %s22161_s22 }
0x291d   :  { %v21322_v46 = vpop.f32.mrf.mxu0 }
0x291f   :  { %v14825_v42 = vpop.f32.mrf.mxu0 }
0x2920   :  { %15675 = vrot.lane.b32.xlu1 %v14825_v42, %s22149_s19 }
0x2921   :  { %v21332_v37 = vpop.f32.mrf.mxu0  ;;  %v14901_v10 = vpop.f32.mrf.mxu1 }
0x2922   :  { %15677 = vrot.lane.b32.xlu0 %v14901_v10, %s22149_s19 }
0x2923   :  { %v21337_v59 = vpop.f32.mrf.mxu1  ;;  %v14977_v26 = vpop.f32.mrf.mxu0 }
0x2924   :  { %15683 = vrot.lane.b32.xlu1 %v14977_v26, %s22162_s23  ;;  %v25020_v26 = vld [vmem:[%s25615_s3 + $0x20] sm:$0xff] }
0x2925   :  { %v21342_v13 = vpop.f32.mrf.mxu0  ;;  %v15053_v50 = vpop.f32.mrf.mxu1  ;;  %v15738_v32 = vrot.slane %v25020_v26, %v22801_v28 }
0x2926   :  { %15685 = vrot.lane.b32.xlu0 %v15053_v50, %s22162_s23 }
0x2927   :  { %v21347_v51 = vpop.f32.mrf.mxu1  ;;  %v15129_v23 = vpop.f32.mrf.mxu0 }
0x2928   :  { %15691 = vrot.lane.b32.xlu1 %v15129_v23, %s22163_s24 }
0x2929   :  { %v21352_v6 = vpop.f32.mrf.mxu0  ;;  %v15205_v5 = vpop.f32.mrf.mxu1 }
0x292a   :  { %15693 = vrot.lane.b32.xlu0 %v15205_v5, %s22163_s24 }
0x292b   :  { %v21357_v48 = vpop.f32.mrf.mxu1  ;;  %v15281_v25 = vpop.f32.mrf.mxu0 }
0x292c   :  { %15699 = vrot.lane.b32.xlu1 %v15281_v25, %s22164_s25 }
0x292d   :  { %v21362_v63 = vpop.f32.mrf.mxu0  ;;  %v15357_v35 = vpop.f32.mrf.mxu1 }
0x292e   :  { %15701 = vrot.lane.b32.xlu0 %v15357_v35, %s22164_s25  ;;  %v12931_v35 = vld [vmem:[#allocation2 + $0x2d8] sm:$0xff] }
0x292f   :  { %v21367_v22 = vpop.f32.mrf.mxu1  ;;  %v15433_v47 = vpop.f32.mrf.mxu0  ;;  %21399 = vmatprep.subr.mxu1 %v12931_v35 }
0x2930   :  { %15707 = vrot.lane.b32.xlu1 %v15433_v47, %s22165_s26  ;;  %v12930_v22 = vld [vmem:[#allocation2 + $0x2d0] sm:$0xff]  ;;  %21400 = vmatpush3.msra.mxu1 %v12931_v35  ;;  %v12939_v47 = vld [vmem:[#allocation2 + $0x318] sm:$0xff] }
0x2931   :  { %v21372_v58 = vpop.f32.mrf.mxu0  ;;  %v15509_v30 = vpop.f32.mrf.mxu1  ;;  %21401 = vmatprep.subr.mxu1 %v12930_v22  ;;  %21410 = vmatprep.subr.mxu0 %v12939_v47 }
0x2932   :  { %15709 = vrot.lane.b32.xlu0 %v15509_v30, %s22165_s26  ;;  %21402 = vmatpush3.msra.mxu1 %v12930_v22  ;;  %v12938_v58 = vld [vmem:[#allocation2 + $0x310] sm:$0xff]  ;;  %v12937_v30 = vld [vmem:[#allocation2 + $0x308] sm:$0xff] }
0x2933   :  { %v21377_v29 = vpop.f32.mrf.mxu1 }
0x2934   :  { %v12936_v29 = vld [vmem:[#allocation2 + $0x300] sm:$0xff] }
0x2935   :  { %v15585_v53 = vpop.f32.mrf.mxu0 }
0x2936   :  { %v15661_v8 = vpop.f32.mrf.mxu1  ;;  %15715 = vrot.lane.b32.xlu1 %v15585_v53, %s22166_s27 }
0x2937   :  { %15717 = vrot.lane.b32.xlu0 %v15661_v8, %s22166_s27  ;;  %v21382_v52 = vpop.f32.mrf.mxu0 }
0x2938   :  { %v21387_v57 = vpop.f32.mrf.mxu1 }
0x298a   :  { %v15670_v19 = vpop.permute.xlu0 %15669 }
0x298b   :  { %v15722_v54 = vsel %vm407_vm10, %v24983_v14, %v15670_v19 }
0x298e   :  { %v15668_v24 = vpop.permute.xlu1 %15667 }
0x298f   :  { %v15721_v20 = vsel %vm407_vm10, %v24981_v31, %v15668_v24 }
0x2992   :  { %v15676_v39 = vpop.permute.xlu1 %15675 }
0x2993   :  { %v15723_v44 = vsel %vm1622_vm11, %v15721_v20, %v15676_v39 }
0x2994   :  { %v15678_v33 = vpop.permute.xlu0 %15677 }
0x2995   :  { %v15724_v38 = vsel %vm1622_vm11, %v15722_v54, %v15678_v33  ;;  %v15855_v54 = vrot.slane %v25020_v26, %v22822_v60 }
0x2996   :  { %v15684_v16 = vpop.permute.xlu1 %15683 }
0x2997   :  { %v15725_v15 = vsel %vm3075_vm12, %v15723_v44, %v15684_v16 }
0x2998   :  { %v15686_v21 = vpop.permute.xlu0 %15685 }
0x2999   :  { %v15726_v36 = vsel %vm3075_vm12, %v15724_v38, %v15686_v21  ;;  %v15861_v38 = vrot.slane %v25020_v26, %v22825_v43 }
0x299a   :  { %v15692_v18 = vpop.permute.xlu1 %15691 }
0x299b   :  { %v15727_v4 = vsel %vm3078_vm13, %v15725_v15, %v15692_v18 }
0x299c   :  { %v15694_v7 = vpop.permute.xlu0 %15693 }
0x299d   :  { %v15728_v62 = vsel %vm3078_vm13, %v15726_v36, %v15694_v7 }
0x299e   :  { %v15700_v61 = vpop.permute.xlu1 %15699 }
0x299f   :  { %v15729_v56 = vsel %vm3081_vm14, %v15727_v4, %v15700_v61 }
0x29a0   :  { %v15702_v40 = vpop.permute.xlu0 %15701 }
0x29a1   :  { %v15730_v31 = vsel %vm3081_vm14, %v15728_v62, %v15702_v40 }
0x29a2   :  { %v15708_v17 = vpop.permute.xlu1 %15707 }
0x29a3   :  { %v15731_v14 = vsel %vm3084_vm15, %v15729_v56, %v15708_v17 }
0x29a4   :  { %v15710_v3 = vpop.permute.xlu0 %15709 }
0x29a5   :  { %v15732_v42 = vsel %vm3084_vm15, %v15730_v31, %v15710_v3 }
0x29a8   :  { %v15716_v46 = vpop.permute.xlu1 %15715 }
0x29a9   :  { %v15718_v37 = vpop.permute.xlu0 %15717  ;;  %v15733_v10 = vsel %vm3087_vm0, %v15731_v14, %v15716_v46  ;;  %v12935_v14 = vld [vmem:[#allocation2 + $0x2f8] sm:$0xff]  ;;  %v12934_v46 = vld [vmem:[#allocation2 + $0x2f0] sm:$0xff] }
0x29aa   :  { %v15734_v59 = vsel %vm3087_vm0, %v15732_v42, %v15718_v37  ;;  %21396 = vmatprep.mubr.msk.f32.mxu0 %vm101_vm7, %v15733_v10  ;;  %v12933_v42 = vld [vmem:[#allocation2 + $0x2e8] sm:$0xff]  ;;  %v12932_v37 = vld [vmem:[#allocation2 + $0x2e0] sm:$0xff]  ;;  %v15867_v10 = vrot.slane %v25020_v26, %v22836_v49 }
0x29ab   :  { %21397 = vmatmul.mubr.msk.f32.vlgmr.msra.gmra.mxu0 %vm101_vm7, %v15734_v59 }
0x29ac   :  { %21411 = vmatpush3.msra.mxu0 %v12939_v47 }
0x29ad   :  { %21412 = vmatprep.subr.mxu0 %v12938_v58 }
0x29ae   :  { %21413 = vmatpush3.msra.mxu0 %v12938_v58  ;;  %v16084_v58 = vld [vmem:[#allocation2 + $0x338] sm:$0xff] }
0x29af   :  { %21414 = vmatprep.subr.mxu0 %v12937_v30 }
0x29b0   :  { %21415 = vmatpush3.msra.mxu0 %v12937_v30  ;;  %v16083_v30 = vld [vmem:[#allocation2 + $0x330] sm:$0xff] }
0x29b1   :  { %21416 = vmatprep.subr.mxu0 %v12936_v29 }
0x29b2   :  { %21417 = vmatpush3.msra.mxu0 %v12936_v29  ;;  %v16082_v29 = vld [vmem:[#allocation2 + $0x328] sm:$0xff] }
0x29b3   :  { %21418 = vmatprep.subr.mxu0 %v12935_v14 }
0x29b4   :  { %21419 = vmatpush3.msra.mxu0 %v12935_v14 }
0x29b5   :  { %21420 = vmatprep.subr.mxu0 %v12934_v46 }
0x29b6   :  { %21421 = vmatpush3.msra.mxu0 %v12934_v46  ;;  %v19714_v46 = vld [vmem:[%s25615_s3 + $0x28] sm:$0xff] }
0x29b7   :  { %21422 = vmatprep.subr.mxu0 %v12933_v42 }
0x29b8   :  { %21423 = vmatpush3.msra.mxu0 %v12933_v42 }
0x29b9   :  { %21424 = vmatprep.subr.mxu0 %v12932_v37 }
0x29ba   :  { %21425 = vmatpush3.msra.mxu0 %v12932_v37 }
0x29bb   :  { %21450 = vmatprep.subr.mxu0 %v22154_v9 }
0x2a6b   :  { %v21398_v13 = vpop.f32.mrf.mxu0 }
0x2a6c   :  { %v15817_v50 = vadd.f32 %v21398_v13, %v15738_v32 }
0x2a6d   :  { %v15811_v34 = vpop.f32.mrf.mxu0 }
0x2a6e   :  { %v15821_v12 = vadd.f32 %v15817_v50, %v24495_v11  ;;  %v15812_v51 = vadd.f32 %v15811_v34, %v15738_v32  ;;  %v12929_v11 = vld [vmem:[#allocation2 + $0x2c8] sm:$0xff] }
0x2a6f   :  { %21403 = vmatprep.subr.mxu1 %v12929_v11 }
0x2a70   :  { %v15820_v23 = vadd.f32 %v15812_v51, %v24493_v55  ;;  %v15825_v6 = vsel %vm101_vm7, %v15821_v12, 0.0  ;;  %v15831_v48 = vmul.f32 %v15821_v12, %v15821_v12  ;;  %v12928_v55 = vld [vmem:[#allocation2 + $0x2c0] sm:$0xff]  ;;  %21404 = vmatpush3.msra.mxu1 %v12929_v11  ;;  %v15954_v51 = vrot.slane %v25020_v26, %v22845_v0 }
0x2a71   :  { %15826 = vadd.xlane.f32.xlu0 %v15825_v6  ;;  %21405 = vmatprep.subr.mxu1 %v12928_v55 }
0x2a72   :  { %v15822_v5 = vsel %vm101_vm7, %v15820_v23, 0.0  ;;  %v15830_v27 = vmul.f32 %v15820_v23, %v15820_v23  ;;  %v15835_v63 = vsel %vm101_vm7, %v15831_v48, 0.0  ;;  %21406 = vmatpush3.msra.mxu1 %v12928_v55 }
0x2a73   :  { %15823 = vadd.xlane.f32.xlu1 %v15822_v5  ;;  %21429 = vmatprep.subr.mxu1 %v16084_v58 }
0x2a74   :  { %v15832_v25 = vsel %vm101_vm7, %v15830_v27, 0.0 }
0x2a75   :  { %15833 = vadd.xlane.f32.xlu0 %v15832_v25 }
0x2a77   :  { %15836 = vadd.xlane.f32.xlu1 %v15835_v63 }
0x2afa   :  { %v15827_v53 = vpop.xlane.xlu0 %15826 }
0x2afb   :  { %v15829_v52 = vmul.f32 0.03125, %v15827_v53  ;;  %v16081_v53 = vld [vmem:[#allocation2 + $0x320] sm:$0xff] }
0x2afc   :  { %v15824_v8 = vpop.xlane.xlu1 %15823 }
0x2afd   :  { %v15828_v57 = vmul.f32 0.03125, %v15824_v8  ;;  %v15841_v16 = vmul.f32 %v15829_v52, %v15829_v52  ;;  %v15845_v17 = vsub.f32 %v15821_v12, %v15829_v52 }
0x2afe   :  { %v15834_v24 = vpop.xlane.xlu0 %15833 }
0x2aff   :  { %v15840_v19 = vmul.f32 %v15828_v57, %v15828_v57  ;;  %v15838_v39 = vmul.f32 0.03125, %v15834_v24  ;;  %v15844_v20 = vsub.f32 %v15820_v23, %v15828_v57 }
0x2b00   :  { %v15837_v33 = vpop.xlane.xlu1 %15836 }
0x2b01   :  { %v15842_v21 = vsub.f32 %v15838_v39, %v15840_v19  ;;  %v15839_v18 = vmul.f32 0.03125, %v15837_v33 }
0x2b03   :  { %v15846_v7 = vadd.f32 1e-05, %v15842_v21  ;;  %v15843_v61 = vsub.f32 %v15839_v18, %v15841_v16 }
0x2b05   :  { %22017 = vrsqrt.f32 %v15846_v7  ;;  %v15847_v40 = vadd.f32 1e-05, %v15843_v61 }
0x2b07   :  { %22019 = vrsqrt.f32 %v15847_v40 }
0x2b12   :  { %v22018_v44 = vpop.eup %22017 }
0x2b13   :  { %v15850_v3 = vmul.f32 %v22018_v44, %v15844_v20 }
0x2b14   :  { %v22020_v15 = vpop.eup %22019 }
0x2b15   :  { %v15851_v36 = vmul.f32 %v22020_v15, %v15845_v17  ;;  %v15856_v4 = vmul.f32 %v15855_v54, %v15850_v3  ;;  %v16071_v17 = vrot.slane %v25020_v26, %v22855_v41 }
0x2b17   :  { %v15857_v62 = vmul.f32 %v15855_v54, %v15851_v36  ;;  %v15862_v56 = vadd.f32 %v15861_v38, %v15856_v4 }
0x2b19   :  { %v15863_v31 = vadd.f32 %v15861_v38, %v15857_v62  ;;  %21407 = vmatprep.mubr.msk.f32.mxu1 %vm101_vm7, %v15862_v56  ;;  %v16077_v62 = vrot.slane %v25020_v26, %v22860_v45  ;;  %v16106_v26 = vrot.slane %v19714_v46, %v22293_v2 }
0x2b1b   :  { %21408 = vmatmul.mubr.msk.f32.vlgmr.msra.gmra.mxu1 %vm101_vm7, %v15863_v31 }
0x2b1c   :  { %21430 = vmatpush3.msra.mxu1 %v16084_v58 }
0x2b1d   :  { %21431 = vmatprep.subr.mxu1 %v16083_v30 }
0x2b1e   :  { %21432 = vmatpush3.msra.mxu1 %v16083_v30 }
0x2b1f   :  { %21433 = vmatprep.subr.mxu1 %v16082_v29 }
0x2b20   :  { %21434 = vmatpush3.msra.mxu1 %v16082_v29 }
0x2b21   :  { %21435 = vmatprep.subr.mxu1 %v16081_v53 }
0x2b22   :  { %21436 = vmatpush3.msra.mxu1 %v16081_v53 }
0x2b23   :  { %21440 = vmatprep.subr.mxu1 %v22154_v9 }
0x2bdb   :  { %v21409_v59 = vpop.f32.mrf.mxu1 }
0x2bdc   :  { %v15946_v32 = vadd.f32 %v21409_v59, %v15867_v10 }
0x2bdd   :  { %v15940_v13 = vpop.f32.mrf.mxu1 }
0x2bde   :  { %v15941_v50 = vadd.f32 %v15940_v13, %v15867_v10  ;;  %v15950_v12 = vmax.f32 %v15946_v32, 0.0 }
0x2be0   :  { %v15949_v34 = vmax.f32 %v15941_v50, 0.0 }
0x2be2   :  { %21426 = vmatprep.mubr.msk.f32.mxu0 %vm187_vm8, %v15949_v34 }
0x2be3   :  { %21427 = vmatmul.mubr.msk.f32.vlgmr.msra.gmra.mxu0 %vm187_vm8, %v15950_v12 }
0x2be4   :  { %21452 = vmatprep.mubr.msk.f32.mxu0 %vm22156_vm9, %v22154_v9 }
0x2ca3   :  { %v21428_v23 = vpop.f32.mrf.mxu0 }
0x2ca4   :  { %v16033_v6 = vadd.f32 %v21428_v23, %v15954_v51 }
0x2ca5   :  { %v16027_v5 = vpop.f32.mrf.mxu0 }
0x2ca6   :  { %v16037_v27 = vadd.f32 %v16033_v6, %v15863_v31  ;;  %v16028_v48 = vadd.f32 %v16027_v5, %v15954_v51 }
0x2ca8   :  { %v16036_v25 = vadd.f32 %v16028_v48, %v15862_v56  ;;  %v16041_v63 = vsel %vm101_vm7, %v16037_v27, 0.0  ;;  %v16047_v35 = vmul.f32 %v16037_v27, %v16037_v27 }
0x2ca9   :  { %16042 = vadd.xlane.f32.xlu1 %v16041_v63 }
0x2caa   :  { %v16038_v22 = vsel %vm101_vm7, %v16036_v25, 0.0  ;;  %v16046_v11 = vmul.f32 %v16036_v25, %v16036_v25  ;;  %v16051_v55 = vsel %vm101_vm7, %v16047_v35, 0.0 }
0x2cab   :  { %16039 = vadd.xlane.f32.xlu0 %v16038_v22 }
0x2cac   :  { %v16048_v47 = vsel %vm101_vm7, %v16046_v11, 0.0 }
0x2cad   :  { %16052 = vadd.xlane.f32.xlu1 %v16051_v55 }
0x2caf   :  { %16049 = vadd.xlane.f32.xlu0 %v16048_v47 }
0x2d32   :  { %v16043_v8 = vpop.xlane.xlu1 %16042 }
0x2d33   :  { %v16045_v52 = vmul.f32 0.03125, %v16043_v8 }
0x2d34   :  { %v16040_v57 = vpop.xlane.xlu0 %16039 }
0x2d35   :  { %v16044_v24 = vmul.f32 0.03125, %v16040_v57  ;;  %v16057_v39 = vmul.f32 %v16045_v52, %v16045_v52  ;;  %v16061_v54 = vsub.f32 %v16037_v27, %v16045_v52 }
0x2d36   :  { %v16053_v19 = vpop.xlane.xlu1 %16052 }
0x2d37   :  { %v16055_v33 = vmul.f32 0.03125, %v16053_v19  ;;  %v16056_v21 = vmul.f32 %v16044_v24, %v16044_v24  ;;  %v16060_v3 = vsub.f32 %v16036_v25, %v16044_v24 }
0x2d38   :  { %v16050_v16 = vpop.xlane.xlu0 %16049 }
0x2d39   :  { %v16059_v18 = vsub.f32 %v16055_v33, %v16057_v39  ;;  %v16054_v7 = vmul.f32 0.03125, %v16050_v16 }
0x2d3b   :  { %v16063_v61 = vadd.f32 1e-05, %v16059_v18  ;;  %v16058_v40 = vsub.f32 %v16054_v7, %v16056_v21 }
0x2d3d   :  { %22021 = vrsqrt.f32 %v16063_v61  ;;  %v16062_v20 = vadd.f32 1e-05, %v16058_v40 }
0x2d3f   :  { %22023 = vrsqrt.f32 %v16062_v20 }
0x2d4a   :  { %v22022_v44 = vpop.eup %22021 }
0x2d4b   :  { %v16067_v38 = vmul.f32 %v22022_v44, %v16061_v54 }
0x2d4c   :  { %v22024_v15 = vpop.eup %22023 }
0x2d4d   :  { %v16066_v36 = vmul.f32 %v22024_v15, %v16060_v3  ;;  %v16073_v4 = vmul.f32 %v16071_v17, %v16067_v38 }
0x2d4f   :  { %v16072_v56 = vmul.f32 %v16071_v17, %v16066_v36  ;;  %v25056_v14 = vadd.f32 %v16077_v62, %v16073_v4 }
0x2d51   :  { %v25054_v31 = vadd.f32 %v16077_v62, %v16072_v56 }
0x2d53   :  { %21437 = vmatprep.mubr.msk.f32.mxu1 %vm101_vm7, %v25054_v31 }
0x2d54   :  { %21438 = vmatmul.mubr.msk.f32.vlgmr.msra.gmra.mxu1 %vm101_vm7, %v25056_v14 }
0x2d55   :  { %21442 = vmatprep.mubr.msk.f32.mxu1 %vm22156_vm9, %v22154_v9 }
0x2e14   :  { %v21439_v42 = vpop.f32.mrf.mxu1 }
0x2e15   :  { %v25068_v37 = vadd.f32 %v21439_v42, %v16106_v26 }
0x2e16   :  { %v16179_v10 = vpop.f32.mrf.mxu1 }
0x2e17   :  { %v25070_v59 = vadd.f32 %v16179_v10, %v16106_v26  ;;  %16192 = vrot.lane.b32.xlu1 %v25068_v37, %s22151_s14 }
0x2e19   :  { %16190 = vrot.lane.b32.xlu0 %v25070_v59, %s22151_s14 }
0x2e1b   :  { %16194 = vrot.lane.b32.xlu1 %v25070_v59, %s22150_s1 }
0x2e1d   :  { %16196 = vrot.lane.b32.xlu0 %v25068_v37, %s22150_s1 }
0x2e1f   :  { %16198 = vrot.lane.b32.xlu1 %v25070_v59, %s22152_s15 }
0x2e21   :  { %16200 = vrot.lane.b32.xlu0 %v25068_v37, %s22152_s15 }
0x2e23   :  { %16202 = vrot.lane.b32.xlu1 %v25070_v59, %s22153_s16 }
0x2e25   :  { %16204 = vrot.lane.b32.xlu0 %v25068_v37, %s22153_s16 }
0x2e27   :  { %16206 = vrot.lane.b32.xlu1 %v25070_v59, %s22155_s17 }
0x2e29   :  { %16208 = vrot.lane.b32.xlu0 %v25068_v37, %s22155_s17 }
0x2e2b   :  { %16210 = vrot.lane.b32.xlu1 %v25070_v59, %s22157_s18 }
0x2e2d   :  { %16212 = vrot.lane.b32.xlu0 %v25068_v37, %s22157_s18 }
0x2e2f   :  { %16214 = vrot.lane.b32.xlu1 %v25070_v59, %s22158_s20 }
0x2e31   :  { %16216 = vrot.lane.b32.xlu0 %v25068_v37, %s22158_s20 }
0x2e33   :  { %16218 = vrot.lane.b32.xlu1 %v25070_v59, %s22159_s21 }
0x2e35   :  { %16294 = vrot.lane.b32.xlu0 %v25068_v37, %s22159_s21 }
0x2e89   :  { %v25104_v32 = vpop.permute.xlu1 %16192 }
0x2e8a   :  { %16446 = vrot.lane.b32.xlu0 %v25104_v32, %s22159_s21 }
0x2e8b   :  { %v25108_v13 = vpop.permute.xlu0 %16190 }
0x2e8c   :  { %16370 = vrot.lane.b32.xlu1 %v25108_v13, %s22159_s21 }
0x2e8d   :  { %v25112_v50 = vpop.permute.xlu1 %16194 }
0x2e8f   :  { %v25114_v34 = vpop.permute.xlu0 %16196 }
0x2e90   :  { %16522 = vrot.lane.b32.xlu1 %v25112_v50, %s22159_s21  ;;  %16598 = vrot.lane.b32.xlu0 %v25114_v34, %s22159_s21 }
0x2e91   :  { %v25120_v12 = vpop.permute.xlu1 %16198 }
0x2e93   :  { %v25122_v51 = vpop.permute.xlu0 %16200 }
0x2e94   :  { %16674 = vrot.lane.b32.xlu1 %v25120_v12, %s22159_s21  ;;  %16750 = vrot.lane.b32.xlu0 %v25122_v51, %s22159_s21 }
0x2e95   :  { %v25128_v23 = vpop.permute.xlu1 %16202 }
0x2e97   :  { %v25130_v6 = vpop.permute.xlu0 %16204 }
0x2e98   :  { %16826 = vrot.lane.b32.xlu1 %v25128_v23, %s22159_s21  ;;  %16902 = vrot.lane.b32.xlu0 %v25130_v6, %s22159_s21 }
0x2e99   :  { %v25136_v5 = vpop.permute.xlu1 %16206 }
0x2e9b   :  { %v25138_v27 = vpop.permute.xlu0 %16208 }
0x2e9c   :  { %16978 = vrot.lane.b32.xlu1 %v25136_v5, %s22159_s21  ;;  %17054 = vrot.lane.b32.xlu0 %v25138_v27, %s22159_s21 }
0x2e9d   :  { %v25144_v48 = vpop.permute.xlu1 %16210 }
0x2e9f   :  { %v25146_v25 = vpop.permute.xlu0 %16212 }
0x2ea0   :  { %17130 = vrot.lane.b32.xlu1 %v25144_v48, %s22159_s21  ;;  %17206 = vrot.lane.b32.xlu0 %v25146_v25, %s22159_s21 }
0x2ea1   :  { %v25152_v63 = vpop.permute.xlu1 %16214 }
0x2ea3   :  { %v25154_v35 = vpop.permute.xlu0 %16216 }
0x2ea4   :  { %17282 = vrot.lane.b32.xlu1 %v25152_v63, %s22159_s21  ;;  %17358 = vrot.lane.b32.xlu0 %v25154_v35, %s22159_s21 }
0x2ea5   :  { %v16219_v22 = vpop.permute.xlu1 %16218 }
0x2ea6   :  { %21441 = vmatpush3.xpose.msk.msra.mxu1 %vm407_vm10, %v16219_v22 }
0x2ea7   :  { %21445 = vmatprep.subr.mxu1 %v22154_v9  ;;  %v16295_v11 = vpop.permute.xlu0 %16294 }
0x2ea9   :  { %21443 = vmatmul.mubr.msk.f32.vlgmr.msra.gmra.mxu1 %vm407_vm10, %v25070_v59 }
0x2eaa   :  { %21446 = vmatpush3.xpose.msk.msra.mxu1 %vm407_vm10, %v16295_v11  ;;  %21447 = vmatprep.mubr.msk.f32.mxu1 %vm22156_vm9, %v22154_v9 }
0x2eab   :  { %21455 = vmatprep.subr.mxu1 %v22154_v9 }
0x2ead   :  { %21448 = vmatmul.mubr.msk.f32.vlgmr.msra.gmra.mxu1 %vm407_vm10, %v25068_v37 }
0x2eae   :  { %21457 = vmatprep.mubr.msk.f32.mxu1 %vm22156_vm9, %v22154_v9 }
0x2efc   :  { %v16447_v55 = vpop.permute.xlu0 %16446 }
0x2efd   :  { %21456 = vmatpush3.xpose.msk.msra.mxu1 %vm407_vm10, %v16447_v55 }
0x2efe   :  { %v16371_v47 = vpop.permute.xlu1 %16370  ;;  %21465 = vmatprep.subr.mxu1 %v22154_v9 }
0x2eff   :  { %21451 = vmatpush3.xpose.msk.msra.mxu0 %vm407_vm10, %v16371_v47 }
0x2f00   :  { %21458 = vmatmul.mubr.msk.f32.vlgmr.msra.gmra.mxu1 %vm407_vm10, %v25104_v32  ;;  %21460 = vmatprep.subr.mxu0 %v22154_v9 }
0x2f01   :  { %21467 = vmatprep.mubr.msk.f32.mxu1 %vm22156_vm9, %v22154_v9 }
0x2f02   :  { %21453 = vmatmul.mubr.msk.f32.vlgmr.msra.gmra.mxu0 %vm407_vm10, %v25108_v13  ;;  %v16523_v58 = vpop.permute.xlu1 %16522  ;;  %v16599_v30 = vpop.permute.xlu0 %16598 }
0x2f03   :  { %21461 = vmatpush3.xpose.msk.msra.mxu0 %vm407_vm10, %v16523_v58  ;;  %21466 = vmatpush3.xpose.msk.msra.mxu1 %vm407_vm10, %v16599_v30 }
0x2f04   :  { %21462 = vmatprep.mubr.msk.f32.mxu0 %vm22156_vm9, %v22154_v9  ;;  %21470 = vmatprep.subr.mxu0 %v22154_v9 }
0x2f05   :  { %21475 = vmatprep.subr.mxu1 %v22154_v9 }
0x2f06   :  { %21463 = vmatmul.mubr.msk.f32.vlgmr.msra.gmra.mxu0 %vm407_vm10, %v25112_v50  ;;  %v16675_v29 = vpop.permute.xlu1 %16674  ;;  %21468 = vmatmul.mubr.msk.f32.vlgmr.msra.gmra.mxu1 %vm407_vm10, %v25114_v34  ;;  %v16751_v53 = vpop.permute.xlu0 %16750 }
0x2f07   :  { %21471 = vmatpush3.xpose.msk.msra.mxu0 %vm407_vm10, %v16675_v29  ;;  %21476 = vmatpush3.xpose.msk.msra.mxu1 %vm407_vm10, %v16751_v53 }
0x2f08   :  { %21472 = vmatprep.mubr.msk.f32.mxu0 %vm22156_vm9, %v22154_v9  ;;  %21477 = vmatprep.mubr.msk.f32.mxu1 %vm22156_vm9, %v22154_v9 }
0x2f09   :  { %21480 = vmatprep.subr.mxu0 %v22154_v9  ;;  %21485 = vmatprep.subr.mxu1 %v22154_v9 }
0x2f0a   :  { %21473 = vmatmul.mubr.msk.f32.vlgmr.msra.gmra.mxu0 %vm407_vm10, %v25120_v12  ;;  %v16827_v8 = vpop.permute.xlu1 %16826  ;;  %21478 = vmatmul.mubr.msk.f32.vlgmr.msra.gmra.mxu1 %vm407_vm10, %v25122_v51  ;;  %v16903_v52 = vpop.permute.xlu0 %16902 }
0x2f0b   :  { %21481 = vmatpush3.xpose.msk.msra.mxu0 %vm407_vm10, %v16827_v8  ;;  %21486 = vmatpush3.xpose.msk.msra.mxu1 %vm407_vm10, %v16903_v52 }
0x2f0c   :  { %21482 = vmatprep.mubr.msk.f32.mxu0 %vm22156_vm9, %v22154_v9  ;;  %21487 = vmatprep.mubr.msk.f32.mxu1 %vm22156_vm9, %v22154_v9 }
0x2f0d   :  { %21490 = vmatprep.subr.mxu0 %v22154_v9  ;;  %21495 = vmatprep.subr.mxu1 %v22154_v9 }
0x2f0e   :  { %21483 = vmatmul.mubr.msk.f32.vlgmr.msra.gmra.mxu0 %vm407_vm10, %v25128_v23  ;;  %v16979_v57 = vpop.permute.xlu1 %16978  ;;  %21488 = vmatmul.mubr.msk.f32.vlgmr.msra.gmra.mxu1 %vm407_vm10, %v25130_v6  ;;  %v17055_v24 = vpop.permute.xlu0 %17054 }
0x2f0f   :  { %21491 = vmatpush3.xpose.msk.msra.mxu0 %vm407_vm10, %v16979_v57  ;;  %21496 = vmatpush3.xpose.msk.msra.mxu1 %vm407_vm10, %v17055_v24 }
0x2f10   :  { %21492 = vmatprep.mubr.msk.f32.mxu0 %vm22156_vm9, %v22154_v9  ;;  %21497 = vmatprep.mubr.msk.f32.mxu1 %vm22156_vm9, %v22154_v9 }
0x2f11   :  { %21500 = vmatprep.subr.mxu0 %v22154_v9  ;;  %21505 = vmatprep.subr.mxu1 %v22154_v9 }
0x2f12   :  { %21493 = vmatmul.mubr.msk.f32.vlgmr.msra.gmra.mxu0 %vm407_vm10, %v25136_v5  ;;  %v17131_v19 = vpop.permute.xlu1 %17130  ;;  %21498 = vmatmul.mubr.msk.f32.vlgmr.msra.gmra.mxu1 %vm407_vm10, %v25138_v27  ;;  %v17207_v39 = vpop.permute.xlu0 %17206 }
0x2f13   :  { %21501 = vmatpush3.xpose.msk.msra.mxu0 %vm407_vm10, %v17131_v19  ;;  %21506 = vmatpush3.xpose.msk.msra.mxu1 %vm407_vm10, %v17207_v39 }
0x2f14   :  { %21502 = vmatprep.mubr.msk.f32.mxu0 %vm22156_vm9, %v22154_v9  ;;  %21507 = vmatprep.mubr.msk.f32.mxu1 %vm22156_vm9, %v22154_v9 }
0x2f15   :  { %21510 = vmatprep.subr.mxu0 %v22154_v9  ;;  %21515 = vmatprep.subr.mxu1 %v22154_v9 }
0x2f16   :  { %21503 = vmatmul.mubr.msk.f32.vlgmr.msra.gmra.mxu0 %vm407_vm10, %v25144_v48  ;;  %v17283_v33 = vpop.permute.xlu1 %17282  ;;  %21508 = vmatmul.mubr.msk.f32.vlgmr.msra.gmra.mxu1 %vm407_vm10, %v25146_v25  ;;  %v17359_v16 = vpop.permute.xlu0 %17358 }
0x2f17   :  { %21511 = vmatpush3.xpose.msk.msra.mxu0 %vm407_vm10, %v17283_v33  ;;  %21516 = vmatpush3.xpose.msk.msra.mxu1 %vm407_vm10, %v17359_v16 }
0x2f18   :  { %21512 = vmatprep.mubr.msk.f32.mxu0 %vm22156_vm9, %v22154_v9  ;;  %21517 = vmatprep.mubr.msk.f32.mxu1 %vm22156_vm9, %v22154_v9 }
0x2f19   :  { %21520 = vmatprep.subr.mxu0 %v22154_v9  ;;  %21525 = vmatprep.subr.mxu1 %v22154_v9 }
0x2f1a   :  { %21513 = vmatmul.mubr.msk.f32.vlgmr.msra.gmra.mxu0 %vm407_vm10, %v25152_v63  ;;  %21518 = vmatmul.mubr.msk.f32.vlgmr.msra.gmra.mxu1 %vm407_vm10, %v25154_v35 }
0x2f1b   :  { %21522 = vmatprep.mubr.msk.f32.mxu0 %vm22156_vm9, %v22154_v9  ;;  %21527 = vmatprep.mubr.msk.f32.mxu1 %vm22156_vm9, %v22154_v9 }
0x2f69   :  { %v25256_v21 = vpop.f32.mrf.mxu1 }
0x2f6a   :  { %v17434_v18 = vsel %vm1622_vm11, %v25256_v21, -inf }
0x2f6b   :  { %v21444_v7 = vpop.f32.mrf.mxu1  ;;  %17435 = vmax.xlane.f32.xlu1 %v17434_v18 }
0x2f6d   :  { %v25260_v61 = vpop.f32.mrf.mxu1 }
0x2f6e   :  { %v17437_v40 = vsel %vm1622_vm11, %v25260_v61, -inf }
0x2f6f   :  { %17438 = vmax.xlane.f32.xlu0 %v17437_v40  ;;  %v21449_v20 = vpop.f32.mrf.mxu1 }
0x2fc0   :  { %v25264_v54 = vpop.f32.mrf.mxu1 }
0x2fc1   :  { %v17443_v44 = vsel %vm1622_vm11, %v25264_v54, -inf }
0x2fc2   :  { %v25268_v17 = vpop.f32.mrf.mxu0  ;;  %17444 = vmax.xlane.f32.xlu1 %v17443_v44  ;;  %v21459_v3 = vpop.f32.mrf.mxu1 }
0x2fc3   :  { %v17440_v38 = vsel %vm1622_vm11, %v25268_v17, -inf }
0x2fc4   :  { %v21454_v15 = vpop.f32.mrf.mxu0  ;;  %17441 = vmax.xlane.f32.xlu0 %v17440_v38 }
0x2fc6   :  { %v25272_v36 = vpop.f32.mrf.mxu0  ;;  %v25274_v4 = vpop.f32.mrf.mxu1 }
0x2fc7   :  { %v17446_v62 = vsel %vm1622_vm11, %v25272_v36, -inf  ;;  %v17449_v56 = vsel %vm1622_vm11, %v25274_v4, -inf }
0x2fc8   :  { %v21464_v46 = vpop.f32.mrf.mxu0  ;;  %17447 = vmax.xlane.f32.xlu0 %v17446_v62  ;;  %17450 = vmax.xlane.f32.xlu1 %v17449_v56  ;;  %v21469_v26 = vpop.f32.mrf.mxu1 }
0x2fca   :  { %v25280_v42 = vpop.f32.mrf.mxu0  ;;  %v25282_v10 = vpop.f32.mrf.mxu1 }
0x2fcb   :  { %v17452_v22 = vsel %vm1622_vm11, %v25280_v42, -inf  ;;  %v17455_v11 = vsel %vm1622_vm11, %v25282_v10, -inf }
0x2fcc   :  { %v21474_v55 = vpop.f32.mrf.mxu0  ;;  %17453 = vmax.xlane.f32.xlu0 %v17452_v22  ;;  %17456 = vmax.xlane.f32.xlu1 %v17455_v11  ;;  %v21479_v47 = vpop.f32.mrf.mxu1 }
0x2fce   :  { %v25288_v58 = vpop.f32.mrf.mxu0  ;;  %v25290_v30 = vpop.f32.mrf.mxu1 }
0x2fcf   :  { %v17458_v29 = vsel %vm1622_vm11, %v25288_v58, -inf  ;;  %v17461_v53 = vsel %vm1622_vm11, %v25290_v30, -inf }
0x2fd0   :  { %v21484_v8 = vpop.f32.mrf.mxu0  ;;  %17459 = vmax.xlane.f32.xlu0 %v17458_v29  ;;  %17462 = vmax.xlane.f32.xlu1 %v17461_v53  ;;  %v21489_v52 = vpop.f32.mrf.mxu1 }
0x2fd2   :  { %v25296_v57 = vpop.f32.mrf.mxu0  ;;  %v25298_v24 = vpop.f32.mrf.mxu1 }
0x2fd3   :  { %v17464_v19 = vsel %vm1622_vm11, %v25296_v57, -inf  ;;  %v17467_v39 = vsel %vm1622_vm11, %v25298_v24, -inf }
0x2fd4   :  { %v21494_v33 = vpop.f32.mrf.mxu0  ;;  %17465 = vmax.xlane.f32.xlu0 %v17464_v19  ;;  %17468 = vmax.xlane.f32.xlu1 %v17467_v39  ;;  %v21499_v16 = vpop.f32.mrf.mxu1 }
0x2fd6   :  { %v25304_v18 = vpop.f32.mrf.mxu0  ;;  %v25306_v7 = vpop.f32.mrf.mxu1 }
0x2fd7   :  { %v17470_v40 = vsel %vm1622_vm11, %v25304_v18, -inf  ;;  %v17473_v20 = vsel %vm1622_vm11, %v25306_v7, -inf }
0x2fd8   :  { %v21504_v44 = vpop.f32.mrf.mxu0  ;;  %17471 = vmax.xlane.f32.xlu0 %v17470_v40  ;;  %17474 = vmax.xlane.f32.xlu1 %v17473_v20  ;;  %v21509_v3 = vpop.f32.mrf.mxu1 }
0x2fda   :  { %v25312_v38 = vpop.f32.mrf.mxu0  ;;  %v25314_v15 = vpop.f32.mrf.mxu1 }
0x2fdb   :  { %v17476_v62 = vsel %vm1622_vm11, %v25312_v38, -inf  ;;  %v17479_v56 = vsel %vm1622_vm11, %v25314_v15, -inf }
0x2fdc   :  { %v21514_v46 = vpop.f32.mrf.mxu0  ;;  %17477 = vmax.xlane.f32.xlu0 %v17476_v62  ;;  %17480 = vmax.xlane.f32.xlu1 %v17479_v56  ;;  %v21519_v26 = vpop.f32.mrf.mxu1 }
0x2fed   :  { %17686 = vrot.lane.b32.xlu1 %v25068_v37, %s22160_s0 }
0x2ff1   :  { %17762 = vrot.lane.b32.xlu1 %v25108_v13, %s22160_s0 }
0x2ff2   :  { %17610 = vrot.lane.b32.xlu0 %v25070_v59, %s22160_s0 }
0x2ff4   :  { %v17436_v22 = vpop.xlane.xlu1 %17435 }
0x2ff5   :  { %17838 = vrot.lane.b32.xlu1 %v25104_v32, %s22160_s0  ;;  %v17482_v11 = vsub.f32 %v25256_v21, %v17436_v22 }
0x2ff7   :  { %v17498_v55 = vmul.f32 1.442695, %v17482_v11 }
0x2ff8   :  { %v17439_v32 = vpop.xlane.xlu0 %17438 }
0x2ff9   :  { %17914 = vrot.lane.b32.xlu1 %v25112_v50, %s22160_s0  ;;  %22025 = vpow2.f32 %v17498_v55  ;;  %v17483_v13 = vsub.f32 %v25260_v61, %v17439_v32 }
0x2ffb   :  { %v17500_v50 = vmul.f32 1.442695, %v17483_v13 }
0x2ffd   :  { %17990 = vrot.lane.b32.xlu1 %v25114_v34, %s22160_s0  ;;  %22027 = vpow2.f32 %v17500_v50 }
0x3001   :  { %18066 = vrot.lane.b32.xlu1 %v25120_v12, %s22160_s0 }
0x3005   :  { %18142 = vrot.lane.b32.xlu1 %v25122_v51, %s22160_s0 }
0x3006   :  { %v25339_v37 = vpop.eup %22025 }
0x3007   :  { %v17530_v59 = vsel %vm1622_vm11, %v25339_v37, 0.0 }
0x3009   :  { %18218 = vrot.lane.b32.xlu1 %v25128_v23, %s22160_s0 }
0x300a   :  { %v25346_v34 = vpop.eup %22027 }
0x300b   :  { %v17533_v12 = vsel %vm1622_vm11, %v25346_v34, 0.0 }
0x300d   :  { %18294 = vrot.lane.b32.xlu1 %v25130_v6, %s22160_s0 }
0x3011   :  { %17531 = vadd.xlane.f32.xlu0 %v17530_v59 }
0x3031   :  { %17534 = vadd.xlane.f32.xlu1 %v17533_v12 }
0x304b   :  { %v17445_v51 = vpop.xlane.xlu1 %17444 }
0x304c   :  { %v17485_v23 = vsub.f32 %v25264_v54, %v17445_v51 }
0x304d   :  { %v17442_v21 = vpop.xlane.xlu0 %17441 }
0x304e   :  { %v17504_v6 = vmul.f32 1.442695, %v17485_v23  ;;  %v17484_v47 = vsub.f32 %v25268_v17, %v17442_v21 }
0x3050   :  { %22029 = vpow2.f32 %v17504_v6  ;;  %v17502_v29 = vmul.f32 1.442695, %v17484_v47 }
0x3051   :  { %v17451_v53 = vpop.xlane.xlu1 %17450  ;;  %v17448_v8 = vpop.xlane.xlu0 %17447 }
0x3052   :  { %22031 = vpow2.f32 %v17502_v29  ;;  %v17487_v61 = vsub.f32 %v25274_v4, %v17451_v53  ;;  %v17486_v52 = vsub.f32 %v25272_v36, %v17448_v8 }
0x3054   :  { %v17508_v19 = vmul.f32 1.442695, %v17487_v61  ;;  %v17506_v39 = vmul.f32 1.442695, %v17486_v52 }
0x3055   :  { %v17457_v33 = vpop.xlane.xlu1 %17456  ;;  %v17454_v16 = vpop.xlane.xlu0 %17453 }
0x3056   :  { %22033 = vpow2.f32 %v17508_v19  ;;  %v17489_v54 = vsub.f32 %v25282_v10, %v17457_v33  ;;  %v17488_v40 = vsub.f32 %v25280_v42, %v17454_v16 }
0x3057   :  { %22035 = vpow2.f32 %v17506_v39 }
0x3058   :  { %v17512_v17 = vmul.f32 1.442695, %v17489_v54  ;;  %v17510_v20 = vmul.f32 1.442695, %v17488_v40 }
0x3059   :  { %v17463_v44 = vpop.xlane.xlu1 %17462  ;;  %v17460_v3 = vpop.xlane.xlu0 %17459 }
0x305a   :  { %22037 = vpow2.f32 %v17512_v17  ;;  %v17491_v62 = vsub.f32 %v25290_v30, %v17463_v44  ;;  %v17490_v4 = vsub.f32 %v25288_v58, %v17460_v3 }
0x305b   :  { %22039 = vpow2.f32 %v17510_v20 }
0x305c   :  { %v17516_v36 = vmul.f32 1.442695, %v17491_v62  ;;  %v17514_v56 = vmul.f32 1.442695, %v17490_v4 }
0x305d   :  { %v25358_v46 = vpop.eup %22029  ;;  %v17469_v26 = vpop.xlane.xlu1 %17468 }
0x305e   :  { %v17466_v22 = vpop.xlane.xlu0 %17465  ;;  %22041 = vpow2.f32 %v17516_v36  ;;  %v17493_v42 = vsub.f32 %v25298_v24, %v17469_v26  ;;  %v17539_v11 = vsel %vm1622_vm11, %v25358_v46, 0.0 }
0x305f   :  { %v17492_v10 = vsub.f32 %v25296_v57, %v17466_v22  ;;  %v25364_v55 = vpop.eup %22031  ;;  %22043 = vpow2.f32 %v17514_v56  ;;  %17540 = vadd.xlane.f32.xlu1 %v17539_v11 }
0x3060   :  { %v17520_v58 = vmul.f32 1.442695, %v17493_v42  ;;  %v17536_v59 = vsel %vm1622_vm11, %v25364_v55, 0.0 }
0x3061   :  { %v17518_v30 = vmul.f32 1.442695, %v17492_v10  ;;  %v17475_v32 = vpop.xlane.xlu1 %17474  ;;  %17537 = vadd.xlane.f32.xlu0 %v17536_v59 }
0x3062   :  { %v17472_v13 = vpop.xlane.xlu0 %17471  ;;  %22045 = vpow2.f32 %v17520_v58  ;;  %v17495_v24 = vsub.f32 %v25306_v7, %v17475_v32 }
0x3063   :  { %v17494_v57 = vsub.f32 %v25304_v18, %v17472_v13  ;;  %v25370_v50 = vpop.eup %22033  ;;  %22047 = vpow2.f32 %v17518_v30 }
0x3064   :  { %v25372_v12 = vpop.eup %22035  ;;  %v17524_v51 = vmul.f32 1.442695, %v17495_v24  ;;  %v17545_v21 = vsel %vm1622_vm11, %v25370_v50, 0.0 }
0x3065   :  { %v17522_v23 = vmul.f32 1.442695, %v17494_v57  ;;  %v17481_v6 = vpop.xlane.xlu1 %17480  ;;  %17546 = vadd.xlane.f32.xlu1 %v17545_v21  ;;  %v17542_v47 = vsel %vm1622_vm11, %v25372_v12, 0.0 }
0x3066   :  { %v17478_v29 = vpop.xlane.xlu0 %17477  ;;  %22049 = vpow2.f32 %v17524_v51  ;;  %v17497_v7 = vsub.f32 %v25314_v15, %v17481_v6  ;;  %17543 = vadd.xlane.f32.xlu0 %v17542_v47 }
0x3067   :  { %v25379_v18 = vpop.eup %22037  ;;  %22051 = vpow2.f32 %v17522_v23  ;;  %v17496_v58 = vsub.f32 %v25312_v38, %v17478_v29 }
0x3068   :  { %v25381_v53 = vpop.eup %22039  ;;  %v17528_v8 = vmul.f32 1.442695, %v17497_v7  ;;  %v17551_v61 = vsel %vm1622_vm11, %v25379_v18, 0.0 }
0x3069   :  { %v17687_v52 = vpop.permute.xlu1 %17686  ;;  %17552 = vadd.xlane.f32.xlu1 %v17551_v61  ;;  %v17548_v19 = vsel %vm1622_vm11, %v25381_v53, 0.0  ;;  %v17526_v30 = vmul.f32 1.442695, %v17496_v58 }
0x306a   :  { %v17611_v39 = vpop.permute.xlu0 %17610  ;;  %22053 = vpow2.f32 %v17528_v8  ;;  %17549 = vadd.xlane.f32.xlu0 %v17548_v19  ;;  %21526 = vmatpush3.msra.mxu1 %v17687_v52 }
0x306b   :  { %21521 = vmatpush3.msra.mxu0 %v17611_v39  ;;  %v25387_v15 = vpop.eup %22041  ;;  %21535 = vmatprep.subr.mxu1 %v22154_v9 }
0x306c   :  { %21530 = vmatprep.subr.mxu0 %v22154_v9  ;;  %v25390_v33 = vpop.eup %22043  ;;  %v17557_v16 = vsel %vm1622_vm11, %v25387_v15, 0.0 }
0x306d   :  { %17558 = vadd.xlane.f32.xlu1 %v17557_v16  ;;  %v17554_v54 = vsel %vm1622_vm11, %v25390_v33, 0.0  ;;  %v17763_v22 = vpop.permute.xlu1 %17762 }
0x306e   :  { %17555 = vadd.xlane.f32.xlu0 %v17554_v54 }
0x306f   :  { %v25397_v40 = vpop.eup %22045 }
0x3070   :  { %v25399_v17 = vpop.eup %22047  ;;  %v17563_v20 = vsel %vm1622_vm11, %v25397_v40, 0.0 }
0x3071   :  { %17564 = vadd.xlane.f32.xlu1 %v17563_v20  ;;  %v17560_v44 = vsel %vm1622_vm11, %v25399_v17, 0.0  ;;  %v17839_v42 = vpop.permute.xlu1 %17838 }
0x3072   :  { %17561 = vadd.xlane.f32.xlu0 %v17560_v44 }
0x3073   :  { %v25405_v3 = vpop.eup %22049 }
0x3074   :  { %v25407_v62 = vpop.eup %22051  ;;  %v17569_v4 = vsel %vm1622_vm11, %v25405_v3, 0.0 }
0x3075   :  { %17570 = vadd.xlane.f32.xlu1 %v17569_v4  ;;  %v17566_v36 = vsel %vm1622_vm11, %v25407_v62, 0.0  ;;  %v17915_v10 = vpop.permute.xlu1 %17914 }
0x3076   :  { %17567 = vadd.xlane.f32.xlu0 %v17566_v36 }
0x3077   :  { %v25413_v56 = vpop.eup %22053 }
0x3078   :  { %v17575_v26 = vsel %vm1622_vm11, %v25413_v56, 0.0 }
0x307a   :  { %17576 = vadd.xlane.f32.xlu0 %v17575_v26 }
0x3086   :  { %18446 = vrot.lane.b32.xlu1 %v25138_v27, %s22160_s0  ;;  %v17991_v27 = vpop.permute.xlu1 %17990 }
0x308a   :  { %18522 = vrot.lane.b32.xlu1 %v25144_v48, %s22160_s0  ;;  %v25428_v59 = vpop.permute.xlu1 %18066 }
0x308e   :  { %18598 = vrot.lane.b32.xlu1 %v25146_v25, %s22160_s0  ;;  %v18143_v32 = vpop.permute.xlu1 %18142 }
0x3090   :  { %18370 = vrot.lane.b32.xlu0 %v25136_v5, %s22160_s0 }
0x3092   :  { %18674 = vrot.lane.b32.xlu1 %v25152_v63, %s22160_s0  ;;  %v25435_v5 = vpop.permute.xlu1 %18218 }
0x3096   :  { %v25441_v13 = vpop.permute.xlu1 %18294 }
0x309a   :  { %v17532_v11 = vpop.xlane.xlu0 %17531 }
0x309b   :  { %22055 = vrcp.f32 %v17532_v11 }
0x309c   :  { %22057 = vpow2.f32 %v17526_v30 }
0x30a8   :  { %v22056_v48 = vpop.eup %22055 }
0x30a9   :  { %v17594_v25 = vmul.f32 %v22056_v48, %v25339_v37  ;;  %v25437_v63 = vpop.eup %22057 }
0x30aa   :  { %v17572_v38 = vsel %vm1622_vm11, %v25437_v63, 0.0 }
0x30ab   :  { %21523 = vmatmul.mubr.msk.f32.vlgmr.msra.gmra.mxu0 %vm1622_vm11, %v17594_v25 }
0x30ac   :  { %21531 = vmatpush3.msra.mxu0 %v17763_v22  ;;  %21532 = vmatprep.mubr.msk.f32.mxu0 %vm22156_vm9, %v22154_v9 }
0x30ad   :  { %21540 = vmatprep.subr.mxu0 %v22154_v9 }
0x30b6   :  { %17573 = vadd.xlane.f32.xlu1 %v17572_v38 }
0x30ba   :  { %v17535_v37 = vpop.xlane.xlu1 %17534 }
0x30bb   :  { %22059 = vrcp.f32 %v17535_v37 }
0x30c7   :  { %18750 = vrot.lane.b32.xlu1 %v25154_v35, %s22160_s0 }
0x30c8   :  { %v22060_v24 = vpop.eup %22059 }
0x30c9   :  { %v17595_v57 = vmul.f32 %v22060_v24, %v25346_v34 }
0x30cb   :  { %21528 = vmatmul.mubr.msk.f32.vlgmr.msra.gmra.mxu1 %vm1622_vm11, %v17595_v57 }
0x30cc   :  { %21536 = vmatpush3.msra.mxu1 %v17839_v42  ;;  %21537 = vmatprep.mubr.msk.f32.mxu1 %vm22156_vm9, %v22154_v9 }
0x30cd   :  { %21545 = vmatprep.subr.mxu1 %v22154_v9 }
0x30e8   :  { %v17541_v51 = vpop.xlane.xlu1 %17540 }
0x30e9   :  { %22061 = vrcp.f32 %v17541_v51 }
0x30ea   :  { %v17538_v23 = vpop.xlane.xlu0 %17537 }
0x30eb   :  { %22063 = vrcp.f32 %v17538_v23 }
0x30ee   :  { %v17547_v21 = vpop.xlane.xlu1 %17546 }
0x30ef   :  { %22065 = vrcp.f32 %v17547_v21  ;;  %v17544_v6 = vpop.xlane.xlu0 %17543 }
0x30f0   :  { %22067 = vrcp.f32 %v17544_v6 }
0x30f2   :  { %v17553_v35 = vpop.xlane.xlu1 %17552 }
0x30f3   :  { %22069 = vrcp.f32 %v17553_v35  ;;  %v17550_v47 = vpop.xlane.xlu0 %17549 }
0x30f4   :  { %22071 = vrcp.f32 %v17550_v47 }
0x30f6   :  { %v22062_v34 = vpop.eup %22061  ;;  %v17559_v29 = vpop.xlane.xlu1 %17558 }
0x30f7   :  { %v17597_v7 = vmul.f32 %v22062_v34, %v25358_v46  ;;  %22073 = vrcp.f32 %v17559_v29  ;;  %v17556_v8 = vpop.xlane.xlu0 %17555 }
0x30f8   :  { %v22064_v61 = vpop.eup %22063  ;;  %22075 = vrcp.f32 %v17556_v8 }
0x30f9   :  { %v17596_v52 = vmul.f32 %v22064_v61, %v25364_v55  ;;  %21538 = vmatmul.mubr.msk.f32.vlgmr.msra.gmra.mxu1 %vm1622_vm11, %v17597_v7 }
0x30fa   :  { %21546 = vmatpush3.msra.mxu1 %v17991_v27  ;;  %v17565_v19 = vpop.xlane.xlu1 %17564  ;;  %21547 = vmatprep.mubr.msk.f32.mxu1 %vm22156_vm9, %v22154_v9 }
0x30fb   :  { %22077 = vrcp.f32 %v17565_v19  ;;  %v17562_v39 = vpop.xlane.xlu0 %17561  ;;  %21533 = vmatmul.mubr.msk.f32.vlgmr.msra.gmra.mxu0 %vm1622_vm11, %v17596_v52  ;;  %21555 = vmatprep.subr.mxu1 %v22154_v9 }
0x30fc   :  { %v22066_v46 = vpop.eup %22065  ;;  %22079 = vrcp.f32 %v17562_v39  ;;  %21541 = vmatpush3.msra.mxu0 %v17915_v10  ;;  %21542 = vmatprep.mubr.msk.f32.mxu0 %vm22156_vm9, %v22154_v9 }
0x30fd   :  { %v22068_v55 = vpop.eup %22067  ;;  %v17599_v16 = vmul.f32 %v22066_v46, %v25370_v50  ;;  %21550 = vmatprep.subr.mxu0 %v22154_v9 }
0x30fe   :  { %v17598_v54 = vmul.f32 %v22068_v55, %v25372_v12  ;;  %v17571_v20 = vpop.xlane.xlu1 %17570 }
0x30ff   :  { %22081 = vrcp.f32 %v17571_v20  ;;  %v17568_v44 = vpop.xlane.xlu0 %17567  ;;  %21548 = vmatmul.mubr.msk.f32.vlgmr.msra.gmra.mxu1 %vm1622_vm11, %v17599_v16 }
0x3100   :  { %v22070_v4 = vpop.eup %22069  ;;  %22083 = vrcp.f32 %v17568_v44  ;;  %21543 = vmatmul.mubr.msk.f32.vlgmr.msra.gmra.mxu0 %vm1622_vm11, %v17598_v54  ;;  %21556 = vmatpush3.msra.mxu1 %v18143_v32 }
0x3101   :  { %v22072_v36 = vpop.eup %22071  ;;  %v17601_v26 = vmul.f32 %v22070_v4, %v25379_v18  ;;  %21551 = vmatpush3.msra.mxu0 %v25428_v59  ;;  %21557 = vmatprep.mubr.msk.f32.mxu1 %vm22156_vm9, %v22154_v9 }
0x3102   :  { %v17600_v50 = vmul.f32 %v22072_v36, %v25381_v53  ;;  %21565 = vmatprep.subr.mxu1 %v22154_v9  ;;  %v18447_v12 = vpop.permute.xlu1 %18446  ;;  %21552 = vmatprep.mubr.msk.f32.mxu0 %vm22156_vm9, %v22154_v9 }
0x3103   :  { %21560 = vmatprep.subr.mxu0 %v22154_v9  ;;  %v17577_v22 = vpop.xlane.xlu0 %17576  ;;  %21558 = vmatmul.mubr.msk.f32.vlgmr.msra.gmra.mxu1 %vm1622_vm11, %v17601_v26 }
0x3104   :  { %v22074_v42 = vpop.eup %22073  ;;  %21553 = vmatmul.mubr.msk.f32.vlgmr.msra.gmra.mxu0 %vm1622_vm11, %v17600_v50  ;;  %21566 = vmatpush3.msra.mxu1 %v25441_v13  ;;  %22085 = vrcp.f32 %v17577_v22  ;;  %v16088_v50 = vld [vmem:[#allocation2 + $0x358] sm:$0xff]  ;;  %v16086_v22 = vld [vmem:[#allocation2 + $0x348] sm:$0xff] }
0x3105   :  { %v22076_v18 = vpop.eup %22075  ;;  %v17603_v10 = vmul.f32 %v22074_v42, %v25387_v15  ;;  %21561 = vmatpush3.msra.mxu0 %v25435_v5  ;;  %21567 = vmatprep.mubr.msk.f32.mxu1 %vm22156_vm9, %v22154_v9  ;;  %v16085_v42 = vld [vmem:[#allocation2 + $0x340] sm:$0xff] }
0x3106   :  { %v17602_v53 = vmul.f32 %v22076_v18, %v25390_v33  ;;  %21575 = vmatprep.subr.mxu1 %v22154_v9  ;;  %v18523_v11 = vpop.permute.xlu1 %18522  ;;  %21562 = vmatprep.mubr.msk.f32.mxu0 %vm22156_vm9, %v22154_v9 }
0x3107   :  { %21570 = vmatprep.subr.mxu0 %v22154_v9  ;;  %v18371_v58 = vpop.permute.xlu0 %18370  ;;  %21568 = vmatmul.mubr.msk.f32.vlgmr.msra.gmra.mxu1 %vm1622_vm11, %v17603_v10 }
0x3108   :  { %v22078_v27 = vpop.eup %22077  ;;  %21563 = vmatmul.mubr.msk.f32.vlgmr.msra.gmra.mxu0 %vm1622_vm11, %v17602_v53  ;;  %21576 = vmatpush3.msra.mxu1 %v18447_v12  ;;  %v16087_v12 = vld [vmem:[#allocation2 + $0x350] sm:$0xff] }
0x3109   :  { %v22080_v15 = vpop.eup %22079  ;;  %v17605_v30 = vmul.f32 %v22078_v27, %v25397_v40  ;;  %21571 = vmatpush3.msra.mxu0 %v18371_v58  ;;  %21577 = vmatprep.mubr.msk.f32.mxu1 %vm22156_vm9, %v22154_v9 }
0x310a   :  { %v17604_v33 = vmul.f32 %v22080_v15, %v25399_v17  ;;  %21585 = vmatprep.subr.mxu1 %v22154_v9  ;;  %v18599_v59 = vpop.permute.xlu1 %18598  ;;  %21572 = vmatprep.mubr.msk.f32.mxu0 %vm22156_vm9, %v22154_v9 }
0x310b   :  { %21580 = vmatprep.subr.mxu0 %v22154_v9  ;;  %21578 = vmatmul.mubr.msk.f32.vlgmr.msra.gmra.mxu1 %vm1622_vm11, %v17605_v30 }
0x310c   :  { %v22082_v48 = vpop.eup %22081  ;;  %21573 = vmatmul.mubr.msk.f32.vlgmr.msra.gmra.mxu0 %vm1622_vm11, %v17604_v33  ;;  %21586 = vmatpush3.msra.mxu1 %v18599_v59 }
0x310d   :  { %v22084_v40 = vpop.eup %22083  ;;  %v17607_v25 = vmul.f32 %v22082_v48, %v25405_v3  ;;  %21581 = vmatpush3.msra.mxu0 %v18523_v11  ;;  %21587 = vmatprep.mubr.msk.f32.mxu1 %vm22156_vm9, %v22154_v9 }
0x310e   :  { %v17606_v17 = vmul.f32 %v22084_v40, %v25407_v62  ;;  %v18675_v32 = vpop.permute.xlu1 %18674  ;;  %21582 = vmatprep.mubr.msk.f32.mxu0 %vm22156_vm9, %v22154_v9  ;;  %21590 = vmatprep.subr.mxu0 %v22154_v9 }
0x310f   :  { %21588 = vmatmul.mubr.msk.f32.vlgmr.msra.gmra.mxu1 %vm1622_vm11, %v17607_v25  ;;  %21595 = vmatprep.subr.mxu1 %v22154_v9 }
0x3110   :  { %21583 = vmatmul.mubr.msk.f32.vlgmr.msra.gmra.mxu0 %vm1622_vm11, %v17606_v17  ;;  %21597 = vmatprep.mubr.msk.f32.mxu1 %vm22156_vm9, %v22154_v9 }
0x3111   :  { %21591 = vmatpush3.msra.mxu0 %v18675_v32  ;;  %21592 = vmatprep.mubr.msk.f32.mxu0 %vm22156_vm9, %v22154_v9  ;;  %v22086_v62 = vpop.eup %22085 }
0x3112   :  { %v17609_v5 = vmul.f32 %v22086_v62, %v25413_v56  ;;  %21600 = vmatprep.subr.mxu0 %v16088_v50 }
0x313f   :  { %v17574_v3 = vpop.xlane.xlu1 %17573 }
0x3140   :  { %22087 = vrcp.f32 %v17574_v3 }
0x3143   :  { %v18751_v38 = vpop.permute.xlu1 %18750 }
0x3144   :  { %21596 = vmatpush3.msra.mxu1 %v18751_v38 }
0x3145   :  { %21598 = vmatmul.mubr.msk.f32.vlgmr.msra.gmra.mxu1 %vm1622_vm11, %v17609_v5 }
0x314d   :  { %v22088_v13 = vpop.eup %22087 }
0x314e   :  { %v17608_v37 = vmul.f32 %v22088_v13, %v25437_v63 }
0x3150   :  { %21593 = vmatmul.mubr.msk.f32.vlgmr.msra.gmra.mxu0 %vm1622_vm11, %v17608_v37 }
0x3151   :  { %21601 = vmatpush3.msra.mxu0 %v16088_v50  ;;  %v16098_v50 = vld [vmem:[#allocation2 + $0x3a8] sm:$0xff] }
0x3152   :  { %21602 = vmatprep.subr.mxu0 %v16087_v12 }
0x3153   :  { %21603 = vmatpush3.msra.mxu0 %v16087_v12  ;;  %v16097_v12 = vld [vmem:[#allocation2 + $0x3a0] sm:$0xff] }
0x3154   :  { %21604 = vmatprep.subr.mxu0 %v16086_v22 }
0x3155   :  { %21605 = vmatpush3.msra.mxu0 %v16086_v22 }
0x3156   :  { %21606 = vmatprep.subr.mxu0 %v16085_v42 }
0x3157   :  { %21607 = vmatpush3.msra.mxu0 %v16085_v42 }
0x316b   :  { %v25515_v24 = vpop.f32.mrf.mxu0 }
0x316d   :  { %v21524_v57 = vpop.f32.mrf.mxu0 }
0x318b   :  { %v25517_v51 = vpop.f32.mrf.mxu1 }
0x318d   :  { %v21529_v9 = vpop.f32.mrf.mxu1 }
0x31b9   :  { %v17910_v23 = vpop.f32.mrf.mxu1 }
0x31ba   :  { %18830 = vrot.lane.b32.xlu1 %v17910_v23, %s22161_s22 }
0x31bb   :  { %v17834_v21 = vpop.f32.mrf.mxu0  ;;  %v21539_v56 = vpop.f32.mrf.mxu1 }
0x31bc   :  { %18828 = vrot.lane.b32.xlu0 %v17834_v21, %s22161_s22 }
0x31bd   :  { %v21534_v6 = vpop.f32.mrf.mxu0 }
0x31bf   :  { %v18062_v35 = vpop.f32.mrf.mxu1 }
0x31c0   :  { %v17986_v47 = vpop.f32.mrf.mxu0  ;;  %18838 = vrot.lane.b32.xlu1 %v18062_v35, %s22149_s19 }
0x31c1   :  { %18836 = vrot.lane.b32.xlu0 %v17986_v47, %s22149_s19  ;;  %v21549_v63 = vpop.f32.mrf.mxu1 }
0x31c2   :  { %v21544_v34 = vpop.f32.mrf.mxu0 }
0x31c3   :  { %v18214_v29 = vpop.f32.mrf.mxu1  ;;  %v25554_v34 = vld [vmem:[%s25615_s3 + $0x28] sm:$0xff]  ;;  %s22168_s3 = smov [#allocation5]  }
0x31c4   :  { %v18138_v7 = vpop.f32.mrf.mxu0  ;;  %18846 = vrot.lane.b32.xlu1 %v18214_v29, %s22162_s23  ;;  %v18899_v29 = vrot.slane %v25554_v34, %v22801_v28  ;;  %s19412_s14 = sshll.u32 %s22168_s3, 4  ;;  %s19413_s14 = int_to_ptr.vmem [resolvable:$true] %s19412_s14 }
0x31c5   :  { %18844 = vrot.lane.b32.xlu0 %v18138_v7, %s22162_s23  ;;  %v21559_v8 = vpop.f32.mrf.mxu1  ;;  %s22123_s15 = scalar_lea.vmem %s19413_s14, 256  ;;  %p22128_p6 = scmp.lt.s32.totalorder %s19413_s14, %s19413_s14 }
0x31c6   :  { %v21554_v61 = vpop.f32.mrf.mxu0  ;;  %p22124_p5 = scmp.ne.s32.totalorder %s19413_s14, %s22123_s15  ;;  %p22129_p7 = scmp.lt.s32.totalorder %s22123_s15, %s22123_s15 }
0x31c7   :  { %v18366_v52 = vpop.f32.mrf.mxu1 }
0x31c8   :  { %v18290_v19 = vpop.f32.mrf.mxu0  ;;  %18854 = vrot.lane.b32.xlu1 %v18366_v52, %s22163_s24  ;;  %p22130_p8 = por %p22129_p7, %p22128_p6 }
0x31c9   :  { %18852 = vrot.lane.b32.xlu0 %v18290_v19, %s22163_s24  ;;  %v21569_v39 = vpop.f32.mrf.mxu1 }
0x31ca   :  { %v21564_v46 = vpop.f32.mrf.mxu0  ;;  %p22131_p9 = pnand %p22130_p8, %p22124_p5 }
0x31cb   :  { %v18518_v55 = vpop.f32.mrf.mxu1 }
0x31cc   :  { %v18442_v16 = vpop.f32.mrf.mxu0  ;;  %18862 = vrot.lane.b32.xlu1 %v18518_v55, %s22164_s25 }
0x31cd   :  { %18860 = vrot.lane.b32.xlu0 %v18442_v16, %s22164_s25  ;;  %v21579_v54 = vpop.f32.mrf.mxu1 }
0x31ce   :  { %v21574_v20 = vpop.f32.mrf.mxu0 }
0x31cf   :  { %v18670_v44 = vpop.f32.mrf.mxu1 }
0x31d0   :  { %v18594_v4 = vpop.f32.mrf.mxu0  ;;  %18870 = vrot.lane.b32.xlu1 %v18670_v44, %s22165_s26  ;;  %v16092_v44 = vld [vmem:[#allocation2 + $0x378] sm:$0xff] }
0x31d1   :  { %18868 = vrot.lane.b32.xlu0 %v18594_v4, %s22165_s26  ;;  %v21589_v36 = vpop.f32.mrf.mxu1  ;;  %v16091_v4 = vld [vmem:[#allocation2 + $0x370] sm:$0xff]  ;;  %21611 = vmatprep.subr.mxu1 %v16092_v44 }
0x31d2   :  { %v21584_v26 = vpop.f32.mrf.mxu0  ;;  %21612 = vmatpush3.msra.mxu1 %v16092_v44  ;;  %v16100_v36 = vld [vmem:[#allocation2 + $0x3b8] sm:$0xff] }
0x31d3   :  { %21613 = vmatprep.subr.mxu1 %v16091_v4  ;;  %v16099_v26 = vld [vmem:[#allocation2 + $0x3b0] sm:$0xff]  ;;  %21622 = vmatprep.subr.mxu0 %v16100_v36 }
0x31d4   :  { %21614 = vmatpush3.msra.mxu1 %v16091_v4 }
0x3205   :  { %v18822_v18 = vpop.f32.mrf.mxu1 }
0x3206   :  { %18878 = vrot.lane.b32.xlu1 %v18822_v18, %s22166_s27 }
0x3207   :  { %v21599_v10 = vpop.f32.mrf.mxu1 }
0x3210   :  { %v18746_v53 = vpop.f32.mrf.mxu0 }
0x3211   :  { %18876 = vrot.lane.b32.xlu0 %v18746_v53, %s22166_s27 }
0x3212   :  { %v21594_v11 = vpop.f32.mrf.mxu0 }
0x322c   :  { %v18831_v27 = vpop.permute.xlu1 %18830 }
0x322d   :  { %v18883_v62 = vsel %vm407_vm10, %v25517_v51, %v18831_v27 }
0x322e   :  { %v18829_v58 = vpop.permute.xlu0 %18828 }
0x322f   :  { %v18882_v32 = vsel %vm407_vm10, %v25515_v24, %v18829_v58 }
0x3232   :  { %v18839_v15 = vpop.permute.xlu1 %18838 }
0x3233   :  { %v18837_v30 = vpop.permute.xlu0 %18836  ;;  %v18885_v13 = vsel %vm1622_vm11, %v18883_v62, %v18839_v15  ;;  %v19022_v62 = vrot.slane %v25554_v34, %v22825_v43  ;;  %v19028_v43 = vrot.slane %v25554_v34, %v22836_v49 }
0x3234   :  { %v18884_v5 = vsel %vm1622_vm11, %v18882_v32, %v18837_v30 }
0x3236   :  { %v18847_v33 = vpop.permute.xlu1 %18846 }
0x3237   :  { %v18845_v59 = vpop.permute.xlu0 %18844  ;;  %v18887_v57 = vsel %vm3075_vm12, %v18885_v13, %v18847_v33 }
0x3238   :  { %v18886_v37 = vsel %vm3075_vm12, %v18884_v5, %v18845_v59 }
0x323a   :  { %v18855_v48 = vpop.permute.xlu1 %18854 }
0x323b   :  { %v18853_v40 = vpop.permute.xlu0 %18852  ;;  %v18889_v23 = vsel %vm3078_vm13, %v18887_v57, %v18855_v48 }
0x323c   :  { %v18888_v9 = vsel %vm3078_vm13, %v18886_v37, %v18853_v40 }
0x323e   :  { %v18863_v25 = vpop.permute.xlu1 %18862 }
0x323f   :  { %v18861_v17 = vpop.permute.xlu0 %18860  ;;  %v18891_v56 = vsel %vm3081_vm14, %v18889_v23, %v18863_v25 }
0x3240   :  { %v18890_v21 = vsel %vm3081_vm14, %v18888_v9, %v18861_v17  ;;  %v19016_v17 = vrot.slane %v25554_v34, %v22822_v60  ;;  %v16095_v60 = vld [vmem:[#allocation2 + $0x390] sm:$0xff] }
0x3242   :  { %v18871_v3 = vpop.permute.xlu1 %18870 }
0x3243   :  { %v18869_v38 = vpop.permute.xlu0 %18868  ;;  %v18893_v35 = vsel %vm3084_vm15, %v18891_v56, %v18871_v3  ;;  %v16093_v56 = vld [vmem:[#allocation2 + $0x380] sm:$0xff] }
0x3244   :  { %v18892_v51 = vsel %vm3084_vm15, %v18890_v21, %v18869_v38  ;;  %v16096_v21 = vld [vmem:[#allocation2 + $0x398] sm:$0xff] }
0x3278   :  { %v18879_v24 = vpop.permute.xlu1 %18878 }
0x3279   :  { %v18895_v63 = vsel %vm3087_vm0, %v18893_v35, %v18879_v24  ;;  %v16094_v24 = vld [vmem:[#allocation2 + $0x388] sm:$0xff] }
0x3283   :  { %v18877_v6 = vpop.permute.xlu0 %18876 }
0x3284   :  { %v18894_v47 = vsel %vm3087_vm0, %v18892_v51, %v18877_v6 }
0x3285   :  { %21608 = vmatprep.mubr.msk.f32.mxu0 %vm101_vm7, %v18894_v47 }
0x3286   :  { %21609 = vmatmul.mubr.msk.f32.vlgmr.msra.gmra.mxu0 %vm101_vm7, %v18895_v63 }
0x3287   :  { %21623 = vmatpush3.msra.mxu0 %v16100_v36 }
0x3288   :  { %21624 = vmatprep.subr.mxu0 %v16099_v26 }
0x3289   :  { %21625 = vmatpush3.msra.mxu0 %v16099_v26 }
0x328a   :  { %21626 = vmatprep.subr.mxu0 %v16098_v50 }
0x328b   :  { %21627 = vmatpush3.msra.mxu0 %v16098_v50 }
0x328c   :  { %21628 = vmatprep.subr.mxu0 %v16097_v12 }
0x328d   :  { %21629 = vmatpush3.msra.mxu0 %v16097_v12 }
0x328e   :  { %21630 = vmatprep.subr.mxu0 %v16096_v21 }
0x328f   :  { %21631 = vmatpush3.msra.mxu0 %v16096_v21 }
0x3290   :  { %21632 = vmatprep.subr.mxu0 %v16095_v60 }
0x3291   :  { %21633 = vmatpush3.msra.mxu0 %v16095_v60 }
0x3292   :  { %21634 = vmatprep.subr.mxu0 %v16094_v24 }
0x3293   :  { %21635 = vmatpush3.msra.mxu0 %v16094_v24 }
0x3294   :  { %21636 = vmatprep.subr.mxu0 %v16093_v56 }
0x3295   :  { %21637 = vmatpush3.msra.mxu0 %v16093_v56 }
0x3346   :  { %v21610_v7 = vpop.f32.mrf.mxu0 }
0x3347   :  { %v18978_v8 = vadd.f32 %v21610_v7, %v18899_v29  ;;  %v19115_v7 = vrot.slane %v25554_v34, %v22845_v0 }
0x3348   :  { %v18972_v61 = vpop.f32.mrf.mxu0 }
0x3349   :  { %v18982_v52 = vadd.f32 %v18978_v8, %v25056_v14  ;;  %v18973_v19 = vadd.f32 %v18972_v61, %v18899_v29  ;;  %v16090_v14 = vld [vmem:[#allocation2 + $0x368] sm:$0xff] }
0x334a   :  { %21615 = vmatprep.subr.mxu1 %v16090_v14 }
0x334b   :  { %v18981_v39 = vadd.f32 %v18973_v19, %v25054_v31  ;;  %v18986_v46 = vsel %vm101_vm7, %v18982_v52, 0.0  ;;  %v18992_v20 = vmul.f32 %v18982_v52, %v18982_v52  ;;  %21616 = vmatpush3.msra.mxu1 %v16090_v14  ;;  %v16089_v31 = vld [vmem:[#allocation2 + $0x360] sm:$0xff] }
0x334c   :  { %18987 = vadd.xlane.f32.xlu1 %v18986_v46  ;;  %21617 = vmatprep.subr.mxu1 %v16089_v31 }
0x334d   :  { %v18983_v55 = vsel %vm101_vm7, %v18981_v39, 0.0  ;;  %v18991_v16 = vmul.f32 %v18981_v39, %v18981_v39  ;;  %v18996_v28 = vsel %vm101_vm7, %v18992_v20, 0.0  ;;  %21618 = vmatpush3.msra.mxu1 %v16089_v31 }
0x334e   :  { %18984 = vadd.xlane.f32.xlu0 %v18983_v55 }
0x334f   :  { %v18993_v54 = vsel %vm101_vm7, %v18991_v16, 0.0 }
0x3352   :  { %18994 = vadd.xlane.f32.xlu0 %v18993_v54 }
0x3356   :  { %18997 = vadd.xlane.f32.xlu0 %v18996_v28 }
0x33d5   :  { %v18988_v18 = vpop.xlane.xlu1 %18987 }
0x33d6   :  { %v18990_v53 = vmul.f32 0.03125, %v18988_v18 }
0x33d7   :  { %v18985_v22 = vpop.xlane.xlu0 %18984 }
0x33d8   :  { %v18989_v42 = vmul.f32 0.03125, %v18985_v22  ;;  %v19002_v30 = vmul.f32 %v18990_v53, %v18990_v53  ;;  %v19006_v5 = vsub.f32 %v18982_v52, %v18990_v53 }
0x33da   :  { %v19001_v11 = vmul.f32 %v18989_v42, %v18989_v42  ;;  %v19005_v25 = vsub.f32 %v18981_v39, %v18989_v42 }
0x33db   :  { %v18995_v10 = vpop.xlane.xlu0 %18994 }
0x33dc   :  { %v18999_v58 = vmul.f32 0.03125, %v18995_v10 }
0x33de   :  { %v19003_v27 = vsub.f32 %v18999_v58, %v19001_v11  ;;  %v22167_v11 = vmov 1966171168  }
0x33df   :  { %v18998_v15 = vpop.xlane.xlu0 %18997  ;;  %v19244_v58 = vunpack.c.l.s4 %v22167_v11 }
0x33e0   :  { %v19007_v33 = vadd.f32 1e-05, %v19003_v27  ;;  %v19000_v59 = vmul.f32 0.03125, %v18998_v15  ;;  %v19232_v15 = vrot.slane %v25554_v34, %v22855_v41 }
0x33e2   :  { %22089 = vrsqrt.f32 %v19007_v33  ;;  %v19004_v48 = vsub.f32 %v19000_v59, %v19002_v30  ;;  %v19245_v30 = vunpack.c.0.s8 %v19244_v58 }
0x33e4   :  { %v19008_v40 = vadd.f32 1e-05, %v19004_v48  ;;  %v19238_v48 = vrot.slane %v25554_v34, %v22860_v45 }
0x33e6   :  { %22091 = vrsqrt.f32 %v19008_v40 }
0x33ef   :  { %v22090_v32 = vpop.eup %22089 }
0x33f0   :  { %v19011_v3 = vmul.f32 %v22090_v32, %v19005_v25 }
0x33f2   :  { %v19017_v38 = vmul.f32 %v19016_v17, %v19011_v3 }
0x33f3   :  { %v22092_v13 = vpop.eup %22091 }
0x33f4   :  { %v19012_v37 = vmul.f32 %v22092_v13, %v19006_v5  ;;  %v19023_v57 = vadd.f32 %v19022_v62, %v19017_v38 }
0x33f6   :  { %v19018_v9 = vmul.f32 %v19016_v17, %v19012_v37  ;;  %21619 = vmatprep.mubr.msk.f32.mxu1 %vm101_vm7, %v19023_v57  ;;  %v19248_v17 = vsub.s32 %v19245_v30, %v22290_v1 }
0x33f8   :  { %v19024_v23 = vadd.f32 %v19022_v62, %v19018_v9 }
0x33fa   :  { %21620 = vmatmul.mubr.msk.f32.vlgmr.msra.gmra.mxu1 %vm101_vm7, %v19024_v23 }
0x34ba   :  { %v21621_v51 = vpop.f32.mrf.mxu1 }
0x34bb   :  { %v19107_v6 = vadd.f32 %v21621_v51, %v19028_v43 }
0x34bc   :  { %v19101_v35 = vpop.f32.mrf.mxu1 }
0x34bd   :  { %v19102_v47 = vadd.f32 %v19101_v35, %v19028_v43  ;;  %v19111_v29 = vmax.f32 %v19107_v6, 0.0 }
0x34bf   :  { %v19110_v63 = vmax.f32 %v19102_v47, 0.0 }
0x34c1   :  { %21638 = vmatprep.mubr.msk.f32.mxu0 %vm187_vm8, %v19110_v63 }
0x34c2   :  { %21639 = vmatmul.mubr.msk.f32.vlgmr.msra.gmra.mxu0 %vm187_vm8, %v19111_v29 }
0x3582   :  { %v21640_v8 = vpop.f32.mrf.mxu0 }
0x3583   :  { %v19194_v61 = vadd.f32 %v21640_v8, %v19115_v7 }
0x3584   :  { %v19188_v52 = vpop.f32.mrf.mxu0 }
0x3585   :  { %v19198_v19 = vadd.f32 %v19194_v61, %v19024_v23  ;;  %v19189_v39 = vadd.f32 %v19188_v52, %v19115_v7 }
0x3587   :  { %v19197_v46 = vadd.f32 %v19189_v39, %v19023_v57  ;;  %v19202_v49 = vsel %vm101_vm7, %v19198_v19, 0.0  ;;  %v19208_v55 = vmul.f32 %v19198_v19, %v19198_v19 }
0x3588   :  { %19203 = vadd.xlane.f32.xlu1 %v19202_v49 }
0x3589   :  { %v19199_v16 = vsel %vm101_vm7, %v19197_v46, 0.0  ;;  %v19207_v54 = vmul.f32 %v19197_v46, %v19197_v46  ;;  %v19212_v20 = vsel %vm101_vm7, %v19208_v55, 0.0 }
0x358a   :  { %19200 = vadd.xlane.f32.xlu0 %v19199_v16 }
0x358b   :  { %v19209_v28 = vsel %vm101_vm7, %v19207_v54, 0.0 }
0x358c   :  { %19213 = vadd.xlane.f32.xlu1 %v19212_v20 }
0x358e   :  { %19210 = vadd.xlane.f32.xlu0 %v19209_v28 }
0x3611   :  { %v19204_v0 = vpop.xlane.xlu1 %19203 }
0x3612   :  { %v19206_v44 = vmul.f32 0.03125, %v19204_v0 }
0x3613   :  { %v19201_v4 = vpop.xlane.xlu0 %19200 }
0x3614   :  { %v19205_v14 = vmul.f32 0.03125, %v19201_v4  ;;  %v19218_v36 = vmul.f32 %v19206_v44, %v19206_v44  ;;  %v19222_v27 = vsub.f32 %v19198_v19, %v19206_v44 }
0x3615   :  { %v19214_v31 = vpop.xlane.xlu1 %19213 }
0x3616   :  { %v19216_v26 = vmul.f32 0.03125, %v19214_v31  ;;  %v19217_v12 = vmul.f32 %v19205_v14, %v19205_v14  ;;  %v19221_v59 = vsub.f32 %v19197_v46, %v19205_v14 }
0x3617   :  { %v19211_v50 = vpop.xlane.xlu0 %19210 }
0x3618   :  { %v19220_v22 = vsub.f32 %v19216_v26, %v19218_v36  ;;  %v19215_v42 = vmul.f32 0.03125, %v19211_v50 }
0x361a   :  { %v19224_v18 = vadd.f32 1e-05, %v19220_v22  ;;  %v19219_v10 = vsub.f32 %v19215_v42, %v19217_v12 }
0x361c   :  { %22093 = vrsqrt.f32 %v19224_v18  ;;  %v19223_v53 = vadd.f32 1e-05, %v19219_v10 }
0x361e   :  { %22095 = vrsqrt.f32 %v19223_v53 }
0x3629   :  { %v22094_v33 = vpop.eup %22093 }
0x362a   :  { %v19228_v40 = vmul.f32 %v22094_v33, %v19222_v27 }
0x362b   :  { %v22096_v25 = vpop.eup %22095 }
0x362c   :  { %v19234_v32 = vmul.f32 %v19232_v15, %v19228_v40  ;;  %v19227_v3 = vmul.f32 %v22096_v25, %v19221_v59 }
0x362e   :  { %v19240_v62 = vadd.f32 %v19238_v48, %v19234_v32  ;;  %v19233_v5 = vmul.f32 %v19232_v15, %v19227_v3 }
0x3630   :  { %v19300_v38 = vcombine.high %v19240_v62, %v19240_v62  ;;  %v19307_v13 = vrot.slane %v19240_v62, %v19248_v17  ;;  %v19239_v37 = vadd.f32 %v19238_v48, %v19233_v5 }
0x3632   :  { %v19314_v57 = vrot.slane %v19300_v38, %v19248_v17  ;;  %v19315_v9 = vcombine.high %v19307_v13, %v19307_v13  ;;  %v19323_v41 = vrot.slane %v19307_v13, %v19248_v17  ;;  %v19242_v23 = vcombine.high %v19239_v37, %v19239_v37 }
0x3633   :  { %v19249_v21 = vrot.slane %v19239_v37, %v19248_v17 }
0x3634   :  { %v19316_v60 = vcombine.high %v19314_v57, %v19314_v57  ;;  %v19330_v45 = vrot.slane %v19314_v57, %v19248_v17  ;;  %v19337_v34 = vrot.slane %v19315_v9, %v19248_v17  ;;  %v19345_v24 = vcombine.high %v19323_v41, %v19323_v41 }
0x3635   :  { %v19352_v1 = vrot.slane %v19323_v41, %v22293_v2  ;;  %v19256_v56 = vrot.slane %v19242_v23, %v19248_v17  ;;  %v19257_v43 = vcombine.high %v19249_v21, %v19249_v21  ;;  %v19265_v51 = vrot.slane %v19249_v21, %v19248_v17 }
0x3636   :  { %v19344_v6 = vrot.slane %v19316_v60, %v19248_v17  ;;  %v19346_v35 = vcombine.high %v19330_v45, %v19330_v45  ;;  %v19347_v47 = vcombine.high %v19337_v34, %v19337_v34  ;;  %v19356_v63 = vrot.slane %v19337_v34, %v22293_v2 }
0x3637   :  { %v19360_v29 = vrot.slane %v19345_v24, %v22293_v2  ;;  %v19368_v7 = vrot.slane %v19330_v45, %v22293_v2  ;;  %v19258_v8 = vcombine.high %v19256_v56, %v19256_v56  ;;  %v19272_v61 = vrot.slane %v19256_v56, %v19248_v17 }
0x3638   :  { %v19348_v52 = vcombine.high %v19344_v6, %v19344_v6  ;;  %v19364_v19 = vrot.slane %v19347_v47, %v22293_v2  ;;  %v19372_v39 = vrot.slane %v19344_v6, %v22293_v2  ;;  %v19376_v46 = vrot.slane %v19346_v35, %v22293_v2 }
0x3639   :  { %v19279_v49 = vrot.slane %v19257_v43, %v19248_v17  ;;  %v19286_v55 = vrot.slane %v19258_v8, %v19248_v17  ;;  %v19287_v16 = vcombine.high %v19265_v51, %v19265_v51  ;;  %v19288_v54 = vcombine.high %v19272_v61, %v19272_v61 }
0x363a   :  { %v19380_v20 = vrot.slane %v19348_v52, %v22293_v2  ;;  %v19390_v28 = vsel %vm19389_vm1, %v19265_v51, %v19352_v1  ;;  %v19394_v0 = vsel %vm19389_vm1, %v19272_v61, %v19368_v7 }
0x363b   :  { %v19289_v44 = vcombine.high %v19279_v49, %v19279_v49  ;;  %v19290_v4 = vcombine.high %v19286_v55, %v19286_v55  ;;  %v19391_v14 = vsel %vm19389_vm1, %v19279_v49, %v19356_v63  ;;  %v19392_v31 = vsel %vm19389_vm1, %v19287_v16, %v19360_v29  ;;  %19399 = vst.msk [vmem:[#allocation5] sm:$0x3] %vm19398_vm2, %v19390_v28 }
0x363c   :  { %19403 = vst.msk [vmem:[#allocation5 + $0x8] sm:$0x3] %vm19398_vm2, %v19394_v0  ;;  %v19395_v36 = vsel %vm19389_vm1, %v19286_v55, %v19372_v39  ;;  %v19396_v26 = vsel %vm19389_vm1, %v19288_v54, %v19376_v46  ;;  %19400 = vst.msk [vmem:[#allocation5 + $0x2] sm:$0x3] %vm19398_vm2, %v19391_v14 }
0x363d   :  { %19401 = vst.msk [vmem:[#allocation5 + $0x4] sm:$0x3] %vm19398_vm2, %v19392_v31  ;;  %v19393_v2 = vsel %vm19389_vm1, %v19289_v44, %v19364_v19  ;;  %v19397_v50 = vsel %vm19389_vm1, %v19290_v4, %v19380_v20  ;;  %19404 = vst.msk [vmem:[#allocation5 + $0xa] sm:$0x3] %vm19398_vm2, %v19395_v36 }
0x363e   :  { %19405 = vst.msk [vmem:[#allocation5 + $0xc] sm:$0x3] %vm19398_vm2, %v19396_v26  ;;  %19402 = vst.msk [vmem:[#allocation5 + $0x6] sm:$0x3] %vm19398_vm2, %v19393_v2 }
0x363f   :  { %19406 = vst.msk [vmem:[#allocation5 + $0xe] sm:$0x3] %vm19398_vm2, %v19397_v50 }
0x3640   :  { %22134 = shalt.err (!%p22131_p9)
}
0x3641   :  { %s22169_s16 = smov 32   ;;  %s22170_s17 = smov 2  }
0x3642   :  { %19418 = dma.vmem_to_hbm [thread:$0]  %s19413_s14, 256, %s25616_s4, [#allocation4], %s22169_s16, %s22169_s16, %s22170_s17  }
0x3643   :  { %22145 = dma.done.wait [#allocation4], 256  }
0x3644   :  { %22146 = vsyncadd [#allocation4], 4294967040 }
0x3645   :  { %19422 = vsyncpa [#allocation3], 1 }
0x3646   :  { %19423 = vsyncpa [#allocation4], 1 }

</bundles_post_ra>
